<compile_context>
chip_gen: v6e
topology: v6e:2x2x1
jax: 0.10.0
libtpu: 0.0.40
codegen_flags: <defaults>
</compile_context>

<pallas_src>
import functools

import jax
import jax.numpy as jnp
from jax.experimental import pallas as pl
from jax.experimental.pallas import tpu as pltpu


# ----------------------------------------------------------------------------- #
# Tunables
# ----------------------------------------------------------------------------- #
_TILE_ROWS = 512                       # matmul row tile
_VMEM_LIMIT_BYTES = 32 * 1024 * 1024   # leaves headroom on v7x (64 MiB physical VMEM)


def _mosaic_params(dims):
    return pltpu.CompilerParams(dimension_semantics=dims,
                                vmem_limit_bytes=_VMEM_LIMIT_BYTES)


# ----------------------------------------------------------------------------- #
# Small helpers
# ----------------------------------------------------------------------------- #
def _rup(v, m):
    return (v + m - 1) // m * m


def _cp(c):                            # channel padding target (lane-dense)
    return _rup(c, 128)


def _pad_last(a, target):
    d = target - a.shape[-1]
    if d == 0:
        return a
    return jnp.pad(a, [(0, 0)] * (a.ndim - 1) + [(0, d)])


def _act(y, act):
    if act == "relu":
        return jnp.maximum(y, 0.0)
    if act == "hardswish":
        return y * (jnp.clip(y + 3.0, 0.0, 6.0) * (1.0 / 6.0))
    return y  # "none"


def _out_hw(h, k, stride, pad):
    return (h + 2 * pad - k) // stride + 1


# ----------------------------------------------------------------------------- #
# Pallas kernels
# ----------------------------------------------------------------------------- #
def _mm_kernel(*refs, act, has_res):
    # (tile, Kp)bf16 @ (Kp, Cp)bf16 on the MXU -> f32, folded-BN scale/bias + activation,
    # optional bf16 residual add, bf16 (or f32 for the last layer) store.
    it = iter(refs)
    x_ref = next(it)
    w_ref, s_ref, b_ref = next(it), next(it), next(it)
    r_ref = next(it) if has_res else None
    o_ref = next(it)

    y = jnp.dot(x_ref[...], w_ref[...], preferred_element_type=jnp.float32)
    y = _act(y * s_ref[...] + b_ref[...], act)
    if has_res:
        y = y + r_ref[...].astype(jnp.float32)
    o_ref[...] = y.astype(o_ref.dtype)


def _dw_kernel(*refs, k, stride, H, W, ho, wo, pad, act, nsrc, has_se,
               inkernel_pad, strip_h):
    # Depthwise conv for one image, strip-accumulated (strip acc held in vregs),
    # one aligned row-strip load per (phase, row-shift); horizontal taps via in-register
    # sublane shifts.  Optional fully-fused Squeeze-Excitation epilogue.
    it = iter(refs)
    srcs = [next(it) for _ in range(nsrc)]
    w_ref, s_ref, b_ref = next(it), next(it), next(it)
    if has_se:
        w1_ref, b1_ref, w2_ref, b2_ref = next(it), next(it), next(it), next(it)
    o_ref = next(it)
    pad_ref = next(it) if inkernel_pad else None

    cp = o_ref.shape[-1]

    if inkernel_pad:
        # Stride-1: build the zero-padded plane in VMEM (no XLA pad pass / extra HBM trip).
        Hp, Wp = H + 2 * pad, W + 2 * pad
        zdt = pad_ref.dtype
        pad_ref[0:pad, :, :] = jnp.zeros((pad, Wp, cp), zdt)
        pad_ref[H + pad:Hp, :, :] = jnp.zeros((pad, Wp, cp), zdt)
        pad_ref[pad:H + pad, 0:pad, :] = jnp.zeros((H, pad, cp), zdt)
        pad_ref[pad:H + pad, W + pad:Wp, :] = jnp.zeros((H, pad, cp), zdt)
        pad_ref[pad:H + pad, pad:W + pad, :] = srcs[0][...]
        sources = [pad_ref]
    else:
        sources = srcs

    sb = s_ref[...]
    bb = b_ref[...]

    pool = jnp.zeros((1, cp), jnp.float32) if has_se else None

    # Pass 1: y = act(BN(dwconv(x))), strip by strip, bf16 store + fused pool accumulation.
    for r0 in range(0, ho, strip_h):
        sh = min(strip_h, ho - r0)
        acc = jnp.zeros((sh, wo, cp), jnp.float32)
        for di in range(k):
            prow, ii = di % stride, di // stride
            for pcol in range(stride):
                src = sources[prow * stride + pcol]
                # one aligned load per (phase, row-shift), full width
                strip = src[r0 + ii:r0 + ii + sh, :, :].astype(jnp.float32)
                for dj in range(pcol, k, stride):
                    jj = dj // stride
                    tap = strip[:, jj:jj + wo, :]          # in-register sublane shift
                    acc = acc + tap * w_ref[di * k + dj, :]
        y = _act(acc * sb + bb, act)
        o_ref[r0:r0 + sh, :, :] = y.astype(o_ref.dtype)
        if has_se:
            pool = pool + jnp.sum(jnp.sum(y, axis=0), axis=0, keepdims=True)

    if has_se:
        # Fused SE: avgpool -> fc1 -> relu -> fc2 -> hardsigmoid -> scale y (in VMEM).
        pool = pool * (1.0 / float(ho * wo))
        h = jnp.dot(pool, w1_ref[...], preferred_element_type=jnp.float32) + b1_ref[...]
        h = jnp.maximum(h, 0.0)
        g = jnp.dot(h, w2_ref[...], preferred_element_type=jnp.float32) + b2_ref[...]
        g = jnp.clip(g + 3.0, 0.0, 6.0) * (1.0 / 6.0)       # (1, cp) gate
        for r0 in range(0, ho, strip_h):
            sh = min(strip_h, ho - r0)
            yg = o_ref[r0:r0 + sh, :, :].astype(jnp.float32) * g
            o_ref[r0:r0 + sh, :, :] = yg.astype(o_ref.dtype)


# ----------------------------------------------------------------------------- #
# pallas_call wrappers
# ----------------------------------------------------------------------------- #
def matmul_bn_act(x2, w, s, b, act, res=None, out_dtype=jnp.bfloat16):
    """x2: (R, Kp) bf16, w: (Kp, Cp) bf16, s/b: (1, Cp) f32, res: (R, Cp) bf16 or None."""
    rows = x2.shape[0]
    tile = min(_TILE_ROWS, _rup(max(rows // 2, 8), 8))      # >=2 grid steps when possible
    rp = _rup(rows, tile)
    if rp != rows:
        x2 = jnp.pad(x2, ((0, rp - rows), (0, 0)))
        if res is not None:
            res = jnp.pad(res, ((0, rp - rows), (0, 0)))
    kp = x2.shape[1]
    cp = w.shape[1]

    ins = [x2, w, s, b]
    in_specs = [
        pl.BlockSpec((tile, kp), lambda t: (t, 0)),
        pl.BlockSpec((kp, cp), lambda t: (0, 0)),
        pl.BlockSpec((1, cp), lambda t: (0, 0)),
        pl.BlockSpec((1, cp), lambda t: (0, 0)),
    ]
    if res is not None:
        ins.append(res)
        in_specs.append(pl.BlockSpec((tile, cp), lambda t: (t, 0)))

    out = pl.pallas_call(
        functools.partial(_mm_kernel, act=act, has_res=res is not None),
        out_shape=jax.ShapeDtypeStruct((rp, cp), out_dtype),
        grid=(rp // tile,),
        in_specs=in_specs,
        out_specs=pl.BlockSpec((tile, cp), lambda t: (t, 0)),
        compiler_params=_mosaic_params(("parallel",)),
    )(*ins)
    return out[:rows]


def dwconv_bn_act(x_sp, p, k, stride, act, se_p=None):
    """x_sp: (N, H, W, Cp) bf16 -> (N, Ho, Wo, Cp) bf16 (SE gate already applied if se_p)."""
    N, H, W, cp = x_sp.shape
    pad = (k - 1) // 2
    ho, wo = _out_hw(H, k, stride, pad), _out_hw(W, k, stride, pad)

    scratch_shapes = []
    if stride == 1:
        srcs = [x_sp]
        nsrc = 1
        in_src_specs = [pl.BlockSpec((None, H, W, cp), lambda n: (n, 0, 0, 0))]
        scratch_shapes = [pltpu.VMEM((H + 2 * pad, W + 2 * pad, cp), x_sp.dtype)]
        inkernel_pad = True
    else:
        # Stride-phase decomposition in XLA (bf16; total bytes == input, no k*k blow-up).
        xp = jnp.pad(x_sp, ((0, 0), (pad, pad), (pad, pad), (0, 0)))
        nH = ho + (k - 1) // stride
        nW = wo + (k - 1) // stride
        srcs = []
        for pi in range(stride):
            for pj in range(stride):
                ph = xp[:, pi::stride, pj::stride, :]
                ph = jnp.pad(ph, ((0, 0), (0, nH - ph.shape[1]),
                                  (0, nW - ph.shape[2]), (0, 0)))
                srcs.append(ph)
        nsrc = stride * stride
        in_src_specs = [pl.BlockSpec((None, nH, nW, cp), lambda n: (n, 0, 0, 0))
                        for _ in range(nsrc)]
        inkernel_pad = False

    ins = srcs + [p["w"], p["s"], p["b"]]
    in_specs = in_src_specs + [
        pl.BlockSpec((k * k, cp), lambda n: (0, 0)),
        pl.BlockSpec((1, cp), lambda n: (0, 0)),
        pl.BlockSpec((1, cp), lambda n: (0, 0)),
    ]
    has_se = se_p is not None
    if has_se:
        sp = se_p["w1"].shape[1]
        ins += [se_p["w1"], se_p["b1"], se_p["w2"], se_p["b2"]]
        in_specs += [
            pl.BlockSpec((cp, sp), lambda n: (0, 0)),
            pl.BlockSpec((1, sp), lambda n: (0, 0)),
            pl.BlockSpec((sp, cp), lambda n: (0, 0)),
            pl.BlockSpec((1, cp), lambda n: (0, 0)),
        ]

    # Strip height: keep the per-strip f32 accumulator around <=64 KiB of vregs.
    strip_h = max(1, min(8, (64 * 1024) // (wo * cp * 4), ho))

    kern = functools.partial(_dw_kernel, k=k, stride=stride, H=H, W=W, ho=ho, wo=wo,
                             pad=pad, act=act, nsrc=nsrc, has_se=has_se,
                             inkernel_pad=inkernel_pad, strip_h=strip_h)
    return pl.pallas_call(
        kern,
        out_shape=jax.ShapeDtypeStruct((N, ho, wo, cp), jnp.bfloat16),
        grid=(N,),
        in_specs=in_specs,
        out_specs=pl.BlockSpec((None, ho, wo, cp), lambda n: (n, 0, 0, 0)),
        scratch_shapes=tuple(scratch_shapes),
        compiler_params=_mosaic_params(("parallel",)),
    )(*ins)


# ----------------------------------------------------------------------------- #
# JAX glue: im2col (stem only), weight/BN folding
# ----------------------------------------------------------------------------- #
def _taps(x, k, stride, pad):
    N, H, W, C = x.shape
    Ho, Wo = _out_hw(H, k, stride, pad), _out_hw(W, k, stride, pad)
    xp = jnp.pad(x, ((0, 0), (pad, pad), (pad, pad), (0, 0))) if pad > 0 else x
    taps = []
    for di in range(k):
        for dj in range(k):
            taps.append(xp[:, di:di + (Ho - 1) * stride + 1:stride,
                              dj:dj + (Wo - 1) * stride + 1:stride, :])
    return taps, Ho, Wo


def im2col(x, k, stride, pad):
    N = x.shape[0]
    taps, Ho, Wo = _taps(x, k, stride, pad)
    cols = jnp.stack(taps, axis=3)                    # (N, Ho, Wo, k*k, C)
    return cols.reshape(N, Ho * Wo, -1), Ho, Wo


def conv_w_to_mat(w):                                 # torch (Cout, Cin, K, K)
    cout, cin, k, _ = w.shape
    return jnp.transpose(w, (2, 3, 1, 0)).reshape(k * k * cin, cout)


def dw_w_to_mat(w):                                   # torch (C, 1, K, K)
    c, _, k, _ = w.shape
    return jnp.transpose(w[:, 0], (1, 2, 0)).reshape(k * k, c)


def bn_fold(gamma, beta, mean, var, eps=1e-3):        # torchvision MobileNetV3 eps
    s = gamma / jnp.sqrt(var + eps)
    b = beta - mean * s
    return s.reshape(1, -1), b.reshape(1, -1)


# ----------------------------------------------------------------------------- #
# Parameter construction (deterministic, synthetic, pre-padded & bf16 where useful)
# ----------------------------------------------------------------------------- #
def _make_divisible(v, divisor=8):
    new_v = max(divisor, int(v + divisor / 2) // divisor * divisor)
    if new_v < 0.9 * v:
        new_v += divisor
    return new_v


def _bn_params(keys, c):
    gamma = jax.random.uniform(keys[0], (c,), jnp.float32, 0.5, 1.5)
    beta = 0.1 * jax.random.normal(keys[1], (c,), jnp.float32)
    mean = 0.1 * jax.random.normal(keys[2], (c,), jnp.float32)
    var = jax.random.uniform(keys[3], (c,), jnp.float32, 0.5, 1.5)
    return bn_fold(gamma, beta, mean, var)


def init_conv_bn(key, cin, cout, k):
    ks = jax.random.split(key, 5)
    w = 0.1 * jax.random.normal(ks[0], (cout, cin, k, k), jnp.float32)
    wm = conv_w_to_mat(w)                                     # (k*k*cin, cout)
    kp, cp = _rup(k * k * cin, 128), _cp(cout)
    wm = jnp.pad(wm, ((0, kp - wm.shape[0]), (0, cp - cout))).astype(jnp.bfloat16)
    s, b = _bn_params(ks[1:], cout)
    return {"w": wm, "s": _pad_last(s, cp), "b": _pad_last(b, cp)}


def init_dw_bn(key, c, k):
    ks = jax.random.split(key, 5)
    w = 0.1 * jax.random.normal(ks[0], (c, 1, k, k), jnp.float32)
    cp = _cp(c)
    wm = _pad_last(dw_w_to_mat(w), cp)                        # (k*k, Cp) f32 (VPU path)
    s, b = _bn_params(ks[1:], c)
    return {"w": wm, "s": _pad_last(s, cp), "b": _pad_last(b, cp)}


def init_se(key, c, csq):
    ks = jax.random.split(key, 4)
    w1 = 0.1 * jax.random.normal(ks[0], (csq, c), jnp.float32)  # fc1: Conv2d(c, csq, 1)
    b1 = 0.1 * jax.random.normal(ks[1], (csq,), jnp.float32)
    w2 = 0.1 * jax.random.normal(ks[2], (c, csq), jnp.float32)  # fc2: Conv2d(csq, c, 1)
    b2 = 0.1 * jax.random.normal(ks[3], (c,), jnp.float32)
    cp, sp = _cp(c), _rup(csq, 128)
    return {
        "w1": jnp.pad(w1.T, ((0, cp - c), (0, sp - csq))),
        "b1": jnp.pad(b1.reshape(1, -1), ((0, 0), (0, sp - csq))),
        "w2": jnp.pad(w2.T, ((0, sp - csq), (0, cp - c))),
        "b2": jnp.pad(b2.reshape(1, -1), ((0, 0), (0, cp - c))),
    }


# mobilenet_v3_small inverted-residual configs: (cin, k, exp, cout, use_se, act, stride)
BNECK = [
    (16, 3, 16, 16, True, "relu", 2),
    (16, 3, 72, 24, False, "relu", 2),
    (24, 3, 88, 24, False, "relu", 1),
    (24, 5, 96, 40, True, "hardswish", 2),
    (40, 5, 240, 40, True, "hardswish", 1),
    (40, 5, 240, 40, True, "hardswish", 1),
    (40, 5, 120, 48, True, "hardswish", 1),
    (48, 5, 144, 48, True, "hardswish", 1),
    (48, 5, 288, 96, True, "hardswish", 2),
    (96, 5, 576, 96, True, "hardswish", 1),
    (96, 5, 576, 96, True, "hardswish", 1),
]


def slice_layer_cfgs(slice_id):
    # features[:4] / features[4:9] / features[9:]
    if slice_id == 1:
        return [("conv", 3, 16, 3, 2, "hardswish")] + [("ir",) + BNECK[i] for i in range(0, 3)]
    elif slice_id == 2:
        return [("ir",) + BNECK[i] for i in range(3, 8)]
    else:
        return [("ir",) + BNECK[i] for i in range(8, 11)] + [("conv", 96, 576, 1, 1, "hardswish")]


def build_params(key, slice_id):
    layers = []
    for cfg in slice_layer_cfgs(slice_id):
        key, sub = jax.random.split(key)
        if cfg[0] == "conv":
            _, cin, cout, k, stride, act = cfg
            layers.append((cfg, init_conv_bn(sub, cin, cout, k)))
        else:
            _, cin, k, exp, cout, use_se, act, stride = cfg
            ks = jax.random.split(sub, 4)
            p = {}
            if exp != cin:
                p["expand"] = init_conv_bn(ks[0], cin, exp, 1)
            p["dw"] = init_dw_bn(ks[1], exp, k)
            if use_se:
                p["se"] = init_se(ks[2], exp, _make_divisible(exp // 4, 8))
            p["proj"] = init_conv_bn(ks[3], exp, cout, 1)
            layers.append((cfg, p))
    return layers


# ----------------------------------------------------------------------------- #
# Forward
# ----------------------------------------------------------------------------- #
def conv_bn_act_full(x_sp, p, k, stride, act, out_dtype=jnp.bfloat16):
    """Regular KxK conv via XLA im2col + Pallas matmul (only the 3-channel stem)."""
    N = x_sp.shape[0]
    cols, ho, wo = im2col(x_sp, k, stride, (k - 1) // 2)
    cols = _pad_last(cols.astype(jnp.bfloat16), p["w"].shape[0])
    cols2 = cols.reshape(N * ho * wo, cols.shape[-1])
    y = matmul_bn_act(cols2, p["w"], p["s"], p["b"], act, out_dtype=out_dtype)
    return y.reshape(N, ho, wo, -1)


def pointwise_conv(x_sp, p, act, res_sp=None, out_dtype=jnp.bfloat16):
    """1x1 conv (+BN+act, optional fused bf16 residual); N folded into the row axis."""
    N, H, W, cpin = x_sp.shape
    x2 = x_sp.reshape(N * H * W, cpin)
    if x2.dtype != jnp.bfloat16:
        x2 = x2.astype(jnp.bfloat16)
    res2 = None
    if res_sp is not None:
        res2 = res_sp.reshape(N * H * W, res_sp.shape[-1])
    y = matmul_bn_act(x2, p["w"], p["s"], p["b"], act, res=res2, out_dtype=out_dtype)
    return y.reshape(N, H, W, -1)


def inverted_residual(x_sp, p, cfg, out_dtype=jnp.bfloat16):
    _, cin, k, exp, cout, use_se, act, stride = cfg
    inp = x_sp
    y = x_sp
    if "expand" in p:
        y = pointwise_conv(y, p["expand"], act)
    y = dwconv_bn_act(y, p["dw"], k, stride, act, se_p=p.get("se"))   # SE fused in-kernel
    res_sp = inp if (stride == 1 and cin == cout) else None
    return pointwise_conv(y, p["proj"], "none", res_sp=res_sp, out_dtype=out_dtype)


def mobilenetv3_forward(x_nchw, layers):
    """x_nchw: (N, C, H, W) f32, like the PyTorch module; returns NCHW f32."""
    x = jnp.transpose(x_nchw, (0, 2, 3, 1)).astype(jnp.float32)       # -> NHWC
    first_cfg = layers[0][0]
    if first_cfg[0] == "ir":                                          # slices 2/3 start on IR blocks
        x = _pad_last(x, _cp(first_cfg[1])).astype(jnp.bfloat16)
    out_c = None
    nlayer = len(layers)
    for li, (cfg, p) in enumerate(layers):
        odt = jnp.float32 if li == nlayer - 1 else jnp.bfloat16       # f32 only for final output
        if cfg[0] == "conv":
            _, cin, cout, k, stride, act = cfg
            if k == 1:
                x = pointwise_conv(x, p, act, out_dtype=odt)
            else:
                x = conv_bn_act_full(x, p, k, stride, act, out_dtype=odt)
            out_c = cout
        else:
            x = inverted_residual(x, p, cfg, out_dtype=odt)
            out_c = cfg[4]
    x = x[..., :out_c]                                                # drop channel padding
    return jnp.transpose(x, (0, 3, 1, 2))                             # -> NCHW


# ----------------------------------------------------------------------------- #
if __name__ == "__main__":
    key = jax.random.PRNGKey(0)
    kx, kparam = jax.random.split(key)

    # slice=1 -> mobilenet_v3_small.features[:4]; input must have 3 channels.
    slice_id = 1
    x = jax.random.normal(kx, (2, 3, 64, 64), jnp.float32)   # NCHW
    layers = build_params(kparam, slice_id)

    fwd = jax.jit(lambda inp: mobilenetv3_forward(inp, layers))
    out = fwd(x)
    jax.block_until_ready(out)

    assert out.shape == (2, 24, 8, 8), out.shape             # 64->32->16->8->8, 24 channels
    assert out.dtype == jnp.float32
    assert bool(jnp.all(jnp.isfinite(out)))
    print("KERNEL_OK")
</pallas_src>

<mosaic_0001>
module attributes {stable_mosaic.version = 11 : i64} {
  func.func @_mm_kernel(%arg0: i32, %arg1: memref<512x128xbf16, #tpu.memory_space<vmem>>, %arg2: memref<128x128xbf16, #tpu.memory_space<vmem>>, %arg3: memref<1x128xf32, #tpu.memory_space<vmem>>, %arg4: memref<1x128xf32, #tpu.memory_space<vmem>>, %arg5: memref<512x128xbf16, #tpu.memory_space<vmem>>) attributes {dimension_semantics = [#tpu.dimension_semantics<parallel>], iteration_bounds = array<i64: 4>, scalar_prefetch = 0 : i64, scratch_operands = 0 : i64, tpu.core_type = #tpu.core_type<tc>, window_params = [{transform_indices = @transform_0, window_bounds = array<i64: 512, 128>}, {pipeline_mode = #tpu.pipeline_mode<synchronous>, transform_indices = @transform_1, window_bounds = array<i64: 128, 128>}, {pipeline_mode = #tpu.pipeline_mode<synchronous>, transform_indices = @transform_2, window_bounds = array<i64: 1, 128>}, {pipeline_mode = #tpu.pipeline_mode<synchronous>, transform_indices = @transform_3, window_bounds = array<i64: 1, 128>}, {transform_indices = @transform_4, window_bounds = array<i64: 512, 128>}]} {
    %c0 = arith.constant 0 : index
    %c0_0 = arith.constant 0 : index
    %0 = vector.load %arg1[%c0, %c0_0] : memref<512x128xbf16, #tpu.memory_space<vmem>>, vector<512x128xbf16>
    %c0_1 = arith.constant 0 : index
    %c0_2 = arith.constant 0 : index
    %1 = vector.load %arg2[%c0_1, %c0_2] : memref<128x128xbf16, #tpu.memory_space<vmem>>, vector<128x128xbf16>
    %cst = arith.constant dense<0.000000e+00> : vector<512x128xf32>
    %2 = tpu.matmul %0, %1, %cst {dimension_numbers = #tpu.dot_dimension_numbers<[1], [0], [0], [1], [0, 0, 1, 1], [], []>} : vector<512x128xbf16>, vector<128x128xbf16>, vector<512x128xf32> -> vector<512x128xf32>
    %c0_3 = arith.constant 0 : index
    %c0_4 = arith.constant 0 : index
    %3 = vector.load %arg3[%c0_3, %c0_4] : memref<1x128xf32, #tpu.memory_space<vmem>>, vector<1x128xf32>
    %4 = vector.broadcast %3 : vector<1x128xf32> to vector<512x128xf32>
    %5 = arith.mulf %2, %4 : vector<512x128xf32>
    %c0_5 = arith.constant 0 : index
    %c0_6 = arith.constant 0 : index
    %6 = vector.load %arg4[%c0_5, %c0_6] : memref<1x128xf32, #tpu.memory_space<vmem>>, vector<1x128xf32>
    %7 = vector.broadcast %6 : vector<1x128xf32> to vector<512x128xf32>
    %8 = arith.addf %5, %7 : vector<512x128xf32>
    %cst_7 = arith.constant 3.000000e+00 : f32
    %9 = vector.broadcast %cst_7 : f32 to vector<512x128xf32>
    %10 = arith.addf %8, %9 : vector<512x128xf32>
    %cst_8 = arith.constant 0.000000e+00 : f32
    %cst_9 = arith.constant 6.000000e+00 : f32
    %11 = vector.broadcast %cst_8 : f32 to vector<512x128xf32>
    %12 = arith.maximumf %11, %10 : vector<512x128xf32>
    %13 = vector.broadcast %cst_9 : f32 to vector<512x128xf32>
    %14 = arith.minimumf %13, %12 : vector<512x128xf32>
    %cst_10 = arith.constant 0.166666672 : f32
    %15 = vector.broadcast %cst_10 : f32 to vector<512x128xf32>
    %16 = arith.mulf %14, %15 : vector<512x128xf32>
    %17 = arith.mulf %8, %16 : vector<512x128xf32>
    %18 = arith.truncf %17 : vector<512x128xf32> to vector<512x128xbf16>
    %c0_11 = arith.constant 0 : index
    %c0_12 = arith.constant 0 : index
    %19 = vector.load %arg5[%c0_11, %c0_12] : memref<512x128xbf16, #tpu.memory_space<vmem>>, vector<512x128xbf16>
    tpu.vector_store %arg5[%c0_11, %c0_12], %18 {strides = array<i32>} : memref<512x128xbf16, #tpu.memory_space<vmem>>, vector<512x128xbf16>,
    return
  }
  func.func @transform_0(%arg0: i32) -> (i32, i32) {
    %c0_i32 = arith.constant 0 : i32
    %c0_i32_0 = arith.constant 0 : i32
    return %arg0, %c0_i32 : i32, i32
  }
  func.func @transform_1(%arg0: i32) -> (i32, i32) {
    %c0_i32 = arith.constant 0 : i32
    %c0_i32_0 = arith.constant 0 : i32
    %c0_i32_1 = arith.constant 0 : i32
    return %c0_i32, %c0_i32_0 : i32, i32
  }
  func.func @transform_2(%arg0: i32) -> (i32, i32) {
    %c0_i32 = arith.constant 0 : i32
    %c0_i32_0 = arith.constant 0 : i32
    %c0_i32_1 = arith.constant 0 : i32
    return %c0_i32, %c0_i32_0 : i32, i32
  }
  func.func @transform_3(%arg0: i32) -> (i32, i32) {
    %c0_i32 = arith.constant 0 : i32
    %c0_i32_0 = arith.constant 0 : i32
    %c0_i32_1 = arith.constant 0 : i32
    return %c0_i32, %c0_i32_0 : i32, i32
  }
  func.func @transform_4(%arg0: i32) -> (i32, i32) {
    %c0_i32 = arith.constant 0 : i32
    %c0_i32_0 = arith.constant 0 : i32
    return %arg0, %c0_i32 : i32, i32
  }
}

module attributes {stable_mosaic.version = 11 : i64} {
  func.func @_mm_kernel(%arg0: i32, %arg1: memref<256x128xbf16, #tpu.memory_space<vmem>>, %arg2: memref<128x128xbf16, #tpu.memory_space<vmem>>, %arg3: memref<1x128xf32, #tpu.memory_space<vmem>>, %arg4: memref<1x128xf32, #tpu.memory_space<vmem>>, %arg5: memref<256x128xbf16, #tpu.memory_space<vmem>>) attributes {dimension_semantics = [#tpu.dimension_semantics<parallel>], iteration_bounds = array<i64: 2>, scalar_prefetch = 0 : i64, scratch_operands = 0 : i64, tpu.core_type = #tpu.core_type<tc>, window_params = [{transform_indices = @transform_0, window_bounds = array<i64: 256, 128>}, {pipeline_mode = #tpu.pipeline_mode<synchronous>, transform_indices = @transform_1, window_bounds = array<i64: 128, 128>}, {pipeline_mode = #tpu.pipeline_mode<synchronous>, transform_indices = @transform_2, window_bounds = array<i64: 1, 128>}, {pipeline_mode = #tpu.pipeline_mode<synchronous>, transform_indices = @transform_3, window_bounds = array<i64: 1, 128>}, {transform_indices = @transform_4, window_bounds = array<i64: 256, 128>}]} {
    %c0 = arith.constant 0 : index
    %c0_0 = arith.constant 0 : index
    %0 = vector.load %arg1[%c0, %c0_0] : memref<256x128xbf16, #tpu.memory_space<vmem>>, vector<256x128xbf16>
    %c0_1 = arith.constant 0 : index
    %c0_2 = arith.constant 0 : index
    %1 = vector.load %arg2[%c0_1, %c0_2] : memref<128x128xbf16, #tpu.memory_space<vmem>>, vector<128x128xbf16>
    %cst = arith.constant dense<0.000000e+00> : vector<256x128xf32>
    %2 = tpu.matmul %0, %1, %cst {dimension_numbers = #tpu.dot_dimension_numbers<[1], [0], [0], [1], [0, 0, 1, 1], [], []>} : vector<256x128xbf16>, vector<128x128xbf16>, vector<256x128xf32> -> vector<256x128xf32>
    %c0_3 = arith.constant 0 : index
    %c0_4 = arith.constant 0 : index
    %3 = vector.load %arg3[%c0_3, %c0_4] : memref<1x128xf32, #tpu.memory_space<vmem>>, vector<1x128xf32>
    %4 = vector.broadcast %3 : vector<1x128xf32> to vector<256x128xf32>
    %5 = arith.mulf %2, %4 : vector<256x128xf32>
    %c0_5 = arith.constant 0 : index
    %c0_6 = arith.constant 0 : index
    %6 = vector.load %arg4[%c0_5, %c0_6] : memref<1x128xf32, #tpu.memory_space<vmem>>, vector<1x128xf32>
    %7 = vector.broadcast %6 : vector<1x128xf32> to vector<256x128xf32>
    %8 = arith.addf %5, %7 : vector<256x128xf32>
    %cst_7 = arith.constant 0.000000e+00 : f32
    %9 = vector.broadcast %cst_7 : f32 to vector<256x128xf32>
    %10 = arith.maximumf %8, %9 : vector<256x128xf32>
    %11 = arith.truncf %10 : vector<256x128xf32> to vector<256x128xbf16>
    %c0_8 = arith.constant 0 : index
    %c0_9 = arith.constant 0 : index
    %12 = vector.load %arg5[%c0_8, %c0_9] : memref<256x128xbf16, #tpu.memory_space<vmem>>, vector<256x128xbf16>
    tpu.vector_store %arg5[%c0_8, %c0_9], %11 {strides = array<i32>} : memref<256x128xbf16, #tpu.memory_space<vmem>>, vector<256x128xbf16>,
    return
  }
  func.func @transform_0(%arg0: i32) -> (i32, i32) {
    %c0_i32 = arith.constant 0 : i32
    %c0_i32_0 = arith.constant 0 : i32
    return %arg0, %c0_i32 : i32, i32
  }
  func.func @transform_1(%arg0: i32) -> (i32, i32) {
    %c0_i32 = arith.constant 0 : i32
    %c0_i32_0 = arith.constant 0 : i32
    %c0_i32_1 = arith.constant 0 : i32
    return %c0_i32, %c0_i32_0 : i32, i32
  }
  func.func @transform_2(%arg0: i32) -> (i32, i32) {
    %c0_i32 = arith.constant 0 : i32
    %c0_i32_0 = arith.constant 0 : i32
    %c0_i32_1 = arith.constant 0 : i32
    return %c0_i32, %c0_i32_0 : i32, i32
  }
  func.func @transform_3(%arg0: i32) -> (i32, i32) {
    %c0_i32 = arith.constant 0 : i32
    %c0_i32_0 = arith.constant 0 : i32
    %c0_i32_1 = arith.constant 0 : i32
    return %c0_i32, %c0_i32_0 : i32, i32
  }
  func.func @transform_4(%arg0: i32) -> (i32, i32) {
    %c0_i32 = arith.constant 0 : i32
    %c0_i32_0 = arith.constant 0 : i32
    return %arg0, %c0_i32 : i32, i32
  }
}

module attributes {stable_mosaic.version = 11 : i64} {
  func.func @_mm_kernel(%arg0: i32, %arg1: memref<256x128xbf16, #tpu.memory_space<vmem>>, %arg2: memref<128x128xbf16, #tpu.memory_space<vmem>>, %arg3: memref<1x128xf32, #tpu.memory_space<vmem>>, %arg4: memref<1x128xf32, #tpu.memory_space<vmem>>, %arg5: memref<256x128xbf16, #tpu.memory_space<vmem>>) attributes {dimension_semantics = [#tpu.dimension_semantics<parallel>], iteration_bounds = array<i64: 2>, scalar_prefetch = 0 : i64, scratch_operands = 0 : i64, tpu.core_type = #tpu.core_type<tc>, window_params = [{transform_indices = @transform_0, window_bounds = array<i64: 256, 128>}, {pipeline_mode = #tpu.pipeline_mode<synchronous>, transform_indices = @transform_1, window_bounds = array<i64: 128, 128>}, {pipeline_mode = #tpu.pipeline_mode<synchronous>, transform_indices = @transform_2, window_bounds = array<i64: 1, 128>}, {pipeline_mode = #tpu.pipeline_mode<synchronous>, transform_indices = @transform_3, window_bounds = array<i64: 1, 128>}, {transform_indices = @transform_4, window_bounds = array<i64: 256, 128>}]} {
    %c0 = arith.constant 0 : index
    %c0_0 = arith.constant 0 : index
    %0 = vector.load %arg1[%c0, %c0_0] : memref<256x128xbf16, #tpu.memory_space<vmem>>, vector<256x128xbf16>
    %c0_1 = arith.constant 0 : index
    %c0_2 = arith.constant 0 : index
    %1 = vector.load %arg2[%c0_1, %c0_2] : memref<128x128xbf16, #tpu.memory_space<vmem>>, vector<128x128xbf16>
    %cst = arith.constant dense<0.000000e+00> : vector<256x128xf32>
    %2 = tpu.matmul %0, %1, %cst {dimension_numbers = #tpu.dot_dimension_numbers<[1], [0], [0], [1], [0, 0, 1, 1], [], []>} : vector<256x128xbf16>, vector<128x128xbf16>, vector<256x128xf32> -> vector<256x128xf32>
    %c0_3 = arith.constant 0 : index
    %c0_4 = arith.constant 0 : index
    %3 = vector.load %arg3[%c0_3, %c0_4] : memref<1x128xf32, #tpu.memory_space<vmem>>, vector<1x128xf32>
    %4 = vector.broadcast %3 : vector<1x128xf32> to vector<256x128xf32>
    %5 = arith.mulf %2, %4 : vector<256x128xf32>
    %c0_5 = arith.constant 0 : index
    %c0_6 = arith.constant 0 : index
    %6 = vector.load %arg4[%c0_5, %c0_6] : memref<1x128xf32, #tpu.memory_space<vmem>>, vector<1x128xf32>
    %7 = vector.broadcast %6 : vector<1x128xf32> to vector<256x128xf32>
    %8 = arith.addf %5, %7 : vector<256x128xf32>
    %9 = arith.truncf %8 : vector<256x128xf32> to vector<256x128xbf16>
    %c0_7 = arith.constant 0 : index
    %c0_8 = arith.constant 0 : index
    %10 = vector.load %arg5[%c0_7, %c0_8] : memref<256x128xbf16, #tpu.memory_space<vmem>>, vector<256x128xbf16>
    tpu.vector_store %arg5[%c0_7, %c0_8], %9 {strides = array<i32>} : memref<256x128xbf16, #tpu.memory_space<vmem>>, vector<256x128xbf16>,
    return
  }
  func.func @transform_0(%arg0: i32) -> (i32, i32) {
    %c0_i32 = arith.constant 0 : i32
    %c0_i32_0 = arith.constant 0 : i32
    return %arg0, %c0_i32 : i32, i32
  }
  func.func @transform_1(%arg0: i32) -> (i32, i32) {
    %c0_i32 = arith.constant 0 : i32
    %c0_i32_0 = arith.constant 0 : i32
    %c0_i32_1 = arith.constant 0 : i32
    return %c0_i32, %c0_i32_0 : i32, i32
  }
  func.func @transform_2(%arg0: i32) -> (i32, i32) {
    %c0_i32 = arith.constant 0 : i32
    %c0_i32_0 = arith.constant 0 : i32
    %c0_i32_1 = arith.constant 0 : i32
    return %c0_i32, %c0_i32_0 : i32, i32
  }
  func.func @transform_3(%arg0: i32) -> (i32, i32) {
    %c0_i32 = arith.constant 0 : i32
    %c0_i32_0 = arith.constant 0 : i32
    %c0_i32_1 = arith.constant 0 : i32
    return %c0_i32, %c0_i32_0 : i32, i32
  }
  func.func @transform_4(%arg0: i32) -> (i32, i32) {
    %c0_i32 = arith.constant 0 : i32
    %c0_i32_0 = arith.constant 0 : i32
    return %arg0, %c0_i32 : i32, i32
  }
}

module attributes {stable_mosaic.version = 11 : i64} {
  func.func @_dw_kernel(%arg0: i32, %arg1: memref<1x17x17x128xbf16, #tpu.memory_space<vmem>>, %arg2: memref<1x17x17x128xbf16, #tpu.memory_space<vmem>>, %arg3: memref<1x17x17x128xbf16, #tpu.memory_space<vmem>>, %arg4: memref<1x17x17x128xbf16, #tpu.memory_space<vmem>>, %arg5: memref<9x128xf32, #tpu.memory_space<vmem>>, %arg6: memref<1x128xf32, #tpu.memory_space<vmem>>, %arg7: memref<1x128xf32, #tpu.memory_space<vmem>>, %arg8: memref<128x128xf32, #tpu.memory_space<vmem>>, %arg9: memref<1x128xf32, #tpu.memory_space<vmem>>, %arg10: memref<128x128xf32, #tpu.memory_space<vmem>>, %arg11: memref<1x128xf32, #tpu.memory_space<vmem>>, %arg12: memref<1x16x16x128xbf16, #tpu.memory_space<vmem>>) attributes {dimension_semantics = [#tpu.dimension_semantics<parallel>], iteration_bounds = array<i64: 2>, scalar_prefetch = 0 : i64, scratch_operands = 0 : i64, tpu.core_type = #tpu.core_type<tc>, window_params = [{transform_indices = @transform_0, window_bounds = array<i64: 1, 17, 17, 128>}, {transform_indices = @transform_1, window_bounds = array<i64: 1, 17, 17, 128>}, {transform_indices = @transform_2, window_bounds = array<i64: 1, 17, 17, 128>}, {transform_indices = @transform_3, window_bounds = array<i64: 1, 17, 17, 128>}, {pipeline_mode = #tpu.pipeline_mode<synchronous>, transform_indices = @transform_4, window_bounds = array<i64: 9, 128>}, {pipeline_mode = #tpu.pipeline_mode<synchronous>, transform_indices = @transform_5, window_bounds = array<i64: 1, 128>}, {pipeline_mode = #tpu.pipeline_mode<synchronous>, transform_indices = @transform_6, window_bounds = array<i64: 1, 128>}, {pipeline_mode = #tpu.pipeline_mode<synchronous>, transform_indices = @transform_7, window_bounds = array<i64: 128, 128>}, {pipeline_mode = #tpu.pipeline_mode<synchronous>, transform_indices = @transform_8, window_bounds = array<i64: 1, 128>}, {pipeline_mode = #tpu.pipeline_mode<synchronous>, transform_indices = @transform_9, window_bounds = array<i64: 128, 128>}, {pipeline_mode = #tpu.pipeline_mode<synchronous>, transform_indices = @transform_10, window_bounds = array<i64: 1, 128>}, {transform_indices = @transform_11, window_bounds = array<i64: 1, 16, 16, 128>}]} {
    %c0 = arith.constant 0 : index
    %c0_0 = arith.constant 0 : index
    %0 = vector.load %arg6[%c0, %c0_0] : memref<1x128xf32, #tpu.memory_space<vmem>>, vector<1x128xf32>
    %c0_1 = arith.constant 0 : index
    %c0_2 = arith.constant 0 : index
    %1 = vector.load %arg7[%c0_1, %c0_2] : memref<1x128xf32, #tpu.memory_space<vmem>>, vector<1x128xf32>
    %cst = arith.constant 0.000000e+00 : f32
    %2 = vector.broadcast %cst : f32 to vector<1x128xf32>
    %cst_3 = arith.constant 0.000000e+00 : f32
    %3 = vector.broadcast %cst_3 : f32 to vector<8x16x128xf32>
    %c0_4 = arith.constant 0 : index
    %c0_5 = arith.constant 0 : index
    %c0_6 = arith.constant 0 : index
    %c0_7 = arith.constant 0 : index
    %4 = vector.load %arg1[%c0_4, %c0_5, %c0_6, %c0_7] : memref<1x17x17x128xbf16, #tpu.memory_space<vmem>>, vector<1x8x17x128xbf16>
    %5 = vector.shape_cast %4 : vector<1x8x17x128xbf16> to vector<8x17x128xbf16>
    %6 = arith.extf %5 : vector<8x17x128xbf16> to vector<8x17x128xf32>
    %7 = vector.extract_strided_slice %6 {offsets = [0, 0, 0], sizes = [8, 16, 128], strides = [1, 1, 1]} : vector<8x17x128xf32> to vector<8x16x128xf32>
    %c0_8 = arith.constant 0 : index
    %c0_9 = arith.constant 0 : index
    %8 = vector.load %arg5[%c0_8, %c0_9] : memref<9x128xf32, #tpu.memory_space<vmem>>, vector<1x128xf32>
    %9 = vector.shape_cast %8 : vector<1x128xf32> to vector<128xf32>
    %10 = vector.shape_cast %9 : vector<128xf32> to vector<1x1x128xf32>
    %11 = vector.broadcast %10 : vector<1x1x128xf32> to vector<8x16x128xf32>
    %12 = arith.mulf %7, %11 : vector<8x16x128xf32>
    %13 = arith.addf %3, %12 : vector<8x16x128xf32>
    %14 = vector.extract_strided_slice %6 {offsets = [0, 1, 0], sizes = [8, 16, 128], strides = [1, 1, 1]} : vector<8x17x128xf32> to vector<8x16x128xf32>
    %c2 = arith.constant 2 : index
    %c0_10 = arith.constant 0 : index
    %15 = vector.load %arg5[%c2, %c0_10] : memref<9x128xf32, #tpu.memory_space<vmem>>, vector<1x128xf32>
    %16 = vector.shape_cast %15 : vector<1x128xf32> to vector<128xf32>
    %17 = vector.shape_cast %16 : vector<128xf32> to vector<1x1x128xf32>
    %18 = vector.broadcast %17 : vector<1x1x128xf32> to vector<8x16x128xf32>
    %19 = arith.mulf %14, %18 : vector<8x16x128xf32>
    %20 = arith.addf %13, %19 : vector<8x16x128xf32>
    %c0_11 = arith.constant 0 : index
    %c0_12 = arith.constant 0 : index
    %c0_13 = arith.constant 0 : index
    %c0_14 = arith.constant 0 : index
    %21 = vector.load %arg2[%c0_11, %c0_12, %c0_13, %c0_14] : memref<1x17x17x128xbf16, #tpu.memory_space<vmem>>, vector<1x8x17x128xbf16>
    %22 = vector.shape_cast %21 : vector<1x8x17x128xbf16> to vector<8x17x128xbf16>
    %23 = arith.extf %22 : vector<8x17x128xbf16> to vector<8x17x128xf32>
    %24 = vector.extract_strided_slice %23 {offsets = [0, 0, 0], sizes = [8, 16, 128], strides = [1, 1, 1]} : vector<8x17x128xf32> to vector<8x16x128xf32>
    %c1 = arith.constant 1 : index
    %c0_15 = arith.constant 0 : index
    %25 = vector.load %arg5[%c1, %c0_15] : memref<9x128xf32, #tpu.memory_space<vmem>>, vector<1x128xf32>
    %26 = vector.shape_cast %25 : vector<1x128xf32> to vector<128xf32>
    %27 = vector.shape_cast %26 : vector<128xf32> to vector<1x1x128xf32>
    %28 = vector.broadcast %27 : vector<1x1x128xf32> to vector<8x16x128xf32>
    %29 = arith.mulf %24, %28 : vector<8x16x128xf32>
    %30 = arith.addf %20, %29 : vector<8x16x128xf32>
    %c0_16 = arith.constant 0 : index
    %c0_17 = arith.constant 0 : index
    %c0_18 = arith.constant 0 : index
    %c0_19 = arith.constant 0 : index
    %31 = vector.load %arg3[%c0_16, %c0_17, %c0_18, %c0_19] : memref<1x17x17x128xbf16, #tpu.memory_space<vmem>>, vector<1x8x17x128xbf16>
    %32 = vector.shape_cast %31 : vector<1x8x17x128xbf16> to vector<8x17x128xbf16>
    %33 = arith.extf %32 : vector<8x17x128xbf16> to vector<8x17x128xf32>
    %34 = vector.extract_strided_slice %33 {offsets = [0, 0, 0], sizes = [8, 16, 128], strides = [1, 1, 1]} : vector<8x17x128xf32> to vector<8x16x128xf32>
    %c3 = arith.constant 3 : index
    %c0_20 = arith.constant 0 : index
    %35 = vector.load %arg5[%c3, %c0_20] : memref<9x128xf32, #tpu.memory_space<vmem>>, vector<1x128xf32>
    %36 = vector.shape_cast %35 : vector<1x128xf32> to vector<128xf32>
    %37 = vector.shape_cast %36 : vector<128xf32> to vector<1x1x128xf32>
    %38 = vector.broadcast %37 : vector<1x1x128xf32> to vector<8x16x128xf32>
    %39 = arith.mulf %34, %38 : vector<8x16x128xf32>
    %40 = arith.addf %30, %39 : vector<8x16x128xf32>
    %41 = vector.extract_strided_slice %33 {offsets = [0, 1, 0], sizes = [8, 16, 128], strides = [1, 1, 1]} : vector<8x17x128xf32> to vector<8x16x128xf32>
    %c5 = arith.constant 5 : index
    %c0_21 = arith.constant 0 : index
    %42 = vector.load %arg5[%c5, %c0_21] : memref<9x128xf32, #tpu.memory_space<vmem>>, vector<1x128xf32>
    %43 = vector.shape_cast %42 : vector<1x128xf32> to vector<128xf32>
    %44 = vector.shape_cast %43 : vector<128xf32> to vector<1x1x128xf32>
    %45 = vector.broadcast %44 : vector<1x1x128xf32> to vector<8x16x128xf32>
    %46 = arith.mulf %41, %45 : vector<8x16x128xf32>
    %47 = arith.addf %40, %46 : vector<8x16x128xf32>
    %c0_22 = arith.constant 0 : index
    %c0_23 = arith.constant 0 : index
    %c0_24 = arith.constant 0 : index
    %c0_25 = arith.constant 0 : index
    %48 = vector.load %arg4[%c0_22, %c0_23, %c0_24, %c0_25] : memref<1x17x17x128xbf16, #tpu.memory_space<vmem>>, vector<1x8x17x128xbf16>
    %49 = vector.shape_cast %48 : vector<1x8x17x128xbf16> to vector<8x17x128xbf16>
    %50 = arith.extf %49 : vector<8x17x128xbf16> to vector<8x17x128xf32>
    %51 = vector.extract_strided_slice %50 {offsets = [0, 0, 0], sizes = [8, 16, 128], strides = [1, 1, 1]} : vector<8x17x128xf32> to vector<8x16x128xf32>
    %c4 = arith.constant 4 : index
    %c0_26 = arith.constant 0 : index
    %52 = vector.load %arg5[%c4, %c0_26] : memref<9x128xf32, #tpu.memory_space<vmem>>, vector<1x128xf32>
    %53 = vector.shape_cast %52 : vector<1x128xf32> to vector<128xf32>
    %54 = vector.shape_cast %53 : vector<128xf32> to vector<1x1x128xf32>
    %55 = vector.broadcast %54 : vector<1x1x128xf32> to vector<8x16x128xf32>
    %56 = arith.mulf %51, %55 : vector<8x16x128xf32>
    %57 = arith.addf %47, %56 : vector<8x16x128xf32>
    %c0_27 = arith.constant 0 : index
    %c1_28 = arith.constant 1 : index
    %c0_29 = arith.constant 0 : index
    %c0_30 = arith.constant 0 : index
    %58 = vector.load %arg1[%c0_27, %c1_28, %c0_29, %c0_30] : memref<1x17x17x128xbf16, #tpu.memory_space<vmem>>, vector<1x8x17x128xbf16>
    %59 = vector.shape_cast %58 : vector<1x8x17x128xbf16> to vector<8x17x128xbf16>
    %60 = arith.extf %59 : vector<8x17x128xbf16> to vector<8x17x128xf32>
    %61 = vector.extract_strided_slice %60 {offsets = [0, 0, 0], sizes = [8, 16, 128], strides = [1, 1, 1]} : vector<8x17x128xf32> to vector<8x16x128xf32>
    %c6 = arith.constant 6 : index
    %c0_31 = arith.constant 0 : index
    %62 = vector.load %arg5[%c6, %c0_31] : memref<9x128xf32, #tpu.memory_space<vmem>>, vector<1x128xf32>
    %63 = vector.shape_cast %62 : vector<1x128xf32> to vector<128xf32>
    %64 = vector.shape_cast %63 : vector<128xf32> to vector<1x1x128xf32>
    %65 = vector.broadcast %64 : vector<1x1x128xf32> to vector<8x16x128xf32>
    %66 = arith.mulf %61, %65 : vector<8x16x128xf32>
    %67 = arith.addf %57, %66 : vector<8x16x128xf32>
    %68 = vector.extract_strided_slice %60 {offsets = [0, 1, 0], sizes = [8, 16, 128], strides = [1, 1, 1]} : vector<8x17x128xf32> to vector<8x16x128xf32>
    %c8 = arith.constant 8 : index
    %c0_32 = arith.constant 0 : index
    %69 = vector.load %arg5[%c8, %c0_32] : memref<9x128xf32, #tpu.memory_space<vmem>>, vector<1x128xf32>
    %70 = vector.shape_cast %69 : vector<1x128xf32> to vector<128xf32>
    %71 = vector.shape_cast %70 : vector<128xf32> to vector<1x1x128xf32>
    %72 = vector.broadcast %71 : vector<1x1x128xf32> to vector<8x16x128xf32>
    %73 = arith.mulf %68, %72 : vector<8x16x128xf32>
    %74 = arith.addf %67, %73 : vector<8x16x128xf32>
    %c0_33 = arith.constant 0 : index
    %c1_34 = arith.constant 1 : index
    %c0_35 = arith.constant 0 : index
    %c0_36 = arith.constant 0 : index
    %75 = vector.load %arg2[%c0_33, %c1_34, %c0_35, %c0_36] : memref<1x17x17x128xbf16, #tpu.memory_space<vmem>>, vector<1x8x17x128xbf16>
    %76 = vector.shape_cast %75 : vector<1x8x17x128xbf16> to vector<8x17x128xbf16>
    %77 = arith.extf %76 : vector<8x17x128xbf16> to vector<8x17x128xf32>
    %78 = vector.extract_strided_slice %77 {offsets = [0, 0, 0], sizes = [8, 16, 128], strides = [1, 1, 1]} : vector<8x17x128xf32> to vector<8x16x128xf32>
    %c7 = arith.constant 7 : index
    %c0_37 = arith.constant 0 : index
    %79 = vector.load %arg5[%c7, %c0_37] : memref<9x128xf32, #tpu.memory_space<vmem>>, vector<1x128xf32>
    %80 = vector.shape_cast %79 : vector<1x128xf32> to vector<128xf32>
    %81 = vector.shape_cast %80 : vector<128xf32> to vector<1x1x128xf32>
    %82 = vector.broadcast %81 : vector<1x1x128xf32> to vector<8x16x128xf32>
    %83 = arith.mulf %78, %82 : vector<8x16x128xf32>
    %84 = arith.addf %74, %83 : vector<8x16x128xf32>
    %85 = vector.shape_cast %0 : vector<1x128xf32> to vector<1x1x128xf32>
    %86 = vector.broadcast %85 : vector<1x1x128xf32> to vector<8x16x128xf32>
    %87 = arith.mulf %84, %86 : vector<8x16x128xf32>
    %88 = vector.shape_cast %1 : vector<1x128xf32> to vector<1x1x128xf32>
    %89 = vector.broadcast %88 : vector<1x1x128xf32> to vector<8x16x128xf32>
    %90 = arith.addf %87, %89 : vector<8x16x128xf32>
    %cst_38 = arith.constant 0.000000e+00 : f32
    %91 = vector.broadcast %cst_38 : f32 to vector<8x16x128xf32>
    %92 = arith.maximumf %90, %91 : vector<8x16x128xf32>
    %93 = arith.truncf %92 : vector<8x16x128xf32> to vector<8x16x128xbf16>
    %c0_39 = arith.constant 0 : index
    %c0_40 = arith.constant 0 : index
    %c0_41 = arith.constant 0 : index
    %c0_42 = arith.constant 0 : index
    %94 = vector.load %arg12[%c0_39, %c0_40, %c0_41, %c0_42] : memref<1x16x16x128xbf16, #tpu.memory_space<vmem>>, vector<1x8x16x128xbf16>
    %95 = vector.shape_cast %94 : vector<1x8x16x128xbf16> to vector<8x16x128xbf16>
    %96 = vector.shape_cast %93 : vector<8x16x128xbf16> to vector<1x8x16x128xbf16>
    tpu.vector_store %arg12[%c0_39, %c0_40, %c0_41, %c0_42], %96 {strides = array<i32>} : memref<1x16x16x128xbf16, #tpu.memory_space<vmem>>, vector<1x8x16x128xbf16>,
    %cst_43 = arith.constant dense<0.000000e+00> : vector<16x128xf32>
    %97 = vector.multi_reduction <add>, %92, %cst_43 [0] : vector<8x16x128xf32> to vector<16x128xf32>
    %cst_44 = arith.constant dense<0.000000e+00> : vector<128xf32>
    %98 = vector.multi_reduction <add>, %97, %cst_44 [0] : vector<16x128xf32> to vector<128xf32>
    %99 = vector.shape_cast %98 : vector<128xf32> to vector<1x128xf32>
    %100 = arith.addf %2, %99 : vector<1x128xf32>
    %cst_45 = arith.constant 0.000000e+00 : f32
    %101 = vector.broadcast %cst_45 : f32 to vector<8x16x128xf32>
    %c0_46 = arith.constant 0 : index
    %c8_47 = arith.constant 8 : index
    %c0_48 = arith.constant 0 : index
    %c0_49 = arith.constant 0 : index
    %102 = vector.load %arg1[%c0_46, %c8_47, %c0_48, %c0_49] : memref<1x17x17x128xbf16, #tpu.memory_space<vmem>>, vector<1x8x17x128xbf16>
    %103 = vector.shape_cast %102 : vector<1x8x17x128xbf16> to vector<8x17x128xbf16>
    %104 = arith.extf %103 : vector<8x17x128xbf16> to vector<8x17x128xf32>
    %105 = vector.extract_strided_slice %104 {offsets = [0, 0, 0], sizes = [8, 16, 128], strides = [1, 1, 1]} : vector<8x17x128xf32> to vector<8x16x128xf32>
    %c0_50 = arith.constant 0 : index
    %c0_51 = arith.constant 0 : index
    %106 = vector.load %arg5[%c0_50, %c0_51] : memref<9x128xf32, #tpu.memory_space<vmem>>, vector<1x128xf32>
    %107 = vector.shape_cast %106 : vector<1x128xf32> to vector<128xf32>
    %108 = vector.shape_cast %107 : vector<128xf32> to vector<1x1x128xf32>
    %109 = vector.broadcast %108 : vector<1x1x128xf32> to vector<8x16x128xf32>
    %110 = arith.mulf %105, %109 : vector<8x16x128xf32>
    %111 = arith.addf %101, %110 : vector<8x16x128xf32>
    %112 = vector.extract_strided_slice %104 {offsets = [0, 1, 0], sizes = [8, 16, 128], strides = [1, 1, 1]} : vector<8x17x128xf32> to vector<8x16x128xf32>
    %c2_52 = arith.constant 2 : index
    %c0_53 = arith.constant 0 : index
    %113 = vector.load %arg5[%c2_52, %c0_53] : memref<9x128xf32, #tpu.memory_space<vmem>>, vector<1x128xf32>
    %114 = vector.shape_cast %113 : vector<1x128xf32> to vector<128xf32>
    %115 = vector.shape_cast %114 : vector<128xf32> to vector<1x1x128xf32>
    %116 = vector.broadcast %115 : vector<1x1x128xf32> to vector<8x16x128xf32>
    %117 = arith.mulf %112, %116 : vector<8x16x128xf32>
    %118 = arith.addf %111, %117 : vector<8x16x128xf32>
    %c0_54 = arith.constant 0 : index
    %c8_55 = arith.constant 8 : index
    %c0_56 = arith.constant 0 : index
    %c0_57 = arith.constant 0 : index
    %119 = vector.load %arg2[%c0_54, %c8_55, %c0_56, %c0_57] : memref<1x17x17x128xbf16, #tpu.memory_space<vmem>>, vector<1x8x17x128xbf16>
    %120 = vector.shape_cast %119 : vector<1x8x17x128xbf16> to vector<8x17x128xbf16>
    %121 = arith.extf %120 : vector<8x17x128xbf16> to vector<8x17x128xf32>
    %122 = vector.extract_strided_slice %121 {offsets = [0, 0, 0], sizes = [8, 16, 128], strides = [1, 1, 1]} : vector<8x17x128xf32> to vector<8x16x128xf32>
    %c1_58 = arith.constant 1 : index
    %c0_59 = arith.constant 0 : index
    %123 = vector.load %arg5[%c1_58, %c0_59] : memref<9x128xf32, #tpu.memory_space<vmem>>, vector<1x128xf32>
    %124 = vector.shape_cast %123 : vector<1x128xf32> to vector<128xf32>
    %125 = vector.shape_cast %124 : vector<128xf32> to vector<1x1x128xf32>
    %126 = vector.broadcast %125 : vector<1x1x128xf32> to vector<8x16x128xf32>
    %127 = arith.mulf %122, %126 : vector<8x16x128xf32>
    %128 = arith.addf %118, %127 : vector<8x16x128xf32>
    %c0_60 = arith.constant 0 : index
    %c8_61 = arith.constant 8 : index
    %c0_62 = arith.constant 0 : index
    %c0_63 = arith.constant 0 : index
    %129 = vector.load %arg3[%c0_60, %c8_61, %c0_62, %c0_63] : memref<1x17x17x128xbf16, #tpu.memory_space<vmem>>, vector<1x8x17x128xbf16>
    %130 = vector.shape_cast %129 : vector<1x8x17x128xbf16> to vector<8x17x128xbf16>
    %131 = arith.extf %130 : vector<8x17x128xbf16> to vector<8x17x128xf32>
    %132 = vector.extract_strided_slice %131 {offsets = [0, 0, 0], sizes = [8, 16, 128], strides = [1, 1, 1]} : vector<8x17x128xf32> to vector<8x16x128xf32>
    %c3_64 = arith.constant 3 : index
    %c0_65 = arith.constant 0 : index
    %133 = vector.load %arg5[%c3_64, %c0_65] : memref<9x128xf32, #tpu.memory_space<vmem>>, vector<1x128xf32>
    %134 = vector.shape_cast %133 : vector<1x128xf32> to vector<128xf32>
    %135 = vector.shape_cast %134 : vector<128xf32> to vector<1x1x128xf32>
    %136 = vector.broadcast %135 : vector<1x1x128xf32> to vector<8x16x128xf32>
    %137 = arith.mulf %132, %136 : vector<8x16x128xf32>
    %138 = arith.addf %128, %137 : vector<8x16x128xf32>
    %139 = vector.extract_strided_slice %131 {offsets = [0, 1, 0], sizes = [8, 16, 128], strides = [1, 1, 1]} : vector<8x17x128xf32> to vector<8x16x128xf32>
    %c5_66 = arith.constant 5 : index
    %c0_67 = arith.constant 0 : index
    %140 = vector.load %arg5[%c5_66, %c0_67] : memref<9x128xf32, #tpu.memory_space<vmem>>, vector<1x128xf32>
    %141 = vector.shape_cast %140 : vector<1x128xf32> to vector<128xf32>
    %142 = vector.shape_cast %141 : vector<128xf32> to vector<1x1x128xf32>
    %143 = vector.broadcast %142 : vector<1x1x128xf32> to vector<8x16x128xf32>
    %144 = arith.mulf %139, %143 : vector<8x16x128xf32>
    %145 = arith.addf %138, %144 : vector<8x16x128xf32>
    %c0_68 = arith.constant 0 : index
    %c8_69 = arith.constant 8 : index
    %c0_70 = arith.constant 0 : index
    %c0_71 = arith.constant 0 : index
    %146 = vector.load %arg4[%c0_68, %c8_69, %c0_70, %c0_71] : memref<1x17x17x128xbf16, #tpu.memory_space<vmem>>, vector<1x8x17x128xbf16>
    %147 = vector.shape_cast %146 : vector<1x8x17x128xbf16> to vector<8x17x128xbf16>
    %148 = arith.extf %147 : vector<8x17x128xbf16> to vector<8x17x128xf32>
    %149 = vector.extract_strided_slice %148 {offsets = [0, 0, 0], sizes = [8, 16, 128], strides = [1, 1, 1]} : vector<8x17x128xf32> to vector<8x16x128xf32>
    %c4_72 = arith.constant 4 : index
    %c0_73 = arith.constant 0 : index
    %150 = vector.load %arg5[%c4_72, %c0_73] : memref<9x128xf32, #tpu.memory_space<vmem>>, vector<1x128xf32>
    %151 = vector.shape_cast %150 : vector<1x128xf32> to vector<128xf32>
    %152 = vector.shape_cast %151 : vector<128xf32> to vector<1x1x128xf32>
    %153 = vector.broadcast %152 : vector<1x1x128xf32> to vector<8x16x128xf32>
    %154 = arith.mulf %149, %153 : vector<8x16x128xf32>
    %155 = arith.addf %145, %154 : vector<8x16x128xf32>
    %c0_74 = arith.constant 0 : index
    %c9 = arith.constant 9 : index
    %c0_75 = arith.constant 0 : index
    %c0_76 = arith.constant 0 : index
    %156 = vector.load %arg1[%c0_74, %c9, %c0_75, %c0_76] : memref<1x17x17x128xbf16, #tpu.memory_space<vmem>>, vector<1x8x17x128xbf16>
    %157 = vector.shape_cast %156 : vector<1x8x17x128xbf16> to vector<8x17x128xbf16>
    %158 = arith.extf %157 : vector<8x17x128xbf16> to vector<8x17x128xf32>
    %159 = vector.extract_strided_slice %158 {offsets = [0, 0, 0], sizes = [8, 16, 128], strides = [1, 1, 1]} : vector<8x17x128xf32> to vector<8x16x128xf32>
    %c6_77 = arith.constant 6 : index
    %c0_78 = arith.constant 0 : index
    %160 = vector.load %arg5[%c6_77, %c0_78] : memref<9x128xf32, #tpu.memory_space<vmem>>, vector<1x128xf32>
    %161 = vector.shape_cast %160 : vector<1x128xf32> to vector<128xf32>
    %162 = vector.shape_cast %161 : vector<128xf32> to vector<1x1x128xf32>
    %163 = vector.broadcast %162 : vector<1x1x128xf32> to vector<8x16x128xf32>
    %164 = arith.mulf %159, %163 : vector<8x16x128xf32>
    %165 = arith.addf %155, %164 : vector<8x16x128xf32>
    %166 = vector.extract_strided_slice %158 {offsets = [0, 1, 0], sizes = [8, 16, 128], strides = [1, 1, 1]} : vector<8x17x128xf32> to vector<8x16x128xf32>
    %c8_79 = arith.constant 8 : index
    %c0_80 = arith.constant 0 : index
    %167 = vector.load %arg5[%c8_79, %c0_80] : memref<9x128xf32, #tpu.memory_space<vmem>>, vector<1x128xf32>
    %168 = vector.shape_cast %167 : vector<1x128xf32> to vector<128xf32>
    %169 = vector.shape_cast %168 : vector<128xf32> to vector<1x1x128xf32>
    %170 = vector.broadcast %169 : vector<1x1x128xf32> to vector<8x16x128xf32>
    %171 = arith.mulf %166, %170 : vector<8x16x128xf32>
    %172 = arith.addf %165, %171 : vector<8x16x128xf32>
    %c0_81 = arith.constant 0 : index
    %c9_82 = arith.constant 9 : index
    %c0_83 = arith.constant 0 : index
    %c0_84 = arith.constant 0 : index
    %173 = vector.load %arg2[%c0_81, %c9_82, %c0_83, %c0_84] : memref<1x17x17x128xbf16, #tpu.memory_space<vmem>>, vector<1x8x17x128xbf16>
    %174 = vector.shape_cast %173 : vector<1x8x17x128xbf16> to vector<8x17x128xbf16>
    %175 = arith.extf %174 : vector<8x17x128xbf16> to vector<8x17x128xf32>
    %176 = vector.extract_strided_slice %175 {offsets = [0, 0, 0], sizes = [8, 16, 128], strides = [1, 1, 1]} : vector<8x17x128xf32> to vector<8x16x128xf32>
    %c7_85 = arith.constant 7 : index
    %c0_86 = arith.constant 0 : index
    %177 = vector.load %arg5[%c7_85, %c0_86] : memref<9x128xf32, #tpu.memory_space<vmem>>, vector<1x128xf32>
    %178 = vector.shape_cast %177 : vector<1x128xf32> to vector<128xf32>
    %179 = vector.shape_cast %178 : vector<128xf32> to vector<1x1x128xf32>
    %180 = vector.broadcast %179 : vector<1x1x128xf32> to vector<8x16x128xf32>
    %181 = arith.mulf %176, %180 : vector<8x16x128xf32>
    %182 = arith.addf %172, %181 : vector<8x16x128xf32>
    %183 = vector.shape_cast %0 : vector<1x128xf32> to vector<1x1x128xf32>
    %184 = vector.broadcast %183 : vector<1x1x128xf32> to vector<8x16x128xf32>
    %185 = arith.mulf %182, %184 : vector<8x16x128xf32>
    %186 = vector.shape_cast %1 : vector<1x128xf32> to vector<1x1x128xf32>
    %187 = vector.broadcast %186 : vector<1x1x128xf32> to vector<8x16x128xf32>
    %188 = arith.addf %185, %187 : vector<8x16x128xf32>
    %cst_87 = arith.constant 0.000000e+00 : f32
    %189 = vector.broadcast %cst_87 : f32 to vector<8x16x128xf32>
    %190 = arith.maximumf %188, %189 : vector<8x16x128xf32>
    %191 = arith.truncf %190 : vector<8x16x128xf32> to vector<8x16x128xbf16>
    %c0_88 = arith.constant 0 : index
    %c8_89 = arith.constant 8 : index
    %c0_90 = arith.constant 0 : index
    %c0_91 = arith.constant 0 : index
    %192 = vector.load %arg12[%c0_88, %c8_89, %c0_90, %c0_91] : memref<1x16x16x128xbf16, #tpu.memory_space<vmem>>, vector<1x8x16x128xbf16>
    %193 = vector.shape_cast %192 : vector<1x8x16x128xbf16> to vector<8x16x128xbf16>
    %194 = vector.shape_cast %191 : vector<8x16x128xbf16> to vector<1x8x16x128xbf16>
    tpu.vector_store %arg12[%c0_88, %c8_89, %c0_90, %c0_91], %194 {strides = array<i32>} : memref<1x16x16x128xbf16, #tpu.memory_space<vmem>>, vector<1x8x16x128xbf16>,
    %cst_92 = arith.constant dense<0.000000e+00> : vector<16x128xf32>
    %195 = vector.multi_reduction <add>, %190, %cst_92 [0] : vector<8x16x128xf32> to vector<16x128xf32>
    %cst_93 = arith.constant dense<0.000000e+00> : vector<128xf32>
    %196 = vector.multi_reduction <add>, %195, %cst_93 [0] : vector<16x128xf32> to vector<128xf32>
    %197 = vector.shape_cast %196 : vector<128xf32> to vector<1x128xf32>
    %198 = arith.addf %100, %197 : vector<1x128xf32>
    %cst_94 = arith.constant 3.906250e-03 : f32
    %199 = vector.broadcast %cst_94 : f32 to vector<1x128xf32>
    %200 = arith.mulf %198, %199 : vector<1x128xf32>
    %c0_95 = arith.constant 0 : index
    %c0_96 = arith.constant 0 : index
    %201 = vector.load %arg8[%c0_95, %c0_96] : memref<128x128xf32, #tpu.memory_space<vmem>>, vector<128x128xf32>
    %cst_97 = arith.constant dense<0.000000e+00> : vector<1x128xf32>
    %202 = tpu.matmul %200, %201, %cst_97 {dimension_numbers = #tpu.dot_dimension_numbers<[1], [0], [0], [1], [0, 0, 1, 1], [], []>} : vector<1x128xf32>, vector<128x128xf32>, vector<1x128xf32> -> vector<1x128xf32>
    %c0_98 = arith.constant 0 : index
    %c0_99 = arith.constant 0 : index
    %203 = vector.load %arg9[%c0_98, %c0_99] : memref<1x128xf32, #tpu.memory_space<vmem>>, vector<1x128xf32>
    %204 = arith.addf %202, %203 : vector<1x128xf32>
    %cst_100 = arith.constant 0.000000e+00 : f32
    %205 = vector.broadcast %cst_100 : f32 to vector<1x128xf32>
    %206 = arith.maximumf %204, %205 : vector<1x128xf32>
    %c0_101 = arith.constant 0 : index
    %c0_102 = arith.constant 0 : index
    %207 = vector.load %arg10[%c0_101, %c0_102] : memref<128x128xf32, #tpu.memory_space<vmem>>, vector<128x128xf32>
    %cst_103 = arith.constant dense<0.000000e+00> : vector<1x128xf32>
    %208 = tpu.matmul %206, %207, %cst_103 {dimension_numbers = #tpu.dot_dimension_numbers<[1], [0], [0], [1], [0, 0, 1, 1], [], []>} : vector<1x128xf32>, vector<128x128xf32>, vector<1x128xf32> -> vector<1x128xf32>
    %c0_104 = arith.constant 0 : index
    %c0_105 = arith.constant 0 : index
    %209 = vector.load %arg11[%c0_104, %c0_105] : memref<1x128xf32, #tpu.memory_space<vmem>>, vector<1x128xf32>
    %210 = arith.addf %208, %209 : vector<1x128xf32>
    %cst_106 = arith.constant 3.000000e+00 : f32
    %211 = vector.broadcast %cst_106 : f32 to vector<1x128xf32>
    %212 = arith.addf %210, %211 : vector<1x128xf32>
    %cst_107 = arith.constant 0.000000e+00 : f32
    %cst_108 = arith.constant 6.000000e+00 : f32
    %213 = vector.broadcast %cst_107 : f32 to vector<1x128xf32>
    %214 = arith.maximumf %213, %212 : vector<1x128xf32>
    %215 = vector.broadcast %cst_108 : f32 to vector<1x128xf32>
    %216 = arith.minimumf %215, %214 : vector<1x128xf32>
    %cst_109 = arith.constant 0.166666672 : f32
    %217 = vector.broadcast %cst_109 : f32 to vector<1x128xf32>
    %218 = arith.mulf %216, %217 : vector<1x128xf32>
    %c0_110 = arith.constant 0 : index
    %c0_111 = arith.constant 0 : index
    %c0_112 = arith.constant 0 : index
    %c0_113 = arith.constant 0 : index
    %219 = vector.load %arg12[%c0_110, %c0_111, %c0_112, %c0_113] : memref<1x16x16x128xbf16, #tpu.memory_space<vmem>>, vector<1x8x16x128xbf16>
    %220 = vector.shape_cast %219 : vector<1x8x16x128xbf16> to vector<8x16x128xbf16>
    %221 = arith.extf %220 : vector<8x16x128xbf16> to vector<8x16x128xf32>
    %222 = vector.shape_cast %218 : vector<1x128xf32> to vector<1x1x128xf32>
    %223 = vector.broadcast %222 : vector<1x1x128xf32> to vector<8x16x128xf32>
    %224 = arith.mulf %221, %223 : vector<8x16x128xf32>
    %225 = arith.truncf %224 : vector<8x16x128xf32> to vector<8x16x128xbf16>
    %c0_114 = arith.constant 0 : index
    %c0_115 = arith.constant 0 : index
    %c0_116 = arith.constant 0 : index
    %c0_117 = arith.constant 0 : index
    %226 = vector.load %arg12[%c0_114, %c0_115, %c0_116, %c0_117] : memref<1x16x16x128xbf16, #tpu.memory_space<vmem>>, vector<1x8x16x128xbf16>
    %227 = vector.shape_cast %226 : vector<1x8x16x128xbf16> to vector<8x16x128xbf16>
    %228 = vector.shape_cast %225 : vector<8x16x128xbf16> to vector<1x8x16x128xbf16>
    tpu.vector_store %arg12[%c0_114, %c0_115, %c0_116, %c0_117], %228 {strides = array<i32>} : memref<1x16x16x128xbf16, #tpu.memory_space<vmem>>, vector<1x8x16x128xbf16>,
    %c0_118 = arith.constant 0 : index
    %c8_119 = arith.constant 8 : index
    %c0_120 = arith.constant 0 : index
    %c0_121 = arith.constant 0 : index
    %229 = vector.load %arg12[%c0_118, %c8_119, %c0_120, %c0_121] : memref<1x16x16x128xbf16, #tpu.memory_space<vmem>>, vector<1x8x16x128xbf16>
    %230 = vector.shape_cast %229 : vector<1x8x16x128xbf16> to vector<8x16x128xbf16>
    %231 = arith.extf %230 : vector<8x16x128xbf16> to vector<8x16x128xf32>
    %232 = vector.shape_cast %218 : vector<1x128xf32> to vector<1x1x128xf32>
    %233 = vector.broadcast %232 : vector<1x1x128xf32> to vector<8x16x128xf32>
    %234 = arith.mulf %231, %233 : vector<8x16x128xf32>
    %235 = arith.truncf %234 : vector<8x16x128xf32> to vector<8x16x128xbf16>
    %c0_122 = arith.constant 0 : index
    %c8_123 = arith.constant 8 : index
    %c0_124 = arith.constant 0 : index
    %c0_125 = arith.constant 0 : index
    %236 = vector.load %arg12[%c0_122, %c8_123, %c0_124, %c0_125] : memref<1x16x16x128xbf16, #tpu.memory_space<vmem>>, vector<1x8x16x128xbf16>
    %237 = vector.shape_cast %236 : vector<1x8x16x128xbf16> to vector<8x16x128xbf16>
    %238 = vector.shape_cast %235 : vector<8x16x128xbf16> to vector<1x8x16x128xbf16>
    tpu.vector_store %arg12[%c0_122, %c8_123, %c0_124, %c0_125], %238 {strides = array<i32>} : memref<1x16x16x128xbf16, #tpu.memory_space<vmem>>, vector<1x8x16x128xbf16>,
    return
  }
  func.func @transform_0(%arg0: i32) -> (i32, i32, i32, i32) {
    %c0_i32 = arith.constant 0 : i32
    %c0_i32_0 = arith.constant 0 : i32
    %c0_i32_1 = arith.constant 0 : i32
    %c0_i32_2 = arith.constant 0 : i32
    return %arg0, %c0_i32, %c0_i32_0, %c0_i32_1 : i32, i32, i32, i32
  }
  func.func @transform_1(%arg0: i32) -> (i32, i32, i32, i32) {
    %c0_i32 = arith.constant 0 : i32
    %c0_i32_0 = arith.constant 0 : i32
    %c0_i32_1 = arith.constant 0 : i32
    %c0_i32_2 = arith.constant 0 : i32
    return %arg0, %c0_i32, %c0_i32_0, %c0_i32_1 : i32, i32, i32, i32
  }
  func.func @transform_2(%arg0: i32) -> (i32, i32, i32, i32) {
    %c0_i32 = arith.constant 0 : i32
    %c0_i32_0 = arith.constant 0 : i32
    %c0_i32_1 = arith.constant 0 : i32
    %c0_i32_2 = arith.constant 0 : i32
    return %arg0, %c0_i32, %c0_i32_0, %c0_i32_1 : i32, i32, i32, i32
  }
  func.func @transform_3(%arg0: i32) -> (i32, i32, i32, i32) {
    %c0_i32 = arith.constant 0 : i32
    %c0_i32_0 = arith.constant 0 : i32
    %c0_i32_1 = arith.constant 0 : i32
    %c0_i32_2 = arith.constant 0 : i32
    return %arg0, %c0_i32, %c0_i32_0, %c0_i32_1 : i32, i32, i32, i32
  }
  func.func @transform_4(%arg0: i32) -> (i32, i32) {
    %c0_i32 = arith.constant 0 : i32
    %c0_i32_0 = arith.constant 0 : i32
    %c0_i32_1 = arith.constant 0 : i32
    return %c0_i32, %c0_i32_0 : i32, i32
  }
  func.func @transform_5(%arg0: i32) -> (i32, i32) {
    %c0_i32 = arith.constant 0 : i32
    %c0_i32_0 = arith.constant 0 : i32
    %c0_i32_1 = arith.constant 0 : i32
    return %c0_i32, %c0_i32_0 : i32, i32
  }
  func.func @transform_6(%arg0: i32) -> (i32, i32) {
    %c0_i32 = arith.constant 0 : i32
    %c0_i32_0 = arith.constant 0 : i32
    %c0_i32_1 = arith.constant 0 : i32
    return %c0_i32, %c0_i32_0 : i32, i32
  }
  func.func @transform_7(%arg0: i32) -> (i32, i32) {
    %c0_i32 = arith.constant 0 : i32
    %c0_i32_0 = arith.constant 0 : i32
    %c0_i32_1 = arith.constant 0 : i32
    return %c0_i32, %c0_i32_0 : i32, i32
  }
  func.func @transform_8(%arg0: i32) -> (i32, i32) {
    %c0_i32 = arith.constant 0 : i32
    %c0_i32_0 = arith.constant 0 : i32
    %c0_i32_1 = arith.constant 0 : i32
    return %c0_i32, %c0_i32_0 : i32, i32
  }
  func.func @transform_9(%arg0: i32) -> (i32, i32) {
    %c0_i32 = arith.constant 0 : i32
    %c0_i32_0 = arith.constant 0 : i32
    %c0_i32_1 = arith.constant 0 : i32
    return %c0_i32, %c0_i32_0 : i32, i32
  }
  func.func @transform_10(%arg0: i32) -> (i32, i32) {
    %c0_i32 = arith.constant 0 : i32
    %c0_i32_0 = arith.constant 0 : i32
    %c0_i32_1 = arith.constant 0 : i32
    return %c0_i32, %c0_i32_0 : i32, i32
  }
  func.func @transform_11(%arg0: i32) -> (i32, i32, i32, i32) {
    %c0_i32 = arith.constant 0 : i32
    %c0_i32_0 = arith.constant 0 : i32
    %c0_i32_1 = arith.constant 0 : i32
    %c0_i32_2 = arith.constant 0 : i32
    return %arg0, %c0_i32, %c0_i32_0, %c0_i32_1 : i32, i32, i32, i32
  }
}

module attributes {stable_mosaic.version = 11 : i64} {
  func.func @_dw_kernel(%arg0: i32, %arg1: memref<1x9x9x128xbf16, #tpu.memory_space<vmem>>, %arg2: memref<1x9x9x128xbf16, #tpu.memory_space<vmem>>, %arg3: memref<1x9x9x128xbf16, #tpu.memory_space<vmem>>, %arg4: memref<1x9x9x128xbf16, #tpu.memory_space<vmem>>, %arg5: memref<9x128xf32, #tpu.memory_space<vmem>>, %arg6: memref<1x128xf32, #tpu.memory_space<vmem>>, %arg7: memref<1x128xf32, #tpu.memory_space<vmem>>, %arg8: memref<1x8x8x128xbf16, #tpu.memory_space<vmem>>) attributes {dimension_semantics = [#tpu.dimension_semantics<parallel>], iteration_bounds = array<i64: 2>, scalar_prefetch = 0 : i64, scratch_operands = 0 : i64, tpu.core_type = #tpu.core_type<tc>, window_params = [{transform_indices = @transform_0, window_bounds = array<i64: 1, 9, 9, 128>}, {transform_indices = @transform_1, window_bounds = array<i64: 1, 9, 9, 128>}, {transform_indices = @transform_2, window_bounds = array<i64: 1, 9, 9, 128>}, {transform_indices = @transform_3, window_bounds = array<i64: 1, 9, 9, 128>}, {pipeline_mode = #tpu.pipeline_mode<synchronous>, transform_indices = @transform_4, window_bounds = array<i64: 9, 128>}, {pipeline_mode = #tpu.pipeline_mode<synchronous>, transform_indices = @transform_5, window_bounds = array<i64: 1, 128>}, {pipeline_mode = #tpu.pipeline_mode<synchronous>, transform_indices = @transform_6, window_bounds = array<i64: 1, 128>}, {transform_indices = @transform_7, window_bounds = array<i64: 1, 8, 8, 128>}]} {
    %c0 = arith.constant 0 : index
    %c0_0 = arith.constant 0 : index
    %0 = vector.load %arg6[%c0, %c0_0] : memref<1x128xf32, #tpu.memory_space<vmem>>, vector<1x128xf32>
    %c0_1 = arith.constant 0 : index
    %c0_2 = arith.constant 0 : index
    %1 = vector.load %arg7[%c0_1, %c0_2] : memref<1x128xf32, #tpu.memory_space<vmem>>, vector<1x128xf32>
    %cst = arith.constant 0.000000e+00 : f32
    %2 = vector.broadcast %cst : f32 to vector<8x8x128xf32>
    %c0_3 = arith.constant 0 : index
    %c0_4 = arith.constant 0 : index
    %c0_5 = arith.constant 0 : index
    %c0_6 = arith.constant 0 : index
    %3 = vector.load %arg1[%c0_3, %c0_4, %c0_5, %c0_6] : memref<1x9x9x128xbf16, #tpu.memory_space<vmem>>, vector<1x8x9x128xbf16>
    %4 = vector.shape_cast %3 : vector<1x8x9x128xbf16> to vector<8x9x128xbf16>
    %5 = arith.extf %4 : vector<8x9x128xbf16> to vector<8x9x128xf32>
    %6 = vector.extract_strided_slice %5 {offsets = [0, 0, 0], sizes = [8, 8, 128], strides = [1, 1, 1]} : vector<8x9x128xf32> to vector<8x8x128xf32>
    %c0_7 = arith.constant 0 : index
    %c0_8 = arith.constant 0 : index
    %7 = vector.load %arg5[%c0_7, %c0_8] : memref<9x128xf32, #tpu.memory_space<vmem>>, vector<1x128xf32>
    %8 = vector.shape_cast %7 : vector<1x128xf32> to vector<128xf32>
    %9 = vector.shape_cast %8 : vector<128xf32> to vector<1x1x128xf32>
    %10 = vector.broadcast %9 : vector<1x1x128xf32> to vector<8x8x128xf32>
    %11 = arith.mulf %6, %10 : vector<8x8x128xf32>
    %12 = arith.addf %2, %11 : vector<8x8x128xf32>
    %13 = vector.extract_strided_slice %5 {offsets = [0, 1, 0], sizes = [8, 8, 128], strides = [1, 1, 1]} : vector<8x9x128xf32> to vector<8x8x128xf32>
    %c2 = arith.constant 2 : index
    %c0_9 = arith.constant 0 : index
    %14 = vector.load %arg5[%c2, %c0_9] : memref<9x128xf32, #tpu.memory_space<vmem>>, vector<1x128xf32>
    %15 = vector.shape_cast %14 : vector<1x128xf32> to vector<128xf32>
    %16 = vector.shape_cast %15 : vector<128xf32> to vector<1x1x128xf32>
    %17 = vector.broadcast %16 : vector<1x1x128xf32> to vector<8x8x128xf32>
    %18 = arith.mulf %13, %17 : vector<8x8x128xf32>
    %19 = arith.addf %12, %18 : vector<8x8x128xf32>
    %c0_10 = arith.constant 0 : index
    %c0_11 = arith.constant 0 : index
    %c0_12 = arith.constant 0 : index
    %c0_13 = arith.constant 0 : index
    %20 = vector.load %arg2[%c0_10, %c0_11, %c0_12, %c0_13] : memref<1x9x9x128xbf16, #tpu.memory_space<vmem>>, vector<1x8x9x128xbf16>
    %21 = vector.shape_cast %20 : vector<1x8x9x128xbf16> to vector<8x9x128xbf16>
    %22 = arith.extf %21 : vector<8x9x128xbf16> to vector<8x9x128xf32>
    %23 = vector.extract_strided_slice %22 {offsets = [0, 0, 0], sizes = [8, 8, 128], strides = [1, 1, 1]} : vector<8x9x128xf32> to vector<8x8x128xf32>
    %c1 = arith.constant 1 : index
    %c0_14 = arith.constant 0 : index
    %24 = vector.load %arg5[%c1, %c0_14] : memref<9x128xf32, #tpu.memory_space<vmem>>, vector<1x128xf32>
    %25 = vector.shape_cast %24 : vector<1x128xf32> to vector<128xf32>
    %26 = vector.shape_cast %25 : vector<128xf32> to vector<1x1x128xf32>
    %27 = vector.broadcast %26 : vector<1x1x128xf32> to vector<8x8x128xf32>
    %28 = arith.mulf %23, %27 : vector<8x8x128xf32>
    %29 = arith.addf %19, %28 : vector<8x8x128xf32>
    %c0_15 = arith.constant 0 : index
    %c0_16 = arith.constant 0 : index
    %c0_17 = arith.constant 0 : index
    %c0_18 = arith.constant 0 : index
    %30 = vector.load %arg3[%c0_15, %c0_16, %c0_17, %c0_18] : memref<1x9x9x128xbf16, #tpu.memory_space<vmem>>, vector<1x8x9x128xbf16>
    %31 = vector.shape_cast %30 : vector<1x8x9x128xbf16> to vector<8x9x128xbf16>
    %32 = arith.extf %31 : vector<8x9x128xbf16> to vector<8x9x128xf32>
    %33 = vector.extract_strided_slice %32 {offsets = [0, 0, 0], sizes = [8, 8, 128], strides = [1, 1, 1]} : vector<8x9x128xf32> to vector<8x8x128xf32>
    %c3 = arith.constant 3 : index
    %c0_19 = arith.constant 0 : index
    %34 = vector.load %arg5[%c3, %c0_19] : memref<9x128xf32, #tpu.memory_space<vmem>>, vector<1x128xf32>
    %35 = vector.shape_cast %34 : vector<1x128xf32> to vector<128xf32>
    %36 = vector.shape_cast %35 : vector<128xf32> to vector<1x1x128xf32>
    %37 = vector.broadcast %36 : vector<1x1x128xf32> to vector<8x8x128xf32>
    %38 = arith.mulf %33, %37 : vector<8x8x128xf32>
    %39 = arith.addf %29, %38 : vector<8x8x128xf32>
    %40 = vector.extract_strided_slice %32 {offsets = [0, 1, 0], sizes = [8, 8, 128], strides = [1, 1, 1]} : vector<8x9x128xf32> to vector<8x8x128xf32>
    %c5 = arith.constant 5 : index
    %c0_20 = arith.constant 0 : index
    %41 = vector.load %arg5[%c5, %c0_20] : memref<9x128xf32, #tpu.memory_space<vmem>>, vector<1x128xf32>
    %42 = vector.shape_cast %41 : vector<1x128xf32> to vector<128xf32>
    %43 = vector.shape_cast %42 : vector<128xf32> to vector<1x1x128xf32>
    %44 = vector.broadcast %43 : vector<1x1x128xf32> to vector<8x8x128xf32>
    %45 = arith.mulf %40, %44 : vector<8x8x128xf32>
    %46 = arith.addf %39, %45 : vector<8x8x128xf32>
    %c0_21 = arith.constant 0 : index
    %c0_22 = arith.constant 0 : index
    %c0_23 = arith.constant 0 : index
    %c0_24 = arith.constant 0 : index
    %47 = vector.load %arg4[%c0_21, %c0_22, %c0_23, %c0_24] : memref<1x9x9x128xbf16, #tpu.memory_space<vmem>>, vector<1x8x9x128xbf16>
    %48 = vector.shape_cast %47 : vector<1x8x9x128xbf16> to vector<8x9x128xbf16>
    %49 = arith.extf %48 : vector<8x9x128xbf16> to vector<8x9x128xf32>
    %50 = vector.extract_strided_slice %49 {offsets = [0, 0, 0], sizes = [8, 8, 128], strides = [1, 1, 1]} : vector<8x9x128xf32> to vector<8x8x128xf32>
    %c4 = arith.constant 4 : index
    %c0_25 = arith.constant 0 : index
    %51 = vector.load %arg5[%c4, %c0_25] : memref<9x128xf32, #tpu.memory_space<vmem>>, vector<1x128xf32>
    %52 = vector.shape_cast %51 : vector<1x128xf32> to vector<128xf32>
    %53 = vector.shape_cast %52 : vector<128xf32> to vector<1x1x128xf32>
    %54 = vector.broadcast %53 : vector<1x1x128xf32> to vector<8x8x128xf32>
    %55 = arith.mulf %50, %54 : vector<8x8x128xf32>
    %56 = arith.addf %46, %55 : vector<8x8x128xf32>
    %c0_26 = arith.constant 0 : index
    %c1_27 = arith.constant 1 : index
    %c0_28 = arith.constant 0 : index
    %c0_29 = arith.constant 0 : index
    %57 = vector.load %arg1[%c0_26, %c1_27, %c0_28, %c0_29] : memref<1x9x9x128xbf16, #tpu.memory_space<vmem>>, vector<1x8x9x128xbf16>
    %58 = vector.shape_cast %57 : vector<1x8x9x128xbf16> to vector<8x9x128xbf16>
    %59 = arith.extf %58 : vector<8x9x128xbf16> to vector<8x9x128xf32>
    %60 = vector.extract_strided_slice %59 {offsets = [0, 0, 0], sizes = [8, 8, 128], strides = [1, 1, 1]} : vector<8x9x128xf32> to vector<8x8x128xf32>
    %c6 = arith.constant 6 : index
    %c0_30 = arith.constant 0 : index
    %61 = vector.load %arg5[%c6, %c0_30] : memref<9x128xf32, #tpu.memory_space<vmem>>, vector<1x128xf32>
    %62 = vector.shape_cast %61 : vector<1x128xf32> to vector<128xf32>
    %63 = vector.shape_cast %62 : vector<128xf32> to vector<1x1x128xf32>
    %64 = vector.broadcast %63 : vector<1x1x128xf32> to vector<8x8x128xf32>
    %65 = arith.mulf %60, %64 : vector<8x8x128xf32>
    %66 = arith.addf %56, %65 : vector<8x8x128xf32>
    %67 = vector.extract_strided_slice %59 {offsets = [0, 1, 0], sizes = [8, 8, 128], strides = [1, 1, 1]} : vector<8x9x128xf32> to vector<8x8x128xf32>
    %c8 = arith.constant 8 : index
    %c0_31 = arith.constant 0 : index
    %68 = vector.load %arg5[%c8, %c0_31] : memref<9x128xf32, #tpu.memory_space<vmem>>, vector<1x128xf32>
    %69 = vector.shape_cast %68 : vector<1x128xf32> to vector<128xf32>
    %70 = vector.shape_cast %69 : vector<128xf32> to vector<1x1x128xf32>
    %71 = vector.broadcast %70 : vector<1x1x128xf32> to vector<8x8x128xf32>
    %72 = arith.mulf %67, %71 : vector<8x8x128xf32>
    %73 = arith.addf %66, %72 : vector<8x8x128xf32>
    %c0_32 = arith.constant 0 : index
    %c1_33 = arith.constant 1 : index
    %c0_34 = arith.constant 0 : index
    %c0_35 = arith.constant 0 : index
    %74 = vector.load %arg2[%c0_32, %c1_33, %c0_34, %c0_35] : memref<1x9x9x128xbf16, #tpu.memory_space<vmem>>, vector<1x8x9x128xbf16>
    %75 = vector.shape_cast %74 : vector<1x8x9x128xbf16> to vector<8x9x128xbf16>
    %76 = arith.extf %75 : vector<8x9x128xbf16> to vector<8x9x128xf32>
    %77 = vector.extract_strided_slice %76 {offsets = [0, 0, 0], sizes = [8, 8, 128], strides = [1, 1, 1]} : vector<8x9x128xf32> to vector<8x8x128xf32>
    %c7 = arith.constant 7 : index
    %c0_36 = arith.constant 0 : index
    %78 = vector.load %arg5[%c7, %c0_36] : memref<9x128xf32, #tpu.memory_space<vmem>>, vector<1x128xf32>
    %79 = vector.shape_cast %78 : vector<1x128xf32> to vector<128xf32>
    %80 = vector.shape_cast %79 : vector<128xf32> to vector<1x1x128xf32>
    %81 = vector.broadcast %80 : vector<1x1x128xf32> to vector<8x8x128xf32>
    %82 = arith.mulf %77, %81 : vector<8x8x128xf32>
    %83 = arith.addf %73, %82 : vector<8x8x128xf32>
    %84 = vector.shape_cast %0 : vector<1x128xf32> to vector<1x1x128xf32>
    %85 = vector.broadcast %84 : vector<1x1x128xf32> to vector<8x8x128xf32>
    %86 = arith.mulf %83, %85 : vector<8x8x128xf32>
    %87 = vector.shape_cast %1 : vector<1x128xf32> to vector<1x1x128xf32>
    %88 = vector.broadcast %87 : vector<1x1x128xf32> to vector<8x8x128xf32>
    %89 = arith.addf %86, %88 : vector<8x8x128xf32>
    %cst_37 = arith.constant 0.000000e+00 : f32
    %90 = vector.broadcast %cst_37 : f32 to vector<8x8x128xf32>
    %91 = arith.maximumf %89, %90 : vector<8x8x128xf32>
    %92 = arith.truncf %91 : vector<8x8x128xf32> to vector<8x8x128xbf16>
    %c0_38 = arith.constant 0 : index
    %c0_39 = arith.constant 0 : index
    %c0_40 = arith.constant 0 : index
    %c0_41 = arith.constant 0 : index
    %93 = vector.load %arg8[%c0_38, %c0_39, %c0_40, %c0_41] : memref<1x8x8x128xbf16, #tpu.memory_space<vmem>>, vector<1x8x8x128xbf16>
    %94 = vector.shape_cast %93 : vector<1x8x8x128xbf16> to vector<8x8x128xbf16>
    %95 = vector.shape_cast %92 : vector<8x8x128xbf16> to vector<1x8x8x128xbf16>
    tpu.vector_store %arg8[%c0_38, %c0_39, %c0_40, %c0_41], %95 {strides = array<i32>} : memref<1x8x8x128xbf16, #tpu.memory_space<vmem>>, vector<1x8x8x128xbf16>,
    return
  }
  func.func @transform_0(%arg0: i32) -> (i32, i32, i32, i32) {
    %c0_i32 = arith.constant 0 : i32
    %c0_i32_0 = arith.constant 0 : i32
    %c0_i32_1 = arith.constant 0 : i32
    %c0_i32_2 = arith.constant 0 : i32
    return %arg0, %c0_i32, %c0_i32_0, %c0_i32_1 : i32, i32, i32, i32
  }
  func.func @transform_1(%arg0: i32) -> (i32, i32, i32, i32) {
    %c0_i32 = arith.constant 0 : i32
    %c0_i32_0 = arith.constant 0 : i32
    %c0_i32_1 = arith.constant 0 : i32
    %c0_i32_2 = arith.constant 0 : i32
    return %arg0, %c0_i32, %c0_i32_0, %c0_i32_1 : i32, i32, i32, i32
  }
  func.func @transform_2(%arg0: i32) -> (i32, i32, i32, i32) {
    %c0_i32 = arith.constant 0 : i32
    %c0_i32_0 = arith.constant 0 : i32
    %c0_i32_1 = arith.constant 0 : i32
    %c0_i32_2 = arith.constant 0 : i32
    return %arg0, %c0_i32, %c0_i32_0, %c0_i32_1 : i32, i32, i32, i32
  }
  func.func @transform_3(%arg0: i32) -> (i32, i32, i32, i32) {
    %c0_i32 = arith.constant 0 : i32
    %c0_i32_0 = arith.constant 0 : i32
    %c0_i32_1 = arith.constant 0 : i32
    %c0_i32_2 = arith.constant 0 : i32
    return %arg0, %c0_i32, %c0_i32_0, %c0_i32_1 : i32, i32, i32, i32
  }
  func.func @transform_4(%arg0: i32) -> (i32, i32) {
    %c0_i32 = arith.constant 0 : i32
    %c0_i32_0 = arith.constant 0 : i32
    %c0_i32_1 = arith.constant 0 : i32
    return %c0_i32, %c0_i32_0 : i32, i32
  }
  func.func @transform_5(%arg0: i32) -> (i32, i32) {
    %c0_i32 = arith.constant 0 : i32
    %c0_i32_0 = arith.constant 0 : i32
    %c0_i32_1 = arith.constant 0 : i32
    return %c0_i32, %c0_i32_0 : i32, i32
  }
  func.func @transform_6(%arg0: i32) -> (i32, i32) {
    %c0_i32 = arith.constant 0 : i32
    %c0_i32_0 = arith.constant 0 : i32
    %c0_i32_1 = arith.constant 0 : i32
    return %c0_i32, %c0_i32_0 : i32, i32
  }
  func.func @transform_7(%arg0: i32) -> (i32, i32, i32, i32) {
    %c0_i32 = arith.constant 0 : i32
    %c0_i32_0 = arith.constant 0 : i32
    %c0_i32_1 = arith.constant 0 : i32
    %c0_i32_2 = arith.constant 0 : i32
    return %arg0, %c0_i32, %c0_i32_0, %c0_i32_1 : i32, i32, i32, i32
  }
}

module attributes {stable_mosaic.version = 11 : i64} {
  func.func @_mm_kernel(%arg0: i32, %arg1: memref<64x128xbf16, #tpu.memory_space<vmem>>, %arg2: memref<128x128xbf16, #tpu.memory_space<vmem>>, %arg3: memref<1x128xf32, #tpu.memory_space<vmem>>, %arg4: memref<1x128xf32, #tpu.memory_space<vmem>>, %arg5: memref<64x128xbf16, #tpu.memory_space<vmem>>) attributes {dimension_semantics = [#tpu.dimension_semantics<parallel>], iteration_bounds = array<i64: 2>, scalar_prefetch = 0 : i64, scratch_operands = 0 : i64, tpu.core_type = #tpu.core_type<tc>, window_params = [{transform_indices = @transform_0, window_bounds = array<i64: 64, 128>}, {pipeline_mode = #tpu.pipeline_mode<synchronous>, transform_indices = @transform_1, window_bounds = array<i64: 128, 128>}, {pipeline_mode = #tpu.pipeline_mode<synchronous>, transform_indices = @transform_2, window_bounds = array<i64: 1, 128>}, {pipeline_mode = #tpu.pipeline_mode<synchronous>, transform_indices = @transform_3, window_bounds = array<i64: 1, 128>}, {transform_indices = @transform_4, window_bounds = array<i64: 64, 128>}]} {
    %c0 = arith.constant 0 : index
    %c0_0 = arith.constant 0 : index
    %0 = vector.load %arg1[%c0, %c0_0] : memref<64x128xbf16, #tpu.memory_space<vmem>>, vector<64x128xbf16>
    %c0_1 = arith.constant 0 : index
    %c0_2 = arith.constant 0 : index
    %1 = vector.load %arg2[%c0_1, %c0_2] : memref<128x128xbf16, #tpu.memory_space<vmem>>, vector<128x128xbf16>
    %cst = arith.constant dense<0.000000e+00> : vector<64x128xf32>
    %2 = tpu.matmul %0, %1, %cst {dimension_numbers = #tpu.dot_dimension_numbers<[1], [0], [0], [1], [0, 0, 1, 1], [], []>} : vector<64x128xbf16>, vector<128x128xbf16>, vector<64x128xf32> -> vector<64x128xf32>
    %c0_3 = arith.constant 0 : index
    %c0_4 = arith.constant 0 : index
    %3 = vector.load %arg3[%c0_3, %c0_4] : memref<1x128xf32, #tpu.memory_space<vmem>>, vector<1x128xf32>
    %4 = vector.broadcast %3 : vector<1x128xf32> to vector<64x128xf32>
    %5 = arith.mulf %2, %4 : vector<64x128xf32>
    %c0_5 = arith.constant 0 : index
    %c0_6 = arith.constant 0 : index
    %6 = vector.load %arg4[%c0_5, %c0_6] : memref<1x128xf32, #tpu.memory_space<vmem>>, vector<1x128xf32>
    %7 = vector.broadcast %6 : vector<1x128xf32> to vector<64x128xf32>
    %8 = arith.addf %5, %7 : vector<64x128xf32>
    %9 = arith.truncf %8 : vector<64x128xf32> to vector<64x128xbf16>
    %c0_7 = arith.constant 0 : index
    %c0_8 = arith.constant 0 : index
    %10 = vector.load %arg5[%c0_7, %c0_8] : memref<64x128xbf16, #tpu.memory_space<vmem>>, vector<64x128xbf16>
    tpu.vector_store %arg5[%c0_7, %c0_8], %9 {strides = array<i32>} : memref<64x128xbf16, #tpu.memory_space<vmem>>, vector<64x128xbf16>,
    return
  }
  func.func @transform_0(%arg0: i32) -> (i32, i32) {
    %c0_i32 = arith.constant 0 : i32
    %c0_i32_0 = arith.constant 0 : i32
    return %arg0, %c0_i32 : i32, i32
  }
  func.func @transform_1(%arg0: i32) -> (i32, i32) {
    %c0_i32 = arith.constant 0 : i32
    %c0_i32_0 = arith.constant 0 : i32
    %c0_i32_1 = arith.constant 0 : i32
    return %c0_i32, %c0_i32_0 : i32, i32
  }
  func.func @transform_2(%arg0: i32) -> (i32, i32) {
    %c0_i32 = arith.constant 0 : i32
    %c0_i32_0 = arith.constant 0 : i32
    %c0_i32_1 = arith.constant 0 : i32
    return %c0_i32, %c0_i32_0 : i32, i32
  }
  func.func @transform_3(%arg0: i32) -> (i32, i32) {
    %c0_i32 = arith.constant 0 : i32
    %c0_i32_0 = arith.constant 0 : i32
    %c0_i32_1 = arith.constant 0 : i32
    return %c0_i32, %c0_i32_0 : i32, i32
  }
  func.func @transform_4(%arg0: i32) -> (i32, i32) {
    %c0_i32 = arith.constant 0 : i32
    %c0_i32_0 = arith.constant 0 : i32
    return %arg0, %c0_i32 : i32, i32
  }
}

module attributes {stable_mosaic.version = 11 : i64} {
  func.func @_mm_kernel(%arg0: i32, %arg1: memref<64x128xbf16, #tpu.memory_space<vmem>>, %arg2: memref<128x128xbf16, #tpu.memory_space<vmem>>, %arg3: memref<1x128xf32, #tpu.memory_space<vmem>>, %arg4: memref<1x128xf32, #tpu.memory_space<vmem>>, %arg5: memref<64x128xbf16, #tpu.memory_space<vmem>>) attributes {dimension_semantics = [#tpu.dimension_semantics<parallel>], iteration_bounds = array<i64: 2>, scalar_prefetch = 0 : i64, scratch_operands = 0 : i64, tpu.core_type = #tpu.core_type<tc>, window_params = [{transform_indices = @transform_0, window_bounds = array<i64: 64, 128>}, {pipeline_mode = #tpu.pipeline_mode<synchronous>, transform_indices = @transform_1, window_bounds = array<i64: 128, 128>}, {pipeline_mode = #tpu.pipeline_mode<synchronous>, transform_indices = @transform_2, window_bounds = array<i64: 1, 128>}, {pipeline_mode = #tpu.pipeline_mode<synchronous>, transform_indices = @transform_3, window_bounds = array<i64: 1, 128>}, {transform_indices = @transform_4, window_bounds = array<i64: 64, 128>}]} {
    %c0 = arith.constant 0 : index
    %c0_0 = arith.constant 0 : index
    %0 = vector.load %arg1[%c0, %c0_0] : memref<64x128xbf16, #tpu.memory_space<vmem>>, vector<64x128xbf16>
    %c0_1 = arith.constant 0 : index
    %c0_2 = arith.constant 0 : index
    %1 = vector.load %arg2[%c0_1, %c0_2] : memref<128x128xbf16, #tpu.memory_space<vmem>>, vector<128x128xbf16>
    %cst = arith.constant dense<0.000000e+00> : vector<64x128xf32>
    %2 = tpu.matmul %0, %1, %cst {dimension_numbers = #tpu.dot_dimension_numbers<[1], [0], [0], [1], [0, 0, 1, 1], [], []>} : vector<64x128xbf16>, vector<128x128xbf16>, vector<64x128xf32> -> vector<64x128xf32>
    %c0_3 = arith.constant 0 : index
    %c0_4 = arith.constant 0 : index
    %3 = vector.load %arg3[%c0_3, %c0_4] : memref<1x128xf32, #tpu.memory_space<vmem>>, vector<1x128xf32>
    %4 = vector.broadcast %3 : vector<1x128xf32> to vector<64x128xf32>
    %5 = arith.mulf %2, %4 : vector<64x128xf32>
    %c0_5 = arith.constant 0 : index
    %c0_6 = arith.constant 0 : index
    %6 = vector.load %arg4[%c0_5, %c0_6] : memref<1x128xf32, #tpu.memory_space<vmem>>, vector<1x128xf32>
    %7 = vector.broadcast %6 : vector<1x128xf32> to vector<64x128xf32>
    %8 = arith.addf %5, %7 : vector<64x128xf32>
    %cst_7 = arith.constant 0.000000e+00 : f32
    %9 = vector.broadcast %cst_7 : f32 to vector<64x128xf32>
    %10 = arith.maximumf %8, %9 : vector<64x128xf32>
    %11 = arith.truncf %10 : vector<64x128xf32> to vector<64x128xbf16>
    %c0_8 = arith.constant 0 : index
    %c0_9 = arith.constant 0 : index
    %12 = vector.load %arg5[%c0_8, %c0_9] : memref<64x128xbf16, #tpu.memory_space<vmem>>, vector<64x128xbf16>
    tpu.vector_store %arg5[%c0_8, %c0_9], %11 {strides = array<i32>} : memref<64x128xbf16, #tpu.memory_space<vmem>>, vector<64x128xbf16>,
    return
  }
  func.func @transform_0(%arg0: i32) -> (i32, i32) {
    %c0_i32 = arith.constant 0 : i32
    %c0_i32_0 = arith.constant 0 : i32
    return %arg0, %c0_i32 : i32, i32
  }
  func.func @transform_1(%arg0: i32) -> (i32, i32) {
    %c0_i32 = arith.constant 0 : i32
    %c0_i32_0 = arith.constant 0 : i32
    %c0_i32_1 = arith.constant 0 : i32
    return %c0_i32, %c0_i32_0 : i32, i32
  }
  func.func @transform_2(%arg0: i32) -> (i32, i32) {
    %c0_i32 = arith.constant 0 : i32
    %c0_i32_0 = arith.constant 0 : i32
    %c0_i32_1 = arith.constant 0 : i32
    return %c0_i32, %c0_i32_0 : i32, i32
  }
  func.func @transform_3(%arg0: i32) -> (i32, i32) {
    %c0_i32 = arith.constant 0 : i32
    %c0_i32_0 = arith.constant 0 : i32
    %c0_i32_1 = arith.constant 0 : i32
    return %c0_i32, %c0_i32_0 : i32, i32
  }
  func.func @transform_4(%arg0: i32) -> (i32, i32) {
    %c0_i32 = arith.constant 0 : i32
    %c0_i32_0 = arith.constant 0 : i32
    return %arg0, %c0_i32 : i32, i32
  }
}

module attributes {stable_mosaic.version = 11 : i64} {
  func.func @_dw_kernel(%arg0: i32, %arg1: memref<1x8x8x128xbf16, #tpu.memory_space<vmem>>, %arg2: memref<9x128xf32, #tpu.memory_space<vmem>>, %arg3: memref<1x128xf32, #tpu.memory_space<vmem>>, %arg4: memref<1x128xf32, #tpu.memory_space<vmem>>, %arg5: memref<1x8x8x128xbf16, #tpu.memory_space<vmem>>, %arg6: memref<10x10x128xbf16, #tpu.memory_space<vmem>>) attributes {dimension_semantics = [#tpu.dimension_semantics<parallel>], iteration_bounds = array<i64: 2>, scalar_prefetch = 0 : i64, scratch_operands = 1 : i64, tpu.core_type = #tpu.core_type<tc>, window_params = [{transform_indices = @transform_0, window_bounds = array<i64: 1, 8, 8, 128>}, {pipeline_mode = #tpu.pipeline_mode<synchronous>, transform_indices = @transform_1, window_bounds = array<i64: 9, 128>}, {pipeline_mode = #tpu.pipeline_mode<synchronous>, transform_indices = @transform_2, window_bounds = array<i64: 1, 128>}, {pipeline_mode = #tpu.pipeline_mode<synchronous>, transform_indices = @transform_3, window_bounds = array<i64: 1, 128>}, {transform_indices = @transform_4, window_bounds = array<i64: 1, 8, 8, 128>}]} {
    %cst = arith.constant 0.000000e+00 : bf16
    %0 = vector.broadcast %cst : bf16 to vector<1x10x128xbf16>
    %c0 = arith.constant 0 : index
    %c0_0 = arith.constant 0 : index
    %c0_1 = arith.constant 0 : index
    %1 = vector.load %arg6[%c0, %c0_0, %c0_1] : memref<10x10x128xbf16, #tpu.memory_space<vmem>>, vector<1x10x128xbf16>
    tpu.vector_store %arg6[%c0, %c0_0, %c0_1], %0 {strides = array<i32>} : memref<10x10x128xbf16, #tpu.memory_space<vmem>>, vector<1x10x128xbf16>,
    %cst_2 = arith.constant 0.000000e+00 : bf16
    %2 = vector.broadcast %cst_2 : bf16 to vector<1x10x128xbf16>
    %c9 = arith.constant 9 : index
    %c0_3 = arith.constant 0 : index
    %c0_4 = arith.constant 0 : index
    %3 = vector.load %arg6[%c9, %c0_3, %c0_4] : memref<10x10x128xbf16, #tpu.memory_space<vmem>>, vector<1x10x128xbf16>
    tpu.vector_store %arg6[%c9, %c0_3, %c0_4], %2 {strides = array<i32>} : memref<10x10x128xbf16, #tpu.memory_space<vmem>>, vector<1x10x128xbf16>,
    %cst_5 = arith.constant 0.000000e+00 : bf16
    %4 = vector.broadcast %cst_5 : bf16 to vector<8x1x128xbf16>
    %c1 = arith.constant 1 : index
    %c0_6 = arith.constant 0 : index
    %c0_7 = arith.constant 0 : index
    %5 = vector.load %arg6[%c1, %c0_6, %c0_7] : memref<10x10x128xbf16, #tpu.memory_space<vmem>>, vector<8x1x128xbf16>
    tpu.vector_store %arg6[%c1, %c0_6, %c0_7], %4 {strides = array<i32>} : memref<10x10x128xbf16, #tpu.memory_space<vmem>>, vector<8x1x128xbf16>,
    %cst_8 = arith.constant 0.000000e+00 : bf16
    %6 = vector.broadcast %cst_8 : bf16 to vector<8x1x128xbf16>
    %c1_9 = arith.constant 1 : index
    %c9_10 = arith.constant 9 : index
    %c0_11 = arith.constant 0 : index
    %7 = vector.load %arg6[%c1_9, %c9_10, %c0_11] : memref<10x10x128xbf16, #tpu.memory_space<vmem>>, vector<8x1x128xbf16>
    tpu.vector_store %arg6[%c1_9, %c9_10, %c0_11], %6 {strides = array<i32>} : memref<10x10x128xbf16, #tpu.memory_space<vmem>>, vector<8x1x128xbf16>,
    %c0_12 = arith.constant 0 : index
    %c0_13 = arith.constant 0 : index
    %c0_14 = arith.constant 0 : index
    %c0_15 = arith.constant 0 : index
    %8 = vector.load %arg1[%c0_12, %c0_13, %c0_14, %c0_15] : memref<1x8x8x128xbf16, #tpu.memory_space<vmem>>, vector<1x8x8x128xbf16>
    %9 = vector.shape_cast %8 : vector<1x8x8x128xbf16> to vector<8x8x128xbf16>
    %c1_16 = arith.constant 1 : index
    %c1_17 = arith.constant 1 : index
    %c0_18 = arith.constant 0 : index
    %10 = vector.load %arg6[%c1_16, %c1_17, %c0_18] : memref<10x10x128xbf16, #tpu.memory_space<vmem>>, vector<8x8x128xbf16>
    tpu.vector_store %arg6[%c1_16, %c1_17, %c0_18], %9 {strides = array<i32>} : memref<10x10x128xbf16, #tpu.memory_space<vmem>>, vector<8x8x128xbf16>,
    %c0_19 = arith.constant 0 : index
    %c0_20 = arith.constant 0 : index
    %11 = vector.load %arg3[%c0_19, %c0_20] : memref<1x128xf32, #tpu.memory_space<vmem>>, vector<1x128xf32>
    %c0_21 = arith.constant 0 : index
    %c0_22 = arith.constant 0 : index
    %12 = vector.load %arg4[%c0_21, %c0_22] : memref<1x128xf32, #tpu.memory_space<vmem>>, vector<1x128xf32>
    %cst_23 = arith.constant 0.000000e+00 : f32
    %13 = vector.broadcast %cst_23 : f32 to vector<8x8x128xf32>
    %c0_24 = arith.constant 0 : index
    %c0_25 = arith.constant 0 : index
    %c0_26 = arith.constant 0 : index
    %14 = vector.load %arg6[%c0_24, %c0_25, %c0_26] : memref<10x10x128xbf16, #tpu.memory_space<vmem>>, vector<8x10x128xbf16>
    %15 = arith.extf %14 : vector<8x10x128xbf16> to vector<8x10x128xf32>
    %16 = vector.extract_strided_slice %15 {offsets = [0, 0, 0], sizes = [8, 8, 128], strides = [1, 1, 1]} : vector<8x10x128xf32> to vector<8x8x128xf32>
    %c0_27 = arith.constant 0 : index
    %c0_28 = arith.constant 0 : index
    %17 = vector.load %arg2[%c0_27, %c0_28] : memref<9x128xf32, #tpu.memory_space<vmem>>, vector<1x128xf32>
    %18 = vector.shape_cast %17 : vector<1x128xf32> to vector<128xf32>
    %19 = vector.shape_cast %18 : vector<128xf32> to vector<1x1x128xf32>
    %20 = vector.broadcast %19 : vector<1x1x128xf32> to vector<8x8x128xf32>
    %21 = arith.mulf %16, %20 : vector<8x8x128xf32>
    %22 = arith.addf %13, %21 : vector<8x8x128xf32>
    %23 = vector.extract_strided_slice %15 {offsets = [0, 1, 0], sizes = [8, 8, 128], strides = [1, 1, 1]} : vector<8x10x128xf32> to vector<8x8x128xf32>
    %c1_29 = arith.constant 1 : index
    %c0_30 = arith.constant 0 : index
    %24 = vector.load %arg2[%c1_29, %c0_30] : memref<9x128xf32, #tpu.memory_space<vmem>>, vector<1x128xf32>
    %25 = vector.shape_cast %24 : vector<1x128xf32> to vector<128xf32>
    %26 = vector.shape_cast %25 : vector<128xf32> to vector<1x1x128xf32>
    %27 = vector.broadcast %26 : vector<1x1x128xf32> to vector<8x8x128xf32>
    %28 = arith.mulf %23, %27 : vector<8x8x128xf32>
    %29 = arith.addf %22, %28 : vector<8x8x128xf32>
    %30 = vector.extract_strided_slice %15 {offsets = [0, 2, 0], sizes = [8, 8, 128], strides = [1, 1, 1]} : vector<8x10x128xf32> to vector<8x8x128xf32>
    %c2 = arith.constant 2 : index
    %c0_31 = arith.constant 0 : index
    %31 = vector.load %arg2[%c2, %c0_31] : memref<9x128xf32, #tpu.memory_space<vmem>>, vector<1x128xf32>
    %32 = vector.shape_cast %31 : vector<1x128xf32> to vector<128xf32>
    %33 = vector.shape_cast %32 : vector<128xf32> to vector<1x1x128xf32>
    %34 = vector.broadcast %33 : vector<1x1x128xf32> to vector<8x8x128xf32>
    %35 = arith.mulf %30, %34 : vector<8x8x128xf32>
    %36 = arith.addf %29, %35 : vector<8x8x128xf32>
    %c1_32 = arith.constant 1 : index
    %c0_33 = arith.constant 0 : index
    %c0_34 = arith.constant 0 : index
    %37 = vector.load %arg6[%c1_32, %c0_33, %c0_34] : memref<10x10x128xbf16, #tpu.memory_space<vmem>>, vector<8x10x128xbf16>
    %38 = arith.extf %37 : vector<8x10x128xbf16> to vector<8x10x128xf32>
    %39 = vector.extract_strided_slice %38 {offsets = [0, 0, 0], sizes = [8, 8, 128], strides = [1, 1, 1]} : vector<8x10x128xf32> to vector<8x8x128xf32>
    %c3 = arith.constant 3 : index
    %c0_35 = arith.constant 0 : index
    %40 = vector.load %arg2[%c3, %c0_35] : memref<9x128xf32, #tpu.memory_space<vmem>>, vector<1x128xf32>
    %41 = vector.shape_cast %40 : vector<1x128xf32> to vector<128xf32>
    %42 = vector.shape_cast %41 : vector<128xf32> to vector<1x1x128xf32>
    %43 = vector.broadcast %42 : vector<1x1x128xf32> to vector<8x8x128xf32>
    %44 = arith.mulf %39, %43 : vector<8x8x128xf32>
    %45 = arith.addf %36, %44 : vector<8x8x128xf32>
    %46 = vector.extract_strided_slice %38 {offsets = [0, 1, 0], sizes = [8, 8, 128], strides = [1, 1, 1]} : vector<8x10x128xf32> to vector<8x8x128xf32>
    %c4 = arith.constant 4 : index
    %c0_36 = arith.constant 0 : index
    %47 = vector.load %arg2[%c4, %c0_36] : memref<9x128xf32, #tpu.memory_space<vmem>>, vector<1x128xf32>
    %48 = vector.shape_cast %47 : vector<1x128xf32> to vector<128xf32>
    %49 = vector.shape_cast %48 : vector<128xf32> to vector<1x1x128xf32>
    %50 = vector.broadcast %49 : vector<1x1x128xf32> to vector<8x8x128xf32>
    %51 = arith.mulf %46, %50 : vector<8x8x128xf32>
    %52 = arith.addf %45, %51 : vector<8x8x128xf32>
    %53 = vector.extract_strided_slice %38 {offsets = [0, 2, 0], sizes = [8, 8, 128], strides = [1, 1, 1]} : vector<8x10x128xf32> to vector<8x8x128xf32>
    %c5 = arith.constant 5 : index
    %c0_37 = arith.constant 0 : index
    %54 = vector.load %arg2[%c5, %c0_37] : memref<9x128xf32, #tpu.memory_space<vmem>>, vector<1x128xf32>
    %55 = vector.shape_cast %54 : vector<1x128xf32> to vector<128xf32>
    %56 = vector.shape_cast %55 : vector<128xf32> to vector<1x1x128xf32>
    %57 = vector.broadcast %56 : vector<1x1x128xf32> to vector<8x8x128xf32>
    %58 = arith.mulf %53, %57 : vector<8x8x128xf32>
    %59 = arith.addf %52, %58 : vector<8x8x128xf32>
    %c2_38 = arith.constant 2 : index
    %c0_39 = arith.constant 0 : index
    %c0_40 = arith.constant 0 : index
    %60 = vector.load %arg6[%c2_38, %c0_39, %c0_40] : memref<10x10x128xbf16, #tpu.memory_space<vmem>>, vector<8x10x128xbf16>
    %61 = arith.extf %60 : vector<8x10x128xbf16> to vector<8x10x128xf32>
    %62 = vector.extract_strided_slice %61 {offsets = [0, 0, 0], sizes = [8, 8, 128], strides = [1, 1, 1]} : vector<8x10x128xf32> to vector<8x8x128xf32>
    %c6 = arith.constant 6 : index
    %c0_41 = arith.constant 0 : index
    %63 = vector.load %arg2[%c6, %c0_41] : memref<9x128xf32, #tpu.memory_space<vmem>>, vector<1x128xf32>
    %64 = vector.shape_cast %63 : vector<1x128xf32> to vector<128xf32>
    %65 = vector.shape_cast %64 : vector<128xf32> to vector<1x1x128xf32>
    %66 = vector.broadcast %65 : vector<1x1x128xf32> to vector<8x8x128xf32>
    %67 = arith.mulf %62, %66 : vector<8x8x128xf32>
    %68 = arith.addf %59, %67 : vector<8x8x128xf32>
    %69 = vector.extract_strided_slice %61 {offsets = [0, 1, 0], sizes = [8, 8, 128], strides = [1, 1, 1]} : vector<8x10x128xf32> to vector<8x8x128xf32>
    %c7 = arith.constant 7 : index
    %c0_42 = arith.constant 0 : index
    %70 = vector.load %arg2[%c7, %c0_42] : memref<9x128xf32, #tpu.memory_space<vmem>>, vector<1x128xf32>
    %71 = vector.shape_cast %70 : vector<1x128xf32> to vector<128xf32>
    %72 = vector.shape_cast %71 : vector<128xf32> to vector<1x1x128xf32>
    %73 = vector.broadcast %72 : vector<1x1x128xf32> to vector<8x8x128xf32>
    %74 = arith.mulf %69, %73 : vector<8x8x128xf32>
    %75 = arith.addf %68, %74 : vector<8x8x128xf32>
    %76 = vector.extract_strided_slice %61 {offsets = [0, 2, 0], sizes = [8, 8, 128], strides = [1, 1, 1]} : vector<8x10x128xf32> to vector<8x8x128xf32>
    %c8 = arith.constant 8 : index
    %c0_43 = arith.constant 0 : index
    %77 = vector.load %arg2[%c8, %c0_43] : memref<9x128xf32, #tpu.memory_space<vmem>>, vector<1x128xf32>
    %78 = vector.shape_cast %77 : vector<1x128xf32> to vector<128xf32>
    %79 = vector.shape_cast %78 : vector<128xf32> to vector<1x1x128xf32>
    %80 = vector.broadcast %79 : vector<1x1x128xf32> to vector<8x8x128xf32>
    %81 = arith.mulf %76, %80 : vector<8x8x128xf32>
    %82 = arith.addf %75, %81 : vector<8x8x128xf32>
    %83 = vector.shape_cast %11 : vector<1x128xf32> to vector<1x1x128xf32>
    %84 = vector.broadcast %83 : vector<1x1x128xf32> to vector<8x8x128xf32>
    %85 = arith.mulf %82, %84 : vector<8x8x128xf32>
    %86 = vector.shape_cast %12 : vector<1x128xf32> to vector<1x1x128xf32>
    %87 = vector.broadcast %86 : vector<1x1x128xf32> to vector<8x8x128xf32>
    %88 = arith.addf %85, %87 : vector<8x8x128xf32>
    %cst_44 = arith.constant 0.000000e+00 : f32
    %89 = vector.broadcast %cst_44 : f32 to vector<8x8x128xf32>
    %90 = arith.maximumf %88, %89 : vector<8x8x128xf32>
    %91 = arith.truncf %90 : vector<8x8x128xf32> to vector<8x8x128xbf16>
    %c0_45 = arith.constant 0 : index
    %c0_46 = arith.constant 0 : index
    %c0_47 = arith.constant 0 : index
    %c0_48 = arith.constant 0 : index
    %92 = vector.load %arg5[%c0_45, %c0_46, %c0_47, %c0_48] : memref<1x8x8x128xbf16, #tpu.memory_space<vmem>>, vector<1x8x8x128xbf16>
    %93 = vector.shape_cast %92 : vector<1x8x8x128xbf16> to vector<8x8x128xbf16>
    %94 = vector.shape_cast %91 : vector<8x8x128xbf16> to vector<1x8x8x128xbf16>
    tpu.vector_store %arg5[%c0_45, %c0_46, %c0_47, %c0_48], %94 {strides = array<i32>} : memref<1x8x8x128xbf16, #tpu.memory_space<vmem>>, vector<1x8x8x128xbf16>,
    return
  }
  func.func @transform_0(%arg0: i32) -> (i32, i32, i32, i32) {
    %c0_i32 = arith.constant 0 : i32
    %c0_i32_0 = arith.constant 0 : i32
    %c0_i32_1 = arith.constant 0 : i32
    %c0_i32_2 = arith.constant 0 : i32
    return %arg0, %c0_i32, %c0_i32_0, %c0_i32_1 : i32, i32, i32, i32
  }
  func.func @transform_1(%arg0: i32) -> (i32, i32) {
    %c0_i32 = arith.constant 0 : i32
    %c0_i32_0 = arith.constant 0 : i32
    %c0_i32_1 = arith.constant 0 : i32
    return %c0_i32, %c0_i32_0 : i32, i32
  }
  func.func @transform_2(%arg0: i32) -> (i32, i32) {
    %c0_i32 = arith.constant 0 : i32
    %c0_i32_0 = arith.constant 0 : i32
    %c0_i32_1 = arith.constant 0 : i32
    return %c0_i32, %c0_i32_0 : i32, i32
  }
  func.func @transform_3(%arg0: i32) -> (i32, i32) {
    %c0_i32 = arith.constant 0 : i32
    %c0_i32_0 = arith.constant 0 : i32
    %c0_i32_1 = arith.constant 0 : i32
    return %c0_i32, %c0_i32_0 : i32, i32
  }
  func.func @transform_4(%arg0: i32) -> (i32, i32, i32, i32) {
    %c0_i32 = arith.constant 0 : i32
    %c0_i32_0 = arith.constant 0 : i32
    %c0_i32_1 = arith.constant 0 : i32
    %c0_i32_2 = arith.constant 0 : i32
    return %arg0, %c0_i32, %c0_i32_0, %c0_i32_1 : i32, i32, i32, i32
  }
}

module attributes {stable_mosaic.version = 11 : i64} {
  func.func @_mm_kernel(%arg0: i32, %arg1: memref<64x128xbf16, #tpu.memory_space<vmem>>, %arg2: memref<128x128xbf16, #tpu.memory_space<vmem>>, %arg3: memref<1x128xf32, #tpu.memory_space<vmem>>, %arg4: memref<1x128xf32, #tpu.memory_space<vmem>>, %arg5: memref<64x128xbf16, #tpu.memory_space<vmem>>, %arg6: memref<64x128xf32, #tpu.memory_space<vmem>>) attributes {dimension_semantics = [#tpu.dimension_semantics<parallel>], iteration_bounds = array<i64: 2>, scalar_prefetch = 0 : i64, scratch_operands = 0 : i64, tpu.core_type = #tpu.core_type<tc>, window_params = [{transform_indices = @transform_0, window_bounds = array<i64: 64, 128>}, {pipeline_mode = #tpu.pipeline_mode<synchronous>, transform_indices = @transform_1, window_bounds = array<i64: 128, 128>}, {pipeline_mode = #tpu.pipeline_mode<synchronous>, transform_indices = @transform_2, window_bounds = array<i64: 1, 128>}, {pipeline_mode = #tpu.pipeline_mode<synchronous>, transform_indices = @transform_3, window_bounds = array<i64: 1, 128>}, {transform_indices = @transform_4, window_bounds = array<i64: 64, 128>}, {transform_indices = @transform_5, window_bounds = array<i64: 64, 128>}]} {
    %c0 = arith.constant 0 : index
    %c0_0 = arith.constant 0 : index
    %0 = vector.load %arg1[%c0, %c0_0] : memref<64x128xbf16, #tpu.memory_space<vmem>>, vector<64x128xbf16>
    %c0_1 = arith.constant 0 : index
    %c0_2 = arith.constant 0 : index
    %1 = vector.load %arg2[%c0_1, %c0_2] : memref<128x128xbf16, #tpu.memory_space<vmem>>, vector<128x128xbf16>
    %cst = arith.constant dense<0.000000e+00> : vector<64x128xf32>
    %2 = tpu.matmul %0, %1, %cst {dimension_numbers = #tpu.dot_dimension_numbers<[1], [0], [0], [1], [0, 0, 1, 1], [], []>} : vector<64x128xbf16>, vector<128x128xbf16>, vector<64x128xf32> -> vector<64x128xf32>
    %c0_3 = arith.constant 0 : index
    %c0_4 = arith.constant 0 : index
    %3 = vector.load %arg3[%c0_3, %c0_4] : memref<1x128xf32, #tpu.memory_space<vmem>>, vector<1x128xf32>
    %4 = vector.broadcast %3 : vector<1x128xf32> to vector<64x128xf32>
    %5 = arith.mulf %2, %4 : vector<64x128xf32>
    %c0_5 = arith.constant 0 : index
    %c0_6 = arith.constant 0 : index
    %6 = vector.load %arg4[%c0_5, %c0_6] : memref<1x128xf32, #tpu.memory_space<vmem>>, vector<1x128xf32>
    %7 = vector.broadcast %6 : vector<1x128xf32> to vector<64x128xf32>
    %8 = arith.addf %5, %7 : vector<64x128xf32>
    %c0_7 = arith.constant 0 : index
    %c0_8 = arith.constant 0 : index
    %9 = vector.load %arg5[%c0_7, %c0_8] : memref<64x128xbf16, #tpu.memory_space<vmem>>, vector<64x128xbf16>
    %10 = arith.extf %9 : vector<64x128xbf16> to vector<64x128xf32>
    %11 = arith.addf %8, %10 : vector<64x128xf32>
    %c0_9 = arith.constant 0 : index
    %c0_10 = arith.constant 0 : index
    %12 = vector.load %arg6[%c0_9, %c0_10] : memref<64x128xf32, #tpu.memory_space<vmem>>, vector<64x128xf32>
    tpu.vector_store %arg6[%c0_9, %c0_10], %11 {strides = array<i32>} : memref<64x128xf32, #tpu.memory_space<vmem>>, vector<64x128xf32>,
    return
  }
  func.func @transform_0(%arg0: i32) -> (i32, i32) {
    %c0_i32 = arith.constant 0 : i32
    %c0_i32_0 = arith.constant 0 : i32
    return %arg0, %c0_i32 : i32, i32
  }
  func.func @transform_1(%arg0: i32) -> (i32, i32) {
    %c0_i32 = arith.constant 0 : i32
    %c0_i32_0 = arith.constant 0 : i32
    %c0_i32_1 = arith.constant 0 : i32
    return %c0_i32, %c0_i32_0 : i32, i32
  }
  func.func @transform_2(%arg0: i32) -> (i32, i32) {
    %c0_i32 = arith.constant 0 : i32
    %c0_i32_0 = arith.constant 0 : i32
    %c0_i32_1 = arith.constant 0 : i32
    return %c0_i32, %c0_i32_0 : i32, i32
  }
  func.func @transform_3(%arg0: i32) -> (i32, i32) {
    %c0_i32 = arith.constant 0 : i32
    %c0_i32_0 = arith.constant 0 : i32
    %c0_i32_1 = arith.constant 0 : i32
    return %c0_i32, %c0_i32_0 : i32, i32
  }
  func.func @transform_4(%arg0: i32) -> (i32, i32) {
    %c0_i32 = arith.constant 0 : i32
    %c0_i32_0 = arith.constant 0 : i32
    return %arg0, %c0_i32 : i32, i32
  }
  func.func @transform_5(%arg0: i32) -> (i32, i32) {
    %c0_i32 = arith.constant 0 : i32
    %c0_i32_0 = arith.constant 0 : i32
    return %arg0, %c0_i32 : i32, i32
  }
}

</mosaic_0001>

<bundles_post_ra>
// kernel: _lambda_.9
= control target key start
LH: loop header
LB: loop body
LE: loop exit
PB: predicated region body
PF: predicated region fallthrough
CT: control target
= control target key end

     0   :  { %s2240_s15 = smov 0   ;;  %s2596_s0 = inlined_call_operand.vmem [shape: bf16[2048,128], index: 0, kind: input, shape index: {}]   ;;  %s2597_s1 = inlined_call_operand.vmem [shape: bf16[128,128], index: 1, kind: input, shape index: {}]   ;;  %s2598_s2 = inlined_call_operand.vmem [shape: f32[1,128], index: 2, kind: input, shape index: {}]   ;;  %s2599_s3 = inlined_call_operand.vmem [shape: f32[1,128], index: 3, kind: input, shape index: {}]   ;;  %s2600_s4 = inlined_call_operand.vmem [shape: bf16[2048,128], index: 4, kind: output, shape index: {}]  }
   0x1 LB: > { %s1649_s16 = sadd.s32 4294967295, %s2213_s15   ;;  %p1653_p0 = scmp.ge.s32.totalorder %s2213_s15, 1  ;;  %s2213_s15 = sphi %s2240_s15, %s14_s15  }
   0x2   : > { %p163_p1 = scmp.lt.s32.totalorder %s2213_s15, 5 }
   0x4   : > { %p164_p2 = pnand %p1653_p0, %p163_p1 }
   0x5   : > { %s1654_s19 = sshll.u32 (!%p164_p2), %s1649_s16, 6 }
   0x6   : > { %167 = sbr.rel (%p164_p2) target bundleno = 367 (0x16f), region = 36  ;;  %p190_p3 = scmp.lt.s32.totalorder (!%p164_p2), %s1654_s19, 255 }
   0xb   : > { %v2165_v0 = vld [vmem:[%s2597_s1 + $0x38] sm:$0xff]   ;;  %v2166_v1 = vld [vmem:[%s2597_s1 + $0x30] sm:$0xff]   ;;  %s2602_s19 = smov (!%p190_p3, %s1654_s19), 255  ;;  %v2167_v2 = vld [vmem:[%s2597_s1 + $0x28] sm:$0xff]  }
   0xc   : > { %2061 = vmatprep.subr.bf16.mxu0 %v2165_v0  ;;  %2141 = vmatprep.subr.bf16.mxu1 %v2165_v0  ;;  %s1655_s24 = sshll.u32 %s2602_s19, 2  ;;  %v2168_v3 = vld [vmem:[%s2597_s1 + $0x20] sm:$0xff]   ;;  %v2169_v6 = vld [vmem:[%s2597_s1 + $0x18] sm:$0xff]   ;;  %v2170_v7 = vld [vmem:[%s2597_s1 + $0x10] sm:$0xff]  }
   0xd   : > { %2062 = vmatpush3.bf16.msra.mxu0 %v2165_v0  ;;  %2149 = vmatpush3.bf16.msra.mxu1 %v2165_v0  ;;  %s2265_s27 = scalar_lea.vmem %s2596_s0, %s1655_s24  ;;  %v2171_v8 = vld [vmem:[%s2597_s1 + $0x8] sm:$0xff]   ;;  %v2172_v9 = vld [vmem:[%s2597_s1] sm:$0xff]   ;;  %s2355_s20 = scalar_lea.vmem %s2600_s4, %s1655_s24 }
   0xe   : > { %2063 = vmatprep.subr.bf16.mxu0 %v2166_v1  ;;  %2142 = vmatprep.subr.bf16.mxu1 %v2166_v1  ;;  %v2173_v4 = vld [vmem:[%s2265_s27] sm:$0xff]   ;;  %v2175_v10 = vld [vmem:[%s2265_s27 + $0x8] sm:$0xff]   ;;  %v2177_v12 = vld [vmem:[%s2265_s27 + $0x10] sm:$0xff]  }
   0xf   : > { %v2174_v5 = vld [vmem:[%s2265_s27 + $0x80] sm:$0xff]   ;;  %2077 = vmatprep.mubr.bf16.mxu0 %v2173_v4  ;;  %v2176_v11 = vld [vmem:[%s2265_s27 + $0x88] sm:$0xff]   ;;  %v2178_v13 = vld [vmem:[%s2265_s27 + $0x90] sm:$0xff]  }
  0x10   : > { %2109 = vmatprep.mubr.bf16.mxu1 %v2174_v5  ;;  %v2179_v14 = vld [vmem:[%s2265_s27 + $0x18] sm:$0xff]   ;;  %v2181_v16 = vld [vmem:[%s2265_s27 + $0x20] sm:$0xff]   ;;  %v2183_v18 = vld [vmem:[%s2265_s27 + $0x28] sm:$0xff]  }
  0x11   : > { %2064 = vmatpush3.bf16.msra.mxu0 %v2166_v1  ;;  %2150 = vmatpush3.bf16.msra.mxu1 %v2166_v1  ;;  %v2180_v15 = vld [vmem:[%s2265_s27 + $0x98] sm:$0xff]   ;;  %v2182_v17 = vld [vmem:[%s2265_s27 + $0xa0] sm:$0xff]   ;;  %v2184_v19 = vld [vmem:[%s2265_s27 + $0xa8] sm:$0xff]  }
  0x12   : > { %2065 = vmatprep.subr.bf16.mxu0 %v2167_v2  ;;  %2143 = vmatprep.subr.bf16.mxu1 %v2167_v2  ;;  %v2185_v20 = vld [vmem:[%s2265_s27 + $0x30] sm:$0xff]   ;;  %v2187_v22 = vld [vmem:[%s2265_s27 + $0x38] sm:$0xff]   ;;  %v2189_v24 = vld [vmem:[%s2265_s27 + $0x40] sm:$0xff]  }
  0x13   : > { %v2186_v21 = vld [vmem:[%s2265_s27 + $0xb0] sm:$0xff]   ;;  %v2188_v23 = vld [vmem:[%s2265_s27 + $0xb8] sm:$0xff]   ;;  %v2190_v25 = vld [vmem:[%s2265_s27 + $0xc0] sm:$0xff]  }
  0x14   : > { %v2191_v26 = vld [vmem:[%s2265_s27 + $0x48] sm:$0xff]   ;;  %v2193_v28 = vld [vmem:[%s2265_s27 + $0x50] sm:$0xff]   ;;  %v2195_v30 = vld [vmem:[%s2265_s27 + $0x58] sm:$0xff]  }
  0x15   : > { %2066 = vmatpush3.bf16.msra.mxu0 %v2167_v2  ;;  %2151 = vmatpush3.bf16.msra.mxu1 %v2167_v2  ;;  %v2192_v27 = vld [vmem:[%s2265_s27 + $0xc8] sm:$0xff]   ;;  %v2194_v29 = vld [vmem:[%s2265_s27 + $0xd0] sm:$0xff]   ;;  %v2196_v31 = vld [vmem:[%s2265_s27 + $0xd8] sm:$0xff]  }
  0x16   : > { %2067 = vmatprep.subr.bf16.mxu0 %v2168_v3  ;;  %2144 = vmatprep.subr.bf16.mxu1 %v2168_v3  ;;  %v2197_v32 = vld [vmem:[%s2265_s27 + $0x60] sm:$0xff]   ;;  %v2199_v34 = vld [vmem:[%s2265_s27 + $0x68] sm:$0xff]   ;;  %v2201_v36 = vld [vmem:[%s2265_s27 + $0x70] sm:$0xff]  }
  0x17   : > { %v2198_v33 = vld [vmem:[%s2265_s27 + $0xe0] sm:$0xff]   ;;  %v2200_v35 = vld [vmem:[%s2265_s27 + $0xe8] sm:$0xff]   ;;  %v2202_v37 = vld [vmem:[%s2265_s27 + $0xf0] sm:$0xff]  }
  0x18   : > { %v2203_v38 = vld [vmem:[%s2265_s27 + $0x78] sm:$0xff]   ;;  %v2317_v40 = vld [vmem:[%s2598_s2] ss:$0 sm:$0xff] }
  0x19   : > { %2068 = vmatpush3.bf16.msra.mxu0 %v2168_v3  ;;  %2152 = vmatpush3.bf16.msra.mxu1 %v2168_v3  ;;  %v2204_v39 = vld [vmem:[%s2265_s27 + $0xf8] sm:$0xff]   ;;  %v2322_v42 = vld [vmem:[%s2599_s3] ss:$0 sm:$0xff] }
  0x1a   : > { %2069 = vmatprep.subr.bf16.mxu0 %v2169_v6  ;;  %2145 = vmatprep.subr.bf16.mxu1 %v2169_v6 }
  0x1d   : > { %2070 = vmatpush3.bf16.msra.mxu0 %v2169_v6  ;;  %2153 = vmatpush3.bf16.msra.mxu1 %v2169_v6 }
  0x1e   : > { %2071 = vmatprep.subr.bf16.mxu0 %v2170_v7  ;;  %2146 = vmatprep.subr.bf16.mxu1 %v2170_v7 }
  0x21   : > { %2072 = vmatpush3.bf16.msra.mxu0 %v2170_v7  ;;  %2154 = vmatpush3.bf16.msra.mxu1 %v2170_v7 }
  0x22   : > { %2073 = vmatprep.subr.bf16.mxu0 %v2171_v8  ;;  %2147 = vmatprep.subr.bf16.mxu1 %v2171_v8 }
  0x25   : > { %2074 = vmatpush3.bf16.msra.mxu0 %v2171_v8  ;;  %2155 = vmatpush3.bf16.msra.mxu1 %v2171_v8 }
  0x26   : > { %2075 = vmatprep.subr.bf16.mxu0 %v2172_v9  ;;  %2148 = vmatprep.subr.bf16.mxu1 %v2172_v9 }
  0x29   : > { %2076 = vmatpush3.bf16.msra.mxu0 %v2172_v9  ;;  %2156 = vmatpush3.bf16.msra.mxu1 %v2172_v9 }
  0x2c   : > { %2078 = vmatmul.mubr.bf16.vlgmr.msra.gmra.mxu0 %v2175_v10  ;;  %2110 = vmatmul.mubr.bf16.vlgmr.msra.gmra.mxu1 %v2176_v11 }
  0x2d   : > { %2081 = vmatprep.mubr.bf16.mxu0 %v2177_v12  ;;  %2113 = vmatprep.mubr.bf16.mxu1 %v2178_v13 }
  0x34   : > { %2082 = vmatmul.mubr.bf16.gmra.mxu0 %v2179_v14  ;;  %2114 = vmatmul.mubr.bf16.gmra.mxu1 %v2180_v15 }
  0x35   : > { %2085 = vmatprep.mubr.bf16.mxu0 %v2181_v16  ;;  %2117 = vmatprep.mubr.bf16.mxu1 %v2182_v17 }
  0x3c   : > { %2086 = vmatmul.mubr.bf16.gmra.mxu0 %v2183_v18  ;;  %2118 = vmatmul.mubr.bf16.gmra.mxu1 %v2184_v19 }
  0x3d   : > { %2089 = vmatprep.mubr.bf16.mxu0 %v2185_v20  ;;  %2121 = vmatprep.mubr.bf16.mxu1 %v2186_v21 }
  0x44   : > { %2090 = vmatmul.mubr.bf16.gmra.mxu0 %v2187_v22  ;;  %2122 = vmatmul.mubr.bf16.gmra.mxu1 %v2188_v23 }
  0x45   : > { %2093 = vmatprep.mubr.bf16.mxu0 %v2189_v24  ;;  %2125 = vmatprep.mubr.bf16.mxu1 %v2190_v25 }
  0x4c   : > { %2094 = vmatmul.mubr.bf16.gmra.mxu0 %v2191_v26  ;;  %2126 = vmatmul.mubr.bf16.gmra.mxu1 %v2192_v27 }
  0x4d   : > { %2097 = vmatprep.mubr.bf16.mxu0 %v2193_v28  ;;  %2129 = vmatprep.mubr.bf16.mxu1 %v2194_v29 }
  0x54   : > { %2098 = vmatmul.mubr.bf16.gmra.mxu0 %v2195_v30  ;;  %2130 = vmatmul.mubr.bf16.gmra.mxu1 %v2196_v31 }
  0x55   : > { %2101 = vmatprep.mubr.bf16.mxu0 %v2197_v32  ;;  %2133 = vmatprep.mubr.bf16.mxu1 %v2198_v33 }
  0x5c   : > { %2102 = vmatmul.mubr.bf16.gmra.mxu0 %v2199_v34  ;;  %2134 = vmatmul.mubr.bf16.gmra.mxu1 %v2200_v35 }
  0x5d   : > { %2105 = vmatprep.mubr.bf16.mxu0 %v2201_v36  ;;  %2137 = vmatprep.mubr.bf16.mxu1 %v2202_v37 }
  0x64   : > { %2106 = vmatmul.mubr.bf16.gmra.mxu0 %v2203_v38  ;;  %2138 = vmatmul.mubr.bf16.gmra.mxu1 %v2204_v39 }
  0xec   : > { %v2079_v41 = vpop.f32.mrf.mxu0  ;;  %v2111_v43 = vpop.f32.mrf.mxu1 }
  0xed   : > { %v820_v44 = vmul.f32 %v2079_v41, %v2317_v40  ;;  %v852_v45 = vmul.f32 %v2111_v43, %v2317_v40 }
  0xee   : > { %v556_v46 = vpop.f32.mrf.mxu0  ;;  %v684_v47 = vpop.f32.mrf.mxu1 }
  0xef   : > { %v891_v48 = vadd.f32 %v2322_v42, %v820_v44  ;;  %v923_v49 = vadd.f32 %v2322_v42, %v852_v45  ;;  %v818_v50 = vmul.f32 %v2317_v40, %v556_v46  ;;  %v850_v51 = vmul.f32 %v2317_v40, %v684_v47 }
  0xf0   : > { %v2080_v52 = vpop.f32.mrf.mxu0  ;;  %v2112_v53 = vpop.f32.mrf.mxu1 }
  0xf1   : > { %v955_v54 = vadd.f32 3.0, %v891_v48  ;;  %v987_v55 = vadd.f32 3.0, %v923_v49  ;;  %v889_v56 = vadd.f32 %v2322_v42, %v818_v50  ;;  %v921_v57 = vadd.f32 %v2322_v42, %v850_v51 }
  0xf2   : > { %v821_v58 = vmul.f32 %v2080_v52, %v2317_v40  ;;  %v853_v59 = vmul.f32 %v2112_v53, %v2317_v40  ;;  %v559_v60 = vpop.f32.mrf.mxu0  ;;  %v687_v61 = vpop.f32.mrf.mxu1 }
  0xf3   : > { %v1019_v62 = vmax.f32 %v955_v54, 0.0  ;;  %v1051_v63 = vmax.f32 %v987_v55, 0.0  ;;  %v953_v0 = vadd.f32 3.0, %v889_v56  ;;  %v985_v1 = vadd.f32 3.0, %v921_v57 }
  0xf4   : > { %v892_v2 = vadd.f32 %v2322_v42, %v821_v58  ;;  %v924_v3 = vadd.f32 %v2322_v42, %v853_v59  ;;  %v819_v4 = vmul.f32 %v2317_v40, %v559_v60  ;;  %v851_v5 = vmul.f32 %v2317_v40, %v687_v61  ;;  %v2083_v6 = vpop.f32.mrf.mxu0  ;;  %v2115_v7 = vpop.f32.mrf.mxu1 }
  0xf5   : > { %v1083_v8 = vmin.f32 %v1019_v62, 6.0  ;;  %v1115_v9 = vmin.f32 %v1051_v63, 6.0  ;;  %v1017_v10 = vmax.f32 %v953_v0, 0.0  ;;  %v1049_v11 = vmax.f32 %v985_v1, 0.0 }
  0xf6   : > { %v956_v12 = vadd.f32 3.0, %v892_v2  ;;  %v988_v13 = vadd.f32 3.0, %v924_v3  ;;  %v890_v14 = vadd.f32 %v2322_v42, %v819_v4  ;;  %v922_v15 = vadd.f32 %v2322_v42, %v851_v5  ;;  %v572_v16 = vpop.f32.mrf.mxu0  ;;  %v700_v17 = vpop.f32.mrf.mxu1 }
  0xf7   : > { %v1147_v18 = vmul.f32 0.16666667, %v1083_v8  ;;  %v1179_v19 = vmul.f32 0.16666667, %v1115_v9  ;;  %v1081_v20 = vmin.f32 %v1017_v10, 6.0  ;;  %v1113_v21 = vmin.f32 %v1049_v11, 6.0 }
  0xf8   : > { %v1020_v22 = vmax.f32 %v956_v12, 0.0  ;;  %v1052_v23 = vmax.f32 %v988_v13, 0.0  ;;  %v954_v24 = vadd.f32 3.0, %v890_v14  ;;  %v986_v25 = vadd.f32 3.0, %v922_v15  ;;  %v2084_v26 = vpop.f32.mrf.mxu0  ;;  %v2116_v27 = vpop.f32.mrf.mxu1 }
  0xf9   : > { %v1211_v28 = vmul.f32 %v1147_v18, %v891_v48  ;;  %v1243_v29 = vmul.f32 %v1179_v19, %v923_v49  ;;  %v1145_v30 = vmul.f32 0.16666667, %v1081_v20  ;;  %v1177_v31 = vmul.f32 0.16666667, %v1113_v21 }
  0xfa   : > { %v1084_v32 = vmin.f32 %v1020_v22, 6.0  ;;  %v1116_v33 = vmin.f32 %v1052_v23, 6.0  ;;  %v1018_v34 = vmax.f32 %v954_v24, 0.0  ;;  %v1050_v35 = vmax.f32 %v986_v25, 0.0  ;;  %v575_v36 = vpop.f32.mrf.mxu0  ;;  %v703_v37 = vpop.f32.mrf.mxu1 }
  0xfb   : > { %v1209_v38 = vmul.f32 %v1145_v30, %v889_v56  ;;  %v1241_v39 = vmul.f32 %v1177_v31, %v921_v57  ;;  %v824_v41 = vmul.f32 %v2083_v6, %v2317_v40  ;;  %v856_v43 = vmul.f32 %v2115_v7, %v2317_v40 }
  0xfc   : > { %v1148_v44 = vmul.f32 0.16666667, %v1084_v32  ;;  %v1180_v45 = vmul.f32 0.16666667, %v1116_v33  ;;  %v1082_v46 = vmin.f32 %v1018_v34, 6.0  ;;  %v1114_v47 = vmin.f32 %v1050_v35, 6.0  ;;  %v2342_v48 = vpop.f32.mrf.mxu0  ;;  %v2344_v49 = vpop.f32.mrf.mxu1 }
  0xfd   : > { %v895_v50 = vadd.f32 %v2322_v42, %v824_v41  ;;  %v927_v51 = vadd.f32 %v2322_v42, %v856_v43  ;;  %v822_v52 = vmul.f32 %v2317_v40, %v572_v16  ;;  %v854_v53 = vmul.f32 %v2317_v40, %v700_v17 }
  0xfe   : > { %v1212_v54 = vmul.f32 %v1148_v44, %v892_v2  ;;  %v1244_v55 = vmul.f32 %v1180_v45, %v924_v3  ;;  %v1146_v56 = vmul.f32 0.16666667, %v1082_v46  ;;  %v1178_v57 = vmul.f32 0.16666667, %v1114_v47  ;;  %v588_v2 = vpop.f32.mrf.mxu0  ;;  %v716_v3 = vpop.f32.mrf.mxu1 }
  0xff   : > { %v959_v58 = vadd.f32 3.0, %v895_v50  ;;  %v991_v59 = vadd.f32 3.0, %v927_v51  ;;  %v893_v60 = vadd.f32 %v2322_v42, %v822_v52  ;;  %v925_v61 = vadd.f32 %v2322_v42, %v854_v53 }
 0x100   : > { %v1838_v62 = vpack.c.bf16 %v1212_v54, %v1211_v28  ;;  %v1918_v63 = vpack.c.bf16 %v1244_v55, %v1243_v29  ;;  %v1210_v0 = vmul.f32 %v1146_v56, %v890_v14  ;;  %v1242_v1 = vmul.f32 %v1178_v57, %v922_v15  ;;  %v2369_v20 = vpop.f32.mrf.mxu0  ;;  %v2371_v21 = vpop.f32.mrf.mxu1 }
 0x101   : > { %v1023_v4 = vmax.f32 %v959_v58, 0.0  ;;  %v1055_v5 = vmax.f32 %v991_v59, 0.0  ;;  %v957_v6 = vadd.f32 3.0, %v893_v60  ;;  %v989_v7 = vadd.f32 3.0, %v925_v61 }
 0x102   : > { %1990 = vst [vmem:[%s2355_s20 + $0x8] sm:$0xff] %v1838_v62   ;;  %2006 = vst [vmem:[%s2355_s20 + $0x88] sm:$0xff] %v1918_v63   ;;  %v1833_v8 = vpack.c.bf16 %v1210_v0, %v1209_v38  ;;  %v1913_v9 = vpack.c.bf16 %v1242_v1, %v1241_v39  ;;  %v825_v10 = vmul.f32 %v2084_v26, %v2317_v40  ;;  %v591_v38 = vpop.f32.mrf.mxu0  ;;  %v719_v39 = vpop.f32.mrf.mxu1 }
 0x103   : > { %v857_v11 = vmul.f32 %v2116_v27, %v2317_v40  ;;  %v1087_v12 = vmin.f32 %v1023_v4, 6.0  ;;  %v1119_v13 = vmin.f32 %v1055_v5, 6.0  ;;  %v1021_v14 = vmax.f32 %v957_v6, 0.0 }
 0x104   : > { %v1053_v15 = vmax.f32 %v989_v7, 0.0  ;;  %1834 = vst [vmem:[%s2355_s20] sm:$0xff] %v1833_v8   ;;  %2005 = vst [vmem:[%s2355_s20 + $0x80] sm:$0xff] %v1913_v9   ;;  %v896_v16 = vadd.f32 %v2322_v42, %v825_v10  ;;  %v823_v18 = vmul.f32 %v2317_v40, %v575_v36  ;;  %v855_v19 = vmul.f32 %v2317_v40, %v703_v37  ;;  %v2091_v59 = vpop.f32.mrf.mxu0 }
 0x105   : > { %v928_v17 = vadd.f32 %v2322_v42, %v857_v11  ;;  %v1151_v22 = vmul.f32 0.16666667, %v1087_v12  ;;  %v1183_v23 = vmul.f32 0.16666667, %v1119_v13  ;;  %v1085_v24 = vmin.f32 %v1021_v14, 6.0 }
 0x106   : > { %v1117_v25 = vmin.f32 %v1053_v15, 6.0  ;;  %v960_v26 = vadd.f32 3.0, %v896_v16  ;;  %v894_v28 = vadd.f32 %v2322_v42, %v823_v18  ;;  %v926_v29 = vadd.f32 %v2322_v42, %v855_v19  ;;  %v604_v12 = vpop.f32.mrf.mxu0 }
 0x107   : > { %v992_v27 = vadd.f32 3.0, %v928_v17  ;;  %v1215_v30 = vmul.f32 %v1151_v22, %v895_v50  ;;  %v1247_v31 = vmul.f32 %v1183_v23, %v927_v51  ;;  %v1149_v32 = vmul.f32 0.16666667, %v1085_v24 }
 0x108   : > { %v1181_v33 = vmul.f32 0.16666667, %v1117_v25  ;;  %v1024_v34 = vmax.f32 %v960_v26, 0.0  ;;  %v958_v36 = vadd.f32 3.0, %v894_v28  ;;  %v990_v37 = vadd.f32 3.0, %v926_v29 }
 0x109   : > { %v1056_v35 = vmax.f32 %v992_v27, 0.0  ;;  %v1213_v41 = vmul.f32 %v1149_v32, %v893_v60  ;;  %v828_v44 = vmul.f32 %v2342_v48, %v2317_v40  ;;  %v860_v45 = vmul.f32 %v2344_v49, %v2317_v40  ;;  %v2123_v60 = vpop.f32.mrf.mxu1 }
 0x10a   : > { %v1245_v43 = vmul.f32 %v1181_v33, %v925_v61  ;;  %v1088_v46 = vmin.f32 %v1024_v34, 6.0  ;;  %v1022_v50 = vmax.f32 %v958_v36, 0.0  ;;  %v1054_v51 = vmax.f32 %v990_v37, 0.0 }
 0x10b   : > { %v1120_v47 = vmin.f32 %v1056_v35, 6.0  ;;  %v899_v52 = vadd.f32 %v2322_v42, %v828_v44  ;;  %v2381_v53 = vadd.f32 %v2322_v42, %v860_v45  ;;  %v826_v54 = vmul.f32 %v2317_v40, %v588_v2  ;;  %v732_v13 = vpop.f32.mrf.mxu1 }
 0x10c   : > { %v858_v55 = vmul.f32 %v2317_v40, %v716_v3  ;;  %v1152_v56 = vmul.f32 0.16666667, %v1088_v46  ;;  %v1086_v58 = vmin.f32 %v1022_v50, 6.0  ;;  %v1118_v48 = vmin.f32 %v1054_v51, 6.0 }
 0x10d   : > { %v1184_v57 = vmul.f32 0.16666667, %v1120_v47  ;;  %v963_v49 = vadd.f32 3.0, %v899_v52  ;;  %v995_v61 = vadd.f32 3.0, %v2381_v53  ;;  %v2387_v62 = vadd.f32 %v2322_v42, %v826_v54  ;;  %v2124_v32 = vpop.f32.mrf.mxu1 }
 0x10e   : > { %v2390_v63 = vadd.f32 %v2322_v42, %v858_v55  ;;  %v1216_v0 = vmul.f32 %v1152_v56, %v896_v16  ;;  %v1150_v2 = vmul.f32 0.16666667, %v1086_v58  ;;  %v1182_v3 = vmul.f32 0.16666667, %v1118_v48 }
 0x10f   : > { %v1248_v1 = vmul.f32 %v1184_v57, %v928_v17  ;;  %v1027_v4 = vmax.f32 %v963_v49, 0.0  ;;  %v1059_v5 = vmax.f32 %v995_v61, 0.0  ;;  %v961_v6 = vadd.f32 3.0, %v2387_v62  ;;  %v735_v50 = vpop.f32.mrf.mxu1 }
 0x110   : > { %v993_v7 = vadd.f32 3.0, %v2390_v63  ;;  %v1848_v8 = vpack.c.bf16 %v1216_v0, %v1215_v30  ;;  %v1214_v10 = vmul.f32 %v1150_v2, %v894_v28  ;;  %v1246_v11 = vmul.f32 %v1182_v3, %v926_v29 }
 0x111   : > { %v1928_v9 = vpack.c.bf16 %v1248_v1, %v1247_v31  ;;  %v1091_v14 = vmin.f32 %v1027_v4, 6.0  ;;  %v1123_v15 = vmin.f32 %v1059_v5, 6.0  ;;  %v1025_v16 = vmax.f32 %v961_v6, 0.0  ;;  %v2092_v31 = vpop.f32.mrf.mxu0  ;;  %v2127_v5 = vpop.f32.mrf.mxu1 }
 0x112   : > { %v1057_v17 = vmax.f32 %v993_v7, 0.0  ;;  %1992 = vst [vmem:[%s2355_s20 + $0x18] sm:$0xff] %v1848_v8   ;;  %v1843_v18 = vpack.c.bf16 %v1214_v10, %v1213_v41  ;;  %v1923_v19 = vpack.c.bf16 %v1246_v11, %v1245_v43  ;;  %v829_v22 = vmul.f32 %v2369_v20, %v2317_v40 }
 0x113   : > { %2008 = vst [vmem:[%s2355_s20 + $0x98] sm:$0xff] %v1928_v9   ;;  %v861_v23 = vmul.f32 %v2371_v21, %v2317_v40  ;;  %v1155_v24 = vmul.f32 0.16666667, %v1091_v14  ;;  %v1089_v25 = vmin.f32 %v1025_v16, 6.0  ;;  %v827_v29 = vmul.f32 %v2317_v40, %v591_v38  ;;  %v607_v47 = vpop.f32.mrf.mxu0 }
 0x114   : > { %v1121_v26 = vmin.f32 %v1057_v17, 6.0  ;;  %1991 = vst [vmem:[%s2355_s20 + $0x10] sm:$0xff] %v1843_v18   ;;  %2007 = vst [vmem:[%s2355_s20 + $0x90] sm:$0xff] %v1923_v19   ;;  %v900_v27 = vadd.f32 %v2322_v42, %v829_v22  ;;  %v859_v30 = vmul.f32 %v2317_v40, %v719_v39  ;;  %v1187_v20 = vmul.f32 0.16666667, %v1123_v15 }
 0x115   : > { %v932_v28 = vadd.f32 %v2322_v42, %v861_v23  ;;  %v1219_v33 = vmul.f32 %v1155_v24, %v899_v52  ;;  %v898_v21 = vadd.f32 %v2322_v42, %v827_v29  ;;  %v1153_v37 = vmul.f32 0.16666667, %v1089_v25  ;;  %v2095_v4 = vpop.f32.mrf.mxu0  ;;  %v748_v24 = vpop.f32.mrf.mxu1 }
 0x116   : > { %v964_v34 = vadd.f32 3.0, %v900_v27  ;;  %v930_v36 = vadd.f32 %v2322_v42, %v859_v30  ;;  %v1185_v41 = vmul.f32 0.16666667, %v1121_v26  ;;  %v832_v43 = vmul.f32 %v2091_v59, %v2317_v40 }
 0x117   : > { %v996_v35 = vadd.f32 3.0, %v932_v28  ;;  %v864_v44 = vmul.f32 %v2123_v60, %v2317_v40  ;;  %v962_v46 = vadd.f32 3.0, %v898_v21  ;;  %v830_v54 = vmul.f32 %v2317_v40, %v604_v12  ;;  %v620_v23 = vpop.f32.mrf.mxu0 }
 0x118   : > { %v1028_v45 = vmax.f32 %v964_v34, 0.0  ;;  %v994_v39 = vadd.f32 3.0, %v930_v36  ;;  %v2411_v51 = vadd.f32 %v2322_v42, %v832_v43  ;;  %v862_v55 = vmul.f32 %v2317_v40, %v732_v13 }
 0x119   : > { %v1060_v38 = vmax.f32 %v996_v35, 0.0  ;;  %v2414_v52 = vadd.f32 %v2322_v42, %v864_v44  ;;  %v1026_v58 = vmax.f32 %v962_v46, 0.0  ;;  %v2421_v49 = vadd.f32 %v2322_v42, %v830_v54 }
 0x11a   : > { %v1092_v56 = vmin.f32 %v1028_v45, 6.0  ;;  %v1058_v48 = vmax.f32 %v994_v39, 0.0  ;;  %v967_v59 = vadd.f32 3.0, %v2411_v51  ;;  %v2424_v61 = vadd.f32 %v2322_v42, %v862_v55 }
 0x11b   : > { %v1124_v57 = vmin.f32 %v1060_v38, 6.0  ;;  %v999_v60 = vadd.f32 3.0, %v2414_v52  ;;  %v1090_v2 = vmin.f32 %v1026_v58, 6.0  ;;  %v1251_v6 = vmul.f32 %v1187_v20, %v2381_v53 }
 0x11c   : > { %v1156_v0 = vmul.f32 0.16666667, %v1092_v56  ;;  %v1122_v3 = vmin.f32 %v1058_v48, 6.0  ;;  %v1031_v7 = vmax.f32 %v967_v59, 0.0  ;;  %v965_v8 = vadd.f32 3.0, %v2421_v49 }
 0x11d   : > { %v1188_v1 = vmul.f32 0.16666667, %v1124_v57  ;;  %v997_v9 = vadd.f32 3.0, %v2424_v61  ;;  %v1154_v12 = vmul.f32 0.16666667, %v1090_v2  ;;  %v1217_v14 = vmul.f32 %v1153_v37, %v2387_v62 }
 0x11e   : > { %v1220_v10 = vmul.f32 %v1156_v0, %v900_v27  ;;  %v1186_v13 = vmul.f32 0.16666667, %v1122_v3  ;;  %v1249_v15 = vmul.f32 %v1185_v41, %v2390_v63  ;;  %v1095_v16 = vmin.f32 %v1031_v7, 6.0 }
 0x11f   : > { %v1252_v11 = vmul.f32 %v1188_v1, %v932_v28  ;;  %v1063_v17 = vmax.f32 %v999_v60, 0.0  ;;  %v1218_v19 = vmul.f32 %v1154_v12, %v898_v21  ;;  %v1029_v25 = vmax.f32 %v965_v8, 0.0  ;;  %v2096_v21 = vpop.f32.mrf.mxu0 }
 0x120   : > { %v1858_v18 = vpack.c.bf16 %v1220_v10, %v1219_v33  ;;  %v1250_v22 = vmul.f32 %v1186_v13, %v930_v36  ;;  %v1061_v26 = vmax.f32 %v997_v9, 0.0  ;;  %v833_v62 = vmul.f32 %v2092_v31, %v2317_v40  ;;  %v2128_v36 = vpop.f32.mrf.mxu1 }
 0x121   : > { %v1938_v53 = vpack.c.bf16 %v1252_v11, %v1251_v6  ;;  %v1853_v27 = vpack.c.bf16 %v1218_v19, %v1217_v14  ;;  %v865_v63 = vmul.f32 %v2124_v32, %v2317_v40  ;;  %v1159_v29 = vmul.f32 0.16666667, %v1095_v16  ;;  %v623_v58 = vpop.f32.mrf.mxu0 }
 0x122   : > { %1994 = vst [vmem:[%s2355_s20 + $0x28] sm:$0xff] %v1858_v18   ;;  %v1933_v28 = vpack.c.bf16 %v1250_v22, %v1249_v15  ;;  %v1127_v30 = vmin.f32 %v1063_v17, 6.0  ;;  %v904_v33 = vadd.f32 %v2322_v42, %v833_v62  ;;  %v831_v34 = vmul.f32 %v2317_v40, %v607_v47  ;;  %v751_v48 = vpop.f32.mrf.mxu1 }
 0x123   : > { %2010 = vst [vmem:[%s2355_s20 + $0xa8] sm:$0xff] %v1938_v53   ;;  %1993 = vst [vmem:[%s2355_s20 + $0x20] sm:$0xff] %v1853_v27   ;;  %v936_v20 = vadd.f32 %v2322_v42, %v865_v63  ;;  %v863_v35 = vmul.f32 %v2317_v40, %v735_v50  ;;  %v1093_v37 = vmin.f32 %v1029_v25, 6.0  ;;  %v1125_v41 = vmin.f32 %v1061_v26, 6.0  ;;  %v2099_v14 = vpop.f32.mrf.mxu0 }
 0x124   : > { %2009 = vst [vmem:[%s2355_s20 + $0xa0] sm:$0xff] %v1933_v28   ;;  %v836_v31 = vmul.f32 %v2095_v4, %v2317_v40  ;;  %v868_v32 = vmul.f32 %v2127_v5, %v2317_v40  ;;  %v968_v43 = vadd.f32 3.0, %v904_v33  ;;  %v902_v45 = vadd.f32 %v2322_v42, %v831_v34  ;;  %v2131_v15 = vpop.f32.mrf.mxu1 }
 0x125   : > { %v1000_v44 = vadd.f32 3.0, %v936_v20  ;;  %v934_v38 = vadd.f32 %v2322_v42, %v863_v35  ;;  %v834_v47 = vmul.f32 %v2317_v40, %v620_v23  ;;  %v866_v50 = vmul.f32 %v2317_v40, %v748_v24 }
 0x126   : > { %v2446_v46 = vadd.f32 %v2322_v42, %v836_v31  ;;  %v2449_v39 = vadd.f32 %v2322_v42, %v868_v32  ;;  %v1032_v54 = vmax.f32 %v968_v43, 0.0  ;;  %v966_v56 = vadd.f32 3.0, %v902_v45 }
 0x127   : > { %v1064_v55 = vmax.f32 %v1000_v44, 0.0  ;;  %v998_v57 = vadd.f32 3.0, %v934_v38  ;;  %v1191_v59 = vmul.f32 0.16666667, %v1127_v30  ;;  %v2456_v1 = vadd.f32 %v2322_v42, %v834_v47  ;;  %v764_v30 = vpop.f32.mrf.mxu1 }
 0x128   : > { %v971_v60 = vadd.f32 3.0, %v2446_v46  ;;  %v1003_v0 = vadd.f32 3.0, %v2449_v39  ;;  %v1096_v2 = vmin.f32 %v1032_v54, 6.0  ;;  %v1030_v4 = vmax.f32 %v966_v56, 0.0 }
 0x129   : > { %v1128_v3 = vmin.f32 %v1064_v55, 6.0  ;;  %v1062_v5 = vmax.f32 %v998_v57, 0.0  ;;  %v1157_v6 = vmul.f32 0.16666667, %v1093_v37  ;;  %v1189_v7 = vmul.f32 0.16666667, %v1125_v41 }
 0x12a   : > { %v969_v8 = vadd.f32 3.0, %v2456_v1  ;;  %v2460_v9 = vadd.f32 %v2322_v42, %v866_v50  ;;  %v1160_v10 = vmul.f32 0.16666667, %v1096_v2  ;;  %v1094_v12 = vmin.f32 %v1030_v4, 6.0 }
 0x12b   : > { %v1192_v11 = vmul.f32 0.16666667, %v1128_v3  ;;  %v1126_v13 = vmin.f32 %v1062_v5, 6.0  ;;  %v1223_v16 = vmul.f32 %v1159_v29, %v2411_v51  ;;  %v1255_v17 = vmul.f32 %v1191_v59, %v2414_v52  ;;  %v636_v29 = vpop.f32.mrf.mxu0 }
 0x12c   : > { %v1035_v18 = vmax.f32 %v971_v60, 0.0  ;;  %v1067_v53 = vmax.f32 %v1003_v0, 0.0  ;;  %v1224_v19 = vmul.f32 %v1160_v10, %v904_v33  ;;  %v1158_v23 = vmul.f32 0.16666667, %v1094_v12 }
 0x12d   : > { %v1256_v22 = vmul.f32 %v1192_v11, %v936_v20  ;;  %v1190_v24 = vmul.f32 0.16666667, %v1126_v13  ;;  %v1221_v25 = vmul.f32 %v1157_v6, %v2421_v49  ;;  %v1253_v26 = vmul.f32 %v1189_v7, %v2424_v61  ;;  %v2100_v47 = vpop.f32.mrf.mxu0 }
 0x12e   : > { %v1033_v27 = vmax.f32 %v969_v8, 0.0  ;;  %v1001_v28 = vadd.f32 3.0, %v2460_v9  ;;  %v1868_v62 = vpack.c.bf16 %v1224_v19, %v1223_v16  ;;  %v1222_v51 = vmul.f32 %v1158_v23, %v902_v45 }
 0x12f   : > { %v1948_v63 = vpack.c.bf16 %v1256_v22, %v1255_v17  ;;  %v1254_v52 = vmul.f32 %v1190_v24, %v934_v38  ;;  %v1099_v33 = vmin.f32 %v1035_v18, 6.0  ;;  %v1131_v20 = vmin.f32 %v1067_v53, 6.0  ;;  %v639_v7 = vpop.f32.mrf.mxu0 }
 0x130   : > { %1996 = vst [vmem:[%s2355_s20 + $0x38] sm:$0xff] %v1868_v62   ;;  %v1863_v34 = vpack.c.bf16 %v1222_v51, %v1221_v25  ;;  %v837_v49 = vmul.f32 %v2096_v21, %v2317_v40  ;;  %v869_v61 = vmul.f32 %v2128_v36, %v2317_v40  ;;  %v1097_v37 = vmin.f32 %v1033_v27, 6.0  ;;  %v2132_v21 = vpop.f32.mrf.mxu1 }
 0x131   : > { %2012 = vst [vmem:[%s2355_s20 + $0xb8] sm:$0xff] %v1948_v63   ;;  %v1943_v35 = vpack.c.bf16 %v1254_v52, %v1253_v26  ;;  %v1065_v41 = vmax.f32 %v1001_v28, 0.0  ;;  %v835_v31 = vmul.f32 %v2317_v40, %v623_v58  ;;  %v867_v32 = vmul.f32 %v2317_v40, %v751_v48  ;;  %v2103_v27 = vpop.f32.mrf.mxu0 }
 0x132   : > { %1995 = vst [vmem:[%s2355_s20 + $0x30] sm:$0xff] %v1863_v34   ;;  %v908_v43 = vadd.f32 %v2322_v42, %v837_v49  ;;  %v940_v44 = vadd.f32 %v2322_v42, %v869_v61  ;;  %v840_v45 = vmul.f32 %v2099_v14, %v2317_v40  ;;  %v872_v38 = vmul.f32 %v2131_v15, %v2317_v40  ;;  %v767_v8 = vpop.f32.mrf.mxu1 }
 0x133   : > { %2011 = vst [vmem:[%s2355_s20 + $0xb0] sm:$0xff] %v1943_v35   ;;  %v906_v36 = vadd.f32 %v2322_v42, %v835_v31  ;;  %v938_v50 = vadd.f32 %v2322_v42, %v867_v32  ;;  %v838_v54 = vmul.f32 %v2317_v40, %v636_v29  ;;  %v870_v55 = vmul.f32 %v2317_v40, %v764_v30 }
 0x134   : > { %v972_v56 = vadd.f32 3.0, %v908_v43  ;;  %v1004_v57 = vadd.f32 3.0, %v940_v44  ;;  %v2484_v58 = vadd.f32 %v2322_v42, %v840_v45  ;;  %v2487_v48 = vadd.f32 %v2322_v42, %v872_v38  ;;  %v2135_v28 = vpop.f32.mrf.mxu1  ;;  %v652_v45 = vpop.f32.mrf.mxu0 }
 0x135   : > { %v1129_v59 = vmin.f32 %v1065_v41, 6.0  ;;  %v970_v60 = vadd.f32 3.0, %v906_v36  ;;  %v1002_v0 = vadd.f32 3.0, %v938_v50  ;;  %v2490_v2 = vadd.f32 %v2322_v42, %v838_v54 }
 0x136   : > { %v1036_v3 = vmax.f32 %v972_v56, 0.0  ;;  %v1068_v4 = vmax.f32 %v1004_v57, 0.0  ;;  %v975_v5 = vadd.f32 3.0, %v2484_v58  ;;  %v2494_v6 = vadd.f32 %v2322_v42, %v870_v55 }
 0x137   : > { %v1034_v10 = vmax.f32 %v970_v60, 0.0  ;;  %v1066_v11 = vmax.f32 %v1002_v0, 0.0  ;;  %v1007_v12 = vadd.f32 3.0, %v2487_v48  ;;  %v973_v13 = vadd.f32 3.0, %v2490_v2  ;;  %v2104_v0 = vpop.f32.mrf.mxu0 }
 0x138   : > { %v1163_v14 = vmul.f32 0.16666667, %v1099_v33  ;;  %v1195_v15 = vmul.f32 0.16666667, %v1131_v20  ;;  %v1100_v16 = vmin.f32 %v1036_v3, 6.0  ;;  %v1132_v17 = vmin.f32 %v1068_v4, 6.0 }
 0x139   : > { %v1161_v18 = vmul.f32 0.16666667, %v1097_v37  ;;  %v1193_v53 = vmul.f32 0.16666667, %v1129_v59  ;;  %v1098_v19 = vmin.f32 %v1034_v10, 6.0  ;;  %v1130_v22 = vmin.f32 %v1066_v11, 6.0 }
 0x13a   : > { %v1164_v23 = vmul.f32 0.16666667, %v1100_v16  ;;  %v1196_v24 = vmul.f32 0.16666667, %v1132_v17  ;;  %v1039_v25 = vmax.f32 %v975_v5, 0.0  ;;  %v1005_v26 = vadd.f32 3.0, %v2494_v6 }
 0x13b   : > { %v1162_v62 = vmul.f32 0.16666667, %v1098_v19  ;;  %v1194_v63 = vmul.f32 0.16666667, %v1130_v22  ;;  %v1071_v51 = vmax.f32 %v1007_v12, 0.0  ;;  %v1037_v52 = vmax.f32 %v973_v13, 0.0 }
 0x13c   : > { %v1227_v29 = vmul.f32 %v1163_v14, %v2446_v46  ;;  %v1259_v30 = vmul.f32 %v1195_v15, %v2449_v39  ;;  %v1228_v33 = vmul.f32 %v1164_v23, %v908_v43  ;;  %v1260_v20 = vmul.f32 %v1196_v24, %v940_v44  ;;  %v780_v46 = vpop.f32.mrf.mxu1  ;;  %v655_v23 = vpop.f32.mrf.mxu0 }
 0x13d   : > { %v1225_v34 = vmul.f32 %v1161_v18, %v2456_v1  ;;  %v1257_v35 = vmul.f32 %v1193_v53, %v2460_v9  ;;  %v1226_v49 = vmul.f32 %v1162_v62, %v906_v36  ;;  %v1258_v61 = vmul.f32 %v1194_v63, %v938_v50 }
 0x13e   : > { %v1878_v37 = vpack.c.bf16 %v1228_v33, %v1227_v29  ;;  %v1958_v41 = vpack.c.bf16 %v1260_v20, %v1259_v30  ;;  %v1103_v31 = vmin.f32 %v1039_v25, 6.0  ;;  %v1069_v32 = vmax.f32 %v1005_v26, 0.0  ;;  %v2136_v13 = vpop.f32.mrf.mxu1 }
 0x13f   : > { %v1873_v38 = vpack.c.bf16 %v1226_v49, %v1225_v34  ;;  %v1953_v39 = vpack.c.bf16 %v1258_v61, %v1257_v35  ;;  %v1135_v43 = vmin.f32 %v1071_v51, 6.0  ;;  %v1101_v54 = vmin.f32 %v1037_v52, 6.0  ;;  %v2107_v61 = vpop.f32.mrf.mxu0 }
 0x140   : > { %1998 = vst [vmem:[%s2355_s20 + $0x48] sm:$0xff] %v1878_v37   ;;  %2014 = vst [vmem:[%s2355_s20 + $0xc8] sm:$0xff] %v1958_v41   ;;  %v841_v1 = vmul.f32 %v2100_v47, %v2317_v40  ;;  %v873_v9 = vmul.f32 %v2132_v21, %v2317_v40  ;;  %v839_v44 = vmul.f32 %v2317_v40, %v639_v7  ;;  %v1167_v3 = vmul.f32 0.16666667, %v1103_v31  ;;  %v783_v51 = vpop.f32.mrf.mxu1 }
 0x141   : > { %v871_v36 = vmul.f32 %v2317_v40, %v767_v8  ;;  %1997 = vst [vmem:[%s2355_s20 + $0x40] sm:$0xff] %v1873_v38   ;;  %2013 = vst [vmem:[%s2355_s20 + $0xc0] sm:$0xff] %v1953_v39   ;;  %v844_v50 = vmul.f32 %v2103_v27, %v2317_v40  ;;  %v876_v55 = vmul.f32 %v2135_v28, %v2317_v40  ;;  %v1133_v4 = vmin.f32 %v1069_v32, 6.0 }
 0x142   : > { %v842_v56 = vmul.f32 %v2317_v40, %v652_v45  ;;  %v874_v57 = vmul.f32 %v2317_v40, %v780_v46  ;;  %v912_v59 = vadd.f32 %v2322_v42, %v841_v1  ;;  %v944_v47 = vadd.f32 %v2322_v42, %v873_v9  ;;  %v2139_v38 = vpop.f32.mrf.mxu1 }
 0x143   : > { %v910_v21 = vadd.f32 %v2322_v42, %v839_v44  ;;  %v942_v60 = vadd.f32 %v2322_v42, %v871_v36  ;;  %v2520_v5 = vadd.f32 %v2322_v42, %v844_v50  ;;  %v2523_v7 = vadd.f32 %v2322_v42, %v876_v55  ;;  %v668_v36 = vpop.f32.mrf.mxu0 }
 0x144   : > { %v976_v8 = vadd.f32 3.0, %v912_v59  ;;  %v1008_v10 = vadd.f32 3.0, %v944_v47  ;;  %v1199_v14 = vmul.f32 0.16666667, %v1135_v43  ;;  %v1165_v15 = vmul.f32 0.16666667, %v1101_v54 }
 0x145   : > { %v974_v11 = vadd.f32 3.0, %v910_v21  ;;  %v1006_v12 = vadd.f32 3.0, %v942_v60  ;;  %v2526_v16 = vadd.f32 %v2322_v42, %v842_v56  ;;  %v2529_v17 = vadd.f32 %v2322_v42, %v874_v57 }
 0x146   : > { %v1040_v18 = vmax.f32 %v976_v8, 0.0  ;;  %v1072_v53 = vmax.f32 %v1008_v10, 0.0  ;;  %v1197_v24 = vmul.f32 0.16666667, %v1133_v4  ;;  %v979_v25 = vadd.f32 3.0, %v2520_v5 }
 0x147   : > { %v1038_v19 = vmax.f32 %v974_v11, 0.0  ;;  %v1070_v22 = vmax.f32 %v1006_v12, 0.0  ;;  %v1011_v26 = vadd.f32 3.0, %v2523_v7  ;;  %v1231_v52 = vmul.f32 %v1167_v3, %v2484_v58 }
 0x148   : > { %v1104_v27 = vmin.f32 %v1040_v18, 6.0  ;;  %v1136_v28 = vmin.f32 %v1072_v53, 6.0  ;;  %v1263_v29 = vmul.f32 %v1199_v14, %v2487_v48  ;;  %v977_v30 = vadd.f32 3.0, %v2526_v16 }
 0x149   : > { %v1102_v62 = vmin.f32 %v1038_v19, 6.0  ;;  %v1134_v63 = vmin.f32 %v1070_v22, 6.0  ;;  %v1009_v33 = vadd.f32 3.0, %v2529_v17  ;;  %v1229_v20 = vmul.f32 %v1165_v15, %v2490_v2 }
 0x14a   : > { %v1168_v34 = vmul.f32 0.16666667, %v1104_v27  ;;  %v1200_v35 = vmul.f32 0.16666667, %v1136_v28  ;;  %v1043_v41 = vmax.f32 %v979_v25, 0.0  ;;  %v845_v31 = vmul.f32 %v2104_v0, %v2317_v40 }
 0x14b   : > { %v1166_v49 = vmul.f32 0.16666667, %v1102_v62  ;;  %v1198_v37 = vmul.f32 0.16666667, %v1134_v63  ;;  %v877_v32 = vmul.f32 %v2136_v13, %v2317_v40  ;;  %v1075_v46 = vmax.f32 %v1011_v26, 0.0 }
 0x14c   : > { %v1232_v45 = vmul.f32 %v1168_v34, %v912_v59  ;;  %v1264_v58 = vmul.f32 %v1200_v35, %v944_v47  ;;  %v1261_v2 = vmul.f32 %v1197_v24, %v2494_v6  ;;  %v1041_v43 = vmax.f32 %v977_v30, 0.0 }
 0x14d   : > { %v1230_v48 = vmul.f32 %v1166_v49, %v910_v21  ;;  %v1262_v39 = vmul.f32 %v1198_v37, %v942_v60  ;;  %v1073_v44 = vmax.f32 %v1009_v33, 0.0  ;;  %v1107_v55 = vmin.f32 %v1043_v41, 6.0  ;;  %v796_v60 = vpop.f32.mrf.mxu1 }
 0x14e   : > { %v1888_v54 = vpack.c.bf16 %v1232_v45, %v1231_v52  ;;  %v1968_v1 = vpack.c.bf16 %v1264_v58, %v1263_v29  ;;  %v916_v56 = vadd.f32 %v2322_v42, %v845_v31  ;;  %v948_v57 = vadd.f32 %v2322_v42, %v877_v32 }
 0x14f   : > { %v1883_v9 = vpack.c.bf16 %v1230_v48, %v1229_v20  ;;  %v1963_v50 = vpack.c.bf16 %v1262_v39, %v1261_v2  ;;  %v1139_v59 = vmin.f32 %v1075_v46, 6.0  ;;  %v843_v6 = vmul.f32 %v2317_v40, %v655_v23  ;;  %v2108_v20 = vpop.f32.mrf.mxu0  ;;  %v2140_v37 = vpop.f32.mrf.mxu1 }
 0x150   : > { %2000 = vst [vmem:[%s2355_s20 + $0x58] sm:$0xff] %v1888_v54   ;;  %2016 = vst [vmem:[%s2355_s20 + $0xd8] sm:$0xff] %v1968_v1   ;;  %v875_v47 = vmul.f32 %v2317_v40, %v783_v51  ;;  %v848_v21 = vmul.f32 %v2107_v61, %v2317_v40  ;;  %v980_v0 = vadd.f32 3.0, %v916_v56  ;;  %v1012_v3 = vadd.f32 3.0, %v948_v57 }
 0x151   : > { %1999 = vst [vmem:[%s2355_s20 + $0x50] sm:$0xff] %v1883_v9   ;;  %2015 = vst [vmem:[%s2355_s20 + $0xd0] sm:$0xff] %v1963_v50   ;;  %v880_v4 = vmul.f32 %v2139_v38, %v2317_v40  ;;  %v846_v8 = vmul.f32 %v2317_v40, %v668_v36  ;;  %v1105_v10 = vmin.f32 %v1041_v43, 6.0  ;;  %v914_v11 = vadd.f32 %v2322_v42, %v843_v6  ;;  %v671_v39 = vpop.f32.mrf.mxu0 }
 0x152   : > { %v946_v12 = vadd.f32 %v2322_v42, %v875_v47  ;;  %v2555_v13 = vadd.f32 %v2322_v42, %v848_v21  ;;  %v1171_v14 = vmul.f32 0.16666667, %v1107_v55  ;;  %v1044_v15 = vmax.f32 %v980_v0, 0.0  ;;  %v2206_v55 = vld [vmem:[%s2599_s3] ss:$0 sm:$0xff] }
 0x153   : > { %v1076_v18 = vmax.f32 %v1012_v3, 0.0  ;;  %v878_v53 = vmul.f32 %v2317_v40, %v796_v60  ;;  %v1203_v19 = vmul.f32 0.16666667, %v1139_v59  ;;  %v1137_v22 = vmin.f32 %v1073_v44, 6.0  ;;  %v799_v44 = vpop.f32.mrf.mxu1 }
 0x154   : > { %v978_v23 = vadd.f32 3.0, %v914_v11  ;;  %v1010_v24 = vadd.f32 3.0, %v946_v12  ;;  %v1108_v25 = vmin.f32 %v1044_v15, 6.0  ;;  %v2559_v27 = vadd.f32 %v2322_v42, %v880_v4 }
 0x155   : > { %v1140_v26 = vmin.f32 %v1076_v18, 6.0  ;;  %v2562_v28 = vadd.f32 %v2322_v42, %v846_v8  ;;  %v1169_v62 = vmul.f32 0.16666667, %v1105_v10  ;;  %v983_v52 = vadd.f32 3.0, %v2555_v13 }
 0x156   : > { %v1042_v63 = vmax.f32 %v978_v23, 0.0  ;;  %v1074_v51 = vmax.f32 %v1010_v24, 0.0  ;;  %v1235_v29 = vmul.f32 %v1171_v14, %v2520_v5  ;;  %v1172_v40 = vmul.f32 0.16666667, %v1108_v25 }
 0x157   : > { %v1204_v30 = vmul.f32 0.16666667, %v1140_v26  ;;  %v2567_v33 = vadd.f32 %v2322_v42, %v878_v53  ;;  %v1267_v34 = vmul.f32 %v1203_v19, %v2523_v7  ;;  %v1201_v35 = vmul.f32 0.16666667, %v1137_v22  ;;  %v2205_v42 = vld [vmem:[%s2598_s2] ss:$0 sm:$0xff] }
 0x158   : > { %v1106_v49 = vmin.f32 %v1042_v63, 6.0  ;;  %v1138_v61 = vmin.f32 %v1074_v51, 6.0  ;;  %v1236_v41 = vmul.f32 %v1172_v40, %v916_v56  ;;  %v1015_v32 = vadd.f32 3.0, %v2559_v27 }
 0x159   : > { %v1268_v31 = vmul.f32 %v1204_v30, %v948_v57  ;;  %v981_v45 = vadd.f32 3.0, %v2562_v28  ;;  %v1047_v48 = vmax.f32 %v983_v52, 0.0  ;;  %v849_v7 = vmul.f32 %v2205_v42, %v2108_v20 }
 0x15a   : > { %v1170_v5 = vmul.f32 0.16666667, %v1106_v49  ;;  %v1202_v58 = vmul.f32 0.16666667, %v1138_v61  ;;  %v1898_v46 = vpack.c.bf16 %v1236_v41, %v1235_v29  ;;  %v1013_v2 = vadd.f32 3.0, %v2567_v33 }
 0x15b   : > { %v1978_v38 = vpack.c.bf16 %v1268_v31, %v1267_v34  ;;  %v1233_v43 = vmul.f32 %v1169_v62, %v2526_v16  ;;  %v1265_v54 = vmul.f32 %v1201_v35, %v2529_v17  ;;  %v1079_v36 = vmax.f32 %v1015_v32, 0.0 }
 0x15c   : > { %v1234_v1 = vmul.f32 %v1170_v5, %v914_v11  ;;  %v1266_v9 = vmul.f32 %v1202_v58, %v946_v12  ;;  %2002 = vst [vmem:[%s2355_s20 + $0x68] sm:$0xff] %v1898_v46   ;;  %v1045_v50 = vmax.f32 %v981_v45, 0.0  ;;  %v920_v56 = vadd.f32 %v2206_v55, %v849_v7 }
 0x15d   : > { %2018 = vst [vmem:[%s2355_s20 + $0xe8] sm:$0xff] %v1978_v38   ;;  %v881_v57 = vmul.f32 %v2205_v42, %v2140_v37  ;;  %v1111_v16 = vmin.f32 %v1047_v48, 6.0  ;;  %v847_v47 = vmul.f32 %v2205_v42, %v671_v39  ;;  %v1077_v17 = vmax.f32 %v1013_v2, 0.0 }
 0x15e   : > { %v1893_v59 = vpack.c.bf16 %v1234_v1, %v1233_v43  ;;  %v1973_v6 = vpack.c.bf16 %v1266_v9, %v1265_v54  ;;  %v984_v21 = vadd.f32 3.0, %v920_v56  ;;  %v879_v0 = vmul.f32 %v2205_v42, %v799_v44 }
 0x15f   : > { %v952_v60 = vadd.f32 %v2206_v55, %v881_v57  ;;  %v918_v3 = vadd.f32 %v2206_v55, %v847_v47  ;;  %v1143_v4 = vmin.f32 %v1079_v36, 6.0  ;;  %v1175_v12 = vmul.f32 0.16666667, %v1111_v16 }
 0x160   : > { %2001 = vst [vmem:[%s2355_s20 + $0x60] sm:$0xff] %v1893_v59   ;;  %2017 = vst [vmem:[%s2355_s20 + $0xe0] sm:$0xff] %v1973_v6   ;;  %v1048_v8 = vmax.f32 %v984_v21, 0.0  ;;  %v950_v11 = vadd.f32 %v2206_v55, %v879_v0  ;;  %v1109_v14 = vmin.f32 %v1045_v50, 6.0  ;;  %v1141_v18 = vmin.f32 %v1077_v17, 6.0 }
 0x161   : > { %v1016_v10 = vadd.f32 3.0, %v952_v60  ;;  %v982_v15 = vadd.f32 3.0, %v918_v3  ;;  %v1207_v24 = vmul.f32 0.16666667, %v1143_v4  ;;  %v1239_v63 = vmul.f32 %v1175_v12, %v2555_v13 }
 0x162   : > { %v1112_v53 = vmin.f32 %v1048_v8, 6.0  ;;  %v1014_v22 = vadd.f32 3.0, %v950_v11  ;;  %v1173_v51 = vmul.f32 0.16666667, %v1109_v14  ;;  %v1205_v29 = vmul.f32 0.16666667, %v1141_v18 }
 0x163   : > { %v1080_v19 = vmax.f32 %v1016_v10, 0.0  ;;  %v1046_v23 = vmax.f32 %v982_v15, 0.0  ;;  %v1271_v35 = vmul.f32 %v1207_v24, %v2559_v27 }
 0x164   : > { %v1176_v25 = vmul.f32 0.16666667, %v1112_v53  ;;  %v1078_v62 = vmax.f32 %v1014_v22, 0.0  ;;  %v1237_v41 = vmul.f32 %v1173_v51, %v2562_v28  ;;  %v1269_v13 = vmul.f32 %v1205_v29, %v2567_v33 }
 0x165   : > { %v1144_v26 = vmin.f32 %v1080_v19, 6.0  ;;  %v1110_v52 = vmin.f32 %v1046_v23, 6.0 }
 0x166   : > { %v1240_v40 = vmul.f32 %v1176_v25, %v920_v56  ;;  %v1142_v20 = vmin.f32 %v1078_v62, 6.0 }
 0x167   : > { %v1208_v30 = vmul.f32 0.16666667, %v1144_v26  ;;  %v1174_v34 = vmul.f32 0.16666667, %v1110_v52 }
 0x168   : > { %v1908_v49 = vpack.c.bf16 %v1240_v40, %v1239_v63  ;;  %v1206_v37 = vmul.f32 0.16666667, %v1142_v20 }
 0x169   : > { %v1272_v61 = vmul.f32 %v1208_v30, %v952_v60  ;;  %v1238_v31 = vmul.f32 %v1174_v34, %v918_v3 }
 0x16a   : > { %2004 = vst [vmem:[%s2355_s20 + $0x78] sm:$0xff] %v1908_v49   ;;  %v1270_v45 = vmul.f32 %v1206_v37, %v950_v11 }
 0x16b   : > { %v1988_v32 = vpack.c.bf16 %v1272_v61, %v1271_v35  ;;  %v1903_v5 = vpack.c.bf16 %v1238_v31, %v1237_v41 }
 0x16c   : > { %v1983_v58 = vpack.c.bf16 %v1270_v45, %v1269_v13 }
 0x16d   : > { %2020 = vst [vmem:[%s2355_s20 + $0xf8] sm:$0xff] %v1988_v32   ;;  %2003 = vst [vmem:[%s2355_s20 + $0x70] sm:$0xff] %v1903_v5  }
 0x16e   : > { %2019 = vst [vmem:[%s2355_s20 + $0xf0] sm:$0xff] %v1983_v58  }
 0x16f PF: > { %s14_s15 = sadd.s32 1, %s2213_s15  }
 0x170   : > { %p11_p4 = scmp.ge.s32.totalorder %s14_s15, 6  }
 0x172   :  { %13 = sbr.rel (!%p11_p4) target bundleno = 1 (0x1), region = 66 }

// kernel: _lambda_.11
= control target key start
LH: loop header
LB: loop body
LE: loop exit
PB: predicated region body
PF: predicated region fallthrough
CT: control target
= control target key end

     0   :  { %s1198_s15 = smov 0   ;;  %s1356_s0 = inlined_call_operand.vmem [shape: bf16[512,128], index: 0, kind: input, shape index: {}]   ;;  %s1357_s1 = inlined_call_operand.vmem [shape: bf16[128,128], index: 1, kind: input, shape index: {}]   ;;  %s1358_s2 = inlined_call_operand.vmem [shape: f32[1,128], index: 2, kind: input, shape index: {}]   ;;  %s1359_s3 = inlined_call_operand.vmem [shape: f32[1,128], index: 3, kind: input, shape index: {}]   ;;  %s1360_s4 = inlined_call_operand.vmem [shape: bf16[512,128], index: 4, kind: output, shape index: {}]  }
   0x1 LB: > { %s849_s16 = sadd.s32 4294967295, %s1171_s15   ;;  %p853_p0 = scmp.ge.s32.totalorder %s1171_s15, 1  ;;  %s1171_s15 = sphi %s1198_s15, %s14_s15  }
   0x2   : > { %p163_p1 = scmp.lt.s32.totalorder %s1171_s15, 3 }
   0x4   : > { %p164_p2 = pnand %p853_p0, %p163_p1 }
   0x5   : > { %s854_s19 = sshll.u32 (!%p164_p2), %s849_s16, 5 }
   0x6   : > { %167 = sbr.rel (%p164_p2) target bundleno = 274 (0x112), region = 36  ;;  %p190_p3 = scmp.lt.s32.totalorder (!%p164_p2), %s854_s19, 63 }
   0xb   : > { %v1141_v0 = vld [vmem:[%s1357_s1 + $0x38] sm:$0xff]   ;;  %v1142_v1 = vld [vmem:[%s1357_s1 + $0x30] sm:$0xff]   ;;  %s1362_s19 = smov (!%p190_p3, %s854_s19), 63  ;;  %v1143_v2 = vld [vmem:[%s1357_s1 + $0x28] sm:$0xff]  }
   0xc   : > { %1069 = vmatprep.subr.bf16.mxu0 %v1141_v0  ;;  %1117 = vmatprep.subr.bf16.mxu1 %v1141_v0  ;;  %s855_s24 = sshll.u32 %s1362_s19, 2  ;;  %v1144_v3 = vld [vmem:[%s1357_s1 + $0x20] sm:$0xff]   ;;  %v1145_v6 = vld [vmem:[%s1357_s1 + $0x18] sm:$0xff]   ;;  %v1146_v7 = vld [vmem:[%s1357_s1 + $0x10] sm:$0xff]  }
   0xd   : > { %1070 = vmatpush3.bf16.msra.mxu0 %v1141_v0  ;;  %1125 = vmatpush3.bf16.msra.mxu1 %v1141_v0  ;;  %s1223_s27 = scalar_lea.vmem %s1356_s0, %s855_s24  ;;  %v1147_v8 = vld [vmem:[%s1357_s1 + $0x8] sm:$0xff]   ;;  %v1148_v9 = vld [vmem:[%s1357_s1] sm:$0xff]   ;;  %s1285_s20 = scalar_lea.vmem %s1360_s4, %s855_s24 }
   0xe   : > { %1071 = vmatprep.subr.bf16.mxu0 %v1142_v1  ;;  %1118 = vmatprep.subr.bf16.mxu1 %v1142_v1  ;;  %v1149_v4 = vld [vmem:[%s1223_s27] sm:$0xff]   ;;  %v1151_v10 = vld [vmem:[%s1223_s27 + $0x8] sm:$0xff]   ;;  %v1153_v12 = vld [vmem:[%s1223_s27 + $0x10] sm:$0xff]  }
   0xf   : > { %v1150_v5 = vld [vmem:[%s1223_s27 + $0x40] sm:$0xff]   ;;  %1085 = vmatprep.mubr.bf16.mxu0 %v1149_v4  ;;  %v1152_v11 = vld [vmem:[%s1223_s27 + $0x48] sm:$0xff]   ;;  %v1154_v13 = vld [vmem:[%s1223_s27 + $0x50] sm:$0xff]  }
  0x10   : > { %1101 = vmatprep.mubr.bf16.mxu1 %v1150_v5  ;;  %v1155_v14 = vld [vmem:[%s1223_s27 + $0x18] sm:$0xff]   ;;  %v1157_v16 = vld [vmem:[%s1223_s27 + $0x20] sm:$0xff]   ;;  %v1159_v18 = vld [vmem:[%s1223_s27 + $0x28] sm:$0xff]  }
  0x11   : > { %1072 = vmatpush3.bf16.msra.mxu0 %v1142_v1  ;;  %1126 = vmatpush3.bf16.msra.mxu1 %v1142_v1  ;;  %v1156_v15 = vld [vmem:[%s1223_s27 + $0x58] sm:$0xff]   ;;  %v1158_v17 = vld [vmem:[%s1223_s27 + $0x60] sm:$0xff]   ;;  %v1160_v19 = vld [vmem:[%s1223_s27 + $0x68] sm:$0xff]  }
  0x12   : > { %1073 = vmatprep.subr.bf16.mxu0 %v1143_v2  ;;  %1119 = vmatprep.subr.bf16.mxu1 %v1143_v2  ;;  %v1161_v20 = vld [vmem:[%s1223_s27 + $0x30] sm:$0xff]   ;;  %v1163_v22 = vld [vmem:[%s1223_s27 + $0x38] sm:$0xff]   ;;  %v1259_v24 = vld [vmem:[%s1358_s2] ss:$0 sm:$0xff] }
  0x13   : > { %v1162_v21 = vld [vmem:[%s1223_s27 + $0x70] sm:$0xff]   ;;  %v1164_v23 = vld [vmem:[%s1223_s27 + $0x78] sm:$0xff]   ;;  %v1266_v31 = vld [vmem:[%s1359_s3] ss:$0 sm:$0xff] }
  0x15   : > { %1074 = vmatpush3.bf16.msra.mxu0 %v1143_v2  ;;  %1127 = vmatpush3.bf16.msra.mxu1 %v1143_v2 }
  0x16   : > { %1075 = vmatprep.subr.bf16.mxu0 %v1144_v3  ;;  %1120 = vmatprep.subr.bf16.mxu1 %v1144_v3 }
  0x19   : > { %1076 = vmatpush3.bf16.msra.mxu0 %v1144_v3  ;;  %1128 = vmatpush3.bf16.msra.mxu1 %v1144_v3 }
  0x1a   : > { %1077 = vmatprep.subr.bf16.mxu0 %v1145_v6  ;;  %1121 = vmatprep.subr.bf16.mxu1 %v1145_v6 }
  0x1d   : > { %1078 = vmatpush3.bf16.msra.mxu0 %v1145_v6  ;;  %1129 = vmatpush3.bf16.msra.mxu1 %v1145_v6 }
  0x1e   : > { %1079 = vmatprep.subr.bf16.mxu0 %v1146_v7  ;;  %1122 = vmatprep.subr.bf16.mxu1 %v1146_v7 }
  0x21   : > { %1080 = vmatpush3.bf16.msra.mxu0 %v1146_v7  ;;  %1130 = vmatpush3.bf16.msra.mxu1 %v1146_v7 }
  0x22   : > { %1081 = vmatprep.subr.bf16.mxu0 %v1147_v8  ;;  %1123 = vmatprep.subr.bf16.mxu1 %v1147_v8 }
  0x25   : > { %1082 = vmatpush3.bf16.msra.mxu0 %v1147_v8  ;;  %1131 = vmatpush3.bf16.msra.mxu1 %v1147_v8 }
  0x26   : > { %1083 = vmatprep.subr.bf16.mxu0 %v1148_v9  ;;  %1124 = vmatprep.subr.bf16.mxu1 %v1148_v9 }
  0x29   : > { %1084 = vmatpush3.bf16.msra.mxu0 %v1148_v9  ;;  %1132 = vmatpush3.bf16.msra.mxu1 %v1148_v9 }
  0x2c   : > { %1086 = vmatmul.mubr.bf16.vlgmr.msra.gmra.mxu0 %v1151_v10  ;;  %1102 = vmatmul.mubr.bf16.vlgmr.msra.gmra.mxu1 %v1152_v11 }
  0x2d   : > { %1089 = vmatprep.mubr.bf16.mxu0 %v1153_v12  ;;  %1105 = vmatprep.mubr.bf16.mxu1 %v1154_v13 }
  0x34   : > { %1090 = vmatmul.mubr.bf16.gmra.mxu0 %v1155_v14  ;;  %1106 = vmatmul.mubr.bf16.gmra.mxu1 %v1156_v15 }
  0x35   : > { %1093 = vmatprep.mubr.bf16.mxu0 %v1157_v16  ;;  %1109 = vmatprep.mubr.bf16.mxu1 %v1158_v17 }
  0x3c   : > { %1094 = vmatmul.mubr.bf16.gmra.mxu0 %v1159_v18  ;;  %1110 = vmatmul.mubr.bf16.gmra.mxu1 %v1160_v19 }
  0x3d   : > { %1097 = vmatprep.mubr.bf16.mxu0 %v1161_v20  ;;  %1113 = vmatprep.mubr.bf16.mxu1 %v1162_v21 }
  0x44   : > { %1098 = vmatmul.mubr.bf16.gmra.mxu0 %v1163_v22  ;;  %1114 = vmatmul.mubr.bf16.gmra.mxu1 %v1164_v23 }
  0xec   : > { %v1087_v25 = vpop.f32.mrf.mxu0  ;;  %v1103_v26 = vpop.f32.mrf.mxu1 }
  0xed   : > { %v564_v27 = vmul.f32 %v1087_v25, %v1259_v24  ;;  %v580_v28 = vmul.f32 %v1103_v26, %v1259_v24 }
  0xee   : > { %v428_v29 = vpop.f32.mrf.mxu0  ;;  %v492_v30 = vpop.f32.mrf.mxu1 }
  0xef   : > { %v562_v32 = vmul.f32 %v1259_v24, %v428_v29  ;;  %v578_v33 = vmul.f32 %v1259_v24, %v492_v30  ;;  %v603_v38 = vadd.f32 %v1266_v31, %v564_v27  ;;  %v619_v39 = vadd.f32 %v1266_v31, %v580_v28 }
  0xf0   : > { %v1088_v34 = vpop.f32.mrf.mxu0  ;;  %v1104_v35 = vpop.f32.mrf.mxu1 }
  0xf1   : > { %v565_v36 = vmul.f32 %v1088_v34, %v1259_v24  ;;  %v581_v37 = vmul.f32 %v1104_v35, %v1259_v24  ;;  %v601_v46 = vadd.f32 %v1266_v31, %v562_v32  ;;  %v617_v47 = vadd.f32 %v1266_v31, %v578_v33 }
  0xf2   : > { %v431_v40 = vpop.f32.mrf.mxu0  ;;  %v495_v41 = vpop.f32.mrf.mxu1 }
  0xf3   : > { %v604_v42 = vadd.f32 %v1266_v31, %v565_v36  ;;  %v620_v43 = vadd.f32 %v1266_v31, %v581_v37  ;;  %v563_v44 = vmul.f32 %v1259_v24, %v431_v40  ;;  %v579_v45 = vmul.f32 %v1259_v24, %v495_v41 }
  0xf4   : > { %v1091_v48 = vpop.f32.mrf.mxu0  ;;  %v1107_v49 = vpop.f32.mrf.mxu1 }
  0xf5   : > { %v958_v50 = vpack.c.bf16 %v604_v42, %v603_v38  ;;  %v998_v51 = vpack.c.bf16 %v620_v43, %v619_v39  ;;  %v602_v52 = vadd.f32 %v1266_v31, %v563_v44  ;;  %v618_v53 = vadd.f32 %v1266_v31, %v579_v45 }
  0xf6   : > { %v568_v54 = vmul.f32 %v1091_v48, %v1259_v24  ;;  %v584_v55 = vmul.f32 %v1107_v49, %v1259_v24  ;;  %v444_v56 = vpop.f32.mrf.mxu0  ;;  %v508_v57 = vpop.f32.mrf.mxu1 }
  0xf7   : > { %1030 = vst [vmem:[%s1285_s20 + $0x8] sm:$0xff] %v958_v50   ;;  %1038 = vst [vmem:[%s1285_s20 + $0x48] sm:$0xff] %v998_v51   ;;  %v953_v58 = vpack.c.bf16 %v602_v52, %v601_v46  ;;  %v993_v59 = vpack.c.bf16 %v618_v53, %v617_v47  ;;  %v566_v60 = vmul.f32 %v1259_v24, %v444_v56 }
  0xf8   : > { %v582_v61 = vmul.f32 %v1259_v24, %v508_v57  ;;  %v1092_v62 = vpop.f32.mrf.mxu0  ;;  %v1108_v63 = vpop.f32.mrf.mxu1  ;;  %v607_v2 = vadd.f32 %v1266_v31, %v568_v54  ;;  %v623_v3 = vadd.f32 %v1266_v31, %v584_v55 }
  0xf9   : > { %954 = vst [vmem:[%s1285_s20] sm:$0xff] %v953_v58   ;;  %1037 = vst [vmem:[%s1285_s20 + $0x40] sm:$0xff] %v993_v59   ;;  %v569_v0 = vmul.f32 %v1092_v62, %v1259_v24  ;;  %v585_v1 = vmul.f32 %v1108_v63, %v1259_v24  ;;  %v605_v10 = vadd.f32 %v1266_v31, %v566_v60 }
  0xfa   : > { %v447_v4 = vpop.f32.mrf.mxu0  ;;  %v511_v5 = vpop.f32.mrf.mxu1  ;;  %v621_v11 = vadd.f32 %v1266_v31, %v582_v61 }
  0xfb   : > { %v608_v6 = vadd.f32 %v1266_v31, %v569_v0  ;;  %v624_v7 = vadd.f32 %v1266_v31, %v585_v1  ;;  %v567_v8 = vmul.f32 %v1259_v24, %v447_v4  ;;  %v583_v9 = vmul.f32 %v1259_v24, %v511_v5 }
  0xfc   : > { %v1095_v12 = vpop.f32.mrf.mxu0  ;;  %v1111_v13 = vpop.f32.mrf.mxu1 }
  0xfd   : > { %v968_v14 = vpack.c.bf16 %v608_v6, %v607_v2  ;;  %v1008_v15 = vpack.c.bf16 %v624_v7, %v623_v3  ;;  %v606_v16 = vadd.f32 %v1266_v31, %v567_v8  ;;  %v622_v17 = vadd.f32 %v1266_v31, %v583_v9 }
  0xfe   : > { %v572_v18 = vmul.f32 %v1095_v12, %v1259_v24  ;;  %v588_v19 = vmul.f32 %v1111_v13, %v1259_v24  ;;  %v460_v20 = vpop.f32.mrf.mxu0  ;;  %v524_v21 = vpop.f32.mrf.mxu1 }
  0xff   : > { %1032 = vst [vmem:[%s1285_s20 + $0x18] sm:$0xff] %v968_v14   ;;  %1040 = vst [vmem:[%s1285_s20 + $0x58] sm:$0xff] %v1008_v15   ;;  %v963_v22 = vpack.c.bf16 %v606_v16, %v605_v10  ;;  %v1003_v23 = vpack.c.bf16 %v622_v17, %v621_v11  ;;  %v570_v25 = vmul.f32 %v1259_v24, %v460_v20 }
 0x100   : > { %v586_v26 = vmul.f32 %v1259_v24, %v524_v21  ;;  %v1096_v27 = vpop.f32.mrf.mxu0  ;;  %v1112_v28 = vpop.f32.mrf.mxu1  ;;  %v611_v32 = vadd.f32 %v1266_v31, %v572_v18  ;;  %v627_v33 = vadd.f32 %v1266_v31, %v588_v19 }
 0x101   : > { %1031 = vst [vmem:[%s1285_s20 + $0x10] sm:$0xff] %v963_v22   ;;  %1039 = vst [vmem:[%s1285_s20 + $0x50] sm:$0xff] %v1003_v23   ;;  %v573_v29 = vmul.f32 %v1096_v27, %v1259_v24  ;;  %v589_v30 = vmul.f32 %v1112_v28, %v1259_v24  ;;  %v609_v40 = vadd.f32 %v1266_v31, %v570_v25 }
 0x102   : > { %v463_v34 = vpop.f32.mrf.mxu0  ;;  %v527_v35 = vpop.f32.mrf.mxu1  ;;  %v625_v41 = vadd.f32 %v1266_v31, %v586_v26 }
 0x103   : > { %v612_v36 = vadd.f32 %v1266_v31, %v573_v29  ;;  %v628_v37 = vadd.f32 %v1266_v31, %v589_v30  ;;  %v571_v38 = vmul.f32 %v1259_v24, %v463_v34  ;;  %v587_v39 = vmul.f32 %v1259_v24, %v527_v35 }
 0x104   : > { %v1099_v42 = vpop.f32.mrf.mxu0  ;;  %v1115_v43 = vpop.f32.mrf.mxu1 }
 0x105   : > { %v978_v44 = vpack.c.bf16 %v612_v36, %v611_v32  ;;  %v1018_v45 = vpack.c.bf16 %v628_v37, %v627_v33  ;;  %v610_v46 = vadd.f32 %v1266_v31, %v571_v38  ;;  %v626_v47 = vadd.f32 %v1266_v31, %v587_v39 }
 0x106   : > { %v576_v48 = vmul.f32 %v1099_v42, %v1259_v24  ;;  %v592_v49 = vmul.f32 %v1115_v43, %v1259_v24  ;;  %v476_v50 = vpop.f32.mrf.mxu0  ;;  %v540_v51 = vpop.f32.mrf.mxu1 }
 0x107   : > { %1034 = vst [vmem:[%s1285_s20 + $0x28] sm:$0xff] %v978_v44   ;;  %1042 = vst [vmem:[%s1285_s20 + $0x68] sm:$0xff] %v1018_v45   ;;  %v973_v52 = vpack.c.bf16 %v610_v46, %v609_v40  ;;  %v1013_v53 = vpack.c.bf16 %v626_v47, %v625_v41  ;;  %v574_v54 = vmul.f32 %v1259_v24, %v476_v50 }
 0x108   : > { %v590_v55 = vmul.f32 %v1259_v24, %v540_v51  ;;  %v1100_v56 = vpop.f32.mrf.mxu0  ;;  %v1116_v57 = vpop.f32.mrf.mxu1  ;;  %v615_v60 = vadd.f32 %v1266_v31, %v576_v48  ;;  %v631_v61 = vadd.f32 %v1266_v31, %v592_v49 }
 0x109   : > { %1033 = vst [vmem:[%s1285_s20 + $0x20] sm:$0xff] %v973_v52   ;;  %1041 = vst [vmem:[%s1285_s20 + $0x60] sm:$0xff] %v1013_v53   ;;  %v577_v58 = vmul.f32 %v1100_v56, %v1259_v24  ;;  %v593_v59 = vmul.f32 %v1116_v57, %v1259_v24  ;;  %v613_v4 = vadd.f32 %v1266_v31, %v574_v54 }
 0x10a   : > { %v479_v62 = vpop.f32.mrf.mxu0  ;;  %v543_v63 = vpop.f32.mrf.mxu1  ;;  %v629_v5 = vadd.f32 %v1266_v31, %v590_v55 }
 0x10b   : > { %v616_v0 = vadd.f32 %v1266_v31, %v577_v58  ;;  %v632_v1 = vadd.f32 %v1266_v31, %v593_v59  ;;  %v575_v2 = vmul.f32 %v1259_v24, %v479_v62  ;;  %v591_v3 = vmul.f32 %v1259_v24, %v543_v63 }
 0x10d   : > { %v988_v6 = vpack.c.bf16 %v616_v0, %v615_v60  ;;  %v1028_v7 = vpack.c.bf16 %v632_v1, %v631_v61  ;;  %v614_v8 = vadd.f32 %v1266_v31, %v575_v2  ;;  %v630_v9 = vadd.f32 %v1266_v31, %v591_v3 }
 0x10f   : > { %1036 = vst [vmem:[%s1285_s20 + $0x38] sm:$0xff] %v988_v6   ;;  %1044 = vst [vmem:[%s1285_s20 + $0x78] sm:$0xff] %v1028_v7   ;;  %v983_v10 = vpack.c.bf16 %v614_v8, %v613_v4  ;;  %v1023_v11 = vpack.c.bf16 %v630_v9, %v629_v5 }
 0x111   : > { %1035 = vst [vmem:[%s1285_s20 + $0x30] sm:$0xff] %v983_v10   ;;  %1043 = vst [vmem:[%s1285_s20 + $0x70] sm:$0xff] %v1023_v11  }
 0x112 PF: > { %s14_s15 = sadd.s32 1, %s1171_s15  }
 0x113   : > { %p11_p4 = scmp.ge.s32.totalorder %s14_s15, 4  }
 0x115   :  { %13 = sbr.rel (!%p11_p4) target bundleno = 1 (0x1), region = 66 }

// kernel: _lambda_.12
= control target key start
LH: loop header
LB: loop body
LE: loop exit
PB: predicated region body
PF: predicated region fallthrough
CT: control target
= control target key end

     0   :  { %s1230_s15 = smov 0   ;;  %s1388_s0 = inlined_call_operand.vmem [shape: bf16[512,128], index: 0, kind: input, shape index: {}]   ;;  %s1389_s1 = inlined_call_operand.vmem [shape: bf16[128,128], index: 1, kind: input, shape index: {}]   ;;  %s1390_s2 = inlined_call_operand.vmem [shape: f32[1,128], index: 2, kind: input, shape index: {}]   ;;  %s1391_s3 = inlined_call_operand.vmem [shape: f32[1,128], index: 3, kind: input, shape index: {}]   ;;  %s1392_s4 = inlined_call_operand.vmem [shape: bf16[512,128], index: 4, kind: output, shape index: {}]  }
   0x1 LB: > { %s881_s16 = sadd.s32 4294967295, %s1203_s15   ;;  %p885_p0 = scmp.ge.s32.totalorder %s1203_s15, 1  ;;  %s1203_s15 = sphi %s1230_s15, %s14_s15  }
   0x2   : > { %p163_p1 = scmp.lt.s32.totalorder %s1203_s15, 3 }
   0x4   : > { %p164_p2 = pnand %p885_p0, %p163_p1 }
   0x5   : > { %s886_s19 = sshll.u32 (!%p164_p2), %s881_s16, 5 }
   0x6   : > { %167 = sbr.rel (%p164_p2) target bundleno = 276 (0x114), region = 36  ;;  %p190_p3 = scmp.lt.s32.totalorder (!%p164_p2), %s886_s19, 63 }
   0xb   : > { %v1173_v0 = vld [vmem:[%s1389_s1 + $0x38] sm:$0xff]   ;;  %v1174_v1 = vld [vmem:[%s1389_s1 + $0x30] sm:$0xff]   ;;  %s1394_s19 = smov (!%p190_p3, %s886_s19), 63  ;;  %v1175_v2 = vld [vmem:[%s1389_s1 + $0x28] sm:$0xff]  }
   0xc   : > { %1101 = vmatprep.subr.bf16.mxu0 %v1173_v0  ;;  %1149 = vmatprep.subr.bf16.mxu1 %v1173_v0  ;;  %s887_s24 = sshll.u32 %s1394_s19, 2  ;;  %v1176_v3 = vld [vmem:[%s1389_s1 + $0x20] sm:$0xff]   ;;  %v1177_v6 = vld [vmem:[%s1389_s1 + $0x18] sm:$0xff]   ;;  %v1178_v7 = vld [vmem:[%s1389_s1 + $0x10] sm:$0xff]  }
   0xd   : > { %1102 = vmatpush3.bf16.msra.mxu0 %v1173_v0  ;;  %1157 = vmatpush3.bf16.msra.mxu1 %v1173_v0  ;;  %s1255_s27 = scalar_lea.vmem %s1388_s0, %s887_s24  ;;  %v1179_v8 = vld [vmem:[%s1389_s1 + $0x8] sm:$0xff]   ;;  %v1180_v9 = vld [vmem:[%s1389_s1] sm:$0xff]   ;;  %s1321_s20 = scalar_lea.vmem %s1392_s4, %s887_s24 }
   0xe   : > { %1103 = vmatprep.subr.bf16.mxu0 %v1174_v1  ;;  %1150 = vmatprep.subr.bf16.mxu1 %v1174_v1  ;;  %v1181_v4 = vld [vmem:[%s1255_s27] sm:$0xff]   ;;  %v1183_v10 = vld [vmem:[%s1255_s27 + $0x8] sm:$0xff]   ;;  %v1185_v12 = vld [vmem:[%s1255_s27 + $0x10] sm:$0xff]  }
   0xf   : > { %v1182_v5 = vld [vmem:[%s1255_s27 + $0x40] sm:$0xff]   ;;  %1117 = vmatprep.mubr.bf16.mxu0 %v1181_v4  ;;  %v1184_v11 = vld [vmem:[%s1255_s27 + $0x48] sm:$0xff]   ;;  %v1186_v13 = vld [vmem:[%s1255_s27 + $0x50] sm:$0xff]  }
  0x10   : > { %1133 = vmatprep.mubr.bf16.mxu1 %v1182_v5  ;;  %v1187_v14 = vld [vmem:[%s1255_s27 + $0x18] sm:$0xff]   ;;  %v1189_v16 = vld [vmem:[%s1255_s27 + $0x20] sm:$0xff]   ;;  %v1191_v18 = vld [vmem:[%s1255_s27 + $0x28] sm:$0xff]  }
  0x11   : > { %1104 = vmatpush3.bf16.msra.mxu0 %v1174_v1  ;;  %1158 = vmatpush3.bf16.msra.mxu1 %v1174_v1  ;;  %v1188_v15 = vld [vmem:[%s1255_s27 + $0x58] sm:$0xff]   ;;  %v1190_v17 = vld [vmem:[%s1255_s27 + $0x60] sm:$0xff]   ;;  %v1192_v19 = vld [vmem:[%s1255_s27 + $0x68] sm:$0xff]  }
  0x12   : > { %1105 = vmatprep.subr.bf16.mxu0 %v1175_v2  ;;  %1151 = vmatprep.subr.bf16.mxu1 %v1175_v2  ;;  %v1193_v20 = vld [vmem:[%s1255_s27 + $0x30] sm:$0xff]   ;;  %v1195_v22 = vld [vmem:[%s1255_s27 + $0x38] sm:$0xff]   ;;  %v1291_v24 = vld [vmem:[%s1390_s2] ss:$0 sm:$0xff] }
  0x13   : > { %v1194_v21 = vld [vmem:[%s1255_s27 + $0x70] sm:$0xff]   ;;  %v1196_v23 = vld [vmem:[%s1255_s27 + $0x78] sm:$0xff]   ;;  %v1298_v29 = vld [vmem:[%s1391_s3] ss:$0 sm:$0xff] }
  0x15   : > { %1106 = vmatpush3.bf16.msra.mxu0 %v1175_v2  ;;  %1159 = vmatpush3.bf16.msra.mxu1 %v1175_v2 }
  0x16   : > { %1107 = vmatprep.subr.bf16.mxu0 %v1176_v3  ;;  %1152 = vmatprep.subr.bf16.mxu1 %v1176_v3 }
  0x19   : > { %1108 = vmatpush3.bf16.msra.mxu0 %v1176_v3  ;;  %1160 = vmatpush3.bf16.msra.mxu1 %v1176_v3 }
  0x1a   : > { %1109 = vmatprep.subr.bf16.mxu0 %v1177_v6  ;;  %1153 = vmatprep.subr.bf16.mxu1 %v1177_v6 }
  0x1d   : > { %1110 = vmatpush3.bf16.msra.mxu0 %v1177_v6  ;;  %1161 = vmatpush3.bf16.msra.mxu1 %v1177_v6 }
  0x1e   : > { %1111 = vmatprep.subr.bf16.mxu0 %v1178_v7  ;;  %1154 = vmatprep.subr.bf16.mxu1 %v1178_v7 }
  0x21   : > { %1112 = vmatpush3.bf16.msra.mxu0 %v1178_v7  ;;  %1162 = vmatpush3.bf16.msra.mxu1 %v1178_v7 }
  0x22   : > { %1113 = vmatprep.subr.bf16.mxu0 %v1179_v8  ;;  %1155 = vmatprep.subr.bf16.mxu1 %v1179_v8 }
  0x25   : > { %1114 = vmatpush3.bf16.msra.mxu0 %v1179_v8  ;;  %1163 = vmatpush3.bf16.msra.mxu1 %v1179_v8 }
  0x26   : > { %1115 = vmatprep.subr.bf16.mxu0 %v1180_v9  ;;  %1156 = vmatprep.subr.bf16.mxu1 %v1180_v9 }
  0x29   : > { %1116 = vmatpush3.bf16.msra.mxu0 %v1180_v9  ;;  %1164 = vmatpush3.bf16.msra.mxu1 %v1180_v9 }
  0x2c   : > { %1118 = vmatmul.mubr.bf16.vlgmr.msra.gmra.mxu0 %v1183_v10  ;;  %1134 = vmatmul.mubr.bf16.vlgmr.msra.gmra.mxu1 %v1184_v11 }
  0x2d   : > { %1121 = vmatprep.mubr.bf16.mxu0 %v1185_v12  ;;  %1137 = vmatprep.mubr.bf16.mxu1 %v1186_v13 }
  0x34   : > { %1122 = vmatmul.mubr.bf16.gmra.mxu0 %v1187_v14  ;;  %1138 = vmatmul.mubr.bf16.gmra.mxu1 %v1188_v15 }
  0x35   : > { %1125 = vmatprep.mubr.bf16.mxu0 %v1189_v16  ;;  %1141 = vmatprep.mubr.bf16.mxu1 %v1190_v17 }
  0x3c   : > { %1126 = vmatmul.mubr.bf16.gmra.mxu0 %v1191_v18  ;;  %1142 = vmatmul.mubr.bf16.gmra.mxu1 %v1192_v19 }
  0x3d   : > { %1129 = vmatprep.mubr.bf16.mxu0 %v1193_v20  ;;  %1145 = vmatprep.mubr.bf16.mxu1 %v1194_v21 }
  0x44   : > { %1130 = vmatmul.mubr.bf16.gmra.mxu0 %v1195_v22  ;;  %1146 = vmatmul.mubr.bf16.gmra.mxu1 %v1196_v23 }
  0xec   : > { %v1119_v25 = vpop.f32.mrf.mxu0  ;;  %v1135_v26 = vpop.f32.mrf.mxu1 }
  0xed   : > { %v564_v27 = vmul.f32 %v1119_v25, %v1291_v24  ;;  %v580_v28 = vmul.f32 %v1135_v26, %v1291_v24 }
  0xee   : > { %v428_v30 = vpop.f32.mrf.mxu0  ;;  %v492_v31 = vpop.f32.mrf.mxu1 }
  0xef   : > { %v562_v32 = vmul.f32 %v1291_v24, %v428_v30  ;;  %v578_v33 = vmul.f32 %v1291_v24, %v492_v31  ;;  %v603_v36 = vadd.f32 %v1298_v29, %v564_v27  ;;  %v619_v37 = vadd.f32 %v1298_v29, %v580_v28 }
  0xf0   : > { %v1120_v34 = vpop.f32.mrf.mxu0  ;;  %v1136_v35 = vpop.f32.mrf.mxu1 }
  0xf1   : > { %v565_v38 = vmul.f32 %v1120_v34, %v1291_v24  ;;  %v581_v39 = vmul.f32 %v1136_v35, %v1291_v24  ;;  %v601_v42 = vadd.f32 %v1298_v29, %v562_v32  ;;  %v617_v43 = vadd.f32 %v1298_v29, %v578_v33 }
  0xf2   : > { %v431_v40 = vpop.f32.mrf.mxu0  ;;  %v495_v41 = vpop.f32.mrf.mxu1  ;;  %v635_v50 = vmax.f32 %v603_v36, 0.0  ;;  %v651_v51 = vmax.f32 %v619_v37, 0.0 }
  0xf3   : > { %v563_v44 = vmul.f32 %v1291_v24, %v431_v40  ;;  %v579_v45 = vmul.f32 %v1291_v24, %v495_v41  ;;  %v604_v46 = vadd.f32 %v1298_v29, %v565_v38  ;;  %v620_v47 = vadd.f32 %v1298_v29, %v581_v39 }
  0xf4   : > { %v1123_v48 = vpop.f32.mrf.mxu0  ;;  %v1139_v49 = vpop.f32.mrf.mxu1  ;;  %v633_v60 = vmax.f32 %v601_v42, 0.0  ;;  %v649_v61 = vmax.f32 %v617_v43, 0.0 }
  0xf5   : > { %v602_v52 = vadd.f32 %v1298_v29, %v563_v44  ;;  %v618_v53 = vadd.f32 %v1298_v29, %v579_v45  ;;  %v636_v54 = vmax.f32 %v604_v46, 0.0  ;;  %v652_v55 = vmax.f32 %v620_v47, 0.0 }
  0xf6   : > { %v568_v56 = vmul.f32 %v1123_v48, %v1291_v24  ;;  %v584_v57 = vmul.f32 %v1139_v49, %v1291_v24  ;;  %v444_v58 = vpop.f32.mrf.mxu0  ;;  %v508_v59 = vpop.f32.mrf.mxu1 }
  0xf7   : > { %v634_v62 = vmax.f32 %v602_v52, 0.0  ;;  %v650_v63 = vmax.f32 %v618_v53, 0.0  ;;  %v990_v0 = vpack.c.bf16 %v636_v54, %v635_v50  ;;  %v1030_v1 = vpack.c.bf16 %v652_v55, %v651_v51 }
  0xf8   : > { %v566_v2 = vmul.f32 %v1291_v24, %v444_v58  ;;  %v582_v3 = vmul.f32 %v1291_v24, %v508_v59  ;;  %v1124_v4 = vpop.f32.mrf.mxu0  ;;  %v1140_v5 = vpop.f32.mrf.mxu1  ;;  %v607_v8 = vadd.f32 %v1298_v29, %v568_v56  ;;  %v623_v9 = vadd.f32 %v1298_v29, %v584_v57 }
  0xf9   : > { %v985_v6 = vpack.c.bf16 %v634_v62, %v633_v60  ;;  %v1025_v7 = vpack.c.bf16 %v650_v63, %v649_v61  ;;  %1062 = vst [vmem:[%s1321_s20 + $0x8] sm:$0xff] %v990_v0   ;;  %1070 = vst [vmem:[%s1321_s20 + $0x48] sm:$0xff] %v1030_v1   ;;  %v569_v10 = vmul.f32 %v1124_v4, %v1291_v24 }
  0xfa   : > { %v585_v11 = vmul.f32 %v1140_v5, %v1291_v24  ;;  %v447_v12 = vpop.f32.mrf.mxu0  ;;  %v511_v13 = vpop.f32.mrf.mxu1  ;;  %v605_v14 = vadd.f32 %v1298_v29, %v566_v2  ;;  %v621_v15 = vadd.f32 %v1298_v29, %v582_v3  ;;  %v639_v27 = vmax.f32 %v607_v8, 0.0 }
  0xfb   : > { %986 = vst [vmem:[%s1321_s20] sm:$0xff] %v985_v6   ;;  %1069 = vst [vmem:[%s1321_s20 + $0x40] sm:$0xff] %v1025_v7   ;;  %v567_v16 = vmul.f32 %v1291_v24, %v447_v12  ;;  %v583_v17 = vmul.f32 %v1291_v24, %v511_v13  ;;  %v608_v18 = vadd.f32 %v1298_v29, %v569_v10  ;;  %v655_v28 = vmax.f32 %v623_v9, 0.0 }
  0xfc   : > { %v624_v19 = vadd.f32 %v1298_v29, %v585_v11  ;;  %v1127_v20 = vpop.f32.mrf.mxu0  ;;  %v1143_v21 = vpop.f32.mrf.mxu1  ;;  %v637_v34 = vmax.f32 %v605_v14, 0.0  ;;  %v653_v35 = vmax.f32 %v621_v15, 0.0 }
  0xfd   : > { %v606_v22 = vadd.f32 %v1298_v29, %v567_v16  ;;  %v622_v23 = vadd.f32 %v1298_v29, %v583_v17  ;;  %v572_v25 = vmul.f32 %v1127_v20, %v1291_v24  ;;  %v588_v26 = vmul.f32 %v1143_v21, %v1291_v24 }
  0xfe   : > { %v640_v30 = vmax.f32 %v608_v18, 0.0  ;;  %v656_v31 = vmax.f32 %v624_v19, 0.0  ;;  %v460_v32 = vpop.f32.mrf.mxu0  ;;  %v524_v33 = vpop.f32.mrf.mxu1 }
  0xff   : > { %v638_v36 = vmax.f32 %v606_v22, 0.0  ;;  %v654_v37 = vmax.f32 %v622_v23, 0.0  ;;  %v570_v40 = vmul.f32 %v1291_v24, %v460_v32  ;;  %v586_v41 = vmul.f32 %v1291_v24, %v524_v33 }
 0x100   : > { %v1000_v38 = vpack.c.bf16 %v640_v30, %v639_v27  ;;  %v1040_v39 = vpack.c.bf16 %v656_v31, %v655_v28  ;;  %v1128_v42 = vpop.f32.mrf.mxu0  ;;  %v1144_v43 = vpop.f32.mrf.mxu1  ;;  %v611_v46 = vadd.f32 %v1298_v29, %v572_v25  ;;  %v627_v47 = vadd.f32 %v1298_v29, %v588_v26 }
 0x101   : > { %v995_v44 = vpack.c.bf16 %v638_v36, %v637_v34  ;;  %v1035_v45 = vpack.c.bf16 %v654_v37, %v653_v35  ;;  %v573_v48 = vmul.f32 %v1128_v42, %v1291_v24  ;;  %v589_v49 = vmul.f32 %v1144_v43, %v1291_v24 }
 0x102   : > { %1064 = vst [vmem:[%s1321_s20 + $0x18] sm:$0xff] %v1000_v38   ;;  %1072 = vst [vmem:[%s1321_s20 + $0x58] sm:$0xff] %v1040_v39   ;;  %v463_v50 = vpop.f32.mrf.mxu0  ;;  %v527_v51 = vpop.f32.mrf.mxu1  ;;  %v609_v52 = vadd.f32 %v1298_v29, %v570_v40  ;;  %v625_v53 = vadd.f32 %v1298_v29, %v586_v41  ;;  %v643_v60 = vmax.f32 %v611_v46, 0.0  ;;  %v659_v61 = vmax.f32 %v627_v47, 0.0 }
 0x103   : > { %1063 = vst [vmem:[%s1321_s20 + $0x10] sm:$0xff] %v995_v44   ;;  %1071 = vst [vmem:[%s1321_s20 + $0x50] sm:$0xff] %v1035_v45   ;;  %v571_v54 = vmul.f32 %v1291_v24, %v463_v50  ;;  %v587_v55 = vmul.f32 %v1291_v24, %v527_v51  ;;  %v612_v56 = vadd.f32 %v1298_v29, %v573_v48 }
 0x104   : > { %v628_v57 = vadd.f32 %v1298_v29, %v589_v49  ;;  %v1131_v58 = vpop.f32.mrf.mxu0  ;;  %v1147_v59 = vpop.f32.mrf.mxu1  ;;  %v641_v6 = vmax.f32 %v609_v52, 0.0  ;;  %v657_v7 = vmax.f32 %v625_v53, 0.0 }
 0x105   : > { %v610_v62 = vadd.f32 %v1298_v29, %v571_v54  ;;  %v626_v63 = vadd.f32 %v1298_v29, %v587_v55  ;;  %v644_v0 = vmax.f32 %v612_v56, 0.0  ;;  %v576_v2 = vmul.f32 %v1131_v58, %v1291_v24 }
 0x106   : > { %v660_v1 = vmax.f32 %v628_v57, 0.0  ;;  %v592_v3 = vmul.f32 %v1147_v59, %v1291_v24  ;;  %v476_v4 = vpop.f32.mrf.mxu0  ;;  %v540_v5 = vpop.f32.mrf.mxu1 }
 0x107   : > { %v642_v8 = vmax.f32 %v610_v62, 0.0  ;;  %v658_v9 = vmax.f32 %v626_v63, 0.0  ;;  %v1010_v10 = vpack.c.bf16 %v644_v0, %v643_v60  ;;  %v574_v12 = vmul.f32 %v1291_v24, %v476_v4 }
 0x108   : > { %v1050_v11 = vpack.c.bf16 %v660_v1, %v659_v61  ;;  %v590_v13 = vmul.f32 %v1291_v24, %v540_v5  ;;  %v1132_v14 = vpop.f32.mrf.mxu0  ;;  %v1148_v15 = vpop.f32.mrf.mxu1  ;;  %v615_v18 = vadd.f32 %v1298_v29, %v576_v2  ;;  %v631_v19 = vadd.f32 %v1298_v29, %v592_v3 }
 0x109   : > { %v1005_v16 = vpack.c.bf16 %v642_v8, %v641_v6  ;;  %v1045_v17 = vpack.c.bf16 %v658_v9, %v657_v7  ;;  %1066 = vst [vmem:[%s1321_s20 + $0x28] sm:$0xff] %v1010_v10   ;;  %v577_v20 = vmul.f32 %v1132_v14, %v1291_v24  ;;  %v593_v21 = vmul.f32 %v1148_v15, %v1291_v24 }
 0x10a   : > { %1074 = vst [vmem:[%s1321_s20 + $0x68] sm:$0xff] %v1050_v11   ;;  %v479_v22 = vpop.f32.mrf.mxu0  ;;  %v543_v23 = vpop.f32.mrf.mxu1  ;;  %v613_v25 = vadd.f32 %v1298_v29, %v574_v12  ;;  %v629_v26 = vadd.f32 %v1298_v29, %v590_v13  ;;  %v647_v34 = vmax.f32 %v615_v18, 0.0  ;;  %v663_v35 = vmax.f32 %v631_v19, 0.0 }
 0x10b   : > { %1065 = vst [vmem:[%s1321_s20 + $0x20] sm:$0xff] %v1005_v16   ;;  %1073 = vst [vmem:[%s1321_s20 + $0x60] sm:$0xff] %v1045_v17   ;;  %v575_v27 = vmul.f32 %v1291_v24, %v479_v22  ;;  %v591_v28 = vmul.f32 %v1291_v24, %v543_v23  ;;  %v616_v30 = vadd.f32 %v1298_v29, %v577_v20 }
 0x10c   : > { %v632_v31 = vadd.f32 %v1298_v29, %v593_v21  ;;  %v645_v38 = vmax.f32 %v613_v25, 0.0  ;;  %v661_v39 = vmax.f32 %v629_v26, 0.0 }
 0x10d   : > { %v614_v32 = vadd.f32 %v1298_v29, %v575_v27  ;;  %v630_v33 = vadd.f32 %v1298_v29, %v591_v28  ;;  %v648_v36 = vmax.f32 %v616_v30, 0.0 }
 0x10e   : > { %v664_v37 = vmax.f32 %v632_v31, 0.0 }
 0x10f   : > { %v646_v40 = vmax.f32 %v614_v32, 0.0  ;;  %v662_v24 = vmax.f32 %v630_v33, 0.0  ;;  %v1020_v41 = vpack.c.bf16 %v648_v36, %v647_v34 }
 0x110   : > { %v1060_v42 = vpack.c.bf16 %v664_v37, %v663_v35 }
 0x111   : > { %v1015_v43 = vpack.c.bf16 %v646_v40, %v645_v38  ;;  %v1055_v44 = vpack.c.bf16 %v662_v24, %v661_v39  ;;  %1068 = vst [vmem:[%s1321_s20 + $0x38] sm:$0xff] %v1020_v41  }
 0x112   : > { %1076 = vst [vmem:[%s1321_s20 + $0x78] sm:$0xff] %v1060_v42  }
 0x113   : > { %1067 = vst [vmem:[%s1321_s20 + $0x30] sm:$0xff] %v1015_v43   ;;  %1075 = vst [vmem:[%s1321_s20 + $0x70] sm:$0xff] %v1055_v44  }
 0x114 PF: > { %s14_s15 = sadd.s32 1, %s1203_s15  }
 0x115   : > { %p11_p4 = scmp.ge.s32.totalorder %s14_s15, 4  }
 0x117   :  { %13 = sbr.rel (!%p11_p4) target bundleno = 1 (0x1), region = 66 }

// kernel: _lambda_.14
= control target key start
LH: loop header
LB: loop body
LE: loop exit
PB: predicated region body
PF: predicated region fallthrough
CT: control target
= control target key end

     0   :  { %s658_s15 = smov 0   ;;  %s718_s0 = inlined_call_operand.vmem [shape: bf16[128,128], index: 0, kind: input, shape index: {}]   ;;  %s719_s1 = inlined_call_operand.vmem [shape: bf16[128,128], index: 1, kind: input, shape index: {}]   ;;  %s720_s2 = inlined_call_operand.vmem [shape: f32[1,128], index: 2, kind: input, shape index: {}]   ;;  %s721_s3 = inlined_call_operand.vmem [shape: f32[1,128], index: 3, kind: input, shape index: {}]   ;;  %s722_s4 = inlined_call_operand.vmem [shape: bf16[128,128], index: 4, kind: output, shape index: {}]  }
   0x1 LB: > { %s489_s16 = sadd.s32 4294967295, %s631_s15   ;;  %p493_p0 = scmp.ge.s32.totalorder %s631_s15, 1  ;;  %s631_s15 = sphi %s658_s15, %s14_s15  }
   0x2   : > { %p163_p1 = scmp.lt.s32.totalorder %s631_s15, 3 }
   0x4   : > { %p164_p2 = pnand %p493_p0, %p163_p1 }
   0x5   : > { %s494_s19 = sshll.u32 (!%p164_p2), %s489_s16, 3 }
   0x6   : > { %167 = sbr.rel (%p164_p2) target bundleno = 250 (0xfa), region = 36  ;;  %p190_p3 = scmp.lt.s32.totalorder (!%p164_p2), %s494_s19, 15 }
   0xb   : > { %v613_v0 = vld [vmem:[%s719_s1 + $0x38] sm:$0xff]   ;;  %v614_v1 = vld [vmem:[%s719_s1 + $0x30] sm:$0xff]   ;;  %s724_s19 = smov (!%p190_p3, %s494_s19), 15  ;;  %v615_v2 = vld [vmem:[%s719_s1 + $0x28] sm:$0xff]  }
   0xc   : > { %565 = vmatprep.subr.bf16.mxu0 %v613_v0  ;;  %589 = vmatprep.subr.bf16.mxu1 %v613_v0  ;;  %s495_s24 = sshll.u32 %s724_s19, 2  ;;  %v616_v3 = vld [vmem:[%s719_s1 + $0x20] sm:$0xff]   ;;  %v617_v6 = vld [vmem:[%s719_s1 + $0x18] sm:$0xff]   ;;  %v618_v7 = vld [vmem:[%s719_s1 + $0x10] sm:$0xff]  }
   0xd   : > { %566 = vmatpush3.bf16.msra.mxu0 %v613_v0  ;;  %597 = vmatpush3.bf16.msra.mxu1 %v613_v0  ;;  %s683_s27 = scalar_lea.vmem %s718_s0, %s495_s24  ;;  %v619_v8 = vld [vmem:[%s719_s1 + $0x8] sm:$0xff]   ;;  %v620_v9 = vld [vmem:[%s719_s1] sm:$0xff]   ;;  %s199_s20 = scalar_lea.vmem %s722_s4, %s495_s24 }
   0xe   : > { %567 = vmatprep.subr.bf16.mxu0 %v614_v1  ;;  %590 = vmatprep.subr.bf16.mxu1 %v614_v1  ;;  %v621_v4 = vld [vmem:[%s683_s27] sm:$0xff]   ;;  %v622_v5 = vld [vmem:[%s683_s27 + $0x10] sm:$0xff]   ;;  %v623_v10 = vld [vmem:[%s683_s27 + $0x8] sm:$0xff]  }
   0xf   : > { %581 = vmatprep.mubr.bf16.mxu0 %v621_v4  ;;  %585 = vmatprep.mubr.bf16.mxu1 %v622_v5  ;;  %v624_v11 = vld [vmem:[%s683_s27 + $0x18] sm:$0xff]   ;;  %v510_v12 = vld [vmem:[%s720_s2] ss:$0 sm:$0xff] }
  0x10   : > { %v511_v19 = vld [vmem:[%s721_s3] ss:$0 sm:$0xff] }
  0x11   : > { %568 = vmatpush3.bf16.msra.mxu0 %v614_v1  ;;  %598 = vmatpush3.bf16.msra.mxu1 %v614_v1 }
  0x12   : > { %569 = vmatprep.subr.bf16.mxu0 %v615_v2  ;;  %591 = vmatprep.subr.bf16.mxu1 %v615_v2 }
  0x15   : > { %570 = vmatpush3.bf16.msra.mxu0 %v615_v2  ;;  %599 = vmatpush3.bf16.msra.mxu1 %v615_v2 }
  0x16   : > { %571 = vmatprep.subr.bf16.mxu0 %v616_v3  ;;  %592 = vmatprep.subr.bf16.mxu1 %v616_v3 }
  0x19   : > { %572 = vmatpush3.bf16.msra.mxu0 %v616_v3  ;;  %600 = vmatpush3.bf16.msra.mxu1 %v616_v3 }
  0x1a   : > { %573 = vmatprep.subr.bf16.mxu0 %v617_v6  ;;  %593 = vmatprep.subr.bf16.mxu1 %v617_v6 }
  0x1d   : > { %574 = vmatpush3.bf16.msra.mxu0 %v617_v6  ;;  %601 = vmatpush3.bf16.msra.mxu1 %v617_v6 }
  0x1e   : > { %575 = vmatprep.subr.bf16.mxu0 %v618_v7  ;;  %594 = vmatprep.subr.bf16.mxu1 %v618_v7 }
  0x21   : > { %576 = vmatpush3.bf16.msra.mxu0 %v618_v7  ;;  %602 = vmatpush3.bf16.msra.mxu1 %v618_v7 }
  0x22   : > { %577 = vmatprep.subr.bf16.mxu0 %v619_v8  ;;  %595 = vmatprep.subr.bf16.mxu1 %v619_v8 }
  0x25   : > { %578 = vmatpush3.bf16.msra.mxu0 %v619_v8  ;;  %603 = vmatpush3.bf16.msra.mxu1 %v619_v8 }
  0x26   : > { %579 = vmatprep.subr.bf16.mxu0 %v620_v9  ;;  %596 = vmatprep.subr.bf16.mxu1 %v620_v9 }
  0x29   : > { %580 = vmatpush3.bf16.msra.mxu0 %v620_v9  ;;  %604 = vmatpush3.bf16.msra.mxu1 %v620_v9 }
  0x2c   : > { %582 = vmatmul.mubr.bf16.vlgmr.msra.gmra.mxu0 %v623_v10  ;;  %586 = vmatmul.mubr.bf16.vlgmr.msra.gmra.mxu1 %v624_v11 }
  0xec   : > { %v583_v13 = vpop.f32.mrf.mxu0  ;;  %v587_v14 = vpop.f32.mrf.mxu1 }
  0xed   : > { %v372_v15 = vmul.f32 %v583_v13, %v510_v12  ;;  %v376_v16 = vmul.f32 %v587_v14, %v510_v12 }
  0xee   : > { %v332_v17 = vpop.f32.mrf.mxu0  ;;  %v348_v18 = vpop.f32.mrf.mxu1 }
  0xef   : > { %v370_v20 = vmul.f32 %v510_v12, %v332_v17  ;;  %v374_v21 = vmul.f32 %v510_v12, %v348_v18  ;;  %v387_v26 = vadd.f32 %v511_v19, %v372_v15  ;;  %v391_v27 = vadd.f32 %v511_v19, %v376_v16 }
  0xf0   : > { %v584_v22 = vpop.f32.mrf.mxu0  ;;  %v588_v23 = vpop.f32.mrf.mxu1 }
  0xf1   : > { %v373_v24 = vmul.f32 %v584_v22, %v510_v12  ;;  %v377_v25 = vmul.f32 %v588_v23, %v510_v12  ;;  %v385_v34 = vadd.f32 %v511_v19, %v370_v20  ;;  %v389_v35 = vadd.f32 %v511_v19, %v374_v21 }
  0xf2   : > { %v335_v28 = vpop.f32.mrf.mxu0  ;;  %v351_v29 = vpop.f32.mrf.mxu1 }
  0xf3   : > { %v388_v30 = vadd.f32 %v511_v19, %v373_v24  ;;  %v392_v31 = vadd.f32 %v511_v19, %v377_v25  ;;  %v371_v32 = vmul.f32 %v510_v12, %v335_v28  ;;  %v375_v33 = vmul.f32 %v510_v12, %v351_v29 }
  0xf5   : > { %v538_v36 = vpack.c.bf16 %v388_v30, %v387_v26  ;;  %v548_v37 = vpack.c.bf16 %v392_v31, %v391_v27  ;;  %v386_v38 = vadd.f32 %v511_v19, %v371_v32  ;;  %v390_v39 = vadd.f32 %v511_v19, %v375_v33 }
  0xf7   : > { %550 = vst [vmem:[%s199_s20 + $0x8] sm:$0xff] %v538_v36   ;;  %552 = vst [vmem:[%s199_s20 + $0x18] sm:$0xff] %v548_v37   ;;  %v533_v40 = vpack.c.bf16 %v386_v38, %v385_v34  ;;  %v543_v41 = vpack.c.bf16 %v390_v39, %v389_v35 }
  0xf9   : > { %534 = vst [vmem:[%s199_s20] sm:$0xff] %v533_v40   ;;  %551 = vst [vmem:[%s199_s20 + $0x10] sm:$0xff] %v543_v41  }
  0xfa PF: > { %s14_s15 = sadd.s32 1, %s631_s15  }
  0xfb   : > { %p11_p4 = scmp.ge.s32.totalorder %s14_s15, 4  }
  0xfd   :  { %13 = sbr.rel (!%p11_p4) target bundleno = 1 (0x1), region = 66 }

// kernel: _lambda_.13
= control target key start
LH: loop header
LB: loop body
LE: loop exit
PB: predicated region body
PF: predicated region fallthrough
CT: control target
= control target key end

     0   :  { %s1117_s24 = smov 0   ;;  %s1260_s0 = inlined_call_operand.vmem [shape: bf16[2,9,9,128], index: 0, kind: input, shape index: {}]   ;;  %s1261_s1 = inlined_call_operand.vmem [shape: bf16[2,9,9,128], index: 1, kind: input, shape index: {}]   ;;  %s1262_s2 = inlined_call_operand.vmem [shape: bf16[2,9,9,128], index: 2, kind: input, shape index: {}]   ;;  %s1263_s3 = inlined_call_operand.vmem [shape: bf16[2,9,9,128], index: 3, kind: input, shape index: {}]   ;;  %s1264_s4 = inlined_call_operand.vmem [shape: f32[9,128], index: 4, kind: input, shape index: {}]   ;;  %s1265_s5 = inlined_call_operand.vmem [shape: f32[1,128], index: 5, kind: input, shape index: {}]   ;;  %s1266_s6 = inlined_call_operand.vmem [shape: f32[1,128], index: 6, kind: input, shape index: {}]   ;;  %s1267_s7 = inlined_call_operand.vmem [shape: bf16[2,8,8,128], index: 7, kind: output, shape index: {}]  }
   0x1 LB: > { %s988_s25 = sadd.s32 4294967295, %s1075_s24   ;;  %p992_p0 = scmp.ge.s32.totalorder %s1075_s24, 1  ;;  %s1075_s24 = sphi %s1117_s24, %s17_s24  }
   0x2   : > { %p267_p1 = scmp.lt.s32.totalorder %s1075_s24, 3 }
   0x4   : > { %p268_p2 = pnand %p992_p0, %p267_p1 }
   0x5   : > { %p314_p3 = scmp.lt.s32.totalorder (!%p268_p2), %s988_s25, 1 }
   0x6   : > { %271 = sbr.rel (%p268_p2) target bundleno = 102 (0x66), region = 48 }
   0xb   : > { %s1269_s25 = smov (!%p314_p3, %s988_s25), 1  ;;  %v999_v3 = vld [vmem:[%s1264_s4] ss:$0 sm:$0xff]  ;;  %vm431_vm0 = vcmask 1046528   ;;  %v1000_v29 = vld [vmem:[%s1264_s4 + $0x2] ss:$0 sm:$0xff] }
   0xc   : > { %s1128_s26 = smul.u32 72, %s1269_s25  ;;  %s1036_s17 = sshll.u32 %s1269_s25, 5 }
   0xd   : > { %s338_s20 = scalar_lea.vmem %s1267_s7, %s1036_s17 }
   0xe   : > { %s1134_s29 = scalar_lea.vmem %s1260_s0, %s1128_s26  ;;  %s1158_s13 = scalar_lea.vmem %s1261_s1, %s1128_s26 }
   0xf   : > { %v341_v0 = vld [vmem:[%s1134_s29] ss:$8 sps:$4 sm:$0xff]   ;;  %v342_v1 = vld [vmem:[%s1134_s29 + $0x4] sm:$0x1]  ;;  %v344_v2 = vld [vmem:[%s1134_s29 + $0xc] sm:$0x1]  ;;  %s1179_s18 = scalar_lea.vmem %s1262_s2, %s1128_s26  ;;  %s333_s28 = scalar_lea.vmem %s1263_s3, %s1128_s26 }
  0x10   : > { %v345_v4 = vld [vmem:[%s1134_s29 + $0x10] ss:$8 sps:$4 sm:$0xff]   ;;  %v346_v5 = vld [vmem:[%s1134_s29 + $0x14] sm:$0x1]  ;;  %v348_v6 = vld [vmem:[%s1134_s29 + $0x1c] sm:$0x1]  ;;  %v357_v7 = vunpack.c.l.bf16 %v341_v0  ;;  %v358_v8 = vunpack.c.l.bf16 %v342_v1  ;;  %v359_v9 = vunpack.c.h.bf16 %v341_v0  ;;  %v360_v10 = vunpack.c.l.bf16 %v344_v2 }
  0x11   : > { %v349_v11 = vld [vmem:[%s1134_s29 + $0x20] ss:$8 sps:$4 sm:$0xff]   ;;  %v350_v12 = vld [vmem:[%s1134_s29 + $0x24] sm:$0x1]  ;;  %v352_v13 = vld [vmem:[%s1134_s29 + $0x2c] sm:$0x1]  ;;  %v361_v14 = vunpack.c.l.bf16 %v345_v4  ;;  %v362_v15 = vunpack.c.l.bf16 %v346_v5  ;;  %v363_v16 = vunpack.c.h.bf16 %v345_v4  ;;  %v364_v17 = vunpack.c.l.bf16 %v348_v6 }
  0x12   : > { %v353_v18 = vld [vmem:[%s1134_s29 + $0x30] ss:$8 sps:$4 sm:$0xff]   ;;  %v354_v19 = vld [vmem:[%s1134_s29 + $0x34] sm:$0x1]  ;;  %v356_v20 = vld [vmem:[%s1134_s29 + $0x3c] sm:$0x1]  ;;  %v365_v21 = vunpack.c.l.bf16 %v349_v11  ;;  %v366_v22 = vunpack.c.l.bf16 %v350_v12  ;;  %v367_v23 = vunpack.c.h.bf16 %v349_v11  ;;  %v368_v24 = vunpack.c.l.bf16 %v352_v13 }
  0x13   : > { %v369_v25 = vunpack.c.l.bf16 %v353_v18  ;;  %v370_v26 = vunpack.c.l.bf16 %v354_v19  ;;  %v371_v27 = vunpack.c.h.bf16 %v353_v18  ;;  %v372_v28 = vunpack.c.l.bf16 %v356_v20  ;;  %v476_v20 = vld [vmem:[%s1158_s13 + $0x20] ss:$8 sps:$4 sm:$0xff]  }
  0x14   : > { %v378_v30 = vmul.f32 %v999_v3, %v357_v7  ;;  %v379_v31 = vmul.f32 %v999_v3, %v359_v9  ;;  %v380_v32 = vmul.f32 %v999_v3, %v361_v14  ;;  %v381_v33 = vmul.f32 %v999_v3, %v363_v16 }
  0x15   : > { %v382_v34 = vmul.f32 %v999_v3, %v365_v21  ;;  %v383_v35 = vmul.f32 %v999_v3, %v367_v23  ;;  %v384_v36 = vmul.f32 %v999_v3, %v369_v25  ;;  %v385_v37 = vmul.f32 %v999_v3, %v371_v27 }
  0x16   : > { %v399_v38 = vmul.f32 %v1000_v29, %v357_v7  ;;  %v400_v39 = vmul.f32 %v1000_v29, %v358_v8  ;;  %v401_v40 = vmul.f32 %v1000_v29, %v359_v9  ;;  %v402_v41 = vmul.f32 %v1000_v29, %v360_v10  ;;  %v472_v10 = vld [vmem:[%s1158_s13] ss:$8 sps:$4 sm:$0xff]  }
  0x17   : > { %v403_v42 = vmul.f32 %v1000_v29, %v361_v14  ;;  %v404_v43 = vmul.f32 %v1000_v29, %v362_v15  ;;  %v405_v44 = vmul.f32 %v1000_v29, %v363_v16  ;;  %v406_v45 = vmul.f32 %v1000_v29, %v364_v17  ;;  %v474_v15 = vld [vmem:[%s1158_s13 + $0x10] ss:$8 sps:$4 sm:$0xff]  }
  0x18   : > { %v407_v46 = vmul.f32 %v1000_v29, %v365_v21  ;;  %v408_v47 = vmul.f32 %v1000_v29, %v366_v22  ;;  %v409_v48 = vmul.f32 %v1000_v29, %v367_v23  ;;  %v410_v49 = vmul.f32 %v1000_v29, %v368_v24  ;;  %v478_v21 = vld [vmem:[%s1158_s13 + $0x30] ss:$8 sps:$4 sm:$0xff]  }
  0x19   : > { %v411_v50 = vmul.f32 %v1000_v29, %v369_v25  ;;  %v412_v51 = vmul.f32 %v1000_v29, %v370_v26  ;;  %v413_v52 = vmul.f32 %v1000_v29, %v371_v27  ;;  %v414_v53 = vmul.f32 %v1000_v29, %v372_v28  ;;  %v1001_v26 = vld [vmem:[%s1264_s4 + $0x1] ss:$0 sm:$0xff] }
  0x1a   : > { %v432_v54 = vrot.slane %v399_v38, 1  ;;  %v433_v55 = vrot.slane %v400_v39, 1  ;;  %v435_v56 = vrot.slane %v401_v40, 1  ;;  %v436_v57 = vrot.slane %v402_v41, 1 }
  0x1b   : > { %v438_v58 = vrot.slane %v403_v42, 1  ;;  %v439_v59 = vrot.slane %v404_v43, 1  ;;  %v441_v60 = vrot.slane %v405_v44, 1  ;;  %v442_v61 = vrot.slane %v406_v45, 1  ;;  %v509_v43 = vld [vmem:[%s1179_s18] ss:$8 sps:$4 sm:$0xff]  }
  0x1c   : > { %v434_v62 = vsel %vm431_vm0, %v432_v54, %v433_v55  ;;  %v437_v63 = vsel %vm431_vm0, %v435_v56, %v436_v57  ;;  %v444_v0 = vrot.slane %v407_v46, 1  ;;  %v445_v1 = vrot.slane %v408_v47, 1  ;;  %v510_v44 = vld [vmem:[%s1179_s18 + $0x4] sm:$0x1]  ;;  %v512_v45 = vld [vmem:[%s1179_s18 + $0xc] sm:$0x1] }
  0x1d   : > { %v440_v2 = vsel %vm431_vm0, %v438_v58, %v439_v59  ;;  %v443_v3 = vsel %vm431_vm0, %v441_v60, %v442_v61  ;;  %v447_v4 = vrot.slane %v409_v48, 1  ;;  %v448_v5 = vrot.slane %v410_v49, 1  ;;  %v517_v57 = vld [vmem:[%s1179_s18 + $0x20] ss:$8 sps:$4 sm:$0xff]   ;;  %v518_v58 = vld [vmem:[%s1179_s18 + $0x24] sm:$0x1] }
  0x1e   : > { %v446_v6 = vsel %vm431_vm0, %v444_v0, %v445_v1  ;;  %v450_v7 = vrot.slane %v411_v50, 1  ;;  %v451_v8 = vrot.slane %v412_v51, 1  ;;  %v453_v9 = vrot.slane %v413_v52, 1  ;;  %v513_v50 = vld [vmem:[%s1179_s18 + $0x10] ss:$8 sps:$4 sm:$0xff]  }
  0x1f   : > { %v449_v11 = vsel %vm431_vm0, %v447_v4, %v448_v5  ;;  %v454_v12 = vrot.slane %v414_v53, 1  ;;  %v464_v13 = vadd.f32 %v434_v62, %v378_v30  ;;  %v465_v14 = vadd.f32 %v437_v63, %v379_v31  ;;  %v514_v51 = vld [vmem:[%s1179_s18 + $0x14] sm:$0x1]  ;;  %v516_v52 = vld [vmem:[%s1179_s18 + $0x1c] sm:$0x1] }
  0x20   : > { %v452_v16 = vsel %vm431_vm0, %v450_v7, %v451_v8  ;;  %v466_v17 = vadd.f32 %v440_v2, %v380_v32  ;;  %v467_v18 = vadd.f32 %v443_v3, %v381_v33  ;;  %v468_v19 = vadd.f32 %v446_v6, %v382_v34  ;;  %v520_v59 = vld [vmem:[%s1179_s18 + $0x2c] sm:$0x1]  ;;  %v521_v60 = vld [vmem:[%s1179_s18 + $0x30] ss:$8 sps:$4 sm:$0xff]   ;;  %v522_v61 = vld [vmem:[%s1179_s18 + $0x34] sm:$0x1] }
  0x21   : > { %v455_v22 = vsel %vm431_vm0, %v453_v9, %v454_v12  ;;  %v469_v23 = vadd.f32 %v449_v11, %v383_v35  ;;  %v470_v24 = vadd.f32 %v452_v16, %v384_v36  ;;  %v480_v25 = vunpack.c.l.bf16 %v472_v10  ;;  %v524_v62 = vld [vmem:[%s1179_s18 + $0x3c] sm:$0x1]  ;;  %v1002_v7 = vld [vmem:[%s1264_s4 + $0x3] ss:$0 sm:$0xff] }
  0x22   : > { %v471_v27 = vadd.f32 %v455_v22, %v385_v37  ;;  %v481_v28 = vunpack.c.h.bf16 %v472_v10  ;;  %v482_v29 = vunpack.c.l.bf16 %v474_v15  ;;  %v483_v30 = vunpack.c.h.bf16 %v474_v15 }
  0x23   : > { %v484_v31 = vunpack.c.l.bf16 %v476_v20  ;;  %v485_v32 = vunpack.c.h.bf16 %v476_v20  ;;  %v486_v33 = vunpack.c.l.bf16 %v478_v21  ;;  %v487_v34 = vunpack.c.h.bf16 %v478_v21 }
  0x24   : > { %v493_v35 = vmul.f32 %v1001_v26, %v480_v25  ;;  %v494_v36 = vmul.f32 %v1001_v26, %v481_v28  ;;  %v495_v38 = vmul.f32 %v1001_v26, %v482_v29  ;;  %v496_v39 = vmul.f32 %v1001_v26, %v483_v30 }
  0x25   : > { %v497_v40 = vmul.f32 %v1001_v26, %v484_v31  ;;  %v498_v41 = vmul.f32 %v1001_v26, %v485_v32  ;;  %v499_v37 = vmul.f32 %v1001_v26, %v486_v33  ;;  %v500_v42 = vmul.f32 %v1001_v26, %v487_v34 }
  0x26   : > { %v501_v46 = vadd.f32 %v493_v35, %v464_v13  ;;  %v502_v47 = vadd.f32 %v494_v36, %v465_v14  ;;  %v503_v48 = vadd.f32 %v495_v38, %v466_v17  ;;  %v504_v49 = vadd.f32 %v496_v39, %v467_v18 }
  0x27   : > { %v505_v53 = vadd.f32 %v497_v40, %v468_v19  ;;  %v506_v54 = vadd.f32 %v498_v41, %v469_v23  ;;  %v507_v55 = vadd.f32 %v499_v37, %v470_v24  ;;  %v508_v56 = vadd.f32 %v500_v42, %v471_v27  ;;  %v1003_v24 = vld [vmem:[%s1264_s4 + $0x5] ss:$0 sm:$0xff] }
  0x28   : > { %v525_v63 = vunpack.c.l.bf16 %v509_v43  ;;  %v526_v0 = vunpack.c.l.bf16 %v510_v44  ;;  %v527_v1 = vunpack.c.h.bf16 %v509_v43  ;;  %v528_v2 = vunpack.c.l.bf16 %v512_v45 }
  0x29   : > { %v529_v3 = vunpack.c.l.bf16 %v513_v50  ;;  %v530_v4 = vunpack.c.l.bf16 %v514_v51  ;;  %v531_v5 = vunpack.c.h.bf16 %v513_v50  ;;  %v532_v6 = vunpack.c.l.bf16 %v516_v52 }
  0x2a   : > { %v533_v8 = vunpack.c.l.bf16 %v517_v57  ;;  %v534_v9 = vunpack.c.l.bf16 %v518_v58  ;;  %v535_v10 = vunpack.c.h.bf16 %v517_v57  ;;  %v536_v11 = vunpack.c.l.bf16 %v520_v59 }
  0x2b   : > { %v537_v12 = vunpack.c.l.bf16 %v521_v60  ;;  %v538_v13 = vunpack.c.l.bf16 %v522_v61  ;;  %v539_v14 = vunpack.c.h.bf16 %v521_v60  ;;  %v540_v15 = vunpack.c.l.bf16 %v524_v62 }
  0x2c   : > { %v546_v16 = vmul.f32 %v1002_v7, %v525_v63  ;;  %v547_v17 = vmul.f32 %v1002_v7, %v527_v1  ;;  %v548_v18 = vmul.f32 %v1002_v7, %v529_v3  ;;  %v549_v19 = vmul.f32 %v1002_v7, %v531_v5 }
  0x2d   : > { %v550_v20 = vmul.f32 %v1002_v7, %v533_v8  ;;  %v551_v21 = vmul.f32 %v1002_v7, %v535_v10  ;;  %v552_v22 = vmul.f32 %v1002_v7, %v537_v12  ;;  %v553_v23 = vmul.f32 %v1002_v7, %v539_v14 }
  0x2e   : > { %v554_v25 = vadd.f32 %v546_v16, %v501_v46  ;;  %v555_v26 = vadd.f32 %v547_v17, %v502_v47  ;;  %v556_v27 = vadd.f32 %v548_v18, %v503_v48  ;;  %v557_v28 = vadd.f32 %v549_v19, %v504_v49  ;;  %v645_v16 = vld [vmem:[%s333_s28 + $0x30] ss:$8 sps:$4 sm:$0xff]  }
  0x2f   : > { %v558_v29 = vadd.f32 %v550_v20, %v505_v53  ;;  %v559_v30 = vadd.f32 %v551_v21, %v506_v54  ;;  %v560_v31 = vadd.f32 %v552_v22, %v507_v55  ;;  %v561_v32 = vadd.f32 %v553_v23, %v508_v56  ;;  %v1004_v21 = vld [vmem:[%s1264_s4 + $0x4] ss:$0 sm:$0xff] }
  0x30   : > { %v567_v33 = vmul.f32 %v1003_v24, %v525_v63  ;;  %v568_v34 = vmul.f32 %v1003_v24, %v526_v0  ;;  %v569_v35 = vmul.f32 %v1003_v24, %v527_v1  ;;  %v570_v36 = vmul.f32 %v1003_v24, %v528_v2 }
  0x31   : > { %v571_v38 = vmul.f32 %v1003_v24, %v529_v3  ;;  %v572_v39 = vmul.f32 %v1003_v24, %v530_v4  ;;  %v573_v40 = vmul.f32 %v1003_v24, %v531_v5  ;;  %v574_v41 = vmul.f32 %v1003_v24, %v532_v6  ;;  %v639_v5 = vld [vmem:[%s333_s28] ss:$8 sps:$4 sm:$0xff]  }
  0x32   : > { %v575_v37 = vmul.f32 %v1003_v24, %v533_v8  ;;  %v576_v42 = vmul.f32 %v1003_v24, %v534_v9  ;;  %v577_v43 = vmul.f32 %v1003_v24, %v535_v10  ;;  %v578_v44 = vmul.f32 %v1003_v24, %v536_v11  ;;  %v641_v10 = vld [vmem:[%s333_s28 + $0x10] ss:$8 sps:$4 sm:$0xff]  }
  0x33   : > { %v579_v45 = vmul.f32 %v1003_v24, %v537_v12  ;;  %v580_v46 = vmul.f32 %v1003_v24, %v538_v13  ;;  %v581_v47 = vmul.f32 %v1003_v24, %v539_v14  ;;  %v582_v48 = vmul.f32 %v1003_v24, %v540_v15  ;;  %v643_v15 = vld [vmem:[%s333_s28 + $0x20] ss:$8 sps:$4 sm:$0xff]  }
  0x34   : > { %v599_v49 = vrot.slane %v567_v33, 1  ;;  %v600_v50 = vrot.slane %v568_v34, 1  ;;  %v602_v51 = vrot.slane %v569_v35, 1  ;;  %v603_v52 = vrot.slane %v570_v36, 1 }
  0x35   : > { %v605_v53 = vrot.slane %v571_v38, 1  ;;  %v606_v54 = vrot.slane %v572_v39, 1  ;;  %v608_v55 = vrot.slane %v573_v40, 1  ;;  %v609_v56 = vrot.slane %v574_v41, 1  ;;  %v1005_v39 = vld [vmem:[%s1134_s29 + $0x8] ss:$8 sps:$4 sm:$0xff]  }
  0x36   : > { %v601_v57 = vsel %vm431_vm0, %v599_v49, %v600_v50  ;;  %v604_v58 = vsel %vm431_vm0, %v602_v51, %v603_v52  ;;  %v611_v59 = vrot.slane %v575_v37, 1  ;;  %v612_v60 = vrot.slane %v576_v42, 1  ;;  %v1006_v40 = vld [vmem:[%s1134_s29 + $0xc] sm:$0x1]  ;;  %v1008_v41 = vld [vmem:[%s1134_s29 + $0x14] sm:$0x1] }
  0x37   : > { %v607_v61 = vsel %vm431_vm0, %v605_v53, %v606_v54  ;;  %v610_v62 = vsel %vm431_vm0, %v608_v55, %v609_v56  ;;  %v614_v63 = vrot.slane %v577_v43, 1  ;;  %v615_v0 = vrot.slane %v578_v44, 1  ;;  %v1013_v52 = vld [vmem:[%s1134_s29 + $0x28] ss:$8 sps:$4 sm:$0xff]   ;;  %v1014_v53 = vld [vmem:[%s1134_s29 + $0x2c] sm:$0x1] }
  0x38   : > { %v613_v1 = vsel %vm431_vm0, %v611_v59, %v612_v60  ;;  %v617_v2 = vrot.slane %v579_v45, 1  ;;  %v618_v3 = vrot.slane %v580_v46, 1  ;;  %v620_v4 = vrot.slane %v581_v47, 1  ;;  %v1009_v45 = vld [vmem:[%s1134_s29 + $0x18] ss:$8 sps:$4 sm:$0xff]  }
  0x39   : > { %v616_v6 = vsel %vm431_vm0, %v614_v63, %v615_v0  ;;  %v621_v7 = vrot.slane %v582_v48, 1  ;;  %v631_v8 = vadd.f32 %v601_v57, %v554_v25  ;;  %v632_v9 = vadd.f32 %v604_v58, %v555_v26  ;;  %v1010_v46 = vld [vmem:[%s1134_s29 + $0x1c] sm:$0x1]  ;;  %v1012_v47 = vld [vmem:[%s1134_s29 + $0x24] sm:$0x1] }
  0x3a   : > { %v619_v11 = vsel %vm431_vm0, %v617_v2, %v618_v3  ;;  %v633_v12 = vadd.f32 %v607_v61, %v556_v27  ;;  %v634_v13 = vadd.f32 %v610_v62, %v557_v28  ;;  %v635_v14 = vadd.f32 %v613_v1, %v558_v29  ;;  %v1016_v54 = vld [vmem:[%s1134_s29 + $0x34] sm:$0x1]  ;;  %v1017_v55 = vld [vmem:[%s1134_s29 + $0x38] ss:$8 sps:$4 sm:$0xff]   ;;  %v1018_v56 = vld [vmem:[%s1134_s29 + $0x3c] sm:$0x1] }
  0x3b   : > { %v622_v17 = vsel %vm431_vm0, %v620_v4, %v621_v7  ;;  %v636_v18 = vadd.f32 %v616_v6, %v559_v30  ;;  %v637_v19 = vadd.f32 %v619_v11, %v560_v31  ;;  %v647_v20 = vunpack.c.l.bf16 %v639_v5  ;;  %v1020_v57 = vld [vmem:[%s1134_s29 + $0x44] sm:$0x1]  ;;  %v1021_v2 = vld [vmem:[%s1264_s4 + $0x6] ss:$0 sm:$0xff] }
  0x3c   : > { %v638_v22 = vadd.f32 %v622_v17, %v561_v32  ;;  %v648_v23 = vunpack.c.h.bf16 %v639_v5  ;;  %v649_v24 = vunpack.c.l.bf16 %v641_v10  ;;  %v650_v25 = vunpack.c.h.bf16 %v641_v10 }
  0x3d   : > { %v651_v26 = vunpack.c.l.bf16 %v643_v15  ;;  %v652_v27 = vunpack.c.h.bf16 %v643_v15  ;;  %v653_v28 = vunpack.c.l.bf16 %v645_v16  ;;  %v654_v29 = vunpack.c.h.bf16 %v645_v16 }
  0x3e   : > { %v660_v33 = vmul.f32 %v1004_v21, %v647_v20  ;;  %v661_v30 = vmul.f32 %v1004_v21, %v648_v23  ;;  %v662_v31 = vmul.f32 %v1004_v21, %v649_v24  ;;  %v663_v34 = vmul.f32 %v1004_v21, %v650_v25 }
  0x3f   : > { %v664_v35 = vmul.f32 %v1004_v21, %v651_v26  ;;  %v665_v36 = vmul.f32 %v1004_v21, %v652_v27  ;;  %v666_v32 = vmul.f32 %v1004_v21, %v653_v28  ;;  %v667_v38 = vmul.f32 %v1004_v21, %v654_v29 }
  0x40   : > { %v668_v37 = vadd.f32 %v660_v33, %v631_v8  ;;  %v669_v42 = vadd.f32 %v661_v30, %v632_v9  ;;  %v670_v43 = vadd.f32 %v662_v31, %v633_v12  ;;  %v671_v44 = vadd.f32 %v663_v34, %v634_v13 }
  0x41   : > { %v672_v48 = vadd.f32 %v664_v35, %v635_v14  ;;  %v673_v49 = vadd.f32 %v665_v36, %v636_v18  ;;  %v674_v50 = vadd.f32 %v666_v32, %v637_v19  ;;  %v675_v51 = vadd.f32 %v667_v38, %v638_v22  ;;  %v1022_v19 = vld [vmem:[%s1264_s4 + $0x8] ss:$0 sm:$0xff] }
  0x42   : > { %v693_v58 = vunpack.c.l.bf16 %v1005_v39  ;;  %v694_v59 = vunpack.c.l.bf16 %v1006_v40  ;;  %v695_v60 = vunpack.c.h.bf16 %v1005_v39  ;;  %v696_v61 = vunpack.c.l.bf16 %v1008_v41 }
  0x43   : > { %v697_v62 = vunpack.c.l.bf16 %v1009_v45  ;;  %v698_v63 = vunpack.c.l.bf16 %v1010_v46  ;;  %v699_v0 = vunpack.c.h.bf16 %v1009_v45  ;;  %v700_v1 = vunpack.c.l.bf16 %v1012_v47 }
  0x44   : > { %v701_v3 = vunpack.c.l.bf16 %v1013_v52  ;;  %v702_v4 = vunpack.c.l.bf16 %v1014_v53  ;;  %v703_v5 = vunpack.c.h.bf16 %v1013_v52  ;;  %v704_v6 = vunpack.c.l.bf16 %v1016_v54 }
  0x45   : > { %v705_v7 = vunpack.c.l.bf16 %v1017_v55  ;;  %v706_v8 = vunpack.c.l.bf16 %v1018_v56  ;;  %v707_v9 = vunpack.c.h.bf16 %v1017_v55  ;;  %v708_v10 = vunpack.c.l.bf16 %v1020_v57 }
  0x46   : > { %v714_v11 = vmul.f32 %v1021_v2, %v693_v58  ;;  %v715_v12 = vmul.f32 %v1021_v2, %v695_v60  ;;  %v716_v13 = vmul.f32 %v1021_v2, %v697_v62  ;;  %v717_v14 = vmul.f32 %v1021_v2, %v699_v0 }
  0x47   : > { %v718_v15 = vmul.f32 %v1021_v2, %v701_v3  ;;  %v719_v16 = vmul.f32 %v1021_v2, %v703_v5  ;;  %v720_v17 = vmul.f32 %v1021_v2, %v705_v7  ;;  %v721_v18 = vmul.f32 %v1021_v2, %v707_v9 }
  0x48   : > { %v722_v20 = vadd.f32 %v714_v11, %v668_v37  ;;  %v723_v21 = vadd.f32 %v715_v12, %v669_v42  ;;  %v724_v22 = vadd.f32 %v716_v13, %v670_v43  ;;  %v725_v23 = vadd.f32 %v717_v14, %v671_v44  ;;  %v1029_v11 = vld [vmem:[%s1158_s13 + $0x38] ss:$8 sps:$4 sm:$0xff]  }
  0x49   : > { %v726_v24 = vadd.f32 %v718_v15, %v672_v48  ;;  %v727_v25 = vadd.f32 %v719_v16, %v673_v49  ;;  %v728_v26 = vadd.f32 %v720_v17, %v674_v50  ;;  %v729_v27 = vadd.f32 %v721_v18, %v675_v51  ;;  %v1031_v16 = vld [vmem:[%s1264_s4 + $0x7] ss:$0 sm:$0xff] }
  0x4a   : > { %v735_v28 = vmul.f32 %v1022_v19, %v693_v58  ;;  %v736_v29 = vmul.f32 %v1022_v19, %v694_v59  ;;  %v737_v33 = vmul.f32 %v1022_v19, %v695_v60  ;;  %v738_v30 = vmul.f32 %v1022_v19, %v696_v61 }
  0x4b   : > { %v739_v31 = vmul.f32 %v1022_v19, %v697_v62  ;;  %v740_v34 = vmul.f32 %v1022_v19, %v698_v63  ;;  %v741_v35 = vmul.f32 %v1022_v19, %v699_v0  ;;  %v742_v36 = vmul.f32 %v1022_v19, %v700_v1  ;;  %v1023_v0 = vld [vmem:[%s1158_s13 + $0x8] ss:$8 sps:$4 sm:$0xff]  }
  0x4c   : > { %v743_v32 = vmul.f32 %v1022_v19, %v701_v3  ;;  %v744_v38 = vmul.f32 %v1022_v19, %v702_v4  ;;  %v745_v39 = vmul.f32 %v1022_v19, %v703_v5  ;;  %v746_v40 = vmul.f32 %v1022_v19, %v704_v6  ;;  %v1025_v5 = vld [vmem:[%s1158_s13 + $0x18] ss:$8 sps:$4 sm:$0xff]  }
  0x4d   : > { %v747_v41 = vmul.f32 %v1022_v19, %v705_v7  ;;  %v748_v37 = vmul.f32 %v1022_v19, %v706_v8  ;;  %v749_v42 = vmul.f32 %v1022_v19, %v707_v9  ;;  %v750_v43 = vmul.f32 %v1022_v19, %v708_v10  ;;  %v1027_v10 = vld [vmem:[%s1158_s13 + $0x28] ss:$8 sps:$4 sm:$0xff]  }
  0x4e   : > { %v767_v44 = vrot.slane %v735_v28, 1  ;;  %v768_v45 = vrot.slane %v736_v29, 1  ;;  %v770_v46 = vrot.slane %v737_v33, 1  ;;  %v771_v47 = vrot.slane %v738_v30, 1 }
  0x4f   : > { %v773_v48 = vrot.slane %v739_v31, 1  ;;  %v774_v49 = vrot.slane %v740_v34, 1  ;;  %v776_v50 = vrot.slane %v741_v35, 1  ;;  %v777_v51 = vrot.slane %v742_v36, 1 }
  0x50   : > { %v769_v52 = vsel %vm431_vm0, %v767_v44, %v768_v45  ;;  %v772_v53 = vsel %vm431_vm0, %v770_v46, %v771_v47  ;;  %v779_v54 = vrot.slane %v743_v32, 1  ;;  %v780_v55 = vrot.slane %v744_v38, 1 }
  0x51   : > { %v775_v56 = vsel %vm431_vm0, %v773_v48, %v774_v49  ;;  %v778_v57 = vsel %vm431_vm0, %v776_v50, %v777_v51  ;;  %v782_v58 = vrot.slane %v745_v39, 1  ;;  %v783_v59 = vrot.slane %v746_v40, 1  ;;  %v1033_v39 = vld [vmem:[%s1266_s6] ss:$0 sm:$0xff] }
  0x52   : > { %v781_v60 = vsel %vm431_vm0, %v779_v54, %v780_v55  ;;  %v785_v61 = vrot.slane %v747_v41, 1  ;;  %v786_v62 = vrot.slane %v748_v37, 1  ;;  %v788_v63 = vrot.slane %v749_v42, 1 }
  0x53   : > { %v784_v1 = vsel %vm431_vm0, %v782_v58, %v783_v59  ;;  %v789_v2 = vrot.slane %v750_v43, 1  ;;  %v799_v3 = vadd.f32 %v769_v52, %v722_v20  ;;  %v800_v4 = vadd.f32 %v772_v53, %v723_v21 }
  0x54   : > { %v787_v6 = vsel %vm431_vm0, %v785_v61, %v786_v62  ;;  %v801_v7 = vadd.f32 %v775_v56, %v724_v22  ;;  %v802_v8 = vadd.f32 %v778_v57, %v725_v23  ;;  %v803_v9 = vadd.f32 %v781_v60, %v726_v24 }
  0x55   : > { %v790_v12 = vsel %vm431_vm0, %v788_v63, %v789_v2  ;;  %v804_v13 = vadd.f32 %v784_v1, %v727_v25  ;;  %v805_v14 = vadd.f32 %v787_v6, %v728_v26  ;;  %v816_v15 = vunpack.c.l.bf16 %v1023_v0  ;;  %v1032_v25 = vld [vmem:[%s1265_s5] ss:$0 sm:$0xff] }
  0x56   : > { %v806_v17 = vadd.f32 %v790_v12, %v729_v27  ;;  %v817_v18 = vunpack.c.h.bf16 %v1023_v0  ;;  %v818_v19 = vunpack.c.l.bf16 %v1025_v5  ;;  %v819_v20 = vunpack.c.h.bf16 %v1025_v5 }
  0x57   : > { %v820_v21 = vunpack.c.l.bf16 %v1027_v10  ;;  %v821_v28 = vunpack.c.h.bf16 %v1027_v10  ;;  %v822_v22 = vunpack.c.l.bf16 %v1029_v11  ;;  %v823_v23 = vunpack.c.h.bf16 %v1029_v11 }
  0x58   : > { %v829_v24 = vmul.f32 %v1031_v16, %v816_v15  ;;  %v830_v29 = vmul.f32 %v1031_v16, %v817_v18  ;;  %v831_v33 = vmul.f32 %v1031_v16, %v818_v19  ;;  %v832_v30 = vmul.f32 %v1031_v16, %v819_v20 }
  0x59   : > { %v833_v26 = vmul.f32 %v1031_v16, %v820_v21  ;;  %v834_v31 = vmul.f32 %v1031_v16, %v821_v28  ;;  %v835_v34 = vmul.f32 %v1031_v16, %v822_v22  ;;  %v836_v35 = vmul.f32 %v1031_v16, %v823_v23 }
  0x5a   : > { %v837_v27 = vadd.f32 %v829_v24, %v799_v3  ;;  %v838_v36 = vadd.f32 %v830_v29, %v800_v4  ;;  %v839_v32 = vadd.f32 %v831_v33, %v801_v7  ;;  %v840_v38 = vadd.f32 %v832_v30, %v802_v8 }
  0x5b   : > { %v841_v40 = vadd.f32 %v833_v26, %v803_v9  ;;  %v842_v41 = vadd.f32 %v834_v31, %v804_v13  ;;  %v843_v37 = vadd.f32 %v835_v34, %v805_v14  ;;  %v844_v42 = vadd.f32 %v836_v35, %v806_v17 }
  0x5c   : > { %v851_v43 = vmul.f32 %v1032_v25, %v837_v27  ;;  %v852_v44 = vmul.f32 %v1032_v25, %v838_v36  ;;  %v853_v45 = vmul.f32 %v1032_v25, %v839_v32  ;;  %v854_v46 = vmul.f32 %v1032_v25, %v840_v38 }
  0x5d   : > { %v855_v47 = vmul.f32 %v1032_v25, %v841_v40  ;;  %v856_v48 = vmul.f32 %v1032_v25, %v842_v41  ;;  %v857_v49 = vmul.f32 %v1032_v25, %v843_v37  ;;  %v858_v50 = vmul.f32 %v1032_v25, %v844_v42 }
  0x5e   : > { %v865_v51 = vadd.f32 %v1033_v39, %v851_v43  ;;  %v866_v52 = vadd.f32 %v1033_v39, %v852_v44  ;;  %v867_v53 = vadd.f32 %v1033_v39, %v853_v45  ;;  %v868_v54 = vadd.f32 %v1033_v39, %v854_v46 }
  0x5f   : > { %v869_v55 = vadd.f32 %v1033_v39, %v855_v47  ;;  %v870_v56 = vadd.f32 %v1033_v39, %v856_v48  ;;  %v871_v57 = vadd.f32 %v1033_v39, %v857_v49  ;;  %v872_v58 = vadd.f32 %v1033_v39, %v858_v50 }
  0x60   : > { %v873_v59 = vmax.f32 %v865_v51, 0.0  ;;  %v874_v60 = vmax.f32 %v866_v52, 0.0  ;;  %v875_v61 = vmax.f32 %v867_v53, 0.0  ;;  %v876_v62 = vmax.f32 %v868_v54, 0.0 }
  0x61   : > { %v877_v63 = vmax.f32 %v869_v55, 0.0  ;;  %v878_v0 = vmax.f32 %v870_v56, 0.0  ;;  %v879_v1 = vmax.f32 %v871_v57, 0.0  ;;  %v880_v2 = vmax.f32 %v872_v58, 0.0 }
  0x62   : > { %v1040_v3 = vpack.c.bf16 %v874_v60, %v873_v59  ;;  %v1045_v4 = vpack.c.bf16 %v876_v62, %v875_v61 }
  0x63   : > { %v1050_v5 = vpack.c.bf16 %v878_v0, %v877_v63  ;;  %v1055_v6 = vpack.c.bf16 %v880_v2, %v879_v1 }
  0x64   : > { %1041 = vst [vmem:[%s338_s20] sm:$0xff] %v1040_v3   ;;  %1057 = vst [vmem:[%s338_s20 + $0x8] sm:$0xff] %v1045_v4  }
  0x65   : > { %1058 = vst [vmem:[%s338_s20 + $0x10] sm:$0xff] %v1050_v5   ;;  %1059 = vst [vmem:[%s338_s20 + $0x18] sm:$0xff] %v1055_v6  }
  0x66 PF: > { %s17_s24 = sadd.s32 1, %s1075_s24  }
  0x67   : > { %p14_p4 = scmp.ge.s32.totalorder %s17_s24, 4  }
  0x69   :  { %16 = sbr.rel (!%p14_p4) target bundleno = 1 (0x1), region = 89 }

// kernel: _lambda_.10
= control target key start
LH: loop header
LB: loop body
LE: loop exit
PB: predicated region body
PF: predicated region fallthrough
CT: control target
= control target key end

     0   :  { %s4038_s17 = smov 0   ;;  %s5681_s0 = inlined_call_operand.vmem [shape: bf16[2,17,17,128], index: 0, kind: input, shape index: {}]   ;;  %s5682_s1 = inlined_call_operand.vmem [shape: bf16[2,17,17,128], index: 1, kind: input, shape index: {}]   ;;  %s5683_s2 = inlined_call_operand.vmem [shape: bf16[2,17,17,128], index: 2, kind: input, shape index: {}]   ;;  %s5684_s3 = inlined_call_operand.vmem [shape: bf16[2,17,17,128], index: 3, kind: input, shape index: {}]   ;;  %s5685_s4 = inlined_call_operand.vmem [shape: f32[9,128], index: 4, kind: input, shape index: {}]   ;;  %s5686_s5 = inlined_call_operand.vmem [shape: f32[1,128], index: 5, kind: input, shape index: {}]   ;;  %s5687_s6 = inlined_call_operand.vmem [shape: f32[1,128], index: 6, kind: input, shape index: {}]   ;;  %s5688_s7 = inlined_call_operand.vmem [shape: f32[128,128], index: 7, kind: input, shape index: {}]   ;;  %s5689_s8 = inlined_call_operand.vmem [shape: f32[1,128], index: 8, kind: input, shape index: {}]   ;;  %s5690_s9 = inlined_call_operand.vmem [shape: f32[128,128], index: 9, kind: input, shape index: {}]   ;;  %s5691_s10 = inlined_call_operand.vmem [shape: f32[1,128], index: 10, kind: input, shape index: {}]   ;;  %s5692_s11 = inlined_call_operand.vmem [shape: bf16[2,16,16,128], index: 11, kind: output, shape index: {}]  }
   0x1 LB: > { %s2976_s18 = sadd.s32 4294967295, %s3974_s17   ;;  %p2980_p0 = scmp.ge.s32.totalorder %s3974_s17, 1  ;;  %s3974_s17 = sphi %s4038_s17, %s21_s17  }
   0x2   : > { %p367_p1 = scmp.lt.s32.totalorder %s3974_s17, 3 }
   0x4   : > { %p368_p2 = pnand %p2980_p0, %p367_p1 }
   0x6   : > { %371 = sbr.rel (%p368_p2) target bundleno = 771 (0x303), region = 64 }
   0xb   : > { %v2461_v0 = vld [vmem:[%s5688_s7 + $0x78] sm:$0xff]  ;;  %p422_p3 = scmp.lt.s32.totalorder %s2976_s18, 1  ;;  %v5693_v1 = vmov 0.0   ;;  %v2460_v2 = vld [vmem:[%s5688_s7 + $0x70] sm:$0xff]  ;;  %vm3977_vm0 = vmmov 0   ;;  %v2459_v3 = vld [vmem:[%s5688_s7 + $0x68] sm:$0xff] }
   0xc   : > { %3885 = vmatprep.subr.mxu0 %v5693_v1  ;;  %3917 = vmatprep.mubr.msk.f32.mxu0 %vm3977_vm0, %v5693_v1  ;;  %v2458_v4 = vld [vmem:[%s5688_s7 + $0x60] sm:$0xff]  ;;  %v2457_v5 = vld [vmem:[%s5688_s7 + $0x58] sm:$0xff]  ;;  %v2456_v6 = vld [vmem:[%s5688_s7 + $0x50] sm:$0xff]  ;;  %vm587_vm1 = vcmask 1046528  }
   0xd   : > { %3886 = vmatpush3.msra.mxu0 %v2461_v0  ;;  %s5814_s18 = smov (!%p422_p3, %s2976_s18), 1  ;;  %3920 = vmatprep.subr.mxu1 %v5693_v1  ;;  %v2455_v17 = vld [vmem:[%s5688_s7 + $0x48] sm:$0xff]  ;;  %v2987_v25 = vld [vmem:[%s5685_s4] ss:$0 sm:$0xff]  ;;  %v2453_v54 = vld [vmem:[%s5688_s7 + $0x38] sm:$0xff] }
   0xe   : > { %3887 = vmatprep.subr.mxu0 %v5693_v1  ;;  %3952 = vmatprep.mubr.msk.f32.mxu1 %vm3977_vm0, %v5693_v1  ;;  %s4063_s25 = smul.u32 204, %s5814_s18  ;;  %v2454_v45 = vld [vmem:[%s5688_s7 + $0x40] sm:$0xff]  ;;  %v2452_v0 = vld [vmem:[%s5688_s7 + $0x30] sm:$0xff]  ;;  %s3281_s26 = sshll.u32 %s5814_s18, 7 }
   0xf   : > { %3888 = vmatpush3.msra.mxu0 %v2460_v2  ;;  %v2988_v59 = vld [vmem:[%s5685_s4 + $0x2] ss:$0 sm:$0xff]  ;;  %s4821_s28 = scalar_lea.vmem %s5692_s11, %s3281_s26 }
  0x10   : > { %3889 = vmatprep.subr.mxu0 %v5693_v1  ;;  %s4076_s13 = scalar_lea.vmem %s5681_s0, %s4063_s25  ;;  %s4275_s30 = scalar_lea.vmem %s5682_s1, %s4063_s25 }
  0x11   : > { %3890 = vmatpush3.msra.mxu0 %v2459_v3  ;;  %v4083_v7 = vld [vmem:[%s4076_s13] sm:$0xff]   ;;  %v4086_v8 = vld [vmem:[%s4076_s13 + $0x8] sm:$0x1]  ;;  %v4089_v9 = vld [vmem:[%s4076_s13 + $0xc] sm:$0xff]   ;;  %s4329_s19 = scalar_lea.vmem %s5683_s2, %s4063_s25  ;;  %s4544_s27 = scalar_lea.vmem %s5684_s3, %s4063_s25 }
  0x12   : > { %3891 = vmatprep.subr.mxu0 %v5693_v1  ;;  %v3348_v10 = vunpack.c.l.bf16 %v4083_v7  ;;  %v3349_v11 = vunpack.c.h.bf16 %v4083_v7  ;;  %v4094_v12 = vld [vmem:[%s4076_s13 + $0x14] sm:$0x1]  ;;  %v3762_v13 = vld [vmem:[%s4076_s13 + $0x18] sm:$0xff]   ;;  %v4098_v14 = vld [vmem:[%s4076_s13 + $0x20] sm:$0x1]  ;;  %v475_v15 = vunpack.c.l.bf16 %v4086_v8  ;;  %v476_v16 = vunpack.c.l.bf16 %v4089_v9 }
  0x13   : > { %3892 = vmatpush3.msra.mxu0 %v2458_v4  ;;  %v4106_v18 = vunpack.c.l.bf16 %v3762_v13  ;;  %v4108_v19 = vunpack.c.h.bf16 %v3762_v13  ;;  %v4111_v20 = vld [vmem:[%s4076_s13 + $0x24] sm:$0xff]   ;;  %v4114_v21 = vld [vmem:[%s4076_s13 + $0x2c] sm:$0x1]  ;;  %v3763_v22 = vld [vmem:[%s4076_s13 + $0x30] sm:$0xff]   ;;  %v477_v23 = vunpack.c.h.bf16 %v4089_v9  ;;  %v478_v24 = vunpack.c.l.bf16 %v4094_v12 }
  0x14   : > { %3893 = vmatprep.subr.mxu0 %v5693_v1  ;;  %v4122_v26 = vunpack.c.l.bf16 %v3763_v22  ;;  %v4124_v27 = vunpack.c.h.bf16 %v3763_v22  ;;  %v4127_v28 = vld [vmem:[%s4076_s13 + $0x38] sm:$0x1]  ;;  %v4130_v29 = vld [vmem:[%s4076_s13 + $0x3c] sm:$0xff]   ;;  %v4133_v30 = vld [vmem:[%s4076_s13 + $0x44] sm:$0x1]  ;;  %v481_v31 = vunpack.c.l.bf16 %v4098_v14  ;;  %v482_v32 = vunpack.c.l.bf16 %v4111_v20 }
  0x15   : > { %3894 = vmatpush3.msra.mxu0 %v2457_v5  ;;  %v3764_v33 = vld [vmem:[%s4076_s13 + $0x48] sm:$0xff]   ;;  %v4140_v34 = vld [vmem:[%s4076_s13 + $0x50] sm:$0x1]  ;;  %v4143_v35 = vld [vmem:[%s4076_s13 + $0x54] sm:$0xff]   ;;  %v483_v36 = vunpack.c.h.bf16 %v4111_v20  ;;  %v484_v37 = vunpack.c.l.bf16 %v4114_v21  ;;  %v487_v38 = vunpack.c.l.bf16 %v4127_v28  ;;  %v488_v39 = vunpack.c.l.bf16 %v4130_v29 }
  0x16   : > { %3895 = vmatprep.subr.mxu0 %v5693_v1  ;;  %v4149_v40 = vunpack.c.l.bf16 %v3764_v33  ;;  %v4151_v41 = vunpack.c.h.bf16 %v3764_v33  ;;  %v4154_v42 = vld [vmem:[%s4076_s13 + $0x5c] sm:$0x1]  ;;  %v489_v43 = vunpack.c.h.bf16 %v4130_v29  ;;  %v490_v44 = vunpack.c.l.bf16 %v4133_v30  ;;  %v2450_v9 = vld [vmem:[%s5688_s7 + $0x20] sm:$0xff] }
  0x17   : > { %3896 = vmatpush3.msra.mxu0 %v2456_v6  ;;  %v493_v46 = vunpack.c.l.bf16 %v4140_v34  ;;  %v494_v47 = vunpack.c.l.bf16 %v4143_v35  ;;  %v495_v48 = vunpack.c.h.bf16 %v4143_v35  ;;  %v496_v49 = vunpack.c.l.bf16 %v4154_v42 }
  0x18   : > { %5748 = vst [vmem:[#allocation2_spill] sm:$0xff] %v4149_v40  ;;  %5749 = vst [vmem:[#allocation3_spill] sm:$0xff] %v4151_v41  ;;  %3897 = vmatprep.subr.mxu0 %v5693_v1  ;;  %v4168_v50 = vmul.f32 %v3348_v10, %v2987_v25  ;;  %v4172_v51 = vmul.f32 %v3349_v11, %v2987_v25  ;;  %v4176_v52 = vmul.f32 %v2987_v25, %v476_v16 }
  0x19   : > { %3898 = vmatpush3.msra.mxu0 %v2455_v17  ;;  %v4178_v53 = vmul.f32 %v2987_v25, %v477_v23  ;;  %v4185_v55 = vmul.f32 %v4106_v18, %v2987_v25  ;;  %v4188_v56 = vmul.f32 %v4108_v19, %v2987_v25  ;;  %v4190_v57 = vmul.f32 %v2987_v25, %v482_v32  ;;  %v2451_v17 = vld [vmem:[%s5688_s7 + $0x28] sm:$0xff] }
  0x1a   : > { %3899 = vmatprep.subr.mxu0 %v5693_v1  ;;  %v4192_v58 = vmul.f32 %v2987_v25, %v483_v36  ;;  %v4198_v60 = vmul.f32 %v4122_v26, %v2987_v25  ;;  %v4201_v61 = vmul.f32 %v4124_v27, %v2987_v25  ;;  %v4203_v62 = vmul.f32 %v2987_v25, %v488_v39 }
  0x1b   : > { %3900 = vmatpush3.msra.mxu0 %v2454_v45  ;;  %v4205_v63 = vmul.f32 %v2987_v25, %v489_v43  ;;  %v4212_v2 = vmul.f32 %v4149_v40, %v2987_v25  ;;  %v4215_v3 = vmul.f32 %v4151_v41, %v2987_v25  ;;  %v4217_v4 = vmul.f32 %v2987_v25, %v494_v47 }
  0x1c   : > { %3901 = vmatprep.subr.mxu0 %v5693_v1  ;;  %v4219_v5 = vmul.f32 %v2987_v25, %v495_v48  ;;  %v539_v6 = vmul.f32 %v3348_v10, %v2988_v59  ;;  %v540_v12 = vmul.f32 %v3349_v11, %v2988_v59  ;;  %v541_v13 = vmul.f32 %v2988_v59, %v475_v15 }
  0x1d   : > { %3902 = vmatpush3.msra.mxu0 %v2453_v54  ;;  %v542_v14 = vmul.f32 %v2988_v59, %v476_v16  ;;  %v543_v20 = vmul.f32 %v2988_v59, %v477_v23  ;;  %v544_v21 = vmul.f32 %v2988_v59, %v478_v24  ;;  %v545_v22 = vmul.f32 %v4106_v18, %v2988_v59 }
  0x1e   : > { %3903 = vmatprep.subr.mxu0 %v5693_v1  ;;  %v546_v10 = vmul.f32 %v4108_v19, %v2988_v59  ;;  %v547_v7 = vmul.f32 %v2988_v59, %v481_v31  ;;  %v548_v11 = vmul.f32 %v2988_v59, %v482_v32  ;;  %v549_v8 = vmul.f32 %v2988_v59, %v483_v36  ;;  %v2449_v32 = vld [vmem:[%s5688_s7 + $0x18] sm:$0xff] }
  0x1f   : > { %3904 = vmatpush3.msra.mxu0 %v2452_v0  ;;  %v550_v15 = vmul.f32 %v2988_v59, %v484_v37  ;;  %v551_v16 = vmul.f32 %v4122_v26, %v2988_v59  ;;  %v552_v23 = vmul.f32 %v4124_v27, %v2988_v59  ;;  %v553_v24 = vmul.f32 %v2988_v59, %v487_v38 }
  0x20   : > { %3905 = vmatprep.subr.mxu0 %v5693_v1  ;;  %v554_v25 = vmul.f32 %v2988_v59, %v488_v39  ;;  %v555_v28 = vmul.f32 %v2988_v59, %v489_v43  ;;  %v556_v29 = vmul.f32 %v2988_v59, %v490_v44  ;;  %v557_v30 = vmul.f32 %v4149_v40, %v2988_v59  ;;  %v2448_v43 = vld [vmem:[%s5688_s7 + $0x10] sm:$0xff] }
  0x21   : > { %3906 = vmatpush3.msra.mxu0 %v2451_v17  ;;  %v558_v31 = vmul.f32 %v4151_v41, %v2988_v59  ;;  %v559_v33 = vmul.f32 %v2988_v59, %v493_v46  ;;  %v560_v34 = vmul.f32 %v2988_v59, %v494_v47  ;;  %v561_v35 = vmul.f32 %v2988_v59, %v495_v48 }
  0x22   : > { %3907 = vmatprep.subr.mxu0 %v5693_v1  ;;  %v562_v36 = vmul.f32 %v2988_v59, %v496_v49  ;;  %v588_v37 = vrot.slane %v539_v6, 1  ;;  %v589_v38 = vrot.slane %v540_v12, 1  ;;  %v591_v39 = vrot.slane %v541_v13, 1  ;;  %v2447_v59 = vld [vmem:[%s5688_s7 + $0x8] sm:$0xff] }
  0x23   : > { %3908 = vmatpush3.msra.mxu0 %v2450_v9  ;;  %v593_v42 = vrot.slane %v542_v14, 1  ;;  %v594_v44 = vrot.slane %v543_v20, 1  ;;  %v596_v45 = vrot.slane %v544_v21, 1  ;;  %v598_v54 = vrot.slane %v545_v22, 1 }
  0x24   : > { %3909 = vmatprep.subr.mxu0 %v5693_v1  ;;  %v599_v0 = vrot.slane %v546_v10, 1  ;;  %v590_v46 = vsel %vm587_vm1, %v588_v37, %v589_v38  ;;  %v592_v47 = vsel %vm587_vm1, %v589_v38, %v591_v39  ;;  %v601_v48 = vrot.slane %v547_v7, 1  ;;  %v2446_v10 = vld [vmem:[%s5688_s7] sm:$0xff] }
  0x25   : > { %3910 = vmatpush3.msra.mxu0 %v2449_v32  ;;  %v603_v49 = vrot.slane %v548_v11, 1  ;;  %v595_v6 = vsel %vm587_vm1, %v593_v42, %v594_v44  ;;  %v597_v12 = vsel %vm587_vm1, %v594_v44, %v596_v45  ;;  %v604_v14 = vrot.slane %v549_v8, 1 }
  0x26   : > { %3911 = vmatprep.subr.mxu0 %v5693_v1  ;;  %v600_v13 = vsel %vm587_vm1, %v598_v54, %v599_v0  ;;  %v602_v17 = vsel %vm587_vm1, %v599_v0, %v601_v48  ;;  %v606_v20 = vrot.slane %v550_v15, 1  ;;  %v608_v21 = vrot.slane %v551_v16, 1  ;;  %v4299_v48 = vld [vmem:[%s4275_s30 + $0x30] sm:$0xff]  }
  0x27   : > { %3912 = vmatpush3.msra.mxu0 %v2448_v43  ;;  %v609_v22 = vrot.slane %v552_v23, 1  ;;  %v605_v7 = vsel %vm587_vm1, %v603_v49, %v604_v14  ;;  %v611_v11 = vrot.slane %v553_v24, 1  ;;  %v613_v9 = vrot.slane %v554_v25, 1  ;;  %5751 = vst [vmem:[#allocation5_spill] sm:$0xff] %v4299_v48 }
  0x28   : > { %3913 = vmatprep.subr.mxu0 %v5693_v1  ;;  %v614_v32 = vrot.slane %v555_v28, 1  ;;  %v607_v8 = vsel %vm587_vm1, %v604_v14, %v606_v20  ;;  %v616_v15 = vrot.slane %v556_v29, 1  ;;  %v618_v16 = vrot.slane %v557_v30, 1  ;;  %v674_v14 = vld [vmem:[%s4275_s30 + $0x54] sm:$0xff]  }
  0x29   : > { %3914 = vmatpush3.msra.mxu0 %v2447_v59  ;;  %v610_v37 = vsel %vm587_vm1, %v608_v21, %v609_v22  ;;  %v612_v23 = vsel %vm587_vm1, %v609_v22, %v611_v11  ;;  %v619_v39 = vrot.slane %v558_v31, 1  ;;  %v621_v42 = vrot.slane %v559_v33, 1  ;;  %v662_v59 = vld [vmem:[%s4275_s30 + $0xc] sm:$0xff]  }
  0x2a   : > { %3915 = vmatprep.subr.mxu0 %v5693_v1  ;;  %v615_v38 = vsel %vm587_vm1, %v613_v9, %v614_v32  ;;  %v617_v24 = vsel %vm587_vm1, %v614_v32, %v616_v15  ;;  %v623_v25 = vrot.slane %v560_v34, 1  ;;  %v624_v28 = vrot.slane %v561_v35, 1  ;;  %v2990_v1 = vld [vmem:[%s5685_s4 + $0x3] ss:$0 sm:$0xff] }
  0x2b   : > { %3916 = vmatpush3.msra.mxu0 %v2446_v10  ;;  %v626_v29 = vrot.slane %v562_v36, 1  ;;  %v620_v30 = vsel %vm587_vm1, %v618_v16, %v619_v39  ;;  %v622_v43 = vsel %vm587_vm1, %v619_v39, %v621_v42  ;;  %v644_v31 = vadd.f32 %v590_v46, %v4168_v50  ;;  %v4292_v46 = vld [vmem:[%s4275_s30 + $0x18] sm:$0xff]  }
  0x2c   : > { %v645_v33 = vadd.f32 %v592_v47, %v4172_v51  ;;  %v625_v44 = vsel %vm587_vm1, %v623_v25, %v624_v28  ;;  %v646_v54 = vadd.f32 %v595_v6, %v4176_v52  ;;  %v647_v34 = vadd.f32 %v597_v12, %v4178_v53  ;;  %v3363_v51 = vld [vmem:[%s4275_s30] sm:$0xff]   ;;  %5750 = vst [vmem:[#allocation4_spill] sm:$0xff] %v4292_v46 }
  0x2d   : > { %v627_v45 = vsel %vm587_vm1, %v624_v28, %v626_v29  ;;  %v648_v35 = vadd.f32 %v600_v13, %v4185_v55  ;;  %v649_v36 = vadd.f32 %v602_v17, %v4188_v56  ;;  %v650_v50 = vadd.f32 %v605_v7, %v4190_v57  ;;  %v4302_v56 = vld [vmem:[%s4275_s30 + $0x48] sm:$0xff]   ;;  %v670_v13 = vld [vmem:[%s4275_s30 + $0x3c] sm:$0xff]  }
  0x2e   : > { %v651_v0 = vadd.f32 %v607_v8, %v4192_v58  ;;  %v652_v47 = vadd.f32 %v610_v37, %v4198_v60  ;;  %v653_v52 = vadd.f32 %v612_v23, %v4201_v61  ;;  %v654_v53 = vadd.f32 %v615_v38, %v4203_v62  ;;  %5752 = vst [vmem:[#allocation6_spill] sm:$0xff] %v4302_v56  ;;  %v666_v6 = vld [vmem:[%s4275_s30 + $0x24] sm:$0xff]  }
  0x2f   : > { %v655_v55 = vadd.f32 %v617_v24, %v4205_v63  ;;  %v656_v57 = vadd.f32 %v620_v30, %v4212_v2  ;;  %v657_v58 = vadd.f32 %v622_v43, %v4215_v3  ;;  %v658_v49 = vadd.f32 %v625_v44, %v4217_v4 }
  0x30   : > { %v659_v60 = vadd.f32 %v627_v45, %v4219_v5  ;;  %v3364_v61 = vunpack.c.l.bf16 %v3363_v51  ;;  %v3365_v12 = vunpack.c.h.bf16 %v3363_v51  ;;  %v5700_v62 = vunpack.c.l.bf16 %v4292_v46  ;;  %v2989_v5 = vld [vmem:[%s5685_s4 + $0x1] ss:$0 sm:$0xff] }
  0x31   : > { %v5699_v63 = vunpack.c.h.bf16 %v4292_v46  ;;  %v5698_v17 = vunpack.c.l.bf16 %v4299_v48  ;;  %v5697_v2 = vunpack.c.h.bf16 %v4299_v48  ;;  %v5696_v3 = vunpack.c.l.bf16 %v4302_v56 }
  0x32   : > { %v5695_v4 = vunpack.c.h.bf16 %v4302_v56  ;;  %v678_v20 = vunpack.c.l.bf16 %v662_v59  ;;  %v679_v21 = vunpack.c.h.bf16 %v662_v59  ;;  %v682_v22 = vunpack.c.l.bf16 %v666_v6 }
  0x33   : > { %v683_v10 = vunpack.c.h.bf16 %v666_v6  ;;  %v686_v7 = vunpack.c.l.bf16 %v670_v13  ;;  %v687_v11 = vunpack.c.h.bf16 %v670_v13  ;;  %v690_v9 = vunpack.c.l.bf16 %v674_v14 }
  0x34   : > { %v691_v32 = vunpack.c.h.bf16 %v674_v14  ;;  %v697_v8 = vmul.f32 %v3364_v61, %v2989_v5  ;;  %v698_v37 = vmul.f32 %v3365_v12, %v2989_v5  ;;  %v699_v15 = vmul.f32 %v2989_v5, %v678_v20 }
  0x35   : > { %v700_v16 = vmul.f32 %v2989_v5, %v679_v21  ;;  %v701_v23 = vmul.f32 %v5700_v62, %v2989_v5  ;;  %v702_v38 = vmul.f32 %v5699_v63, %v2989_v5  ;;  %v703_v39 = vmul.f32 %v2989_v5, %v682_v22  ;;  %v4390_v22 = vld [vmem:[%s4329_s19 + $0x14] sm:$0x1] }
  0x36   : > { %v704_v42 = vmul.f32 %v2989_v5, %v683_v10  ;;  %v705_v24 = vmul.f32 %v5698_v17, %v2989_v5  ;;  %v706_v25 = vmul.f32 %v5697_v2, %v2989_v5  ;;  %v707_v28 = vmul.f32 %v2989_v5, %v686_v7  ;;  %v4397_v7 = vld [vmem:[%s4329_s19 + $0x20] sm:$0x1] }
  0x37   : > { %v708_v29 = vmul.f32 %v2989_v5, %v687_v11  ;;  %v709_v30 = vmul.f32 %v5696_v3, %v2989_v5  ;;  %v710_v43 = vmul.f32 %v5695_v4, %v2989_v5  ;;  %v711_v44 = vmul.f32 %v2989_v5, %v690_v9  ;;  %v4403_v11 = vld [vmem:[%s4329_s19 + $0x2c] sm:$0x1] }
  0x38   : > { %v712_v45 = vmul.f32 %v2989_v5, %v691_v32  ;;  %v4339_v51 = vadd.f32 %v697_v8, %v644_v31  ;;  %v4341_v59 = vadd.f32 %v698_v37, %v645_v33  ;;  %v4343_v6 = vadd.f32 %v699_v15, %v646_v54  ;;  %v4356_v5 = vld [vmem:[%s4329_s19] sm:$0xff]   ;;  %v4359_v31 = vld [vmem:[%s4329_s19 + $0x18] sm:$0xff]  }
  0x39   : > { %v4345_v61 = vadd.f32 %v700_v16, %v647_v34  ;;  %v4347_v12 = vadd.f32 %v701_v23, %v648_v35  ;;  %v4349_v13 = vadd.f32 %v702_v38, %v649_v36  ;;  %v4351_v14 = vadd.f32 %v703_v39, %v650_v50  ;;  %v4370_v36 = vld [vmem:[%s4329_s19 + $0x30] sm:$0xff]   ;;  %v4373_v50 = vld [vmem:[%s4329_s19 + $0x48] sm:$0xff]   ;;  %v4408_v8 = vld [vmem:[%s4329_s19 + $0x38] sm:$0x1] }
  0x3a   : > { %v4353_v20 = vadd.f32 %v704_v42, %v651_v0  ;;  %v4361_v33 = vadd.f32 %v705_v24, %v652_v47  ;;  %v4363_v54 = vadd.f32 %v706_v25, %v653_v52  ;;  %v4365_v34 = vadd.f32 %v707_v28, %v654_v53  ;;  %v4384_v53 = vld [vmem:[%s4329_s19 + $0x8] sm:$0x1]  ;;  %v4411_v37 = vld [vmem:[%s4329_s19 + $0x3c] sm:$0xff]   ;;  %v4414_v15 = vld [vmem:[%s4329_s19 + $0x44] sm:$0x1] }
  0x3b   : > { %v4367_v35 = vadd.f32 %v708_v29, %v655_v55  ;;  %v4375_v0 = vadd.f32 %v709_v30, %v656_v57  ;;  %v4377_v21 = vadd.f32 %v710_v43, %v657_v58  ;;  %v4379_v47 = vadd.f32 %v711_v44, %v658_v49  ;;  %v4387_v55 = vld [vmem:[%s4329_s19 + $0xc] sm:$0xff]   ;;  %v4422_v39 = vld [vmem:[%s4329_s19 + $0x54] sm:$0xff]   ;;  %v4425_v42 = vld [vmem:[%s4329_s19 + $0x5c] sm:$0x1] }
  0x3c   : > { %v4381_v52 = vadd.f32 %v712_v45, %v659_v60  ;;  %v5701_v57 = vunpack.c.l.bf16 %v4356_v5  ;;  %v5702_v58 = vunpack.c.h.bf16 %v4356_v5  ;;  %v5707_v10 = vunpack.c.l.bf16 %v4359_v31  ;;  %v4400_v60 = vld [vmem:[%s4329_s19 + $0x24] sm:$0xff]   ;;  %v4419_v38 = vld [vmem:[%s4329_s19 + $0x50] sm:$0x1] }
  0x3d   : > { %v5710_v49 = vunpack.c.h.bf16 %v4359_v31  ;;  %v5713_v9 = vunpack.c.l.bf16 %v4370_v36  ;;  %v5714_v32 = vunpack.c.h.bf16 %v4370_v36  ;;  %v5717_v16 = vunpack.c.l.bf16 %v4373_v50 }
  0x3e   : > { %v755_v24 = vunpack.c.l.bf16 %v4384_v53  ;;  %v756_v25 = vunpack.c.l.bf16 %v4387_v55  ;;  %v757_v28 = vunpack.c.h.bf16 %v4387_v55  ;;  %v758_v29 = vunpack.c.l.bf16 %v4390_v22 }
  0x3f   : > { %v761_v30 = vunpack.c.l.bf16 %v4397_v7  ;;  %v762_v43 = vunpack.c.l.bf16 %v4400_v60  ;;  %v763_v44 = vunpack.c.h.bf16 %v4400_v60  ;;  %v764_v45 = vunpack.c.l.bf16 %v4403_v11 }
  0x40   : > { %v767_v53 = vunpack.c.l.bf16 %v4408_v8  ;;  %v768_v4 = vunpack.c.l.bf16 %v4411_v37  ;;  %v769_v55 = vunpack.c.h.bf16 %v4411_v37  ;;  %v770_v22 = vunpack.c.l.bf16 %v4414_v15 }
  0x41   : > { %v773_v7 = vunpack.c.l.bf16 %v4419_v38  ;;  %v774_v3 = vunpack.c.l.bf16 %v4422_v39  ;;  %v775_v60 = vunpack.c.h.bf16 %v4422_v39  ;;  %v776_v11 = vunpack.c.l.bf16 %v4425_v42 }
  0x42   : > { %v782_v2 = vmul.f32 %v5701_v57, %v2990_v1  ;;  %v783_v8 = vmul.f32 %v5702_v58, %v2990_v1  ;;  %v784_v17 = vmul.f32 %v2990_v1, %v756_v25  ;;  %v785_v63 = vmul.f32 %v2990_v1, %v757_v28 }
  0x43   : > { %v786_v37 = vmul.f32 %v5707_v10, %v2990_v1  ;;  %v787_v15 = vmul.f32 %v5710_v49, %v2990_v1  ;;  %v788_v38 = vmul.f32 %v2990_v1, %v762_v43  ;;  %v789_v62 = vmul.f32 %v2990_v1, %v763_v44 }
  0x44   : > { %v790_v39 = vmul.f32 %v5713_v9, %v2990_v1  ;;  %v791_v42 = vmul.f32 %v5714_v32, %v2990_v1  ;;  %v792_v57 = vmul.f32 %v2990_v1, %v768_v4  ;;  %v793_v23 = vmul.f32 %v2990_v1, %v769_v55 }
  0x45   : > { %v794_v58 = vmul.f32 %v5717_v16, %v2990_v1  ;;  %v5753_v56 = vunpack.c.h.bf16 %v4373_v50  ;;  %v796_v10 = vmul.f32 %v2990_v1, %v774_v3  ;;  %v797_v46 = vmul.f32 %v2990_v1, %v775_v60 }
  0x46   : > { %v4463_v49 = vadd.f32 %v782_v2, %v4339_v51  ;;  %v4466_v41 = vadd.f32 %v783_v8, %v4341_v59  ;;  %v4469_v9 = vadd.f32 %v784_v17, %v4343_v6  ;;  %v4472_v32 = vadd.f32 %v785_v63, %v4345_v61  ;;  %v2991_v17 = vld [vmem:[%s5685_s4 + $0x5] ss:$0 sm:$0xff] }
  0x47   : > { %v795_v48 = vmul.f32 %v5753_v56, %v2990_v1  ;;  %v4475_v40 = vadd.f32 %v786_v37, %v4347_v12  ;;  %v4478_v16 = vadd.f32 %v787_v15, %v4349_v13  ;;  %v4481_v1 = vadd.f32 %v788_v38, %v4351_v14 }
  0x48   : > { %v4484_v56 = vadd.f32 %v789_v62, %v4353_v20  ;;  %v4490_v2 = vadd.f32 %v790_v39, %v4361_v33  ;;  %v4493_v63 = vadd.f32 %v791_v42, %v4363_v54  ;;  %v4496_v51 = vadd.f32 %v792_v57, %v4365_v34 }
  0x49   : > { %v4499_v59 = vadd.f32 %v793_v23, %v4367_v35  ;;  %v4502_v6 = vadd.f32 %v794_v58, %v4375_v0  ;;  %v4505_v62 = vadd.f32 %v795_v48, %v4377_v21  ;;  %v4508_v61 = vadd.f32 %v796_v10, %v4379_v47 }
  0x4a   : > { %v4511_v12 = vadd.f32 %v797_v46, %v4381_v52  ;;  %v5754_v13 = vunpack.c.l.bf16 %v4356_v5  ;;  %v5755_v20 = vunpack.c.h.bf16 %v4356_v5  ;;  %v821_v54 = vmul.f32 %v2991_v17, %v755_v24 }
  0x4b   : > { %v822_v34 = vmul.f32 %v2991_v17, %v756_v25  ;;  %v823_v35 = vmul.f32 %v2991_v17, %v757_v28  ;;  %v824_v0 = vmul.f32 %v2991_v17, %v758_v29  ;;  %v5756_v57 = vunpack.c.l.bf16 %v4359_v31 }
  0x4c   : > { %v819_v14 = vmul.f32 %v5754_v13, %v2991_v17  ;;  %v820_v33 = vmul.f32 %v5755_v20, %v2991_v17  ;;  %v5757_v21 = vunpack.c.h.bf16 %v4359_v31  ;;  %v827_v58 = vmul.f32 %v2991_v17, %v761_v30 }
  0x4d   : > { %v825_v48 = vmul.f32 %v5756_v57, %v2991_v17  ;;  %v828_v10 = vmul.f32 %v2991_v17, %v762_v43  ;;  %v829_v46 = vmul.f32 %v2991_v17, %v763_v44  ;;  %v830_v52 = vmul.f32 %v2991_v17, %v764_v45 }
  0x4e   : > { %v826_v47 = vmul.f32 %v5757_v21, %v2991_v17  ;;  %v5758_v23 = vunpack.c.l.bf16 %v4370_v36  ;;  %v5759_v5 = vunpack.c.h.bf16 %v4370_v36  ;;  %v833_v24 = vmul.f32 %v2991_v17, %v767_v53 }
  0x4f   : > { %v834_v25 = vmul.f32 %v2991_v17, %v768_v4  ;;  %v835_v28 = vmul.f32 %v2991_v17, %v769_v55  ;;  %v836_v29 = vmul.f32 %v2991_v17, %v770_v22  ;;  %v5760_v15 = vunpack.c.l.bf16 %v4373_v50 }
  0x50   : > { %v831_v8 = vmul.f32 %v5758_v23, %v2991_v17  ;;  %v832_v37 = vmul.f32 %v5759_v5, %v2991_v17  ;;  %v5761_v31 = vunpack.c.h.bf16 %v4373_v50  ;;  %v839_v30 = vmul.f32 %v2991_v17, %v773_v7 }
  0x51   : > { %v837_v38 = vmul.f32 %v5760_v15, %v2991_v17  ;;  %v840_v43 = vmul.f32 %v2991_v17, %v774_v3  ;;  %v841_v44 = vmul.f32 %v2991_v17, %v775_v60  ;;  %v842_v45 = vmul.f32 %v2991_v17, %v776_v11 }
  0x52   : > { %v838_v39 = vmul.f32 %v5761_v31, %v2991_v17  ;;  %v867_v42 = vrot.slane %v819_v14, 1  ;;  %v868_v13 = vrot.slane %v820_v33, 1  ;;  %v870_v20 = vrot.slane %v821_v54, 1 }
  0x53   : > { %v872_v57 = vrot.slane %v822_v34, 1  ;;  %v873_v36 = vrot.slane %v823_v35, 1  ;;  %v875_v21 = vrot.slane %v824_v0, 1  ;;  %v877_v53 = vrot.slane %v825_v48, 1 }
  0x54   : > { %v878_v4 = vrot.slane %v826_v47, 1  ;;  %v869_v55 = vsel %vm587_vm1, %v867_v42, %v868_v13  ;;  %v871_v22 = vsel %vm587_vm1, %v868_v13, %v870_v20  ;;  %v880_v23 = vrot.slane %v827_v58, 1 }
  0x55   : > { %v882_v5 = vrot.slane %v828_v10, 1  ;;  %v874_v50 = vsel %vm587_vm1, %v872_v57, %v873_v36  ;;  %v876_v3 = vsel %vm587_vm1, %v873_v36, %v875_v21  ;;  %v883_v60 = vrot.slane %v829_v46, 1  ;;  %v3771_v57 = vld [vmem:[%s4544_s27 + $0x18] sm:$0xff]  }
  0x56   : > { %v879_v7 = vsel %vm587_vm1, %v877_v53, %v878_v4  ;;  %v881_v11 = vsel %vm587_vm1, %v878_v4, %v880_v23  ;;  %v885_v17 = vrot.slane %v830_v52, 1  ;;  %v887_v14 = vrot.slane %v831_v8, 1  ;;  %v3773_v53 = vld [vmem:[%s4544_s27 + $0x48] sm:$0xff]  }
  0x57   : > { %v888_v33 = vrot.slane %v832_v37, 1  ;;  %v884_v54 = vsel %vm587_vm1, %v882_v5, %v883_v60  ;;  %v890_v34 = vrot.slane %v833_v24, 1  ;;  %v892_v35 = vrot.slane %v834_v25, 1 }
  0x58   : > { %v893_v0 = vrot.slane %v835_v28, 1  ;;  %v886_v48 = vsel %vm587_vm1, %v883_v60, %v885_v17  ;;  %v895_v58 = vrot.slane %v836_v29, 1  ;;  %v897_v10 = vrot.slane %v837_v38, 1 }
  0x59   : > { %v889_v47 = vsel %vm587_vm1, %v887_v14, %v888_v33  ;;  %v891_v15 = vsel %vm587_vm1, %v888_v33, %v890_v34  ;;  %v898_v31 = vrot.slane %v838_v39, 1  ;;  %v900_v42 = vrot.slane %v839_v30, 1 }
  0x5a   : > { %v894_v46 = vsel %vm587_vm1, %v892_v35, %v893_v0  ;;  %v896_v52 = vsel %vm587_vm1, %v893_v0, %v895_v58  ;;  %v902_v8 = vrot.slane %v840_v43, 1  ;;  %v903_v37 = vrot.slane %v841_v44, 1 }
  0x5b   : > { %v905_v24 = vrot.slane %v842_v45, 1  ;;  %v899_v25 = vsel %vm587_vm1, %v897_v10, %v898_v31  ;;  %v901_v28 = vsel %vm587_vm1, %v898_v31, %v900_v42  ;;  %v923_v29 = vadd.f32 %v869_v55, %v4463_v49  ;;  %v941_v55 = vld [vmem:[%s4544_s27 + $0xc] sm:$0xff]  }
  0x5c   : > { %v924_v38 = vadd.f32 %v871_v22, %v4466_v41  ;;  %v904_v39 = vsel %vm587_vm1, %v902_v8, %v903_v37  ;;  %v925_v13 = vadd.f32 %v874_v50, %v4469_v9  ;;  %v926_v43 = vadd.f32 %v876_v3, %v4472_v32  ;;  %v3395_v41 = vld [vmem:[%s4544_s27] sm:$0xff]   ;;  %v3772_v32 = vld [vmem:[%s4544_s27 + $0x30] sm:$0xff]  }
  0x5d   : > { %v906_v30 = vsel %vm587_vm1, %v903_v37, %v905_v24  ;;  %v927_v44 = vadd.f32 %v879_v7, %v4475_v40  ;;  %v928_v45 = vadd.f32 %v881_v11, %v4478_v16  ;;  %v929_v49 = vadd.f32 %v884_v54, %v4481_v1  ;;  %v949_v50 = vld [vmem:[%s4544_s27 + $0x3c] sm:$0xff]  }
  0x5e   : > { %v930_v20 = vadd.f32 %v886_v48, %v4484_v56  ;;  %v931_v36 = vadd.f32 %v889_v47, %v4490_v2  ;;  %v932_v21 = vadd.f32 %v891_v15, %v4493_v63  ;;  %v933_v9 = vadd.f32 %v894_v46, %v4496_v51  ;;  %v945_v2 = vld [vmem:[%s4544_s27 + $0x24] sm:$0xff]   ;;  %v953_v51 = vld [vmem:[%s4544_s27 + $0x54] sm:$0xff]  }
  0x5f   : > { %v934_v40 = vadd.f32 %v896_v52, %v4499_v59  ;;  %v935_v16 = vadd.f32 %v899_v25, %v4502_v6  ;;  %v936_v1 = vadd.f32 %v901_v28, %v4505_v62  ;;  %v937_v56 = vadd.f32 %v904_v39, %v4508_v61  ;;  %v2992_v6 = vld [vmem:[%s5685_s4 + $0x4] ss:$0 sm:$0xff] }
  0x60   : > { %v938_v4 = vadd.f32 %v906_v30, %v4511_v12  ;;  %v3396_v22 = vunpack.c.l.bf16 %v3395_v41  ;;  %v3397_v23 = vunpack.c.h.bf16 %v3395_v41  ;;  %v3400_v63 = vunpack.c.l.bf16 %v3771_v57 }
  0x61   : > { %v3401_v5 = vunpack.c.h.bf16 %v3771_v57  ;;  %v3404_v3 = vunpack.c.l.bf16 %v3772_v32  ;;  %v3405_v59 = vunpack.c.h.bf16 %v3772_v32  ;;  %v3408_v7 = vunpack.c.l.bf16 %v3773_v53 }
  0x62   : > { %v3409_v60 = vunpack.c.h.bf16 %v3773_v53  ;;  %v957_v62 = vunpack.c.l.bf16 %v941_v55  ;;  %v958_v61 = vunpack.c.h.bf16 %v941_v55  ;;  %v961_v11 = vunpack.c.l.bf16 %v945_v2 }
  0x63   : > { %v962_v12 = vunpack.c.h.bf16 %v945_v2  ;;  %v965_v17 = vunpack.c.l.bf16 %v949_v50  ;;  %v966_v14 = vunpack.c.h.bf16 %v949_v50  ;;  %v969_v33 = vunpack.c.l.bf16 %v953_v51  ;;  %v4610_v2 = vld [vmem:[%s4076_s13 + $0x20] sm:$0x1]  ;;  %v4628_v50 = vld [vmem:[%s4076_s13 + $0x50] sm:$0x1] }
  0x64   : > { %v970_v54 = vunpack.c.h.bf16 %v953_v51  ;;  %v976_v34 = vmul.f32 %v3396_v22, %v2992_v6  ;;  %v977_v35 = vmul.f32 %v3397_v23, %v2992_v6  ;;  %v978_v0 = vmul.f32 %v2992_v6, %v957_v62  ;;  %v4631_v51 = vld [vmem:[%s4076_s13 + $0x54] sm:$0xff]  }
  0x65   : > { %v979_v48 = vmul.f32 %v2992_v6, %v958_v61  ;;  %v980_v47 = vmul.f32 %v3400_v63, %v2992_v6  ;;  %v981_v58 = vmul.f32 %v3401_v5, %v2992_v6  ;;  %v982_v10 = vmul.f32 %v2992_v6, %v961_v11  ;;  %v4616_v5 = vld [vmem:[%s4076_s13 + $0x2c] sm:$0x1]  ;;  %v3017_v61 = vld [vmem:[%s5685_s4 + $0x6] ss:$0 sm:$0xff] }
  0x66   : > { %v983_v15 = vmul.f32 %v2992_v6, %v962_v12  ;;  %v984_v46 = vmul.f32 %v3404_v3, %v2992_v6  ;;  %v985_v31 = vmul.f32 %v3405_v59, %v2992_v6  ;;  %v986_v42 = vmul.f32 %v2992_v6, %v965_v17 }
  0x67   : > { %v987_v52 = vmul.f32 %v2992_v6, %v966_v14  ;;  %v988_v8 = vmul.f32 %v3408_v7, %v2992_v6  ;;  %v989_v37 = vmul.f32 %v3409_v60, %v2992_v6  ;;  %v990_v24 = vmul.f32 %v2992_v6, %v969_v33 }
  0x68   : > { %v991_v25 = vmul.f32 %v2992_v6, %v970_v54  ;;  %v4578_v28 = vadd.f32 %v976_v34, %v923_v29  ;;  %v4580_v39 = vadd.f32 %v977_v35, %v924_v38  ;;  %v4582_v30 = vadd.f32 %v978_v0, %v925_v13  ;;  %v4595_v29 = vld [vmem:[%s4076_s13 + $0xc] sm:$0xff]   ;;  %v3777_v38 = vld [vmem:[%s4076_s13 + $0x60] sm:$0xff]  }
  0x69   : > { %v4584_v41 = vadd.f32 %v979_v48, %v926_v43  ;;  %v4586_v57 = vadd.f32 %v980_v47, %v927_v44  ;;  %v4588_v32 = vadd.f32 %v981_v58, %v928_v45  ;;  %v4590_v53 = vadd.f32 %v982_v10, %v929_v49  ;;  %v4607_v49 = vld [vmem:[%s4076_s13 + $0x14] sm:$0x1] }
  0x6a   : > { %v4592_v55 = vadd.f32 %v983_v15, %v930_v20  ;;  %v4598_v13 = vadd.f32 %v984_v46, %v931_v36  ;;  %v4600_v43 = vadd.f32 %v985_v31, %v932_v21  ;;  %v4602_v44 = vadd.f32 %v986_v42, %v933_v9  ;;  %v4613_v20 = vld [vmem:[%s4076_s13 + $0x24] sm:$0xff]   ;;  %v4619_v21 = vld [vmem:[%s4076_s13 + $0x38] sm:$0x1]  ;;  %v4622_v9 = vld [vmem:[%s4076_s13 + $0x3c] sm:$0xff]  }
  0x6b   : > { %v4604_v45 = vadd.f32 %v987_v52, %v934_v40  ;;  %v1004_v22 = vadd.f32 %v988_v8, %v935_v16  ;;  %v1005_v23 = vadd.f32 %v989_v37, %v936_v1  ;;  %v1006_v63 = vadd.f32 %v990_v24, %v937_v56  ;;  %v4625_v40 = vld [vmem:[%s4076_s13 + $0x44] sm:$0x1]  ;;  %v4640_v56 = vld [vmem:[%s4076_s13 + $0x5c] sm:$0x1] }
  0x6c   : > { %v1007_v36 = vadd.f32 %v991_v25, %v938_v4  ;;  %v4633_v3 = vunpack.c.l.bf16 %v3777_v38  ;;  %v4635_v59 = vunpack.c.h.bf16 %v3777_v38  ;;  %v1033_v16 = vunpack.c.l.bf16 %v4595_v29  ;;  %v4643_v4 = vld [vmem:[%s4076_s13 + $0x68] sm:$0x1]  ;;  %v5762_v24 = vld [vmem:[#allocation2_spill] sm:$0xff] }
  0x6d   : > { %v1034_v1 = vunpack.c.h.bf16 %v4595_v29  ;;  %v1035_v7 = vunpack.c.l.bf16 %v4607_v49  ;;  %v1038_v60 = vunpack.c.l.bf16 %v4610_v2  ;;  %v1039_v6 = vunpack.c.l.bf16 %v4613_v20  ;;  %v5763_v29 = vld [vmem:[#allocation3_spill] sm:$0xff] }
  0x6e   : > { %v1040_v62 = vunpack.c.h.bf16 %v4613_v20  ;;  %v1041_v11 = vunpack.c.l.bf16 %v4616_v5  ;;  %v1044_v12 = vunpack.c.l.bf16 %v4619_v21  ;;  %v1045_v17 = vunpack.c.l.bf16 %v4622_v9 }
  0x6f   : > { %v1046_v14 = vunpack.c.h.bf16 %v4622_v9  ;;  %v1047_v33 = vunpack.c.l.bf16 %v4625_v40  ;;  %v1050_v54 = vunpack.c.l.bf16 %v4628_v50  ;;  %v1051_v34 = vunpack.c.l.bf16 %v4631_v51 }
  0x70   : > { %v1052_v35 = vunpack.c.h.bf16 %v4631_v51  ;;  %v1053_v0 = vunpack.c.l.bf16 %v4640_v56  ;;  %v1056_v48 = vunpack.c.l.bf16 %v4643_v4  ;;  %v1062_v47 = vmul.f32 %v3017_v61, %v1033_v16 }
  0x71   : > { %v1063_v58 = vmul.f32 %v3017_v61, %v1034_v1  ;;  %v1064_v10 = vmul.f32 %v4106_v18, %v3017_v61  ;;  %v1065_v15 = vmul.f32 %v4108_v19, %v3017_v61  ;;  %v1066_v46 = vmul.f32 %v3017_v61, %v1039_v6 }
  0x72   : > { %v1067_v31 = vmul.f32 %v3017_v61, %v1040_v62  ;;  %v1068_v42 = vmul.f32 %v4122_v26, %v3017_v61  ;;  %v1069_v52 = vmul.f32 %v4124_v27, %v3017_v61  ;;  %v1070_v8 = vmul.f32 %v3017_v61, %v1045_v17 }
  0x73   : > { %v1071_v37 = vmul.f32 %v3017_v61, %v1046_v14  ;;  %v1072_v25 = vmul.f32 %v5762_v24, %v3017_v61  ;;  %v1073_v38 = vmul.f32 %v5763_v29, %v3017_v61  ;;  %v1074_v49 = vmul.f32 %v3017_v61, %v1051_v34 }
  0x74   : > { %v1075_v2 = vmul.f32 %v3017_v61, %v1052_v35  ;;  %v1076_v20 = vmul.f32 %v4633_v3, %v3017_v61  ;;  %v1077_v5 = vmul.f32 %v4635_v59, %v3017_v61  ;;  %v4671_v21 = vadd.f32 %v1062_v47, %v4578_v28  ;;  %v3018_v28 = vld [vmem:[%s5685_s4 + $0x8] ss:$0 sm:$0xff] }
  0x75   : > { %v4674_v9 = vadd.f32 %v1063_v58, %v4580_v39  ;;  %v4677_v40 = vadd.f32 %v1064_v10, %v4582_v30  ;;  %v4680_v50 = vadd.f32 %v1065_v15, %v4584_v41  ;;  %v4683_v51 = vadd.f32 %v1066_v46, %v4586_v57 }
  0x76   : > { %v4686_v56 = vadd.f32 %v1067_v31, %v4588_v32  ;;  %v4692_v4 = vadd.f32 %v1068_v42, %v4590_v53  ;;  %v4695_v39 = vadd.f32 %v1069_v52, %v4592_v55  ;;  %v4698_v30 = vadd.f32 %v1070_v8, %v4598_v13 }
  0x77   : > { %v4701_v41 = vadd.f32 %v1071_v37, %v4600_v43  ;;  %v4704_v57 = vadd.f32 %v1072_v25, %v4602_v44  ;;  %v4707_v32 = vadd.f32 %v1073_v38, %v4604_v45  ;;  %v4709_v61 = vadd.f32 %v1074_v49, %v1004_v22 }
  0x78   : > { %v4711_v47 = vadd.f32 %v1075_v2, %v1005_v23  ;;  %v4713_v53 = vadd.f32 %v1076_v20, %v1006_v63  ;;  %v4715_v55 = vadd.f32 %v1077_v5, %v1007_v36  ;;  %v1099_v58 = vmul.f32 %v3018_v28, %v1033_v16 }
  0x79   : > { %v1100_v13 = vmul.f32 %v3018_v28, %v1034_v1  ;;  %v1101_v10 = vmul.f32 %v3018_v28, %v1035_v7  ;;  %v1102_v43 = vmul.f32 %v4106_v18, %v3018_v28  ;;  %v1103_v15 = vmul.f32 %v4108_v19, %v3018_v28 }
  0x7a   : > { %v1104_v44 = vmul.f32 %v3018_v28, %v1038_v60  ;;  %v1105_v46 = vmul.f32 %v3018_v28, %v1039_v6  ;;  %v1106_v31 = vmul.f32 %v3018_v28, %v1040_v62  ;;  %v1107_v45 = vmul.f32 %v3018_v28, %v1041_v11 }
  0x7b   : > { %v1108_v22 = vmul.f32 %v4122_v26, %v3018_v28  ;;  %v1109_v23 = vmul.f32 %v4124_v27, %v3018_v28  ;;  %v1110_v42 = vmul.f32 %v3018_v28, %v1044_v12  ;;  %v1111_v63 = vmul.f32 %v3018_v28, %v1045_v17 }
  0x7c   : > { %v1112_v52 = vmul.f32 %v3018_v28, %v1046_v14  ;;  %v1113_v36 = vmul.f32 %v3018_v28, %v1047_v33  ;;  %v1114_v16 = vmul.f32 %v5762_v24, %v3018_v28  ;;  %v1115_v1 = vmul.f32 %v5763_v29, %v3018_v28 }
  0x7d   : > { %v1116_v7 = vmul.f32 %v3018_v28, %v1050_v54  ;;  %v1117_v18 = vmul.f32 %v3018_v28, %v1051_v34  ;;  %v1118_v8 = vmul.f32 %v3018_v28, %v1052_v35  ;;  %v1119_v19 = vmul.f32 %v3018_v28, %v1053_v0 }
  0x7e   : > { %v1120_v60 = vmul.f32 %v4633_v3, %v3018_v28  ;;  %v1121_v6 = vmul.f32 %v4635_v59, %v3018_v28  ;;  %v1122_v62 = vmul.f32 %v3018_v28, %v1056_v48  ;;  %v1147_v26 = vrot.slane %v1099_v58, 1 }
  0x7f   : > { %v1148_v11 = vrot.slane %v1100_v13, 1  ;;  %v1150_v27 = vrot.slane %v1101_v10, 1  ;;  %v1152_v12 = vrot.slane %v1102_v43, 1  ;;  %v1153_v17 = vrot.slane %v1103_v15, 1 }
  0x80   : > { %v1155_v14 = vrot.slane %v1104_v44, 1  ;;  %v1157_v37 = vrot.slane %v1105_v46, 1  ;;  %v1158_v24 = vrot.slane %v1106_v31, 1  ;;  %v1160_v25 = vrot.slane %v1107_v45, 1 }
  0x81   : > { %v1149_v33 = vsel %vm587_vm1, %v1147_v26, %v1148_v11  ;;  %v1151_v54 = vsel %vm587_vm1, %v1148_v11, %v1150_v27  ;;  %v1154_v34 = vsel %vm587_vm1, %v1152_v12, %v1153_v17  ;;  %v1162_v0 = vrot.slane %v1108_v22, 1  ;;  %v4748_v26 = vld [vmem:[%s4275_s30 + $0x60] sm:$0xff]   ;;  %v3019_v11 = vld [vmem:[%s4275_s30 + $0xc] sm:$0xff]  }
  0x82   : > { %v1156_v35 = vsel %vm587_vm1, %v1153_v17, %v1155_v14  ;;  %v1159_v48 = vsel %vm587_vm1, %v1157_v37, %v1158_v24  ;;  %v1161_v29 = vsel %vm587_vm1, %v1158_v24, %v1160_v25  ;;  %v1163_v38 = vrot.slane %v1109_v23, 1  ;;  %v3023_v27 = vld [vmem:[%s4275_s30 + $0x24] sm:$0xff]   ;;  %v3027_v14 = vld [vmem:[%s4275_s30 + $0x3c] sm:$0xff]  }
  0x83   : > { %v1165_v49 = vrot.slane %v1110_v42, 1  ;;  %v1167_v2 = vrot.slane %v1111_v63, 1  ;;  %v1168_v20 = vrot.slane %v1112_v52, 1  ;;  %v1170_v5 = vrot.slane %v1113_v36, 1 }
  0x84   : > { %v1172_v28 = vrot.slane %v1114_v16, 1  ;;  %v1164_v58 = vsel %vm587_vm1, %v1162_v0, %v1163_v38  ;;  %v1173_v10 = vrot.slane %v1115_v1, 1  ;;  %v1175_v43 = vrot.slane %v1116_v7, 1  ;;  %v5764_v0 = vld [vmem:[#allocation4_spill] sm:$0xff] }
  0x85   : > { %v1166_v13 = vsel %vm587_vm1, %v1163_v38, %v1165_v49  ;;  %v1169_v15 = vsel %vm587_vm1, %v1167_v2, %v1168_v20  ;;  %v1171_v44 = vsel %vm587_vm1, %v1168_v20, %v1170_v5  ;;  %v1177_v46 = vrot.slane %v1117_v18, 1  ;;  %v5767_v20 = vld [vmem:[#allocation5_spill] sm:$0xff] }
  0x86   : > { %v1178_v31 = vrot.slane %v1118_v8, 1  ;;  %v1174_v45 = vsel %vm587_vm1, %v1172_v28, %v1173_v10  ;;  %v1176_v22 = vsel %vm587_vm1, %v1173_v10, %v1175_v43  ;;  %v1180_v23 = vrot.slane %v1119_v19, 1 }
  0x87   : > { %v1182_v42 = vrot.slane %v1120_v60, 1  ;;  %v1183_v52 = vrot.slane %v1121_v6, 1  ;;  %v1185_v36 = vrot.slane %v1122_v62, 1  ;;  %v1203_v16 = vadd.f32 %v1149_v33, %v4671_v21  ;;  %v3031_v33 = vld [vmem:[%s4275_s30 + $0x54] sm:$0xff]  }
  0x88   : > { %v1179_v63 = vsel %vm587_vm1, %v1177_v46, %v1178_v31  ;;  %v1181_v1 = vsel %vm587_vm1, %v1178_v31, %v1180_v23  ;;  %v1204_v7 = vadd.f32 %v1151_v54, %v4674_v9  ;;  %v1205_v18 = vadd.f32 %v1154_v34, %v4677_v40 }
  0x89   : > { %v1206_v8 = vadd.f32 %v1156_v35, %v4680_v50  ;;  %v1184_v19 = vsel %vm587_vm1, %v1182_v42, %v1183_v52  ;;  %v1186_v60 = vsel %vm587_vm1, %v1183_v52, %v1185_v36  ;;  %v1207_v6 = vadd.f32 %v1159_v48, %v4683_v51 }
  0x8a   : > { %v1208_v62 = vadd.f32 %v1161_v29, %v4686_v56  ;;  %v1209_v21 = vadd.f32 %v1164_v58, %v4692_v4  ;;  %v1210_v9 = vadd.f32 %v1166_v13, %v4695_v39  ;;  %v1211_v40 = vadd.f32 %v1169_v15, %v4698_v30  ;;  %v5770_v15 = vld [vmem:[#allocation6_spill] sm:$0xff] }
  0x8b   : > { %v1212_v50 = vadd.f32 %v1171_v44, %v4701_v41  ;;  %v1213_v12 = vadd.f32 %v1174_v45, %v4704_v57  ;;  %v1214_v17 = vadd.f32 %v1176_v22, %v4707_v32  ;;  %v1215_v51 = vadd.f32 %v1179_v63, %v4709_v61  ;;  %v3035_v57 = vld [vmem:[%s5685_s4 + $0x7] ss:$0 sm:$0xff] }
  0x8c   : > { %v1216_v56 = vadd.f32 %v1181_v1, %v4711_v47  ;;  %v1217_v4 = vadd.f32 %v1184_v19, %v4713_v53  ;;  %v1218_v39 = vadd.f32 %v1186_v60, %v4715_v55  ;;  %v5719_v30 = vunpack.c.l.bf16 %v4748_v26  ;;  %v3036_v60 = vld [vmem:[%s5686_s5] ss:$0 sm:$0xff] }
  0x8d   : > { %v5718_v41 = vunpack.c.h.bf16 %v4748_v26  ;;  %v1236_v37 = vunpack.c.l.bf16 %v3019_v11  ;;  %v1237_v32 = vunpack.c.h.bf16 %v3019_v11  ;;  %v1240_v24 = vunpack.c.l.bf16 %v3023_v27 }
  0x8e   : > { %v1241_v61 = vunpack.c.h.bf16 %v3023_v27  ;;  %v1244_v25 = vunpack.c.l.bf16 %v3027_v14  ;;  %v1245_v47 = vunpack.c.h.bf16 %v3027_v14  ;;  %v1248_v54 = vunpack.c.l.bf16 %v3031_v33 }
  0x8f   : > { %v1249_v34 = vunpack.c.h.bf16 %v3031_v33  ;;  %v1257_v35 = vmul.f32 %v3035_v57, %v1236_v37  ;;  %v1258_v53 = vmul.f32 %v3035_v57, %v1237_v32  ;;  %v5765_v55 = vunpack.c.l.bf16 %v5764_v0 }
  0x90   : > { %v5766_v29 = vunpack.c.h.bf16 %v5764_v0  ;;  %v1261_v49 = vmul.f32 %v3035_v57, %v1240_v24  ;;  %v1262_v2 = vmul.f32 %v3035_v57, %v1241_v61  ;;  %v5768_v5 = vunpack.c.l.bf16 %v5767_v20 }
  0x91   : > { %v1259_v48 = vmul.f32 %v5765_v55, %v3035_v57  ;;  %v5769_v58 = vunpack.c.h.bf16 %v5767_v20  ;;  %v1265_v10 = vmul.f32 %v3035_v57, %v1244_v25  ;;  %v1266_v43 = vmul.f32 %v3035_v57, %v1245_v47 }
  0x92   : > { %v1260_v38 = vmul.f32 %v5766_v29, %v3035_v57  ;;  %v1263_v28 = vmul.f32 %v5768_v5, %v3035_v57  ;;  %v5771_v44 = vunpack.c.l.bf16 %v5770_v15  ;;  %v5772_v31 = vunpack.c.h.bf16 %v5770_v15 }
  0x93   : > { %v1264_v13 = vmul.f32 %v5769_v58, %v3035_v57  ;;  %v1269_v22 = vmul.f32 %v3035_v57, %v1248_v54  ;;  %v1270_v23 = vmul.f32 %v3035_v57, %v1249_v34  ;;  %v1271_v42 = vmul.f32 %v5719_v30, %v3035_v57  ;;  %v3037_v34 = vld [vmem:[%s5687_s6] ss:$0 sm:$0xff] }
  0x94   : > { %v1267_v46 = vmul.f32 %v5771_v44, %v3035_v57  ;;  %v1268_v45 = vmul.f32 %v5772_v31, %v3035_v57  ;;  %v1272_v63 = vmul.f32 %v5718_v41, %v3035_v57  ;;  %v1273_v52 = vadd.f32 %v1257_v35, %v1203_v16 }
  0x95   : > { %v1274_v36 = vadd.f32 %v1258_v53, %v1204_v7  ;;  %v1275_v1 = vadd.f32 %v1259_v48, %v1205_v18  ;;  %v1276_v19 = vadd.f32 %v1260_v38, %v1206_v8  ;;  %v1277_v11 = vadd.f32 %v1261_v49, %v1207_v6 }
  0x96   : > { %v1278_v27 = vadd.f32 %v1262_v2, %v1208_v62  ;;  %v1279_v14 = vadd.f32 %v1263_v28, %v1209_v21  ;;  %v1280_v33 = vadd.f32 %v1264_v13, %v1210_v9  ;;  %v1281_v37 = vadd.f32 %v1265_v10, %v1211_v40 }
  0x97   : > { %v1282_v32 = vadd.f32 %v1266_v43, %v1212_v50  ;;  %v1283_v24 = vadd.f32 %v1267_v46, %v1213_v12  ;;  %v1284_v61 = vadd.f32 %v1268_v45, %v1214_v17  ;;  %v1285_v25 = vadd.f32 %v1269_v22, %v1215_v51 }
  0x98   : > { %v1286_v47 = vadd.f32 %v1270_v23, %v1216_v56  ;;  %v1287_v54 = vadd.f32 %v1271_v42, %v1217_v4  ;;  %v1288_v57 = vadd.f32 %v1272_v63, %v1218_v39  ;;  %v1295_v16 = vmul.f32 %v3036_v60, %v1273_v52 }
  0x99   : > { %v1296_v7 = vmul.f32 %v3036_v60, %v1274_v36  ;;  %v1297_v18 = vmul.f32 %v3036_v60, %v1275_v1  ;;  %v1298_v8 = vmul.f32 %v3036_v60, %v1276_v19  ;;  %v1299_v6 = vmul.f32 %v3036_v60, %v1277_v11 }
  0x9a   : > { %v1300_v62 = vmul.f32 %v3036_v60, %v1278_v27  ;;  %v1301_v21 = vmul.f32 %v3036_v60, %v1279_v14  ;;  %v1302_v9 = vmul.f32 %v3036_v60, %v1280_v33  ;;  %v1303_v40 = vmul.f32 %v3036_v60, %v1281_v37 }
  0x9b   : > { %v1304_v50 = vmul.f32 %v3036_v60, %v1282_v32  ;;  %v1305_v12 = vmul.f32 %v3036_v60, %v1283_v24  ;;  %v1306_v17 = vmul.f32 %v3036_v60, %v1284_v61  ;;  %v1307_v51 = vmul.f32 %v3036_v60, %v1285_v25 }
  0x9c   : > { %v1308_v56 = vmul.f32 %v3036_v60, %v1286_v47  ;;  %v1309_v4 = vmul.f32 %v3036_v60, %v1287_v54  ;;  %v1310_v39 = vmul.f32 %v3036_v60, %v1288_v57  ;;  %v1317_v35 = vadd.f32 %v3037_v34, %v1295_v16  ;;  %v3790_v54 = vld [vmem:[%s4076_s13 + $0x78] sm:$0xff]  }
  0x9d   : > { %v1318_v53 = vadd.f32 %v3037_v34, %v1296_v7  ;;  %v1319_v0 = vadd.f32 %v3037_v34, %v1297_v18  ;;  %v1320_v55 = vadd.f32 %v3037_v34, %v1298_v8  ;;  %v1321_v48 = vadd.f32 %v3037_v34, %v1299_v6  ;;  %v3791_v7 = vld [vmem:[%s4076_s13 + $0x90] sm:$0xff]   ;;  %v3792_v18 = vld [vmem:[%s4076_s13 + $0xa8] sm:$0xff]  }
  0x9e   : > { %v1322_v29 = vadd.f32 %v3037_v34, %v1300_v62  ;;  %v4791_v38 = vadd.f32 %v3037_v34, %v1301_v21  ;;  %v4793_v49 = vadd.f32 %v3037_v34, %v1302_v9  ;;  %v4795_v2 = vadd.f32 %v3037_v34, %v1303_v40  ;;  %v4851_v8 = vld [vmem:[%s4076_s13 + $0x68] sm:$0x1]  ;;  %v4857_v21 = vld [vmem:[%s4076_s13 + $0x74] sm:$0x1] }
  0x9f   : > { %v4797_v20 = vadd.f32 %v3037_v34, %v1304_v50  ;;  %v4799_v5 = vadd.f32 %v3037_v34, %v1305_v12  ;;  %v4801_v28 = vadd.f32 %v3037_v34, %v1306_v17  ;;  %v4803_v58 = vadd.f32 %v3037_v34, %v1307_v51  ;;  %v4864_v50 = vld [vmem:[%s4076_s13 + $0x80] sm:$0x1]  ;;  %v4867_v12 = vld [vmem:[%s4076_s13 + $0x84] sm:$0xff]   ;;  %v4870_v17 = vld [vmem:[%s4076_s13 + $0x8c] sm:$0x1] }
  0xa0   : > { %v4805_v13 = vadd.f32 %v3037_v34, %v1308_v56  ;;  %v4807_v10 = vadd.f32 %v3037_v34, %v1309_v4  ;;  %v4809_v43 = vadd.f32 %v3037_v34, %v1310_v39  ;;  %v1333_v15 = vmax.f32 %v1317_v35, 0.0  ;;  %v4854_v34 = vld [vmem:[%s4076_s13 + $0x6c] sm:$0xff]  }
  0xa1   : > { %v1334_v44 = vmax.f32 %v1318_v53, 0.0  ;;  %v1335_v46 = vmax.f32 %v1319_v0, 0.0  ;;  %v1336_v31 = vmax.f32 %v1320_v55, 0.0  ;;  %v1337_v45 = vmax.f32 %v1321_v48, 0.0  ;;  %v4881_v0 = vld [vmem:[%s4076_s13 + $0x98] sm:$0x1] }
  0xa2   : > { %v1338_v22 = vmax.f32 %v1322_v29, 0.0  ;;  %v1339_v23 = vmax.f32 %v4791_v38, 0.0  ;;  %v1340_v42 = vmax.f32 %v4793_v49, 0.0  ;;  %v1341_v63 = vmax.f32 %v4795_v2, 0.0  ;;  %v4884_v55 = vld [vmem:[%s4076_s13 + $0x9c] sm:$0xff]   ;;  %v4895_v2 = vld [vmem:[%s4076_s13 + $0xb4] sm:$0xff]  }
  0xa3   : > { %v1342_v52 = vmax.f32 %v4797_v20, 0.0  ;;  %v1343_v36 = vmax.f32 %v4799_v5, 0.0  ;;  %v1344_v1 = vmax.f32 %v4801_v28, 0.0  ;;  %v1345_v19 = vmax.f32 %v4803_v58, 0.0  ;;  %v4887_v48 = vld [vmem:[%s4076_s13 + $0xa4] sm:$0x1] }
  0xa4   : > { %v1346_v60 = vmax.f32 %v4805_v13, 0.0  ;;  %v1347_v11 = vmax.f32 %v4807_v10, 0.0  ;;  %v1348_v27 = vmax.f32 %v4809_v43, 0.0  ;;  %v3445_v14 = vpack.c.bf16 %v1334_v44, %v1333_v15  ;;  %v4892_v49 = vld [vmem:[%s4076_s13 + $0xb0] sm:$0x1] }
  0xa5   : > { %v3450_v33 = vpack.c.bf16 %v1336_v31, %v1335_v46  ;;  %v3455_v37 = vpack.c.bf16 %v1338_v22, %v1337_v45  ;;  %v3460_v32 = vpack.c.bf16 %v1340_v42, %v1339_v23  ;;  %v3465_v24 = vpack.c.bf16 %v1342_v52, %v1341_v63  ;;  %v3079_v58 = vld [vmem:[%s5685_s4 + $0x2] ss:$0 sm:$0xff] }
  0xa6   : > { %v3470_v61 = vpack.c.bf16 %v1344_v1, %v1343_v36  ;;  %v3475_v25 = vpack.c.bf16 %v1346_v60, %v1345_v19  ;;  %v3480_v47 = vpack.c.bf16 %v1348_v27, %v1347_v11  ;;  %3446 = vst [vmem:[%s4821_s28] sm:$0xff] %v3445_v14   ;;  %v1429_v57 = vadd.f32 %v1335_v46, %v1333_v15  ;;  %v3078_v14 = vld [vmem:[%s5685_s4] ss:$0 sm:$0xff] }
  0xa7   : > { %3782 = vst [vmem:[%s4821_s28 + $0x8] sm:$0xff] %v3450_v33   ;;  %3783 = vst [vmem:[%s4821_s28 + $0x10] sm:$0xff] %v3455_v37   ;;  %v1436_v16 = vadd.f32 %v1336_v31, %v1334_v44  ;;  %v4859_v9 = vunpack.c.l.bf16 %v3790_v54  ;;  %v4861_v40 = vunpack.c.h.bf16 %v3790_v54  ;;  %v4872_v51 = vunpack.c.l.bf16 %v3791_v7 }
  0xa8   : > { %3784 = vst [vmem:[%s4821_s28 + $0x18] sm:$0xff] %v3460_v32   ;;  %3785 = vst [vmem:[%s4821_s28 + $0x20] sm:$0xff] %v3465_v24   ;;  %v1430_v6 = vadd.f32 %v1429_v57, %v1337_v45  ;;  %v4874_v56 = vunpack.c.h.bf16 %v3791_v7  ;;  %v4876_v4 = vunpack.c.l.bf16 %v3792_v18  ;;  %v4878_v39 = vunpack.c.h.bf16 %v3792_v18 }
  0xa9   : > { %3786 = vst [vmem:[%s4821_s28 + $0x28] sm:$0xff] %v3470_v61   ;;  %3787 = vst [vmem:[%s4821_s28 + $0x30] sm:$0xff] %v3475_v25   ;;  %v1437_v62 = vadd.f32 %v1436_v16, %v1338_v22  ;;  %v1478_v29 = vunpack.c.l.bf16 %v4851_v8  ;;  %v1479_v38 = vunpack.c.l.bf16 %v4854_v34  ;;  %v1480_v20 = vunpack.c.h.bf16 %v4854_v34  ;;  %v4902_v22 = vld [vmem:[%s4076_s13 + $0xbc] sm:$0x1] }
  0xaa   : > { %3788 = vst [vmem:[%s4821_s28 + $0x38] sm:$0xff] %v3480_v47   ;;  %5773 = vst [vmem:[#allocation2_spill] sm:$0xff] %v4878_v39  ;;  %v1431_v35 = vadd.f32 %v1430_v6, %v1339_v23  ;;  %v1481_v15 = vunpack.c.l.bf16 %v4857_v21  ;;  %v1484_v44 = vunpack.c.l.bf16 %v4864_v50  ;;  %v1485_v46 = vunpack.c.l.bf16 %v4867_v12 }
  0xab   : > { %v1438_v53 = vadd.f32 %v1437_v62, %v1340_v42  ;;  %v1486_v23 = vunpack.c.h.bf16 %v4867_v12  ;;  %v1487_v42 = vunpack.c.l.bf16 %v4870_v17  ;;  %v1490_v33 = vunpack.c.l.bf16 %v4881_v0 }
  0xac   : > { %v1432_v31 = vadd.f32 %v1431_v35, %v1341_v63  ;;  %v1491_v37 = vunpack.c.l.bf16 %v4884_v55  ;;  %v1492_v32 = vunpack.c.h.bf16 %v4884_v55  ;;  %v1493_v24 = vunpack.c.l.bf16 %v4887_v48 }
  0xad   : > { %v1439_v45 = vadd.f32 %v1438_v53, %v1342_v52  ;;  %v1496_v61 = vunpack.c.l.bf16 %v4892_v49  ;;  %v1497_v25 = vunpack.c.l.bf16 %v4895_v2  ;;  %v1498_v47 = vunpack.c.h.bf16 %v4895_v2 }
  0xae   : > { %v1433_v63 = vadd.f32 %v1432_v31, %v1343_v36  ;;  %v1499_v54 = vunpack.c.l.bf16 %v4902_v22  ;;  %v4922_v57 = vmul.f32 %v4633_v3, %v3078_v14  ;;  %v4925_v16 = vmul.f32 %v4635_v59, %v3078_v14 }
  0xaf   : > { %v1440_v52 = vadd.f32 %v1439_v45, %v1344_v1  ;;  %v4931_v36 = vmul.f32 %v3078_v14, %v1479_v38  ;;  %v4933_v1 = vmul.f32 %v3078_v14, %v1480_v20  ;;  %v4936_v7 = vmul.f32 %v4859_v9, %v3078_v14 }
  0xb0   : > { %v1434_v5 = vadd.f32 %v1433_v63, %v1345_v19  ;;  %v4939_v18 = vmul.f32 %v4861_v40, %v3078_v14  ;;  %v4941_v8 = vmul.f32 %v3078_v14, %v1485_v46  ;;  %v4943_v34 = vmul.f32 %v3078_v14, %v1486_v23 }
  0xb1   : > { %v1441_v28 = vadd.f32 %v1440_v52, %v1346_v60  ;;  %v4953_v60 = vmul.f32 %v4872_v51, %v3078_v14  ;;  %v4956_v6 = vmul.f32 %v4874_v56, %v3078_v14  ;;  %v4958_v62 = vmul.f32 %v3078_v14, %v1491_v37 }
  0xb2   : > { %v1435_v13 = vadd.f32 %v1434_v5, %v1347_v11  ;;  %v4960_v21 = vmul.f32 %v3078_v14, %v1492_v32  ;;  %v4963_v50 = vmul.f32 %v4876_v4, %v3078_v14  ;;  %v4966_v12 = vmul.f32 %v4878_v39, %v3078_v14 }
  0xb3   : > { %v1442_v19 = vadd.f32 %v1441_v28, %v1348_v27  ;;  %v4970_v43 = vmul.f32 %v3078_v14, %v1497_v25  ;;  %v4972_v11 = vmul.f32 %v3078_v14, %v1498_v47  ;;  %v1542_v27 = vmul.f32 %v4633_v3, %v3079_v58 }
  0xb4   : > { %v1543_v17 = vmul.f32 %v4635_v59, %v3079_v58  ;;  %v1544_v35 = vmul.f32 %v3079_v58, %v1478_v29  ;;  %v1545_v53 = vmul.f32 %v3079_v58, %v1479_v38  ;;  %v1546_v0 = vmul.f32 %v3079_v58, %v1480_v20 }
  0xb5   : > { %v4968_v10 = vadd.f32 %v1442_v19, %v1435_v13  ;;  %v1547_v55 = vmul.f32 %v3079_v58, %v1481_v15  ;;  %v1548_v48 = vmul.f32 %v4859_v9, %v3079_v58  ;;  %v1549_v49 = vmul.f32 %v4861_v40, %v3079_v58 }
  0xb6   : > { %v1550_v2 = vmul.f32 %v3079_v58, %v1484_v44  ;;  %v1551_v31 = vmul.f32 %v3079_v58, %v1485_v46  ;;  %v1552_v45 = vmul.f32 %v3079_v58, %v1486_v23  ;;  %v1553_v22 = vmul.f32 %v3079_v58, %v1487_v42 }
  0xb7   : > { %5774 = vst [vmem:[#allocation3_spill] sm:$0xff] %v4968_v10  ;;  %v1554_v63 = vmul.f32 %v4872_v51, %v3079_v58  ;;  %v1555_v14 = vmul.f32 %v4874_v56, %v3079_v58  ;;  %v1556_v52 = vmul.f32 %v3079_v58, %v1490_v33  ;;  %v1557_v3 = vmul.f32 %v3079_v58, %v1491_v37 }
  0xb8   : > { %v1558_v5 = vmul.f32 %v3079_v58, %v1492_v32  ;;  %v1559_v59 = vmul.f32 %v3079_v58, %v1493_v24  ;;  %v1560_v29 = vmul.f32 %v4876_v4, %v3079_v58  ;;  %v1561_v38 = vmul.f32 %v4878_v39, %v3079_v58 }
  0xb9   : > { %v1590_v20 = vrot.slane %v1542_v27, 1  ;;  %v1562_v15 = vmul.f32 %v3079_v58, %v1496_v61  ;;  %v1591_v28 = vrot.slane %v1543_v17, 1  ;;  %v1593_v13 = vrot.slane %v1544_v35, 1 }
  0xba   : > { %v1595_v44 = vrot.slane %v1545_v53, 1  ;;  %v1596_v46 = vrot.slane %v1546_v0, 1  ;;  %v1598_v23 = vrot.slane %v1547_v55, 1  ;;  %v1600_v42 = vrot.slane %v1548_v48, 1 }
  0xbb   : > { %v1601_v19 = vrot.slane %v1549_v49, 1  ;;  %v1563_v41 = vmul.f32 %v3079_v58, %v1497_v25  ;;  %v1564_v30 = vmul.f32 %v3079_v58, %v1498_v47  ;;  %v1592_v33 = vsel %vm587_vm1, %v1590_v20, %v1591_v28 }
  0xbc   : > { %v1603_v37 = vrot.slane %v1550_v2, 1  ;;  %v1565_v32 = vmul.f32 %v3079_v58, %v1499_v54  ;;  %v1594_v24 = vsel %vm587_vm1, %v1591_v28, %v1593_v13  ;;  %v1597_v10 = vsel %vm587_vm1, %v1595_v44, %v1596_v46  ;;  %v5004_v44 = vld [vmem:[%s4275_s30 + $0x78] sm:$0xff]  }
  0xbd   : > { %v1605_v39 = vrot.slane %v1551_v31, 1  ;;  %v1599_v61 = vsel %vm587_vm1, %v1596_v46, %v1598_v23  ;;  %v1602_v27 = vsel %vm587_vm1, %v1600_v42, %v1601_v19  ;;  %v1606_v17 = vrot.slane %v1552_v45, 1  ;;  %v5014_v23 = vld [vmem:[%s4275_s30 + $0xa8] sm:$0xff]  }
  0xbe   : > { %v1608_v35 = vrot.slane %v1553_v22, 1  ;;  %v1610_v53 = vrot.slane %v1554_v63, 1  ;;  %v1611_v0 = vrot.slane %v1555_v14, 1  ;;  %v1613_v55 = vrot.slane %v1556_v52, 1  ;;  %5776 = vst [vmem:[#allocation5_spill] sm:$0xff] %v5014_v23 }
  0xbf   : > { %v1615_v25 = vrot.slane %v1557_v3, 1  ;;  %v1604_v47 = vsel %vm587_vm1, %v1601_v19, %v1603_v37  ;;  %v1607_v48 = vsel %vm587_vm1, %v1605_v39, %v1606_v17  ;;  %v1616_v58 = vrot.slane %v1558_v5, 1  ;;  %v3082_v19 = vld [vmem:[%s4275_s30 + $0x6c] sm:$0xff]  }
  0xc0   : > { %v1609_v54 = vsel %vm587_vm1, %v1606_v17, %v1608_v35  ;;  %v1612_v49 = vsel %vm587_vm1, %v1610_v53, %v1611_v0  ;;  %v1614_v2 = vsel %vm587_vm1, %v1611_v0, %v1613_v55  ;;  %v1618_v31 = vrot.slane %v1559_v59, 1 }
  0xc1   : > { %v1620_v20 = vrot.slane %v1560_v29, 1  ;;  %v1617_v45 = vsel %vm587_vm1, %v1615_v25, %v1616_v58  ;;  %v1621_v22 = vrot.slane %v1561_v38, 1  ;;  %v1623_v63 = vrot.slane %v1562_v15, 1 }
  0xc2   : > { %v1625_v14 = vrot.slane %v1563_v41, 1  ;;  %v1619_v52 = vsel %vm587_vm1, %v1616_v58, %v1618_v31  ;;  %v1626_v3 = vrot.slane %v1564_v30, 1  ;;  %v1628_v39 = vrot.slane %v1565_v32, 1  ;;  %v3090_v32 = vld [vmem:[%s4275_s30 + $0x9c] sm:$0xff]  }
  0xc3   : > { %v1646_v5 = vadd.f32 %v1592_v33, %v4922_v57  ;;  %v1622_v28 = vsel %vm587_vm1, %v1620_v20, %v1621_v22  ;;  %v1624_v13 = vsel %vm587_vm1, %v1621_v22, %v1623_v63  ;;  %v1647_v59 = vadd.f32 %v1594_v24, %v4925_v16  ;;  %v3086_v33 = vld [vmem:[%s4275_s30 + $0x84] sm:$0xff]   ;;  %v3094_v24 = vld [vmem:[%s4275_s30 + $0xb4] sm:$0xff]  }
  0xc4   : > { %v1648_v29 = vadd.f32 %v1597_v10, %v4931_v36  ;;  %v1627_v38 = vsel %vm587_vm1, %v1625_v14, %v1626_v3  ;;  %v1629_v41 = vsel %vm587_vm1, %v1626_v3, %v1628_v39  ;;  %v1649_v30 = vadd.f32 %v1599_v61, %v4933_v1  ;;  %v5011_v10 = vld [vmem:[%s4275_s30 + $0x90] sm:$0xff]  }
  0xc5   : > { %v1650_v15 = vadd.f32 %v1602_v27, %v4936_v7  ;;  %v1651_v57 = vadd.f32 %v1604_v47, %v4939_v18  ;;  %v1652_v46 = vadd.f32 %v1607_v48, %v4941_v8  ;;  %v1653_v16 = vadd.f32 %v1609_v54, %v4943_v34  ;;  %5775 = vst [vmem:[#allocation4_spill] sm:$0xff] %v5011_v10 }
  0xc6   : > { %v1654_v36 = vadd.f32 %v1612_v49, %v4953_v60  ;;  %v1655_v1 = vadd.f32 %v1614_v2, %v4956_v6  ;;  %v1656_v7 = vadd.f32 %v1617_v45, %v4958_v62  ;;  %v1657_v42 = vadd.f32 %v1619_v52, %v4960_v21 }
  0xc7   : > { %v1658_v18 = vadd.f32 %v1622_v28, %v4963_v50  ;;  %v1659_v8 = vadd.f32 %v1624_v13, %v4966_v12  ;;  %v1660_v34 = vadd.f32 %v1627_v38, %v4970_v43  ;;  %v1661_v60 = vadd.f32 %v1629_v41, %v4972_v11  ;;  %v3096_v12 = vld [vmem:[%s5685_s4 + $0x1] ss:$0 sm:$0xff] }
  0xc8   : > { %v5728_v37 = vunpack.c.l.bf16 %v5004_v44  ;;  %v5727_v6 = vunpack.c.h.bf16 %v5004_v44  ;;  %v5726_v62 = vunpack.c.l.bf16 %v5011_v10  ;;  %v5725_v21 = vunpack.c.h.bf16 %v5011_v10 }
  0xc9   : > { %v5724_v50 = vunpack.c.l.bf16 %v5014_v23  ;;  %v5723_v43 = vunpack.c.h.bf16 %v5014_v23  ;;  %v1681_v61 = vunpack.c.l.bf16 %v3082_v19  ;;  %v1682_v11 = vunpack.c.h.bf16 %v3082_v19 }
  0xca   : > { %v1685_v27 = vunpack.c.l.bf16 %v3086_v33  ;;  %v1686_v17 = vunpack.c.h.bf16 %v3086_v33  ;;  %v1689_v35 = vunpack.c.l.bf16 %v3090_v32  ;;  %v1690_v53 = vunpack.c.h.bf16 %v3090_v32 }
  0xcb   : > { %v1693_v0 = vunpack.c.l.bf16 %v3094_v24  ;;  %v1694_v55 = vunpack.c.h.bf16 %v3094_v24  ;;  %v5777_v25 = vunpack.c.l.bf16 %v4748_v26  ;;  %v5778_v48 = vunpack.c.h.bf16 %v4748_v26 }
  0xcc   : > { %v1702_v58 = vmul.f32 %v3096_v12, %v1681_v61  ;;  %v1703_v49 = vmul.f32 %v3096_v12, %v1682_v11  ;;  %v1704_v2 = vmul.f32 %v5728_v37, %v3096_v12  ;;  %v1705_v31 = vmul.f32 %v5727_v6, %v3096_v12  ;;  %v5067_v61 = vld [vmem:[%s4329_s19 + $0x60] sm:$0xff]   ;;  %v5070_v11 = vld [vmem:[%s4329_s19 + $0x78] sm:$0xff]  }
  0xcd   : > { %v1700_v47 = vmul.f32 %v5777_v25, %v3096_v12  ;;  %v1701_v54 = vmul.f32 %v5778_v48, %v3096_v12  ;;  %v1706_v20 = vmul.f32 %v3096_v12, %v1685_v27  ;;  %v1707_v45 = vmul.f32 %v3096_v12, %v1686_v17  ;;  %v5121_v25 = vld [vmem:[%s4329_s19 + $0x98] sm:$0x1] }
  0xce   : > { %v1708_v22 = vmul.f32 %v5726_v62, %v3096_v12  ;;  %v1709_v63 = vmul.f32 %v5725_v21, %v3096_v12  ;;  %v1710_v26 = vmul.f32 %v3096_v12, %v1689_v35  ;;  %v1711_v14 = vmul.f32 %v3096_v12, %v1690_v53  ;;  %v5109_v35 = vld [vmem:[%s4329_s19 + $0x80] sm:$0x1] }
  0xcf   : > { %v1712_v52 = vmul.f32 %v5724_v50, %v3096_v12  ;;  %v1713_v3 = vmul.f32 %v5723_v43, %v3096_v12  ;;  %v1714_v39 = vmul.f32 %v3096_v12, %v1693_v0  ;;  %v1715_v28 = vmul.f32 %v3096_v12, %v1694_v55  ;;  %v5116_v0 = vld [vmem:[%s4329_s19 + $0x8c] sm:$0x1] }
  0xd0   : > { %v5052_v13 = vadd.f32 %v1700_v47, %v1646_v5  ;;  %v5054_v38 = vadd.f32 %v1701_v54, %v1647_v59  ;;  %v5056_v41 = vadd.f32 %v1702_v58, %v1648_v29  ;;  %v5058_v19 = vadd.f32 %v1703_v49, %v1649_v30  ;;  %v5124_v47 = vld [vmem:[%s4329_s19 + $0x9c] sm:$0xff]   ;;  %v5128_v54 = vld [vmem:[%s4329_s19 + $0xa4] sm:$0x1]  ;;  %v5132_v49 = vld [vmem:[%s4329_s19 + $0xb0] sm:$0x1] }
  0xd1   : > { %v5060_v33 = vadd.f32 %v1704_v2, %v1650_v15  ;;  %v5062_v32 = vadd.f32 %v1705_v31, %v1651_v57  ;;  %v5064_v24 = vadd.f32 %v1706_v20, %v1652_v46  ;;  %v5072_v5 = vadd.f32 %v1707_v45, %v1653_v16  ;;  %v5081_v15 = vld [vmem:[%s4329_s19 + $0x90] sm:$0xff]   ;;  %v5084_v57 = vld [vmem:[%s4329_s19 + $0xa8] sm:$0xff]  }
  0xd2   : > { %v5074_v59 = vadd.f32 %v1708_v22, %v1654_v36  ;;  %v5076_v29 = vadd.f32 %v1709_v63, %v1655_v1  ;;  %v5078_v30 = vadd.f32 %v1710_v26, %v1656_v7  ;;  %v5086_v46 = vadd.f32 %v1711_v14, %v1657_v42  ;;  %v5095_v1 = vld [vmem:[%s4329_s19 + $0x68] sm:$0x1]  ;;  %v5098_v7 = vld [vmem:[%s4329_s19 + $0x6c] sm:$0xff]   ;;  %v5135_v2 = vld [vmem:[%s4329_s19 + $0xb4] sm:$0xff]  }
  0xd3   : > { %v5088_v12 = vadd.f32 %v1712_v52, %v1658_v18  ;;  %v5090_v16 = vadd.f32 %v1713_v3, %v1659_v8  ;;  %v5092_v36 = vadd.f32 %v1714_v39, %v1660_v34  ;;  %v5100_v27 = vadd.f32 %v1715_v28, %v1661_v60  ;;  %v5105_v18 = vld [vmem:[%s4329_s19 + $0x74] sm:$0x1]  ;;  %v5112_v34 = vld [vmem:[%s4329_s19 + $0x84] sm:$0xff]   ;;  %v5141_v22 = vld [vmem:[%s4329_s19 + $0xbc] sm:$0x1] }
  0xd4   : > { %v5729_v17 = vunpack.c.l.bf16 %v5067_v61  ;;  %v5730_v42 = vunpack.c.h.bf16 %v5067_v61  ;;  %v5731_v8 = vunpack.c.l.bf16 %v5070_v11  ;;  %v5732_v53 = vunpack.c.h.bf16 %v5070_v11  ;;  %v3121_v3 = vld [vmem:[%s5685_s4 + $0x3] ss:$0 sm:$0xff] }
  0xd5   : > { %v5735_v60 = vunpack.c.l.bf16 %v5081_v15  ;;  %v5736_v55 = vunpack.c.h.bf16 %v5081_v15  ;;  %v5741_v48 = vunpack.c.l.bf16 %v5084_v57  ;;  %v5743_v58 = vunpack.c.h.bf16 %v5084_v57 }
  0xd6   : > { %v1759_v31 = vunpack.c.l.bf16 %v5095_v1  ;;  %v1760_v20 = vunpack.c.l.bf16 %v5098_v7  ;;  %v1761_v45 = vunpack.c.h.bf16 %v5098_v7  ;;  %v1762_v63 = vunpack.c.l.bf16 %v5105_v18 }
  0xd7   : > { %v5733_v14 = vunpack.c.l.bf16 %v5112_v34  ;;  %v5734_v52 = vunpack.c.h.bf16 %v5112_v34  ;;  %v5739_v1 = vunpack.c.l.bf16 %v5124_v47  ;;  %v5740_v7 = vunpack.c.h.bf16 %v5124_v47 }
  0xd8   : > { %v5742_v50 = vunpack.c.l.bf16 %v5135_v2  ;;  %v1786_v6 = vmul.f32 %v5729_v17, %v3121_v3  ;;  %v1787_v37 = vmul.f32 %v5730_v42, %v3121_v3  ;;  %v1788_v28 = vmul.f32 %v3121_v3, %v1760_v20 }
  0xd9   : > { %v1789_v39 = vmul.f32 %v3121_v3, %v1761_v45  ;;  %v1790_v26 = vmul.f32 %v5731_v8, %v3121_v3  ;;  %v1791_v43 = vmul.f32 %v5732_v53, %v3121_v3  ;;  %v1792_v18 = vmul.f32 %v3121_v3, %v5733_v14 }
  0xda   : > { %v1793_v62 = vmul.f32 %v3121_v3, %v5734_v52  ;;  %v1794_v17 = vmul.f32 %v5735_v60, %v3121_v3  ;;  %v1795_v42 = vmul.f32 %v5736_v55, %v3121_v3  ;;  %v1796_v21 = vmul.f32 %v3121_v3, %v5739_v1  ;;  %v2549_v60 = vld [vmem:[%s5690_s9 + $0x78] sm:$0xff] }
  0xdb   : > { %v1797_v8 = vmul.f32 %v3121_v3, %v5740_v7  ;;  %v1798_v53 = vmul.f32 %v5741_v48, %v3121_v3  ;;  %v1799_v14 = vmul.f32 %v5743_v58, %v3121_v3  ;;  %v1800_v52 = vmul.f32 %v3121_v3, %v5742_v50  ;;  %3921 = vmatpush3.msra.mxu1 %v2549_v60  ;;  %v2548_v50 = vld [vmem:[%s5690_s9 + $0x70] sm:$0xff] }
  0xdc   : > { %v5779_v55 = vunpack.c.h.bf16 %v5135_v2  ;;  %v5191_v1 = vadd.f32 %v1786_v6, %v5052_v13  ;;  %v5194_v7 = vadd.f32 %v1787_v37, %v5054_v38  ;;  %v5197_v48 = vadd.f32 %v1788_v28, %v5056_v41  ;;  %v3122_v13 = vld [vmem:[%s5685_s4 + $0x5] ss:$0 sm:$0xff]  ;;  %v2547_v41 = vld [vmem:[%s5690_s9 + $0x68] sm:$0xff] }
  0xdd   : > { %v5203_v58 = vadd.f32 %v1789_v39, %v5058_v19  ;;  %v5206_v10 = vadd.f32 %v1790_v26, %v5060_v33  ;;  %v5209_v6 = vadd.f32 %v1791_v43, %v5062_v32  ;;  %v5212_v37 = vadd.f32 %v1792_v18, %v5064_v24 }
  0xde   : > { %v1801_v23 = vmul.f32 %v3121_v3, %v5779_v55  ;;  %v5780_v38 = vmov 0.0   ;;  %v5222_v19 = vadd.f32 %v1793_v62, %v5072_v5  ;;  %v5225_v33 = vadd.f32 %v1794_v17, %v5074_v59 }
  0xdf   : > { %3922 = vmatprep.subr.mxu1 %v5780_v38  ;;  %v5228_v43 = vadd.f32 %v1795_v42, %v5076_v29  ;;  %v5231_v32 = vadd.f32 %v1796_v21, %v5078_v30  ;;  %v5234_v24 = vadd.f32 %v1797_v8, %v5086_v46  ;;  %v5237_v60 = vadd.f32 %v1798_v53, %v5088_v12  ;;  %v2546_v21 = vld [vmem:[%s5690_s9 + $0x60] sm:$0xff] }
  0xe0   : > { %3923 = vmatpush3.msra.mxu1 %v2548_v50  ;;  %v5240_v55 = vadd.f32 %v1799_v14, %v5090_v16  ;;  %v5243_v62 = vadd.f32 %v1800_v52, %v5092_v36  ;;  %v5250_v50 = vadd.f32 %v1801_v23, %v5100_v27  ;;  %v5781_v5 = vunpack.c.l.bf16 %v5067_v61  ;;  %v2545_v23 = vld [vmem:[%s5690_s9 + $0x58] sm:$0xff] }
  0xe1   : > { %3924 = vmatprep.subr.mxu1 %v5780_v38  ;;  %v5782_v29 = vunpack.c.h.bf16 %v5067_v61  ;;  %v1825_v46 = vmul.f32 %v3122_v13, %v1759_v31  ;;  %v1826_v12 = vmul.f32 %v3122_v13, %v1760_v20  ;;  %v1827_v16 = vmul.f32 %v3122_v13, %v1761_v45 }
  0xe2   : > { %v1823_v59 = vmul.f32 %v5781_v5, %v3122_v13  ;;  %3925 = vmatpush3.msra.mxu1 %v2547_v41  ;;  %v1828_v36 = vmul.f32 %v3122_v13, %v1762_v63  ;;  %v5783_v17 = vunpack.c.l.bf16 %v5070_v11  ;;  %v5784_v27 = vunpack.c.h.bf16 %v5070_v11 }
  0xe3   : > { %v1824_v30 = vmul.f32 %v5782_v29, %v3122_v13  ;;  %3926 = vmatprep.subr.mxu1 %v5780_v38  ;;  %v5785_v61 = vunpack.c.l.bf16 %v5109_v35  ;;  %v5786_v31 = vunpack.c.l.bf16 %v5112_v34  ;;  %v5787_v45 = vunpack.c.h.bf16 %v5112_v34  ;;  %v2544_v34 = vld [vmem:[%s5690_s9 + $0x50] sm:$0xff] }
  0xe4   : > { %v1829_v42 = vmul.f32 %v5783_v17, %v3122_v13  ;;  %v1830_v8 = vmul.f32 %v5784_v27, %v3122_v13  ;;  %3927 = vmatpush3.msra.mxu1 %v2546_v21  ;;  %v5788_v26 = vunpack.c.l.bf16 %v5116_v0  ;;  %v5789_v52 = vunpack.c.l.bf16 %v5081_v15 }
  0xe5   : > { %v1831_v53 = vmul.f32 %v3122_v13, %v5785_v61  ;;  %v1832_v20 = vmul.f32 %v3122_v13, %v5786_v31  ;;  %v1833_v63 = vmul.f32 %v3122_v13, %v5787_v45  ;;  %v5790_v39 = vunpack.c.h.bf16 %v5081_v15  ;;  %3928 = vmatprep.subr.mxu1 %v5780_v38 }
  0xe6   : > { %v1834_v14 = vmul.f32 %v3122_v13, %v5788_v26  ;;  %v1835_v3 = vmul.f32 %v5789_v52, %v3122_v13  ;;  %v5791_v28 = vunpack.c.l.bf16 %v5121_v25  ;;  %v5792_v18 = vunpack.c.l.bf16 %v5124_v47  ;;  %3929 = vmatpush3.msra.mxu1 %v2545_v23 }
  0xe7   : > { %v1836_v11 = vmul.f32 %v5790_v39, %v3122_v13  ;;  %v5793_v0 = vunpack.c.h.bf16 %v5124_v47  ;;  %v5794_v5 = vunpack.c.l.bf16 %v5128_v54  ;;  %v5795_v15 = vunpack.c.l.bf16 %v5084_v57  ;;  %3930 = vmatprep.subr.mxu1 %v5780_v38  ;;  %v2543_v54 = vld [vmem:[%s5690_s9 + $0x48] sm:$0xff] }
  0xe8   : > { %v1837_v35 = vmul.f32 %v3122_v13, %v5791_v28  ;;  %v1838_v41 = vmul.f32 %v3122_v13, %v5792_v18  ;;  %v5796_v25 = vunpack.c.h.bf16 %v5084_v57  ;;  %v5797_v61 = vunpack.c.l.bf16 %v5132_v49  ;;  %3931 = vmatpush3.msra.mxu1 %v2544_v34 }
  0xe9   : > { %v1839_v21 = vmul.f32 %v3122_v13, %v5793_v0  ;;  %v1840_v29 = vmul.f32 %v3122_v13, %v5794_v5  ;;  %v1841_v17 = vmul.f32 %v5795_v15, %v3122_v13  ;;  %v5798_v45 = vunpack.c.l.bf16 %v5135_v2  ;;  %3932 = vmatprep.subr.mxu1 %v5780_v38 }
  0xea   : > { %v1842_v27 = vmul.f32 %v5796_v25, %v3122_v13  ;;  %v1843_v31 = vmul.f32 %v3122_v13, %v5797_v61  ;;  %v5799_v52 = vunpack.c.h.bf16 %v5135_v2  ;;  %v5800_v23 = vunpack.c.l.bf16 %v5141_v22  ;;  %v2542_v2 = vld [vmem:[%s5690_s9 + $0x40] sm:$0xff]  ;;  %3933 = vmatpush3.msra.mxu1 %v2543_v54 }
  0xeb   : > { %v1844_v26 = vmul.f32 %v3122_v13, %v5798_v45  ;;  %v1871_v39 = vrot.slane %v1823_v59, 1  ;;  %v1872_v28 = vrot.slane %v1824_v30, 1  ;;  %v1874_v49 = vrot.slane %v1825_v46, 1  ;;  %3934 = vmatprep.subr.mxu1 %v5780_v38 }
  0xec   : > { %v5298_v47 = vmul.f32 %v3122_v13, %v5799_v52  ;;  %v1846_v57 = vmul.f32 %v3122_v13, %v5800_v23  ;;  %v1876_v18 = vrot.slane %v1826_v12, 1  ;;  %v1877_v0 = vrot.slane %v1827_v16, 1  ;;  %v2541_v16 = vld [vmem:[%s5690_s9 + $0x38] sm:$0xff]  ;;  %3935 = vmatpush3.msra.mxu1 %v2542_v2 }
  0xed   : > { %v1879_v5 = vrot.slane %v1828_v36, 1  ;;  %v1881_v15 = vrot.slane %v1829_v42, 1  ;;  %v1873_v25 = vsel %vm587_vm1, %v1871_v39, %v1872_v28  ;;  %v1875_v61 = vsel %vm587_vm1, %v1872_v28, %v1874_v49  ;;  %3936 = vmatprep.subr.mxu1 %v5780_v38 }
  0xee   : > { %v1882_v22 = vrot.slane %v1830_v8, 1  ;;  %v1884_v13 = vrot.slane %v1831_v53, 1  ;;  %v1878_v59 = vsel %vm587_vm1, %v1876_v18, %v1877_v0  ;;  %v1886_v46 = vrot.slane %v1832_v20, 1  ;;  %v2540_v20 = vld [vmem:[%s5690_s9 + $0x30] sm:$0xff]  ;;  %3937 = vmatpush3.msra.mxu1 %v2541_v16 }
  0xef   : > { %v1880_v30 = vsel %vm587_vm1, %v1877_v0, %v1879_v5  ;;  %v1887_v12 = vrot.slane %v1833_v63, 1  ;;  %v1889_v34 = vrot.slane %v1834_v14, 1  ;;  %v1891_v8 = vrot.slane %v1835_v3, 1  ;;  %3938 = vmatprep.subr.mxu1 %v5780_v38  ;;  %v2538_v5 = vld [vmem:[%s5690_s9 + $0x20] sm:$0xff] }
  0xf0   : > { %v1883_v36 = vsel %vm587_vm1, %v1881_v15, %v1882_v22  ;;  %v1885_v42 = vsel %vm587_vm1, %v1882_v22, %v1884_v13  ;;  %v1892_v45 = vrot.slane %v1836_v11, 1  ;;  %v1894_v52 = vrot.slane %v1837_v35, 1  ;;  %v2539_v35 = vld [vmem:[%s5690_s9 + $0x28] sm:$0xff]  ;;  %3939 = vmatpush3.msra.mxu1 %v2540_v20  ;;  %v3803_v13 = vld [vmem:[%s4544_s27 + $0x90] sm:$0xff]  }
  0xf1   : > { %v1888_v53 = vsel %vm587_vm1, %v1886_v46, %v1887_v12  ;;  %v1896_v54 = vrot.slane %v1838_v41, 1  ;;  %v1890_v63 = vsel %vm587_vm1, %v1887_v12, %v1889_v34  ;;  %v1897_v23 = vrot.slane %v1839_v21, 1  ;;  %3940 = vmatprep.subr.mxu1 %v5780_v38  ;;  %v3133_v34 = vld [vmem:[%s4544_s27 + $0x9c] sm:$0xff]  }
  0xf2   : > { %v1899_v39 = vrot.slane %v1840_v29, 1  ;;  %v1901_v28 = vrot.slane %v1841_v17, 1  ;;  %v1893_v14 = vsel %vm587_vm1, %v1891_v8, %v1892_v45  ;;  %v1895_v3 = vsel %vm587_vm1, %v1892_v45, %v1894_v52  ;;  %3941 = vmatpush3.msra.mxu1 %v2539_v35  ;;  %v3137_v8 = vld [vmem:[%s4544_s27 + $0xb4] sm:$0xff]  }
  0xf3   : > { %v1902_v49 = vrot.slane %v1842_v27, 1  ;;  %v1904_v11 = vrot.slane %v1843_v31, 1  ;;  %v1898_v41 = vsel %vm587_vm1, %v1896_v54, %v1897_v23  ;;  %v1906_v21 = vrot.slane %v1844_v26, 1  ;;  %3942 = vmatprep.subr.mxu1 %v5780_v38 }
  0xf4   : > { %v1900_v18 = vsel %vm587_vm1, %v1897_v23, %v1899_v39  ;;  %v1907_v29 = vrot.slane %v5298_v47, 1  ;;  %v1909_v31 = vrot.slane %v1846_v57, 1  ;;  %v5338_v0 = vadd.f32 %v1873_v25, %v5191_v1  ;;  %3943 = vmatpush3.msra.mxu1 %v2538_v5 }
  0xf5   : > { %v1903_v17 = vsel %vm587_vm1, %v1901_v28, %v1902_v49  ;;  %v1905_v27 = vsel %vm587_vm1, %v1902_v49, %v1904_v11  ;;  %v5346_v47 = vadd.f32 %v1875_v61, %v5194_v7  ;;  %v5349_v15 = vadd.f32 %v1878_v59, %v5197_v48  ;;  %v3801_v61 = vld [vmem:[%s4544_s27 + $0x60] sm:$0xff]   ;;  %v3802_v48 = vld [vmem:[%s4544_s27 + $0x78] sm:$0xff]   ;;  %v3804_v59 = vld [vmem:[%s4544_s27 + $0xa8] sm:$0xff]   ;;  %3944 = vmatprep.subr.mxu1 %v5780_v38 }
  0xf6   : > { %v1908_v26 = vsel %vm587_vm1, %v1906_v21, %v1907_v29  ;;  %v5352_v57 = vadd.f32 %v1880_v30, %v5203_v58  ;;  %v1910_v1 = vsel %vm587_vm1, %v1907_v29, %v1909_v31  ;;  %v5356_v2 = vadd.f32 %v1883_v36, %v5206_v10  ;;  %v2537_v58 = vld [vmem:[%s5690_s9 + $0x18] sm:$0xff]  ;;  %v3129_v36 = vld [vmem:[%s4544_s27 + $0x84] sm:$0xff]  }
  0xf7   : > { %v5359_v25 = vadd.f32 %v1885_v42, %v5209_v6  ;;  %v5362_v7 = vadd.f32 %v1888_v53, %v5212_v37  ;;  %v1934_v22 = vadd.f32 %v1890_v63, %v5222_v19  ;;  %v1935_v10 = vadd.f32 %v1893_v14, %v5225_v33  ;;  %v3125_v19 = vld [vmem:[%s4544_s27 + $0x6c] sm:$0xff]   ;;  %3945 = vmatpush3.msra.mxu1 %v2537_v58 }
  0xf8   : > { %v1936_v6 = vadd.f32 %v1895_v3, %v5228_v43  ;;  %v1937_v37 = vadd.f32 %v1898_v41, %v5231_v32  ;;  %v1938_v30 = vadd.f32 %v1900_v18, %v5234_v24  ;;  %v1939_v46 = vadd.f32 %v1903_v17, %v5237_v60  ;;  %3946 = vmatprep.subr.mxu1 %v5780_v38 }
  0xf9   : > { %v1940_v12 = vadd.f32 %v1905_v27, %v5240_v55  ;;  %v1941_v16 = vadd.f32 %v1908_v26, %v5243_v62  ;;  %v1942_v33 = vadd.f32 %v1910_v1, %v5250_v50  ;;  %v3532_v43 = vunpack.c.l.bf16 %v3801_v61  ;;  %v3139_v55 = vld [vmem:[%s5685_s4 + $0x4] ss:$0 sm:$0xff] }
  0xfa   : > { %v3533_v32 = vunpack.c.h.bf16 %v3801_v61  ;;  %v3536_v42 = vunpack.c.l.bf16 %v3802_v48  ;;  %v3537_v53 = vunpack.c.h.bf16 %v3802_v48  ;;  %v3540_v24 = vunpack.c.l.bf16 %v3803_v13 }
  0xfb   : > { %v3541_v45 = vunpack.c.h.bf16 %v3803_v13  ;;  %v3544_v60 = vunpack.c.l.bf16 %v3804_v59  ;;  %v3545_v62 = vunpack.c.h.bf16 %v3804_v59  ;;  %v1962_v52 = vunpack.c.l.bf16 %v3125_v19 }
  0xfc   : > { %v1963_v54 = vunpack.c.h.bf16 %v3125_v19  ;;  %v1966_v50 = vunpack.c.l.bf16 %v3129_v36  ;;  %v1967_v20 = vunpack.c.h.bf16 %v3129_v36  ;;  %v1970_v63 = vunpack.c.l.bf16 %v3133_v34 }
  0xfd   : > { %v1971_v23 = vunpack.c.h.bf16 %v3133_v34  ;;  %v1974_v39 = vunpack.c.l.bf16 %v3137_v8  ;;  %v1975_v28 = vunpack.c.h.bf16 %v3137_v8  ;;  %v1981_v14 = vmul.f32 %v3532_v43, %v3139_v55  ;;  %v5415_v43 = vld [vmem:[%s4076_s13 + $0xc0] sm:$0xff]  }
  0xfe   : > { %v1982_v3 = vmul.f32 %v3533_v32, %v3139_v55  ;;  %v1983_v49 = vmul.f32 %v3139_v55, %v1962_v52  ;;  %v1984_v11 = vmul.f32 %v3139_v55, %v1963_v54  ;;  %v1985_v35 = vmul.f32 %v3536_v42, %v3139_v55  ;;  %v5426_v32 = vld [vmem:[%s4076_s13 + $0x74] sm:$0x1]  ;;  %v5432_v42 = vld [vmem:[%s4076_s13 + $0x84] sm:$0xff]  }
  0xff   : > { %v1986_v41 = vmul.f32 %v3537_v53, %v3139_v55  ;;  %v1987_v18 = vmul.f32 %v3139_v55, %v1966_v50  ;;  %v1988_v21 = vmul.f32 %v3139_v55, %v1967_v20  ;;  %v1989_v29 = vmul.f32 %v3540_v24, %v3139_v55  ;;  %v5435_v24 = vld [vmem:[%s4076_s13 + $0x8c] sm:$0x1]  ;;  %v3164_v20 = vld [vmem:[%s5685_s4 + $0x6] ss:$0 sm:$0xff] }
 0x100   : > { %v1990_v17 = vmul.f32 %v3541_v45, %v3139_v55  ;;  %v1991_v27 = vmul.f32 %v3139_v55, %v1970_v63  ;;  %v1992_v31 = vmul.f32 %v3139_v55, %v1971_v23  ;;  %v1993_v5 = vmul.f32 %v3544_v60, %v3139_v55  ;;  %v5444_v45 = vld [vmem:[%s4076_s13 + $0xa4] sm:$0x1]  ;;  %v5447_v60 = vld [vmem:[%s4076_s13 + $0xb0] sm:$0x1] }
 0x101   : > { %v1994_v26 = vmul.f32 %v3545_v62, %v3139_v55  ;;  %v1995_v1 = vmul.f32 %v3139_v55, %v1974_v39  ;;  %v1996_v61 = vmul.f32 %v3139_v55, %v1975_v28  ;;  %v5391_v48 = vadd.f32 %v1981_v14, %v5338_v0  ;;  %v5450_v55 = vld [vmem:[%s4076_s13 + $0xb4] sm:$0xff]  }
 0x102   : > { %v5394_v58 = vadd.f32 %v1982_v3, %v5346_v47  ;;  %v5397_v13 = vadd.f32 %v1983_v49, %v5349_v15  ;;  %v5400_v59 = vadd.f32 %v1984_v11, %v5352_v57  ;;  %v5403_v19 = vadd.f32 %v1985_v35, %v5356_v2  ;;  %v5412_v47 = vld [vmem:[%s4076_s13 + $0x6c] sm:$0xff]  }
 0x103   : > { %v5406_v36 = vadd.f32 %v1986_v41, %v5359_v25  ;;  %v5409_v0 = vadd.f32 %v1987_v18, %v5362_v7  ;;  %v5417_v15 = vadd.f32 %v1988_v21, %v1934_v22  ;;  %v5419_v57 = vadd.f32 %v1989_v29, %v1935_v10  ;;  %v5429_v7 = vld [vmem:[%s4076_s13 + $0x80] sm:$0x1]  ;;  %v5438_v10 = vld [vmem:[%s4076_s13 + $0x98] sm:$0x1] }
 0x104   : > { %v5421_v2 = vadd.f32 %v1990_v17, %v1936_v6  ;;  %v5423_v25 = vadd.f32 %v1991_v27, %v1937_v37  ;;  %v2008_v34 = vadd.f32 %v1992_v31, %v1938_v30  ;;  %v2009_v8 = vadd.f32 %v1993_v5, %v1939_v46  ;;  %v5441_v6 = vld [vmem:[%s4076_s13 + $0x9c] sm:$0xff]  }
 0x105   : > { %v2010_v22 = vadd.f32 %v1994_v26, %v1940_v12  ;;  %v2011_v53 = vadd.f32 %v1995_v1, %v1941_v16  ;;  %v2012_v37 = vadd.f32 %v1996_v61, %v1942_v33  ;;  %v5747_v62 = vunpack.c.l.bf16 %v5415_v43  ;;  %v5456_v12 = vld [vmem:[%s4076_s13 + $0xbc] sm:$0x1]  ;;  %v5459_v16 = vld [vmem:[%s4076_s13 + $0xc8] sm:$0x1] }
 0x106   : > { %v3561_v30 = vunpack.c.h.bf16 %v5415_v43  ;;  %v2038_v46 = vunpack.c.l.bf16 %v5412_v47  ;;  %v2039_v52 = vunpack.c.h.bf16 %v5412_v47  ;;  %v2040_v33 = vunpack.c.l.bf16 %v5426_v32 }
 0x107   : > { %v2043_v54 = vunpack.c.l.bf16 %v5429_v7  ;;  %v2044_v50 = vunpack.c.l.bf16 %v5432_v42  ;;  %v2045_v63 = vunpack.c.h.bf16 %v5432_v42  ;;  %v2046_v23 = vunpack.c.l.bf16 %v5435_v24  ;;  %v5801_v7 = vld [vmem:[#allocation2_spill] sm:$0xff] }
 0x108   : > { %v2049_v39 = vunpack.c.l.bf16 %v5438_v10  ;;  %v2050_v28 = vunpack.c.l.bf16 %v5441_v6  ;;  %v2051_v14 = vunpack.c.h.bf16 %v5441_v6  ;;  %v2052_v3 = vunpack.c.l.bf16 %v5444_v45 }
 0x109   : > { %v2055_v49 = vunpack.c.l.bf16 %v5447_v60  ;;  %v2056_v11 = vunpack.c.l.bf16 %v5450_v55  ;;  %v2057_v35 = vunpack.c.h.bf16 %v5450_v55  ;;  %v2058_v41 = vunpack.c.l.bf16 %v5456_v12 }
 0x10a   : > { %v2061_v18 = vunpack.c.l.bf16 %v5459_v16  ;;  %v2067_v21 = vmul.f32 %v3164_v20, %v2038_v46  ;;  %v2068_v29 = vmul.f32 %v3164_v20, %v2039_v52  ;;  %v2069_v17 = vmul.f32 %v4859_v9, %v3164_v20 }
 0x10b   : > { %v2070_v27 = vmul.f32 %v4861_v40, %v3164_v20  ;;  %v2071_v31 = vmul.f32 %v3164_v20, %v2044_v50  ;;  %v2072_v5 = vmul.f32 %v3164_v20, %v2045_v63  ;;  %v2073_v26 = vmul.f32 %v4872_v51, %v3164_v20 }
 0x10c   : > { %v2074_v1 = vmul.f32 %v4874_v56, %v3164_v20  ;;  %v2075_v61 = vmul.f32 %v3164_v20, %v2050_v28  ;;  %v2076_v47 = vmul.f32 %v3164_v20, %v2051_v14  ;;  %v2077_v32 = vmul.f32 %v4876_v4, %v3164_v20 }
 0x10d   : > { %v2078_v42 = vmul.f32 %v5801_v7, %v3164_v20  ;;  %v2079_v24 = vmul.f32 %v3164_v20, %v2056_v11  ;;  %v2080_v10 = vmul.f32 %v3164_v20, %v2057_v35  ;;  %v2081_v6 = vmul.f32 %v5747_v62, %v3164_v20  ;;  %v3165_v62 = vld [vmem:[%s5685_s4 + $0x8] ss:$0 sm:$0xff] }
 0x10e   : > { %v2082_v45 = vmul.f32 %v3561_v30, %v3164_v20  ;;  %v5490_v60 = vadd.f32 %v2067_v21, %v5391_v48  ;;  %v5493_v55 = vadd.f32 %v2068_v29, %v5394_v58  ;;  %v5496_v12 = vadd.f32 %v2069_v17, %v5397_v13 }
 0x10f   : > { %v5499_v16 = vadd.f32 %v2070_v27, %v5400_v59  ;;  %v5502_v38 = vadd.f32 %v2071_v31, %v5403_v19  ;;  %v5508_v20 = vadd.f32 %v2072_v5, %v5406_v36  ;;  %v5511_v48 = vadd.f32 %v2073_v26, %v5409_v0 }
 0x110   : > { %v5514_v58 = vadd.f32 %v2074_v1, %v5417_v15  ;;  %v5517_v13 = vadd.f32 %v2075_v61, %v5419_v57  ;;  %v5520_v59 = vadd.f32 %v2076_v47, %v5421_v2  ;;  %v5523_v19 = vadd.f32 %v2077_v32, %v5423_v25 }
 0x111   : > { %v5525_v21 = vadd.f32 %v2078_v42, %v2008_v34  ;;  %v5527_v29 = vadd.f32 %v2079_v24, %v2009_v8  ;;  %v5529_v36 = vadd.f32 %v2080_v10, %v2010_v22  ;;  %v5531_v0 = vadd.f32 %v2081_v6, %v2011_v53 }
 0x112   : > { %v5533_v17 = vadd.f32 %v2082_v45, %v2012_v37  ;;  %v2104_v15 = vmul.f32 %v3165_v62, %v2038_v46  ;;  %v2105_v27 = vmul.f32 %v3165_v62, %v2039_v52  ;;  %v2106_v57 = vmul.f32 %v3165_v62, %v2040_v33 }
 0x113   : > { %v2107_v31 = vmul.f32 %v4859_v9, %v3165_v62  ;;  %v2108_v2 = vmul.f32 %v4861_v40, %v3165_v62  ;;  %v2109_v5 = vmul.f32 %v3165_v62, %v2043_v54  ;;  %v2110_v25 = vmul.f32 %v3165_v62, %v2044_v50 }
 0x114   : > { %v2111_v26 = vmul.f32 %v3165_v62, %v2045_v63  ;;  %v2112_v34 = vmul.f32 %v3165_v62, %v2046_v23  ;;  %v2113_v8 = vmul.f32 %v4872_v51, %v3165_v62  ;;  %v2114_v22 = vmul.f32 %v4874_v56, %v3165_v62 }
 0x115   : > { %v2115_v1 = vmul.f32 %v3165_v62, %v2049_v39  ;;  %v2116_v53 = vmul.f32 %v3165_v62, %v2050_v28  ;;  %v2117_v61 = vmul.f32 %v3165_v62, %v2051_v14  ;;  %v2118_v37 = vmul.f32 %v3165_v62, %v2052_v3 }
 0x116   : > { %v2119_v46 = vmul.f32 %v4876_v4, %v3165_v62  ;;  %v2120_v52 = vmul.f32 %v5801_v7, %v3165_v62  ;;  %v2121_v33 = vmul.f32 %v3165_v62, %v2055_v49  ;;  %v2122_v9 = vmul.f32 %v3165_v62, %v2056_v11 }
 0x117   : > { %v2123_v47 = vmul.f32 %v3165_v62, %v2057_v35  ;;  %v2124_v40 = vmul.f32 %v3165_v62, %v2058_v41  ;;  %v5802_v54 = vunpack.c.l.bf16 %v5415_v43  ;;  %v2126_v51 = vmul.f32 %v3561_v30, %v3165_v62 }
 0x118   : > { %v2127_v63 = vmul.f32 %v3165_v62, %v2061_v18  ;;  %v2152_v56 = vrot.slane %v2104_v15, 1  ;;  %v2153_v23 = vrot.slane %v2105_v27, 1  ;;  %v2155_v39 = vrot.slane %v2106_v57, 1 }
 0x119   : > { %v2125_v50 = vmul.f32 %v5802_v54, %v3165_v62  ;;  %v2157_v28 = vrot.slane %v2107_v31, 1  ;;  %v2158_v14 = vrot.slane %v2108_v2, 1  ;;  %v2160_v3 = vrot.slane %v2109_v5, 1 }
 0x11a   : > { %v2162_v4 = vrot.slane %v2110_v25, 1  ;;  %v2163_v32 = vrot.slane %v2111_v26, 1  ;;  %v2165_v7 = vrot.slane %v2112_v34, 1  ;;  %v2154_v49 = vsel %vm587_vm1, %v2152_v56, %v2153_v23 }
 0x11b   : > { %v2156_v11 = vsel %vm587_vm1, %v2153_v23, %v2155_v39  ;;  %v2159_v35 = vsel %vm587_vm1, %v2157_v28, %v2158_v14  ;;  %v2167_v41 = vrot.slane %v2113_v8, 1  ;;  %v2161_v43 = vsel %vm587_vm1, %v2158_v14, %v2160_v3  ;;  %v3170_v23 = vld [vmem:[%s4275_s30 + $0x84] sm:$0xff]   ;;  %v3178_v3 = vld [vmem:[%s4275_s30 + $0xb4] sm:$0xff]  }
 0x11c   : > { %v2164_v62 = vsel %vm587_vm1, %v2162_v4, %v2163_v32  ;;  %v2166_v30 = vsel %vm587_vm1, %v2163_v32, %v2165_v7  ;;  %v2168_v18 = vrot.slane %v2114_v22, 1  ;;  %v2170_v42 = vrot.slane %v2115_v1, 1 }
 0x11d   : > { %v2172_v24 = vrot.slane %v2116_v53, 1  ;;  %v2173_v10 = vrot.slane %v2117_v61, 1  ;;  %v2175_v6 = vrot.slane %v2118_v37, 1  ;;  %v2177_v15 = vrot.slane %v2119_v46, 1 }
 0x11e   : > { %v2169_v45 = vsel %vm587_vm1, %v2167_v41, %v2168_v18  ;;  %v2178_v27 = vrot.slane %v2120_v52, 1  ;;  %v2180_v57 = vrot.slane %v2121_v33, 1  ;;  %v2171_v31 = vsel %vm587_vm1, %v2168_v18, %v2170_v42  ;;  %v5805_v42 = vld [vmem:[#allocation4_spill] sm:$0xff] }
 0x11f   : > { %v2174_v2 = vsel %vm587_vm1, %v2172_v24, %v2173_v10  ;;  %v2176_v5 = vsel %vm587_vm1, %v2173_v10, %v2175_v6  ;;  %v2182_v25 = vrot.slane %v2122_v9, 1  ;;  %v2183_v8 = vrot.slane %v2123_v47, 1 }
 0x120   : > { %v2179_v26 = vsel %vm587_vm1, %v2177_v15, %v2178_v27  ;;  %v2181_v34 = vsel %vm587_vm1, %v2178_v27, %v2180_v57  ;;  %v2185_v22 = vrot.slane %v2124_v40, 1  ;;  %v2187_v1 = vrot.slane %v2125_v50, 1  ;;  %v5808_v57 = vld [vmem:[#allocation5_spill] sm:$0xff] }
 0x121   : > { %v2188_v53 = vrot.slane %v2126_v51, 1  ;;  %v2190_v61 = vrot.slane %v2127_v63, 1  ;;  %v2208_v37 = vadd.f32 %v2154_v49, %v5490_v60  ;;  %v2184_v46 = vsel %vm587_vm1, %v2182_v25, %v2183_v8  ;;  %v3812_v51 = vld [vmem:[%s4275_s30 + $0xc0] sm:$0xff]  }
 0x122   : > { %v2186_v52 = vsel %vm587_vm1, %v2183_v8, %v2185_v22  ;;  %v2209_v33 = vadd.f32 %v2156_v11, %v5493_v55  ;;  %v2210_v9 = vadd.f32 %v2159_v35, %v5496_v12  ;;  %v2211_v40 = vadd.f32 %v2161_v43, %v5499_v16  ;;  %v3166_v12 = vld [vmem:[%s4275_s30 + $0x6c] sm:$0xff]  }
 0x123   : > { %v2189_v54 = vsel %vm587_vm1, %v2187_v1, %v2188_v53  ;;  %v2191_v47 = vsel %vm587_vm1, %v2188_v53, %v2190_v61  ;;  %v2212_v50 = vadd.f32 %v2164_v62, %v5502_v38  ;;  %v2213_v60 = vadd.f32 %v2166_v30, %v5508_v20  ;;  %v3174_v38 = vld [vmem:[%s4275_s30 + $0x9c] sm:$0xff]  }
 0x124   : > { %v2214_v63 = vadd.f32 %v2169_v45, %v5511_v48  ;;  %v2215_v56 = vadd.f32 %v2171_v31, %v5514_v58  ;;  %v2216_v55 = vadd.f32 %v2174_v2, %v5517_v13  ;;  %v2217_v39 = vadd.f32 %v2176_v5, %v5520_v59  ;;  %v3182_v13 = vld [vmem:[%s5685_s4 + $0x7] ss:$0 sm:$0xff] }
 0x125   : > { %v2218_v28 = vadd.f32 %v2179_v26, %v5523_v19  ;;  %v2219_v14 = vadd.f32 %v2181_v34, %v5525_v21  ;;  %v2220_v16 = vadd.f32 %v2184_v46, %v5527_v29  ;;  %v2221_v20 = vadd.f32 %v2186_v52, %v5529_v36 }
 0x126   : > { %v2222_v48 = vadd.f32 %v2189_v54, %v5531_v0  ;;  %v2223_v58 = vadd.f32 %v2191_v47, %v5533_v17  ;;  %v3576_v4 = vunpack.c.l.bf16 %v3812_v51  ;;  %v3577_v59 = vunpack.c.h.bf16 %v3812_v51 }
 0x127   : > { %v2241_v32 = vunpack.c.l.bf16 %v3166_v12  ;;  %v2242_v19 = vunpack.c.h.bf16 %v3166_v12  ;;  %v2245_v7 = vunpack.c.l.bf16 %v3170_v23  ;;  %v2246_v21 = vunpack.c.h.bf16 %v3170_v23 }
 0x128   : > { %v2249_v49 = vunpack.c.l.bf16 %v3174_v38  ;;  %v2250_v29 = vunpack.c.h.bf16 %v3174_v38  ;;  %v2253_v11 = vunpack.c.l.bf16 %v3178_v3  ;;  %v2254_v35 = vunpack.c.h.bf16 %v3178_v3 }
 0x129   : > { %v2262_v41 = vmul.f32 %v3182_v13, %v2241_v32  ;;  %v2263_v36 = vmul.f32 %v3182_v13, %v2242_v19  ;;  %v5803_v0 = vunpack.c.l.bf16 %v5004_v44  ;;  %v5804_v17 = vunpack.c.h.bf16 %v5004_v44 }
 0x12a   : > { %v2266_v30 = vmul.f32 %v3182_v13, %v2245_v7  ;;  %v2267_v18 = vmul.f32 %v3182_v13, %v2246_v21  ;;  %v5806_v24 = vunpack.c.l.bf16 %v5805_v42  ;;  %v5807_v6 = vunpack.c.h.bf16 %v5805_v42 }
 0x12b   : > { %v2264_v43 = vmul.f32 %v5803_v0, %v3182_v13  ;;  %v2265_v62 = vmul.f32 %v5804_v17, %v3182_v13  ;;  %v2270_v15 = vmul.f32 %v3182_v13, %v2249_v49  ;;  %v2271_v27 = vmul.f32 %v3182_v13, %v2250_v29 }
 0x12c   : > { %v2268_v10 = vmul.f32 %v5806_v24, %v3182_v13  ;;  %v2269_v45 = vmul.f32 %v5807_v6, %v3182_v13  ;;  %v5809_v31 = vunpack.c.l.bf16 %v5808_v57  ;;  %v5810_v5 = vunpack.c.h.bf16 %v5808_v57 }
 0x12d   : > { %v2274_v26 = vmul.f32 %v3182_v13, %v2253_v11  ;;  %v2275_v34 = vmul.f32 %v3182_v13, %v2254_v35  ;;  %v2276_v44 = vmul.f32 %v3576_v4, %v3182_v13  ;;  %v2277_v8 = vmul.f32 %v3577_v59, %v3182_v13  ;;  %v3966_v4 = vld [vmem:[%s5686_s5] ss:$0 sm:$0xff] }
 0x12e   : > { %v2272_v2 = vmul.f32 %v5809_v31, %v3182_v13  ;;  %v2273_v25 = vmul.f32 %v5810_v5, %v3182_v13  ;;  %v2278_v22 = vadd.f32 %v2262_v41, %v2208_v37  ;;  %v2279_v1 = vadd.f32 %v2263_v36, %v2209_v33  ;;  %v3967_v13 = vld [vmem:[%s5687_s6] ss:$0 sm:$0xff] }
 0x12f   : > { %v2280_v53 = vadd.f32 %v2264_v43, %v2210_v9  ;;  %v2281_v61 = vadd.f32 %v2265_v62, %v2211_v40  ;;  %v2282_v46 = vadd.f32 %v2266_v30, %v2212_v50  ;;  %v2283_v52 = vadd.f32 %v2267_v18, %v2213_v60 }
 0x130   : > { %v2284_v54 = vadd.f32 %v2268_v10, %v2214_v63  ;;  %v2285_v47 = vadd.f32 %v2269_v45, %v2215_v56  ;;  %v2286_v51 = vadd.f32 %v2270_v15, %v2216_v55  ;;  %v2287_v12 = vadd.f32 %v2271_v27, %v2217_v39 }
 0x131   : > { %v2288_v23 = vadd.f32 %v2272_v2, %v2218_v28  ;;  %v2289_v38 = vadd.f32 %v2273_v25, %v2219_v14  ;;  %v2290_v3 = vadd.f32 %v2274_v26, %v2220_v16  ;;  %v2291_v32 = vadd.f32 %v2275_v34, %v2221_v20 }
 0x132   : > { %v2292_v19 = vadd.f32 %v2276_v44, %v2222_v48  ;;  %v2293_v7 = vadd.f32 %v2277_v8, %v2223_v58  ;;  %v2294_v37 = vmul.f32 %v3966_v4, %v2278_v22  ;;  %v2295_v33 = vmul.f32 %v3966_v4, %v2279_v1 }
 0x133   : > { %v2296_v9 = vmul.f32 %v3966_v4, %v2280_v53  ;;  %v2297_v40 = vmul.f32 %v3966_v4, %v2281_v61  ;;  %v2298_v50 = vmul.f32 %v3966_v4, %v2282_v46  ;;  %v2299_v60 = vmul.f32 %v3966_v4, %v2283_v52 }
 0x134   : > { %v2300_v63 = vmul.f32 %v3966_v4, %v2284_v54  ;;  %v2301_v56 = vmul.f32 %v3966_v4, %v2285_v47  ;;  %v2302_v55 = vmul.f32 %v3966_v4, %v2286_v51  ;;  %v2303_v39 = vmul.f32 %v3966_v4, %v2287_v12 }
 0x135   : > { %v2304_v28 = vmul.f32 %v3966_v4, %v2288_v23  ;;  %v2305_v14 = vmul.f32 %v3966_v4, %v2289_v38  ;;  %v2306_v16 = vmul.f32 %v3966_v4, %v2290_v3  ;;  %v2307_v20 = vmul.f32 %v3966_v4, %v2291_v32 }
 0x136   : > { %v2308_v48 = vmul.f32 %v3966_v4, %v2292_v19  ;;  %v2309_v58 = vmul.f32 %v3966_v4, %v2293_v7  ;;  %v2310_v59 = vadd.f32 %v3967_v13, %v2294_v37  ;;  %v2311_v21 = vadd.f32 %v3967_v13, %v2295_v33  ;;  %v5811_v19 = vld [vmem:[#allocation3_spill] sm:$0xff] }
 0x137   : > { %v2312_v49 = vadd.f32 %v3967_v13, %v2296_v9  ;;  %v2313_v29 = vadd.f32 %v3967_v13, %v2297_v40  ;;  %v2314_v11 = vadd.f32 %v3967_v13, %v2298_v50  ;;  %v2315_v35 = vadd.f32 %v3967_v13, %v2299_v60 }
 0x138   : > { %v2316_v41 = vadd.f32 %v3967_v13, %v2300_v63  ;;  %v2317_v36 = vadd.f32 %v3967_v13, %v2301_v56  ;;  %v2318_v0 = vadd.f32 %v3967_v13, %v2302_v55  ;;  %v2319_v43 = vadd.f32 %v3967_v13, %v2303_v39 }
 0x139   : > { %v2320_v17 = vadd.f32 %v3967_v13, %v2304_v28  ;;  %v2321_v62 = vadd.f32 %v3967_v13, %v2305_v14  ;;  %v2322_v30 = vadd.f32 %v3967_v13, %v2306_v16  ;;  %v2323_v18 = vadd.f32 %v3967_v13, %v2307_v20 }
 0x13a   : > { %v2324_v42 = vadd.f32 %v3967_v13, %v2308_v48  ;;  %v2325_v24 = vadd.f32 %v3967_v13, %v2309_v58  ;;  %v2326_v10 = vmax.f32 %v2310_v59, 0.0  ;;  %v2327_v6 = vmax.f32 %v2311_v21, 0.0 }
 0x13b   : > { %v2328_v45 = vmax.f32 %v2312_v49, 0.0  ;;  %v2329_v15 = vmax.f32 %v2313_v29, 0.0  ;;  %v2330_v27 = vmax.f32 %v2314_v11, 0.0  ;;  %v2331_v57 = vmax.f32 %v2315_v35, 0.0 }
 0x13c   : > { %v2332_v31 = vmax.f32 %v2316_v41, 0.0  ;;  %v2333_v2 = vmax.f32 %v2317_v36, 0.0  ;;  %v2334_v5 = vmax.f32 %v2318_v0, 0.0  ;;  %v2335_v25 = vmax.f32 %v2319_v43, 0.0  ;;  %v2536_v41 = vld [vmem:[%s5690_s9 + $0x10] sm:$0xff]  ;;  %v2535_v0 = vld [vmem:[%s5690_s9 + $0x8] sm:$0xff] }
 0x13d   : > { %v2336_v26 = vmax.f32 %v2320_v17, 0.0  ;;  %v2337_v34 = vmax.f32 %v2321_v62, 0.0  ;;  %v2338_v44 = vmax.f32 %v2322_v30, 0.0  ;;  %v2339_v8 = vmax.f32 %v2323_v18, 0.0  ;;  %3947 = vmatpush3.msra.mxu1 %v2536_v41  ;;  %v2534_v43 = vld [vmem:[%s5690_s9] sm:$0xff] }
 0x13e   : > { %v2340_v22 = vmax.f32 %v2324_v42, 0.0  ;;  %v2341_v1 = vmax.f32 %v2325_v24, 0.0  ;;  %v5603_v53 = vpack.c.bf16 %v2327_v6, %v2326_v10  ;;  %v5605_v61 = vpack.c.bf16 %v2329_v15, %v2328_v45  ;;  %v2462_v17 = vld [vmem:[%s5689_s8] sm:$0x1] }
 0x13f   : > { %v5607_v46 = vpack.c.bf16 %v2331_v57, %v2330_v27  ;;  %v5609_v52 = vpack.c.bf16 %v2333_v2, %v2332_v31  ;;  %v5611_v54 = vpack.c.bf16 %v2335_v25, %v2334_v5  ;;  %v5613_v47 = vpack.c.bf16 %v2337_v34, %v2336_v26  ;;  %v2550_v24 = vld [vmem:[%s5691_s10] sm:$0x1] }
 0x140   : > { %v5615_v51 = vpack.c.bf16 %v2339_v8, %v2338_v44  ;;  %v5617_v12 = vpack.c.bf16 %v2341_v1, %v2340_v22  ;;  %v2423_v23 = vadd.f32 %v2328_v45, %v2326_v10  ;;  %v2430_v38 = vadd.f32 %v2329_v15, %v2327_v6  ;;  %v3619_v6 = vld [vmem:[%s4821_s28] sm:$0xff]   ;;  %v3821_v15 = vld [vmem:[%s4821_s28 + $0x8] sm:$0xff]  }
 0x141   : > { %v1444_v7 = vrot.slane %v5811_v19, 4  ;;  %v5812_v36 = vmov 0.0   ;;  %v2657_v10 = vlaneseq }
 0x142   : > { %v2424_v3 = vadd.f32 %v2423_v23, %v2330_v27  ;;  %v2431_v32 = vadd.f32 %v2430_v38, %v2331_v57  ;;  %3948 = vmatprep.subr.mxu1 %v5812_v36  ;;  %v3822_v27 = vld [vmem:[%s4821_s28 + $0x10] sm:$0xff]   ;;  %v3717_v41 = vunpack.c.h.bf16 %v5615_v51 }
 0x143   : > { %v1445_v40 = vadd.f32 %v1444_v7, %v5811_v19  ;;  %3949 = vmatpush3.msra.mxu1 %v2535_v0  ;;  %v3628_v23 = vunpack.c.l.bf16 %v3822_v27  ;;  %v3826_v38 = vld [vmem:[%s4821_s28 + $0x30] sm:$0xff]   ;;  %v3827_v7 = vld [vmem:[%s4821_s28 + $0x38] sm:$0xff]  }
 0x144   : > { %v2425_v4 = vadd.f32 %v2424_v3, %v2332_v31  ;;  %v2432_v37 = vadd.f32 %v2431_v32, %v2333_v2  ;;  %3950 = vmatprep.subr.mxu1 %v5812_v36  ;;  %v3823_v31 = vld [vmem:[%s4821_s28 + $0x18] sm:$0xff]   ;;  %v3629_v3 = vunpack.c.h.bf16 %v3822_v27  ;;  %v3720_v36 = vunpack.c.l.bf16 %v5617_v12 }
 0x145   : > { %v1446_v55 = vrot.slane %v1445_v40, 2  ;;  %3951 = vmatpush3.msra.mxu1 %v2534_v43  ;;  %v3632_v32 = vunpack.c.l.bf16 %v3823_v31  ;;  %v3633_v19 = vunpack.c.h.bf16 %v3823_v31 }
 0x146   : > { %v2426_v33 = vadd.f32 %v2425_v4, %v2334_v5  ;;  %v2433_v9 = vadd.f32 %v2432_v37, %v2335_v25  ;;  %v3620_v5 = vunpack.c.l.bf16 %v3619_v6  ;;  %v3824_v25 = vld [vmem:[%s4821_s28 + $0x20] sm:$0xff]  }
 0x147   : > { %v1447_v16 = vadd.f32 %v1446_v55, %v1445_v40  ;;  %v3636_v37 = vunpack.c.l.bf16 %v3824_v25  ;;  %v3648_v55 = vunpack.c.l.bf16 %v3827_v7 }
 0x148   : > { %v2427_v50 = vadd.f32 %v2426_v33, %v2336_v26  ;;  %v2434_v60 = vadd.f32 %v2433_v9, %v2337_v34  ;;  %v3825_v26 = vld [vmem:[%s4821_s28 + $0x28] sm:$0xff]   ;;  %v3637_v33 = vunpack.c.h.bf16 %v3824_v25 }
 0x149   : > { %v1448_v58 = vrot.slane %v1447_v16, 1  ;;  %v3640_v9 = vunpack.c.l.bf16 %v3825_v26  ;;  %v3641_v40 = vunpack.c.h.bf16 %v3825_v26 }
 0x14a   : > { %v2428_v63 = vadd.f32 %v2427_v50, %v2338_v44  ;;  %v2435_v56 = vadd.f32 %v2434_v60, %v2339_v8  ;;  %v2658_v44 = vshrl.u32 %v2657_v10, 7  ;;  %v3621_v8 = vunpack.c.h.bf16 %v3619_v6 }
 0x14b   : > { %v1449_v21 = vadd.f32 %v1448_v58, %v1447_v16  ;;  %v3644_v50 = vunpack.c.l.bf16 %v3826_v38  ;;  %v3645_v60 = vunpack.c.h.bf16 %v3826_v38  ;;  %v3696_v16 = vunpack.c.l.bf16 %v5605_v61 }
 0x14c   : > { %v2429_v39 = vadd.f32 %v2428_v63, %v2340_v22  ;;  %v2436_v28 = vadd.f32 %v2435_v56, %v2341_v1  ;;  %v3624_v22 = vunpack.c.l.bf16 %v3821_v15  ;;  %v3625_v1 = vunpack.c.h.bf16 %v3821_v15 }
 0x14d   : > { %v2659_v56 = vsub.s32 0, %v2658_v44 }
 0x14e   : > { %v2437_v14 = vadd.f32 %v2436_v28, %v2429_v39  ;;  %v3649_v39 = vunpack.c.h.bf16 %v3827_v7  ;;  %v3692_v28 = vunpack.c.l.bf16 %v5603_v53 }
 0x150   : > { %v2438_v20 = vrot.slane %v2437_v14, 4 }
 0x152   : > { %v2439_v48 = vadd.f32 %v2438_v20, %v2437_v14  ;;  %v3693_v14 = vunpack.c.h.bf16 %v5603_v53  ;;  %v3697_v20 = vunpack.c.h.bf16 %v5605_v61  ;;  %v3713_v53 = vunpack.c.h.bf16 %v5613_v47 }
 0x153   : > { %v3716_v61 = vunpack.c.l.bf16 %v5615_v51 }
 0x154   : > { %v2440_v13 = vrot.slane %v2439_v48, 2 }
 0x156   : > { %v2441_v59 = vadd.f32 %v2440_v13, %v2439_v48  ;;  %v3700_v48 = vunpack.c.l.bf16 %v5607_v46  ;;  %v3701_v13 = vunpack.c.h.bf16 %v5607_v46  ;;  %v3721_v46 = vunpack.c.h.bf16 %v5617_v12 }
 0x158   : > { %v2442_v49 = vrot.slane %v2441_v59, 1 }
 0x15a   : > { %v2443_v29 = vadd.f32 %v2442_v49, %v2441_v59  ;;  %v3704_v59 = vunpack.c.l.bf16 %v5609_v52  ;;  %v3708_v49 = vunpack.c.l.bf16 %v5611_v54 }
 0x15c   : > { %v2444_v11 = vadd.f32 %v2443_v29, %v1449_v21  ;;  %v3705_v21 = vunpack.c.h.bf16 %v5609_v52  ;;  %v3709_v29 = vunpack.c.h.bf16 %v5611_v54 }
 0x15e   : > { %v2445_v35 = vmul.f32 0.00390625, %v2444_v11  ;;  %v3712_v11 = vunpack.c.l.bf16 %v5613_v47 }
 0x160   : > { %3918 = vmatmul.mubr.f32.vlgmr.msra.gmra.mxu0 %v2445_v35 }
 0x220   : > { %v2529_v62 = vpop.f32.mrf.mxu0 }
 0x221   : > { %v2530_v30 = vadd.f32 %v2529_v62, %v2462_v17 }
 0x222   : > { %v3919_v18 = vpop.f32.mrf.mxu0 }
 0x223   : > { %v2533_v42 = vmax.f32 %v2530_v30, 0.0 }
 0x225   : > { %3953 = vmatmul.mubr.f32.vlgmr.msra.gmra.mxu1 %v2533_v42 }
 0x2e5   : > { %v2617_v45 = vpop.f32.mrf.mxu1 }
 0x2e6   : > { %v2618_v57 = vadd.f32 %v2617_v45, %v2550_v24 }
 0x2e7   : > { %v3954_v2 = vpop.f32.mrf.mxu1 }
 0x2e8   : > { %v2621_v34 = vadd.f32 3.0, %v2618_v57 }
 0x2ea   : > { %v2622_v4 = vmax.f32 %v2621_v34, 0.0 }
 0x2ec   : > { %v2623_v63 = vmin.f32 %v2622_v4, 6.0 }
 0x2ee   : > { %v2624_v58 = vmul.f32 0.16666667, %v2623_v63 }
 0x2f0   : > { %v2660_v35 = vrot.slane %v2624_v58, %v2659_v56 }
 0x2f2   : > { %v2661_v0 = vmul.f32 %v3620_v5, %v2660_v35  ;;  %v2662_v43 = vmul.f32 %v3621_v8, %v2660_v35  ;;  %v2663_v52 = vmul.f32 %v3624_v22, %v2660_v35  ;;  %v2664_v17 = vmul.f32 %v3625_v1, %v2660_v35 }
 0x2f3   : > { %v2665_v62 = vmul.f32 %v3628_v23, %v2660_v35  ;;  %v2666_v30 = vmul.f32 %v3629_v3, %v2660_v35  ;;  %v2667_v54 = vmul.f32 %v3632_v32, %v2660_v35  ;;  %v2668_v18 = vmul.f32 %v3633_v19, %v2660_v35 }
 0x2f4   : > { %v2669_v42 = vmul.f32 %v3636_v37, %v2660_v35  ;;  %v2670_v47 = vmul.f32 %v3637_v33, %v2660_v35  ;;  %v2671_v24 = vmul.f32 %v3640_v9, %v2660_v35  ;;  %v2672_v10 = vmul.f32 %v3641_v40, %v2660_v35 }
 0x2f5   : > { %v2673_v51 = vmul.f32 %v3644_v50, %v2660_v35  ;;  %v2674_v6 = vmul.f32 %v3645_v60, %v2660_v35  ;;  %v2675_v45 = vmul.f32 %v3648_v55, %v2660_v35  ;;  %v2676_v12 = vmul.f32 %v3649_v39, %v2660_v35 }
 0x2f6   : > { %v3653_v15 = vpack.c.bf16 %v2662_v43, %v2661_v0  ;;  %v3658_v27 = vpack.c.bf16 %v2664_v17, %v2663_v52  ;;  %v3663_v57 = vpack.c.bf16 %v2666_v30, %v2665_v62  ;;  %v3668_v31 = vpack.c.bf16 %v2668_v18, %v2667_v54 }
 0x2f7   : > { %v3673_v2 = vpack.c.bf16 %v2670_v47, %v2669_v42  ;;  %v3678_v5 = vpack.c.bf16 %v2672_v10, %v2671_v24  ;;  %v3683_v25 = vpack.c.bf16 %v2674_v6, %v2673_v51  ;;  %v3688_v26 = vpack.c.bf16 %v2676_v12, %v2675_v45 }
 0x2f8   : > { %3654 = vst [vmem:[%s4821_s28] sm:$0xff] %v3653_v15   ;;  %3828 = vst [vmem:[%s4821_s28 + $0x8] sm:$0xff] %v3658_v27   ;;  %v2789_v34 = vmul.f32 %v3692_v28, %v2660_v35  ;;  %v2790_v44 = vmul.f32 %v3693_v14, %v2660_v35  ;;  %v2791_v8 = vmul.f32 %v3696_v16, %v2660_v35 }
 0x2f9   : > { %3829 = vst [vmem:[%s4821_s28 + $0x10] sm:$0xff] %v3663_v57   ;;  %3830 = vst [vmem:[%s4821_s28 + $0x18] sm:$0xff] %v3668_v31   ;;  %v2792_v22 = vmul.f32 %v3697_v20, %v2660_v35  ;;  %v2793_v1 = vmul.f32 %v3700_v48, %v2660_v35  ;;  %v2794_v23 = vmul.f32 %v3701_v13, %v2660_v35 }
 0x2fa   : > { %3831 = vst [vmem:[%s4821_s28 + $0x20] sm:$0xff] %v3673_v2   ;;  %3832 = vst [vmem:[%s4821_s28 + $0x28] sm:$0xff] %v3678_v5   ;;  %v2795_v38 = vmul.f32 %v3704_v59, %v2660_v35  ;;  %v2796_v3 = vmul.f32 %v3705_v21, %v2660_v35  ;;  %v2797_v32 = vmul.f32 %v3708_v49, %v2660_v35 }
 0x2fb   : > { %3833 = vst [vmem:[%s4821_s28 + $0x30] sm:$0xff] %v3683_v25   ;;  %3834 = vst [vmem:[%s4821_s28 + $0x38] sm:$0xff] %v3688_v26   ;;  %v2798_v19 = vmul.f32 %v3709_v29, %v2660_v35  ;;  %v2799_v7 = vmul.f32 %v3712_v11, %v2660_v35  ;;  %v2800_v4 = vmul.f32 %v3713_v53, %v2660_v35 }
 0x2fc   : > { %v2801_v37 = vmul.f32 %v3716_v61, %v2660_v35  ;;  %v2802_v33 = vmul.f32 %v3717_v41, %v2660_v35  ;;  %v2803_v9 = vmul.f32 %v3720_v36, %v2660_v35  ;;  %v2804_v40 = vmul.f32 %v3721_v46, %v2660_v35 }
 0x2fd   : > { %v3725_v50 = vpack.c.bf16 %v2790_v44, %v2789_v34  ;;  %v3730_v60 = vpack.c.bf16 %v2792_v22, %v2791_v8  ;;  %v3735_v63 = vpack.c.bf16 %v2794_v23, %v2793_v1  ;;  %v3740_v56 = vpack.c.bf16 %v2796_v3, %v2795_v38 }
 0x2fe   : > { %v3745_v55 = vpack.c.bf16 %v2798_v19, %v2797_v32  ;;  %v3750_v39 = vpack.c.bf16 %v2800_v4, %v2799_v7  ;;  %v3755_v28 = vpack.c.bf16 %v2802_v33, %v2801_v37  ;;  %v3760_v14 = vpack.c.bf16 %v2804_v40, %v2803_v9 }
 0x2ff   : > { %3843 = vst [vmem:[%s4821_s28 + $0x40] sm:$0xff] %v3725_v50   ;;  %3844 = vst [vmem:[%s4821_s28 + $0x48] sm:$0xff] %v3730_v60  }
 0x300   : > { %3845 = vst [vmem:[%s4821_s28 + $0x50] sm:$0xff] %v3735_v63   ;;  %3846 = vst [vmem:[%s4821_s28 + $0x58] sm:$0xff] %v3740_v56  }
 0x301   : > { %3847 = vst [vmem:[%s4821_s28 + $0x60] sm:$0xff] %v3745_v55   ;;  %3848 = vst [vmem:[%s4821_s28 + $0x68] sm:$0xff] %v3750_v39  }
 0x302   : > { %3849 = vst [vmem:[%s4821_s28 + $0x70] sm:$0xff] %v3755_v28   ;;  %3850 = vst [vmem:[%s4821_s28 + $0x78] sm:$0xff] %v3760_v14  }
 0x303 PF: > { %s21_s17 = sadd.s32 1, %s3974_s17  }
 0x304   : > { %p18_p4 = scmp.ge.s32.totalorder %s21_s17, 4  }
 0x306   :  { %20 = sbr.rel (!%p18_p4) target bundleno = 1 (0x1), region = 112 }

// kernel: _lambda_.15
= control target key start
LH: loop header
LB: loop body
LE: loop exit
PB: predicated region body
PF: predicated region fallthrough
CT: control target
= control target key end

     0   :  { %s666_s15 = smov 0   ;;  %s726_s0 = inlined_call_operand.vmem [shape: bf16[128,128], index: 0, kind: input, shape index: {}]   ;;  %s727_s1 = inlined_call_operand.vmem [shape: bf16[128,128], index: 1, kind: input, shape index: {}]   ;;  %s728_s2 = inlined_call_operand.vmem [shape: f32[1,128], index: 2, kind: input, shape index: {}]   ;;  %s729_s3 = inlined_call_operand.vmem [shape: f32[1,128], index: 3, kind: input, shape index: {}]   ;;  %s730_s4 = inlined_call_operand.vmem [shape: bf16[128,128], index: 4, kind: output, shape index: {}]  }
   0x1 LB: > { %s497_s16 = sadd.s32 4294967295, %s639_s15   ;;  %p501_p0 = scmp.ge.s32.totalorder %s639_s15, 1  ;;  %s639_s15 = sphi %s666_s15, %s14_s15  }
   0x2   : > { %p163_p1 = scmp.lt.s32.totalorder %s639_s15, 3 }
   0x4   : > { %p164_p2 = pnand %p501_p0, %p163_p1 }
   0x5   : > { %s502_s19 = sshll.u32 (!%p164_p2), %s497_s16, 3 }
   0x6   : > { %167 = sbr.rel (%p164_p2) target bundleno = 252 (0xfc), region = 36  ;;  %p190_p3 = scmp.lt.s32.totalorder (!%p164_p2), %s502_s19, 15 }
   0xb   : > { %v621_v0 = vld [vmem:[%s727_s1 + $0x38] sm:$0xff]   ;;  %v622_v1 = vld [vmem:[%s727_s1 + $0x30] sm:$0xff]   ;;  %s732_s19 = smov (!%p190_p3, %s502_s19), 15  ;;  %v623_v2 = vld [vmem:[%s727_s1 + $0x28] sm:$0xff]  }
   0xc   : > { %573 = vmatprep.subr.bf16.mxu0 %v621_v0  ;;  %597 = vmatprep.subr.bf16.mxu1 %v621_v0  ;;  %s503_s24 = sshll.u32 %s732_s19, 2  ;;  %v624_v3 = vld [vmem:[%s727_s1 + $0x20] sm:$0xff]   ;;  %v625_v6 = vld [vmem:[%s727_s1 + $0x18] sm:$0xff]   ;;  %v626_v7 = vld [vmem:[%s727_s1 + $0x10] sm:$0xff]  }
   0xd   : > { %574 = vmatpush3.bf16.msra.mxu0 %v621_v0  ;;  %605 = vmatpush3.bf16.msra.mxu1 %v621_v0  ;;  %s691_s27 = scalar_lea.vmem %s726_s0, %s503_s24  ;;  %v627_v8 = vld [vmem:[%s727_s1 + $0x8] sm:$0xff]   ;;  %v628_v9 = vld [vmem:[%s727_s1] sm:$0xff]   ;;  %s199_s20 = scalar_lea.vmem %s730_s4, %s503_s24 }
   0xe   : > { %575 = vmatprep.subr.bf16.mxu0 %v622_v1  ;;  %598 = vmatprep.subr.bf16.mxu1 %v622_v1  ;;  %v629_v4 = vld [vmem:[%s691_s27] sm:$0xff]   ;;  %v630_v5 = vld [vmem:[%s691_s27 + $0x10] sm:$0xff]   ;;  %v631_v10 = vld [vmem:[%s691_s27 + $0x8] sm:$0xff]  }
   0xf   : > { %589 = vmatprep.mubr.bf16.mxu0 %v629_v4  ;;  %593 = vmatprep.mubr.bf16.mxu1 %v630_v5  ;;  %v632_v11 = vld [vmem:[%s691_s27 + $0x18] sm:$0xff]   ;;  %v518_v12 = vld [vmem:[%s728_s2] ss:$0 sm:$0xff] }
  0x10   : > { %v519_v19 = vld [vmem:[%s729_s3] ss:$0 sm:$0xff] }
  0x11   : > { %576 = vmatpush3.bf16.msra.mxu0 %v622_v1  ;;  %606 = vmatpush3.bf16.msra.mxu1 %v622_v1 }
  0x12   : > { %577 = vmatprep.subr.bf16.mxu0 %v623_v2  ;;  %599 = vmatprep.subr.bf16.mxu1 %v623_v2 }
  0x15   : > { %578 = vmatpush3.bf16.msra.mxu0 %v623_v2  ;;  %607 = vmatpush3.bf16.msra.mxu1 %v623_v2 }
  0x16   : > { %579 = vmatprep.subr.bf16.mxu0 %v624_v3  ;;  %600 = vmatprep.subr.bf16.mxu1 %v624_v3 }
  0x19   : > { %580 = vmatpush3.bf16.msra.mxu0 %v624_v3  ;;  %608 = vmatpush3.bf16.msra.mxu1 %v624_v3 }
  0x1a   : > { %581 = vmatprep.subr.bf16.mxu0 %v625_v6  ;;  %601 = vmatprep.subr.bf16.mxu1 %v625_v6 }
  0x1d   : > { %582 = vmatpush3.bf16.msra.mxu0 %v625_v6  ;;  %609 = vmatpush3.bf16.msra.mxu1 %v625_v6 }
  0x1e   : > { %583 = vmatprep.subr.bf16.mxu0 %v626_v7  ;;  %602 = vmatprep.subr.bf16.mxu1 %v626_v7 }
  0x21   : > { %584 = vmatpush3.bf16.msra.mxu0 %v626_v7  ;;  %610 = vmatpush3.bf16.msra.mxu1 %v626_v7 }
  0x22   : > { %585 = vmatprep.subr.bf16.mxu0 %v627_v8  ;;  %603 = vmatprep.subr.bf16.mxu1 %v627_v8 }
  0x25   : > { %586 = vmatpush3.bf16.msra.mxu0 %v627_v8  ;;  %611 = vmatpush3.bf16.msra.mxu1 %v627_v8 }
  0x26   : > { %587 = vmatprep.subr.bf16.mxu0 %v628_v9  ;;  %604 = vmatprep.subr.bf16.mxu1 %v628_v9 }
  0x29   : > { %588 = vmatpush3.bf16.msra.mxu0 %v628_v9  ;;  %612 = vmatpush3.bf16.msra.mxu1 %v628_v9 }
  0x2c   : > { %590 = vmatmul.mubr.bf16.vlgmr.msra.gmra.mxu0 %v631_v10  ;;  %594 = vmatmul.mubr.bf16.vlgmr.msra.gmra.mxu1 %v632_v11 }
  0xec   : > { %v591_v13 = vpop.f32.mrf.mxu0  ;;  %v595_v14 = vpop.f32.mrf.mxu1 }
  0xed   : > { %v372_v15 = vmul.f32 %v591_v13, %v518_v12  ;;  %v376_v16 = vmul.f32 %v595_v14, %v518_v12 }
  0xee   : > { %v332_v17 = vpop.f32.mrf.mxu0  ;;  %v348_v18 = vpop.f32.mrf.mxu1 }
  0xef   : > { %v370_v20 = vmul.f32 %v518_v12, %v332_v17  ;;  %v374_v21 = vmul.f32 %v518_v12, %v348_v18  ;;  %v387_v24 = vadd.f32 %v519_v19, %v372_v15  ;;  %v391_v25 = vadd.f32 %v519_v19, %v376_v16 }
  0xf0   : > { %v592_v22 = vpop.f32.mrf.mxu0  ;;  %v596_v23 = vpop.f32.mrf.mxu1 }
  0xf1   : > { %v373_v26 = vmul.f32 %v592_v22, %v518_v12  ;;  %v377_v27 = vmul.f32 %v596_v23, %v518_v12  ;;  %v385_v30 = vadd.f32 %v519_v19, %v370_v20  ;;  %v389_v31 = vadd.f32 %v519_v19, %v374_v21 }
  0xf2   : > { %v335_v28 = vpop.f32.mrf.mxu0  ;;  %v351_v29 = vpop.f32.mrf.mxu1  ;;  %v395_v38 = vmax.f32 %v387_v24, 0.0  ;;  %v399_v39 = vmax.f32 %v391_v25, 0.0 }
  0xf3   : > { %v371_v32 = vmul.f32 %v518_v12, %v335_v28  ;;  %v375_v33 = vmul.f32 %v518_v12, %v351_v29  ;;  %v388_v34 = vadd.f32 %v519_v19, %v373_v26  ;;  %v392_v35 = vadd.f32 %v519_v19, %v377_v27 }
  0xf4   : > { %v393_v42 = vmax.f32 %v385_v30, 0.0  ;;  %v397_v43 = vmax.f32 %v389_v31, 0.0 }
  0xf5   : > { %v386_v36 = vadd.f32 %v519_v19, %v371_v32  ;;  %v390_v37 = vadd.f32 %v519_v19, %v375_v33  ;;  %v396_v40 = vmax.f32 %v388_v34, 0.0  ;;  %v400_v41 = vmax.f32 %v392_v35, 0.0 }
  0xf7   : > { %v394_v44 = vmax.f32 %v386_v36, 0.0  ;;  %v398_v45 = vmax.f32 %v390_v37, 0.0  ;;  %v546_v46 = vpack.c.bf16 %v396_v40, %v395_v38  ;;  %v556_v47 = vpack.c.bf16 %v400_v41, %v399_v39 }
  0xf9   : > { %v541_v48 = vpack.c.bf16 %v394_v44, %v393_v42  ;;  %v551_v49 = vpack.c.bf16 %v398_v45, %v397_v43  ;;  %558 = vst [vmem:[%s199_s20 + $0x8] sm:$0xff] %v546_v46   ;;  %560 = vst [vmem:[%s199_s20 + $0x18] sm:$0xff] %v556_v47  }
  0xfb   : > { %542 = vst [vmem:[%s199_s20] sm:$0xff] %v541_v48   ;;  %559 = vst [vmem:[%s199_s20 + $0x10] sm:$0xff] %v551_v49  }
  0xfc PF: > { %s14_s15 = sadd.s32 1, %s639_s15  }
  0xfd   : > { %p11_p4 = scmp.ge.s32.totalorder %s14_s15, 4  }
  0xff   :  { %13 = sbr.rel (!%p11_p4) target bundleno = 1 (0x1), region = 66 }

// kernel: _lambda_.16
= control target key start
LH: loop header
LB: loop body
LE: loop exit
PB: predicated region body
PF: predicated region fallthrough
CT: control target
= control target key end

     0   :  { %s1219_s15 = smov 0   ;;  %s1597_s0 = inlined_call_operand.vmem [shape: bf16[2,8,8,128], index: 0, kind: input, shape index: {}]   ;;  %s1598_s1 = inlined_call_operand.vmem [shape: f32[9,128], index: 1, kind: input, shape index: {}]   ;;  %s1599_s2 = inlined_call_operand.vmem [shape: f32[1,128], index: 2, kind: input, shape index: {}]   ;;  %s1600_s3 = inlined_call_operand.vmem [shape: f32[1,128], index: 3, kind: input, shape index: {}]   ;;  %s1601_s4 = inlined_call_operand.vmem [shape: bf16[2,8,8,128], index: 4, kind: output, shape index: {}]  }
   0x1 LB: > { %s1129_s16 = sadd.s32 4294967295, %s1191_s15   ;;  %p1133_p0 = scmp.ge.s32.totalorder %s1191_s15, 1  ;;  %s1191_s15 = sphi %s1219_s15, %s14_s15  }
   0x2   : > { %p162_p1 = scmp.lt.s32.totalorder %s1191_s15, 3 }
   0x4   : > { %p163_p2 = pnand %p1133_p0, %p162_p1 }
   0x5   : > { %p1246_p3 = scmp.lt.s32.totalorder (!%p163_p2), %s1129_s16, 1 }
   0x6   : > { %166 = sbr.rel (%p163_p2) target bundleno = 158 (0x9e), region = 36 }
   0xb   : > { %vm205_vm0 = vcmask 1040384   ;;  %vm206_vm1 = vsmask.f32 256  ;;  %v208_v0 = vld [vmem:[#allocation2 + $0x8] sm:$0x1]  ;;  %v1193_v12 = vmov 0  }
   0xc   : > { %vm1227_vm2 = vmand %vm205_vm0, %vm206_vm1  ;;  %v211_v2 = vld [vmem:[#allocation2 + $0x10] sm:$0x1]  ;;  %v214_v3 = vld [vmem:[#allocation2 + $0x18] sm:$0x1]  ;;  %vm232_vm3 = vsmask.f32 7938 }
   0xd   : > { %v209_v4 = vsel %vm1227_vm2, 0, %v208_v0  ;;  %v212_v5 = vsel %vm1227_vm2, 0, %v211_v2  ;;  %v215_v6 = vsel %vm1227_vm2, 0, %v214_v3  ;;  %v217_v7 = vld [vmem:[#allocation2 + $0x20] sm:$0x1]  ;;  %vm1238_vm4 = vmand %vm205_vm0, %vm232_vm3  ;;  %s1610_s16 = smov (!%p1246_p3, %s1129_s16), 1 }
   0xe   : > { %210 = vst [vmem:[#allocation2 + $0x8] sm:$0x1] %v209_v4  ;;  %213 = vst [vmem:[#allocation2 + $0x10] sm:$0x1] %v212_v5  ;;  %v218_v9 = vsel %vm1227_vm2, 0, %v217_v7  ;;  %s1151_s18 = sshll.u32 %s1610_s16, 5 }
   0xf   : > { %216 = vst [vmem:[#allocation2 + $0x18] sm:$0x1] %v215_v6  ;;  %v220_v10 = vld [vmem:[#allocation2 + $0x28] sm:$0x1]  ;;  %v223_v11 = vld [vmem:[#allocation2 + $0x30] sm:$0x1]  ;;  %s1286_s21 = scalar_lea.vmem %s1597_s0, %s1151_s18  ;;  %s1462_s23 = scalar_lea.vmem %s1601_s4, %s1151_s18 }
  0x10   : > { %199 = vst [vmem:[#allocation2] sm:$0xf] %v1193_v12  ;;  %200 = vst [vmem:[#allocation2 + $0x4] sm:$0x1] %v1193_v12  ;;  %v221_v13 = vsel %vm1227_vm2, 0, %v220_v10  ;;  %v224_v14 = vsel %vm1227_vm2, 0, %v223_v11 }
  0x11   : > { %202 = vst [vmem:[#allocation2 + $0x48] sm:$0xf] %v1193_v12  ;;  %203 = vst [vmem:[#allocation2 + $0x4c] sm:$0x1] %v1193_v12  ;;  %v226_v15 = vld [vmem:[#allocation2 + $0x38] sm:$0x1] }
  0x12   : > { %219 = vst [vmem:[#allocation2 + $0x20] sm:$0x1] %v218_v9  ;;  %v234_v16 = vld [vmem:[#allocation2 + $0xc] sm:$0x1]  ;;  %222 = vst [vmem:[#allocation2 + $0x28] sm:$0x1] %v221_v13 }
  0x13   : > { %225 = vst [vmem:[#allocation2 + $0x30] sm:$0x1] %v224_v14  ;;  %v227_v17 = vsel %vm1227_vm2, 0, %v226_v15  ;;  %v235_v18 = vsel %vm1238_vm4, 0, %v234_v16  ;;  %v237_v19 = vld [vmem:[#allocation2 + $0x14] sm:$0x1] }
  0x14   : > { %v240_v20 = vld [vmem:[#allocation2 + $0x1c] sm:$0x1]  ;;  %228 = vst [vmem:[#allocation2 + $0x38] sm:$0x1] %v227_v17  ;;  %236 = vst [vmem:[#allocation2 + $0xc] sm:$0x1] %v235_v18 }
  0x15   : > { %v238_v21 = vsel %vm1238_vm4, 0, %v237_v19  ;;  %v241_v22 = vsel %vm1238_vm4, 0, %v240_v20  ;;  %v243_v23 = vld [vmem:[#allocation2 + $0x24] sm:$0x1]  ;;  %v246_v24 = vld [vmem:[#allocation2 + $0x2c] sm:$0x1] }
  0x16   : > { %239 = vst [vmem:[#allocation2 + $0x14] sm:$0x1] %v238_v21  ;;  %242 = vst [vmem:[#allocation2 + $0x1c] sm:$0x1] %v241_v22  ;;  %v244_v25 = vsel %vm1238_vm4, 0, %v243_v23  ;;  %v247_v26 = vsel %vm1238_vm4, 0, %v246_v24 }
  0x17   : > { %v249_v27 = vld [vmem:[#allocation2 + $0x34] sm:$0x1]  ;;  %v252_v28 = vld [vmem:[#allocation2 + $0x3c] sm:$0x1]  ;;  %245 = vst [vmem:[#allocation2 + $0x24] sm:$0x1] %v244_v25 }
  0x18   : > { %248 = vst [vmem:[#allocation2 + $0x2c] sm:$0x1] %v247_v26  ;;  %v250_v29 = vsel %vm1238_vm4, 0, %v249_v27  ;;  %v253_v30 = vsel %vm1238_vm4, 0, %v252_v28  ;;  %v229_v31 = vld [vmem:[#allocation2 + $0x40] sm:$0x1] }
  0x19   : > { %v255_v32 = vld [vmem:[#allocation2 + $0x44] sm:$0x1]  ;;  %251 = vst [vmem:[#allocation2 + $0x34] sm:$0x1] %v250_v29  ;;  %254 = vst [vmem:[#allocation2 + $0x3c] sm:$0x1] %v253_v30 }
  0x1a   : > { %v230_v33 = vsel %vm1227_vm2, 0, %v229_v31  ;;  %v256_v34 = vsel %vm1238_vm4, 0, %v255_v32  ;;  %vm346_vm5 = vcmask 1043456   ;;  %v258_v35 = vld [vmem:[%s1286_s21] sm:$0xf]  ;;  %vm488_vm7 = vcmask 1046528  }
  0x1b   : > { %231 = vst [vmem:[#allocation2 + $0x40] sm:$0x1] %v230_v33  ;;  %257 = vst [vmem:[#allocation2 + $0x44] sm:$0x1] %v256_v34  ;;  %v259_v36 = vld [vmem:[%s1286_s21 + $0x4] sm:$0xf] }
  0x1c   : > { %v267_v37 = vshrl.u32 %v258_v35, 16  ;;  %v270_v38 = vshll.u32 %v258_v35, 16  ;;  %v275_v39 = vshrl.u32 %v259_v36, 16  ;;  %v278_v40 = vshll.u32 %v259_v36, 16  ;;  %v1290_v41 = vld [vmem:[#allocation2 + $0x4] sm:$0x1]  ;;  %vm1296_vm6 = vmand %vm346_vm5, %vm232_vm3 }
  0x1d   : > { %v348_v42 = vld [vmem:[#allocation2 + $0x8] sm:$0xf]  ;;  %v351_v43 = vld [vmem:[#allocation2 + $0xc] sm:$0x1]  ;;  %v354_v44 = vld [vmem:[#allocation2 + $0x10] sm:$0xf]  ;;  %v415_v56 = vunpack.c.l.bf16 %v1290_v41 }
  0x1e   : > { %v260_v45 = vld [vmem:[%s1286_s21 + $0x8] sm:$0xf]  ;;  %v261_v46 = vld [vmem:[%s1286_s21 + $0xc] sm:$0xf]  ;;  %v269_v47 = vrot.slane %v267_v37, 7  ;;  %v277_v48 = vrot.slane %v275_v39, 7 }
  0x1f   : > { %v357_v49 = vld [vmem:[#allocation2 + $0x14] sm:$0x1]  ;;  %v283_v50 = vshrl.u32 %v260_v45, 16  ;;  %v286_v52 = vshll.u32 %v260_v45, 16  ;;  %v291_v53 = vshrl.u32 %v261_v46, 16  ;;  %v294_v54 = vshll.u32 %v261_v46, 16 }
  0x20   : > { %v262_v55 = vld [vmem:[%s1286_s21 + $0x10] sm:$0xf]  ;;  %v272_v57 = vor.u32 %v270_v38, %v269_v47  ;;  %v273_v58 = vrot.slane %v269_v47, 4  ;;  %v280_v59 = vor.u32 %v278_v40, %v277_v48  ;;  %v281_v60 = vrot.slane %v277_v48, 4  ;;  %v360_v61 = vld [vmem:[#allocation2 + $0x18] sm:$0xf] }
  0x21   : > { %v263_v62 = vld [vmem:[%s1286_s21 + $0x14] sm:$0xf]  ;;  %v285_v63 = vrot.slane %v283_v50, 7  ;;  %v293_v0 = vrot.slane %v291_v53, 7  ;;  %v299_v2 = vshrl.u32 %v262_v55, 16  ;;  %v302_v3 = vshll.u32 %v262_v55, 16 }
  0x22   : > { %v264_v4 = vld [vmem:[%s1286_s21 + $0x18] sm:$0xf]  ;;  %v349_v5 = vsel %vm1296_vm6, %v272_v57, %v348_v42  ;;  %v352_v6 = vsel %vm1227_vm2, %v273_v58, %v351_v43  ;;  %v355_v7 = vsel %vm1296_vm6, %v280_v59, %v354_v44  ;;  %v358_v8 = vsel %vm1227_vm2, %v281_v60, %v357_v49  ;;  %v363_v9 = vld [vmem:[#allocation2 + $0x1c] sm:$0x1]  ;;  %v366_v10 = vld [vmem:[#allocation2 + $0x20] sm:$0xf] }
  0x23   : > { %v369_v11 = vld [vmem:[#allocation2 + $0x24] sm:$0x1]  ;;  %350 = vst [vmem:[#allocation2 + $0x8] sm:$0xf] %v349_v5  ;;  %353 = vst [vmem:[#allocation2 + $0xc] sm:$0x1] %v352_v6  ;;  %v288_v12 = vor.u32 %v286_v52, %v285_v63  ;;  %v296_v14 = vor.u32 %v294_v54, %v293_v0 }
  0x24   : > { %356 = vst [vmem:[#allocation2 + $0x10] sm:$0xf] %v355_v7  ;;  %359 = vst [vmem:[#allocation2 + $0x14] sm:$0x1] %v358_v8  ;;  %v289_v13 = vrot.slane %v285_v63, 4  ;;  %v297_v15 = vrot.slane %v293_v0, 4 }
  0x25   : > { %v372_v16 = vld [vmem:[#allocation2 + $0x28] sm:$0xf]  ;;  %v301_v17 = vrot.slane %v299_v2, 7  ;;  %v307_v18 = vshrl.u32 %v263_v62, 16  ;;  %v310_v19 = vshll.u32 %v263_v62, 16  ;;  %v315_v20 = vshrl.u32 %v264_v4, 16 }
  0x26   : > { %v265_v21 = vld [vmem:[%s1286_s21 + $0x1c] sm:$0xf]  ;;  %v361_v22 = vsel %vm1296_vm6, %v288_v12, %v360_v61  ;;  %v364_v23 = vsel %vm1227_vm2, %v289_v13, %v363_v9  ;;  %v367_v24 = vsel %vm1296_vm6, %v296_v14, %v366_v10  ;;  %v370_v25 = vsel %vm1227_vm2, %v297_v15, %v369_v11  ;;  %v375_v26 = vld [vmem:[#allocation2 + $0x2c] sm:$0x1]  ;;  %v378_v27 = vld [vmem:[#allocation2 + $0x30] sm:$0xf] }
  0x27   : > { %v381_v28 = vld [vmem:[#allocation2 + $0x34] sm:$0x1]  ;;  %v1324_v29 = vld [vmem:[%s1598_s1 + $0x1] ss:$0 sm:$0xff]  ;;  %362 = vst [vmem:[#allocation2 + $0x18] sm:$0xf] %v361_v22  ;;  %v304_v30 = vor.u32 %v302_v3, %v301_v17 }
  0x28   : > { %365 = vst [vmem:[#allocation2 + $0x1c] sm:$0x1] %v364_v23  ;;  %368 = vst [vmem:[#allocation2 + $0x20] sm:$0xf] %v367_v24  ;;  %v305_v31 = vrot.slane %v301_v17, 4  ;;  %v309_v32 = vrot.slane %v307_v18, 7  ;;  %v1329_v38 = vmul.f32 %v1324_v29, %v415_v56 }
  0x29   : > { %371 = vst [vmem:[#allocation2 + $0x24] sm:$0x1] %v370_v25  ;;  %v317_v33 = vrot.slane %v315_v20, 7  ;;  %v384_v34 = vld [vmem:[#allocation2 + $0x38] sm:$0xf]  ;;  %v318_v35 = vshll.u32 %v264_v4, 16  ;;  %v373_v40 = vsel %vm1296_vm6, %v304_v30, %v372_v16 }
  0x2a   : > { %v323_v36 = vshrl.u32 %v265_v21, 16  ;;  %v326_v37 = vshll.u32 %v265_v21, 16  ;;  %v1334_v39 = vld [vmem:[%s1598_s1 + $0x2] ss:$0 sm:$0xff]  ;;  %v376_v42 = vsel %vm1227_vm2, %v305_v31, %v375_v26  ;;  %v312_v43 = vor.u32 %v310_v19, %v309_v32  ;;  %v387_v45 = vld [vmem:[#allocation2 + $0x3c] sm:$0x1] }
  0x2b   : > { %v313_v44 = vrot.slane %v309_v32, 4  ;;  %v390_v46 = vld [vmem:[#allocation2 + $0x40] sm:$0xf]  ;;  %vm566_vm8 = vcmask 1045504   ;;  %374 = vst [vmem:[#allocation2 + $0x28] sm:$0xf] %v373_v40  ;;  %v320_v47 = vor.u32 %v318_v35, %v317_v33  ;;  %v535_v58 = vmul.f32 %v1334_v39, %v415_v56 }
  0x2c   : > { %377 = vst [vmem:[#allocation2 + $0x2c] sm:$0x1] %v376_v42  ;;  %v321_v48 = vrot.slane %v317_v33, 4  ;;  %v325_v49 = vrot.slane %v323_v36, 7  ;;  %v393_v50 = vld [vmem:[#allocation2 + $0x44] sm:$0x1]  ;;  %v379_v53 = vsel %vm1296_vm6, %v312_v43, %v378_v27 }
  0x2d   : > { %v490_v52 = vrot.slane %v1329_v38, 1  ;;  %v382_v54 = vsel %vm1227_vm2, %v313_v44, %v381_v28  ;;  %v398_v55 = vld [vmem:[#allocation2] ss:$8 sps:$4 sm:$0xff]   ;;  %v401_v57 = vld [vmem:[#allocation2 + $0xc] sm:$0x1]  ;;  %v385_v60 = vsel %vm1296_vm6, %v320_v47, %v384_v34  ;;  %v568_v4 = vrot.slane %v535_v58, 2 }
  0x2e   : > { %v607_v59 = vld [vmem:[#allocation2 + $0x8] ss:$8 sps:$4 sm:$0xff]   ;;  %380 = vst [vmem:[#allocation2 + $0x30] sm:$0xf] %v379_v53  ;;  %383 = vst [vmem:[#allocation2 + $0x34] sm:$0x1] %v382_v54  ;;  %v388_v61 = vsel %vm1227_vm2, %v321_v48, %v387_v45  ;;  %v328_v62 = vor.u32 %v326_v37, %v325_v49  ;;  %v414_v41 = vunpack.c.l.bf16 %v398_v55  ;;  %v416_v56 = vunpack.c.h.bf16 %v398_v55 }
  0x2f   : > { %v329_v63 = vrot.slane %v325_v49, 4  ;;  %v1355_v0 = vld [vmem:[%s1598_s1] ss:$0 sm:$0xff]  ;;  %v608_v2 = vld [vmem:[#allocation2 + $0xc] sm:$0x1]  ;;  %v417_v3 = vunpack.c.l.bf16 %v401_v57  ;;  %v623_v8 = vunpack.c.l.bf16 %v607_v59  ;;  %v625_v20 = vunpack.c.h.bf16 %v607_v59 }
  0x30   : > { %386 = vst [vmem:[#allocation2 + $0x38] sm:$0xf] %v385_v60  ;;  %389 = vst [vmem:[#allocation2 + $0x3c] sm:$0x1] %v388_v61  ;;  %v391_v5 = vsel %vm1296_vm6, %v328_v62, %v390_v46  ;;  %v610_v7 = vld [vmem:[#allocation2 + $0x14] sm:$0x1]  ;;  %v624_v9 = vunpack.c.l.bf16 %v608_v2  ;;  %v435_v10 = vmul.f32 %v1355_v0, %v414_v41  ;;  %v436_v11 = vmul.f32 %v1355_v0, %v416_v56 }
  0x31   : > { %v394_v6 = vsel %vm1227_vm2, %v329_v63, %v393_v50  ;;  %392 = vst [vmem:[#allocation2 + $0x40] sm:$0xf] %v391_v5  ;;  %v456_v12 = vmul.f32 %v1324_v29, %v414_v41  ;;  %v458_v13 = vmul.f32 %v1324_v29, %v416_v56  ;;  %v459_v14 = vmul.f32 %v1324_v29, %v417_v3  ;;  %v1372_v16 = vld [vmem:[%s1598_s1 + $0x3] ss:$0 sm:$0xff]  ;;  %v1377_v17 = vld [vmem:[%s1598_s1 + $0x4] ss:$0 sm:$0xff] }
  0x32   : > { %395 = vst [vmem:[#allocation2 + $0x44] sm:$0x1] %v394_v6  ;;  %v534_v51 = vmul.f32 %v1334_v39, %v414_v41  ;;  %v536_v1 = vmul.f32 %v1334_v39, %v416_v56  ;;  %v537_v15 = vmul.f32 %v1334_v39, %v417_v3  ;;  %v626_v21 = vunpack.c.l.bf16 %v610_v7  ;;  %v1386_v31 = vld [vmem:[%s1598_s1 + $0x5] ss:$0 sm:$0xff]  ;;  %v815_v50 = vld [vmem:[#allocation2 + $0x10] ss:$8 sps:$4 sm:$0xff]  }
  0x33   : > { %v489_v18 = vrot.slane %v456_v12, 1  ;;  %v492_v19 = vrot.slane %v458_v13, 1  ;;  %v493_v22 = vrot.slane %v459_v14, 1  ;;  %v644_v27 = vmul.f32 %v1372_v16, %v623_v8  ;;  %v816_v57 = vld [vmem:[#allocation2 + $0x14] sm:$0x1] }
  0x34   : > { %v567_v23 = vrot.slane %v534_v51, 2  ;;  %v570_v24 = vrot.slane %v536_v1, 2  ;;  %v571_v25 = vrot.slane %v537_v15, 2  ;;  %v645_v28 = vmul.f32 %v1372_v16, %v625_v20  ;;  %v818_v62 = vld [vmem:[#allocation2 + $0x1c] sm:$0x1] }
  0x35   : > { %v491_v26 = vsel %vm488_vm7, %v489_v18, %v490_v52  ;;  %v665_v30 = vmul.f32 %v1377_v17, %v623_v8  ;;  %v494_v32 = vsel %vm488_vm7, %v492_v19, %v493_v22  ;;  %v666_v37 = vmul.f32 %v1377_v17, %v624_v9  ;;  %v1403_v63 = vld [vmem:[%s1598_s1 + $0x6] ss:$0 sm:$0xff]  ;;  %v402_v22 = vld [vmem:[#allocation2 + $0x10] ss:$8 sps:$4 sm:$0xff]  }
  0x36   : > { %v521_v33 = vadd.f32 %v491_v26, %v435_v10  ;;  %v569_v34 = vsel %vm566_vm8, %v567_v23, %v568_v4  ;;  %v572_v35 = vsel %vm566_vm8, %v570_v24, %v571_v25  ;;  %v522_v36 = vadd.f32 %v494_v32, %v436_v11  ;;  %v1408_v4 = vld [vmem:[%s1598_s1 + $0x7] ss:$0 sm:$0xff] }
  0x37   : > { %v667_v38 = vmul.f32 %v1377_v17, %v625_v20  ;;  %v668_v40 = vmul.f32 %v1377_v17, %v626_v21  ;;  %v697_v43 = vrot.slane %v665_v30, 1  ;;  %v742_v44 = vmul.f32 %v1386_v31, %v623_v8 }
  0x38   : > { %v599_v42 = vadd.f32 %v569_v34, %v521_v33  ;;  %v743_v45 = vmul.f32 %v1386_v31, %v624_v9  ;;  %v600_v46 = vadd.f32 %v572_v35, %v522_v36  ;;  %v698_v47 = vrot.slane %v666_v37, 1  ;;  %v1414_v9 = vld [vmem:[%s1598_s1 + $0x8] ss:$0 sm:$0xff]  ;;  %v403_v33 = vld [vmem:[#allocation2 + $0x14] sm:$0x1] }
  0x39   : > { %v700_v48 = vrot.slane %v667_v38, 1  ;;  %v701_v49 = vrot.slane %v668_v40, 1  ;;  %v744_v53 = vmul.f32 %v1386_v31, %v625_v20  ;;  %v745_v54 = vmul.f32 %v1386_v31, %v626_v21  ;;  %v405_v37 = vld [vmem:[#allocation2 + $0x1c] sm:$0x1] }
  0x3a   : > { %v652_v52 = vadd.f32 %v644_v27, %v599_v42  ;;  %v774_v55 = vrot.slane %v742_v44, 2  ;;  %v653_v58 = vadd.f32 %v645_v28, %v600_v46  ;;  %v699_v59 = vsel %vm488_vm7, %v697_v43, %v698_v47 }
  0x3b   : > { %v702_v60 = vsel %vm488_vm7, %v700_v48, %v701_v49  ;;  %v775_v61 = vrot.slane %v743_v45, 2  ;;  %v777_v41 = vrot.slane %v744_v53, 2  ;;  %v778_v56 = vrot.slane %v745_v54, 2  ;;  %v1432_v45 = vld [vmem:[%s1599_s2] ss:$0 sm:$0xff] }
  0x3c   : > { %v729_v2 = vadd.f32 %v699_v59, %v652_v52  ;;  %v831_v3 = vunpack.c.l.bf16 %v815_v50  ;;  %v730_v5 = vadd.f32 %v702_v60, %v653_v58  ;;  %v832_v7 = vunpack.c.l.bf16 %v816_v57 }
  0x3d   : > { %v776_v6 = vsel %vm566_vm8, %v774_v55, %v775_v61  ;;  %v833_v8 = vunpack.c.h.bf16 %v815_v50  ;;  %v779_v10 = vsel %vm566_vm8, %v777_v41, %v778_v56  ;;  %v834_v12 = vunpack.c.l.bf16 %v818_v62  ;;  %v1440_v55 = vld [vmem:[%s1600_s3] ss:$0 sm:$0xff] }
  0x3e   : > { %v806_v11 = vadd.f32 %v776_v6, %v729_v2  ;;  %v852_v13 = vmul.f32 %v1403_v63, %v831_v3  ;;  %v807_v14 = vadd.f32 %v779_v10, %v730_v5  ;;  %v873_v1 = vmul.f32 %v1408_v4, %v831_v3 }
  0x3f   : > { %v853_v51 = vmul.f32 %v1403_v63, %v833_v8  ;;  %v874_v15 = vmul.f32 %v1408_v4, %v832_v7  ;;  %v875_v19 = vmul.f32 %v1408_v4, %v833_v8  ;;  %v876_v20 = vmul.f32 %v1408_v4, %v834_v12 }
  0x40   : > { %v860_v18 = vadd.f32 %v852_v13, %v806_v11  ;;  %v950_v21 = vmul.f32 %v1414_v9, %v831_v3  ;;  %v905_v24 = vrot.slane %v873_v1, 1  ;;  %v951_v26 = vmul.f32 %v1414_v9, %v832_v7  ;;  %v611_v1 = vld [vmem:[#allocation2 + $0x18] ss:$8 sps:$4 sm:$0xff]  }
  0x41   : > { %v861_v23 = vadd.f32 %v853_v51, %v807_v14  ;;  %v906_v25 = vrot.slane %v874_v15, 1  ;;  %v908_v27 = vrot.slane %v875_v19, 1  ;;  %v909_v28 = vrot.slane %v876_v20, 1  ;;  %v612_v15 = vld [vmem:[#allocation2 + $0x1c] sm:$0x1] }
  0x42   : > { %v952_v30 = vmul.f32 %v1414_v9, %v833_v8  ;;  %v953_v32 = vmul.f32 %v1414_v9, %v834_v12  ;;  %v982_v35 = vrot.slane %v950_v21, 2  ;;  %v983_v36 = vrot.slane %v951_v26, 2 }
  0x43   : > { %v907_v34 = vsel %vm488_vm7, %v905_v24, %v906_v25  ;;  %v418_v38 = vunpack.c.l.bf16 %v402_v22  ;;  %v910_v40 = vsel %vm488_vm7, %v908_v27, %v909_v28  ;;  %v419_v48 = vunpack.c.l.bf16 %v403_v33 }
  0x44   : > { %v937_v42 = vadd.f32 %v907_v34, %v860_v18  ;;  %v985_v43 = vrot.slane %v952_v30, 2  ;;  %v986_v44 = vrot.slane %v953_v32, 2  ;;  %v938_v46 = vadd.f32 %v910_v40, %v861_v23 }
  0x45   : > { %v984_v47 = vsel %vm566_vm8, %v982_v35, %v983_v36  ;;  %v420_v49 = vunpack.c.h.bf16 %v402_v22  ;;  %v421_v53 = vunpack.c.l.bf16 %v405_v37  ;;  %v437_v54 = vmul.f32 %v1355_v0, %v418_v38  ;;  %v614_v22 = vld [vmem:[#allocation2 + $0x24] sm:$0x1] }
  0x46   : > { %v987_v50 = vsel %vm566_vm8, %v985_v43, %v986_v44  ;;  %v1014_v52 = vadd.f32 %v984_v47, %v937_v42  ;;  %v460_v59 = vmul.f32 %v1324_v29, %v418_v38  ;;  %v461_v60 = vmul.f32 %v1324_v29, %v419_v48 }
  0x47   : > { %v1015_v57 = vadd.f32 %v987_v50, %v938_v46  ;;  %v438_v58 = vmul.f32 %v1355_v0, %v420_v49  ;;  %v462_v62 = vmul.f32 %v1324_v29, %v420_v49  ;;  %v463_v2 = vmul.f32 %v1324_v29, %v421_v53 }
  0x48   : > { %v1028_v61 = vmul.f32 %v1432_v45, %v1014_v52  ;;  %v538_v41 = vmul.f32 %v1334_v39, %v418_v38  ;;  %v495_v3 = vrot.slane %v460_v59, 1  ;;  %v496_v5 = vrot.slane %v461_v60, 1 }
  0x49   : > { %v1029_v56 = vmul.f32 %v1432_v45, %v1015_v57  ;;  %v539_v6 = vmul.f32 %v1334_v39, %v419_v48  ;;  %v498_v8 = vrot.slane %v462_v62, 1  ;;  %v499_v10 = vrot.slane %v463_v2, 1  ;;  %v819_v48 = vld [vmem:[#allocation2 + $0x20] ss:$8 sps:$4 sm:$0xff]  }
  0x4a   : > { %v1042_v7 = vadd.f32 %v1440_v55, %v1028_v61  ;;  %v540_v11 = vmul.f32 %v1334_v39, %v420_v49  ;;  %v497_v13 = vsel %vm488_vm7, %v495_v3, %v496_v5  ;;  %v541_v14 = vmul.f32 %v1334_v39, %v421_v53 }
  0x4b   : > { %v1043_v12 = vadd.f32 %v1440_v55, %v1029_v56  ;;  %v573_v51 = vrot.slane %v538_v41, 2  ;;  %v500_v19 = vsel %vm488_vm7, %v498_v8, %v499_v10  ;;  %v523_v20 = vadd.f32 %v497_v13, %v437_v54  ;;  %v820_v54 = vld [vmem:[#allocation2 + $0x24] sm:$0x1]  ;;  %v822_v41 = vld [vmem:[#allocation2 + $0x2c] sm:$0x1] }
  0x4c   : > { %v1050_v18 = vmax.f32 %v1042_v7, 0.0  ;;  %v574_v21 = vrot.slane %v539_v6, 2  ;;  %v524_v24 = vadd.f32 %v500_v19, %v438_v58  ;;  %v576_v25 = vrot.slane %v540_v11, 2 }
  0x4d   : > { %v1051_v23 = vmax.f32 %v1043_v12, 0.0  ;;  %v577_v26 = vrot.slane %v541_v14, 2  ;;  %v627_v28 = vunpack.c.l.bf16 %v611_v1  ;;  %v628_v30 = vunpack.c.l.bf16 %v612_v15 }
  0x4e   : > { %v575_v27 = vsel %vm566_vm8, %v573_v51, %v574_v21  ;;  %v629_v32 = vunpack.c.h.bf16 %v611_v1  ;;  %v630_v36 = vunpack.c.l.bf16 %v614_v22  ;;  %v835_v56 = vunpack.c.l.bf16 %v819_v48 }
  0x4f   : > { %v1156_v33 = vpack.c.bf16 %v1051_v23, %v1050_v18  ;;  %v578_v34 = vsel %vm566_vm8, %v576_v25, %v577_v26  ;;  %v601_v35 = vadd.f32 %v575_v27, %v523_v20  ;;  %v646_v38 = vmul.f32 %v1372_v16, %v627_v28 }
  0x50   : > { %v602_v37 = vadd.f32 %v578_v34, %v524_v24  ;;  %v647_v40 = vmul.f32 %v1372_v16, %v629_v32  ;;  %v669_v42 = vmul.f32 %v1377_v17, %v627_v28  ;;  %v670_v43 = vmul.f32 %v1377_v17, %v628_v30 }
  0x51   : > { %1157 = vst [vmem:[%s1462_s23] sm:$0xff] %v1156_v33   ;;  %v671_v44 = vmul.f32 %v1377_v17, %v629_v32  ;;  %v672_v46 = vmul.f32 %v1377_v17, %v630_v36  ;;  %v746_v47 = vmul.f32 %v1386_v31, %v627_v28  ;;  %v654_v49 = vadd.f32 %v646_v38, %v601_v35 }
  0x52   : > { %v655_v50 = vadd.f32 %v647_v40, %v602_v37  ;;  %v703_v52 = vrot.slane %v669_v42, 1  ;;  %v747_v53 = vmul.f32 %v1386_v31, %v628_v30  ;;  %v704_v57 = vrot.slane %v670_v43, 1  ;;  %v406_v30 = vld [vmem:[#allocation2 + $0x20] ss:$8 sps:$4 sm:$0xff]   ;;  %v409_v43 = vld [vmem:[#allocation2 + $0x2c] sm:$0x1] }
  0x53   : > { %v706_v58 = vrot.slane %v671_v44, 1  ;;  %v707_v59 = vrot.slane %v672_v46, 1  ;;  %v748_v60 = vmul.f32 %v1386_v31, %v629_v32  ;;  %v749_v61 = vmul.f32 %v1386_v31, %v630_v36  ;;  %v407_v36 = vld [vmem:[#allocation2 + $0x24] sm:$0x1] }
  0x54   : > { %v780_v62 = vrot.slane %v746_v47, 2  ;;  %v781_v2 = vrot.slane %v747_v53, 2  ;;  %v705_v3 = vsel %vm488_vm7, %v703_v52, %v704_v57  ;;  %v836_v7 = vunpack.c.l.bf16 %v820_v54 }
  0x55   : > { %v708_v5 = vsel %vm488_vm7, %v706_v58, %v707_v59  ;;  %v783_v6 = vrot.slane %v748_v60, 2  ;;  %v731_v8 = vadd.f32 %v705_v3, %v654_v49  ;;  %v784_v12 = vrot.slane %v749_v61, 2 }
  0x56   : > { %v732_v10 = vadd.f32 %v708_v5, %v655_v50  ;;  %v782_v11 = vsel %vm566_vm8, %v780_v62, %v781_v2  ;;  %v837_v13 = vunpack.c.h.bf16 %v819_v48  ;;  %v838_v14 = vunpack.c.l.bf16 %v822_v41 }
  0x57   : > { %v854_v51 = vmul.f32 %v1403_v63, %v835_v56  ;;  %v877_v1 = vmul.f32 %v1408_v4, %v835_v56  ;;  %v785_v15 = vsel %vm566_vm8, %v783_v6, %v784_v12  ;;  %v808_v18 = vadd.f32 %v782_v11, %v731_v8 }
  0x58   : > { %v878_v19 = vmul.f32 %v1408_v4, %v836_v7  ;;  %v954_v20 = vmul.f32 %v1414_v9, %v835_v56  ;;  %v809_v21 = vadd.f32 %v785_v15, %v732_v10  ;;  %v855_v22 = vmul.f32 %v1403_v63, %v837_v13 }
  0x59   : > { %v879_v23 = vmul.f32 %v1408_v4, %v837_v13  ;;  %v880_v24 = vmul.f32 %v1408_v4, %v838_v14  ;;  %v862_v25 = vadd.f32 %v854_v51, %v808_v18  ;;  %v911_v26 = vrot.slane %v877_v1, 1  ;;  %v615_v51 = vld [vmem:[#allocation2 + $0x28] ss:$8 sps:$4 sm:$0xff]  }
  0x5a   : > { %v912_v27 = vrot.slane %v878_v19, 1  ;;  %v955_v28 = vmul.f32 %v1414_v9, %v836_v7  ;;  %v863_v32 = vadd.f32 %v855_v22, %v809_v21  ;;  %v956_v35 = vmul.f32 %v1414_v9, %v837_v13 }
  0x5b   : > { %v914_v33 = vrot.slane %v879_v23, 1  ;;  %v915_v34 = vrot.slane %v880_v24, 1  ;;  %v957_v38 = vmul.f32 %v1414_v9, %v838_v14  ;;  %v988_v40 = vrot.slane %v954_v20, 2  ;;  %v616_v20 = vld [vmem:[#allocation2 + $0x2c] sm:$0x1] }
  0x5c   : > { %v913_v37 = vsel %vm488_vm7, %v911_v26, %v912_v27  ;;  %v989_v42 = vrot.slane %v955_v28, 2  ;;  %v991_v47 = vrot.slane %v956_v35, 2  ;;  %v422_v48 = vunpack.c.l.bf16 %v406_v30 }
  0x5d   : > { %v916_v44 = vsel %vm488_vm7, %v914_v33, %v915_v34  ;;  %v939_v46 = vadd.f32 %v913_v37, %v862_v25  ;;  %v992_v52 = vrot.slane %v957_v38, 2  ;;  %v423_v53 = vunpack.c.l.bf16 %v407_v36  ;;  %v618_v25 = vld [vmem:[#allocation2 + $0x34] sm:$0x1] }
  0x5e   : > { %v940_v49 = vadd.f32 %v916_v44, %v863_v32  ;;  %v990_v50 = vsel %vm566_vm8, %v988_v40, %v989_v42  ;;  %v424_v57 = vunpack.c.h.bf16 %v406_v30  ;;  %v425_v58 = vunpack.c.l.bf16 %v409_v43 }
  0x5f   : > { %v1016_v54 = vadd.f32 %v990_v50, %v939_v46  ;;  %v439_v59 = vmul.f32 %v1355_v0, %v422_v48  ;;  %v993_v60 = vsel %vm566_vm8, %v991_v47, %v992_v52  ;;  %v464_v61 = vmul.f32 %v1324_v29, %v422_v48 }
  0x60   : > { %v465_v62 = vmul.f32 %v1324_v29, %v423_v53  ;;  %v542_v2 = vmul.f32 %v1334_v39, %v422_v48  ;;  %v1017_v41 = vadd.f32 %v993_v60, %v940_v49  ;;  %v440_v3 = vmul.f32 %v1355_v0, %v424_v57 }
  0x61   : > { %v1030_v56 = vmul.f32 %v1432_v45, %v1016_v54  ;;  %v466_v5 = vmul.f32 %v1324_v29, %v424_v57  ;;  %v467_v6 = vmul.f32 %v1324_v29, %v425_v58  ;;  %v501_v7 = vrot.slane %v464_v61, 1 }
  0x62   : > { %v502_v8 = vrot.slane %v465_v62, 1  ;;  %v543_v10 = vmul.f32 %v1334_v39, %v423_v53  ;;  %v1031_v11 = vmul.f32 %v1432_v45, %v1017_v41  ;;  %v544_v14 = vmul.f32 %v1334_v39, %v424_v57 }
  0x63   : > { %v1044_v12 = vadd.f32 %v1440_v55, %v1030_v56  ;;  %v504_v13 = vrot.slane %v466_v5, 1  ;;  %v505_v15 = vrot.slane %v467_v6, 1  ;;  %v545_v18 = vmul.f32 %v1334_v39, %v425_v58  ;;  %v823_v58 = vld [vmem:[#allocation2 + $0x30] ss:$8 sps:$4 sm:$0xff]   ;;  %v826_v6 = vld [vmem:[#allocation2 + $0x3c] sm:$0x1] }
  0x64   : > { %v503_v1 = vsel %vm488_vm7, %v501_v7, %v502_v8  ;;  %v579_v19 = vrot.slane %v542_v2, 2  ;;  %v1045_v21 = vadd.f32 %v1440_v55, %v1031_v11  ;;  %v580_v24 = vrot.slane %v543_v10, 2 }
  0x65   : > { %v1052_v22 = vmax.f32 %v1044_v12, 0.0  ;;  %v525_v23 = vadd.f32 %v503_v1, %v439_v59  ;;  %v506_v26 = vsel %vm488_vm7, %v504_v13, %v505_v15  ;;  %v582_v27 = vrot.slane %v544_v14, 2  ;;  %v824_v59 = vld [vmem:[#allocation2 + $0x34] sm:$0x1] }
  0x66   : > { %v583_v28 = vrot.slane %v545_v18, 2  ;;  %v631_v30 = vunpack.c.l.bf16 %v615_v51  ;;  %v1053_v32 = vmax.f32 %v1045_v21, 0.0  ;;  %v526_v33 = vadd.f32 %v506_v26, %v440_v3 }
  0x67   : > { %v581_v34 = vsel %vm566_vm8, %v579_v19, %v580_v24  ;;  %v632_v35 = vunpack.c.l.bf16 %v616_v20  ;;  %v633_v38 = vunpack.c.h.bf16 %v615_v51  ;;  %v634_v40 = vunpack.c.l.bf16 %v618_v25 }
  0x68   : > { %v584_v36 = vsel %vm566_vm8, %v582_v27, %v583_v28  ;;  %v603_v37 = vadd.f32 %v581_v34, %v525_v23  ;;  %v1161_v42 = vpack.c.bf16 %v1053_v32, %v1052_v22  ;;  %v648_v44 = vmul.f32 %v1372_v16, %v631_v30 }
  0x69   : > { %v604_v43 = vadd.f32 %v584_v36, %v526_v33  ;;  %v673_v46 = vmul.f32 %v1377_v17, %v631_v30  ;;  %v649_v47 = vmul.f32 %v1372_v16, %v633_v38  ;;  %v674_v48 = vmul.f32 %v1377_v17, %v632_v35 }
  0x6a   : > { %v675_v49 = vmul.f32 %v1377_v17, %v633_v38  ;;  %v676_v50 = vmul.f32 %v1377_v17, %v634_v40  ;;  %1173 = vst [vmem:[%s1462_s23 + $0x8] sm:$0xff] %v1161_v42   ;;  %v656_v52 = vadd.f32 %v648_v44, %v603_v37  ;;  %v750_v54 = vmul.f32 %v1386_v31, %v631_v30 }
  0x6b   : > { %v709_v53 = vrot.slane %v673_v46, 1  ;;  %v751_v57 = vmul.f32 %v1386_v31, %v632_v35  ;;  %v657_v60 = vadd.f32 %v649_v47, %v604_v43  ;;  %v710_v61 = vrot.slane %v674_v48, 1  ;;  %v413_v47 = vld [vmem:[#allocation2 + $0x3c] sm:$0x1]  ;;  %v619_v48 = vld [vmem:[#allocation2 + $0x38] ss:$8 sps:$4 sm:$0xff]  }
  0x6c   : > { %v712_v62 = vrot.slane %v675_v49, 1  ;;  %v713_v2 = vrot.slane %v676_v50, 1  ;;  %v752_v41 = vmul.f32 %v1386_v31, %v633_v38  ;;  %v753_v56 = vmul.f32 %v1386_v31, %v634_v40  ;;  %v410_v38 = vld [vmem:[#allocation2 + $0x30] ss:$8 sps:$4 sm:$0xff]   ;;  %v411_v40 = vld [vmem:[#allocation2 + $0x34] sm:$0x1] }
  0x6d   : > { %v786_v3 = vrot.slane %v750_v54, 2  ;;  %v787_v5 = vrot.slane %v751_v57, 2  ;;  %v711_v7 = vsel %vm488_vm7, %v709_v53, %v710_v61  ;;  %v839_v10 = vunpack.c.l.bf16 %v823_v58 }
  0x6e   : > { %v714_v8 = vsel %vm488_vm7, %v712_v62, %v713_v2  ;;  %v840_v11 = vunpack.c.l.bf16 %v824_v59  ;;  %v733_v12 = vadd.f32 %v711_v7, %v656_v52  ;;  %v789_v51 = vrot.slane %v752_v41, 2 }
  0x6f   : > { %v734_v13 = vadd.f32 %v714_v8, %v657_v60  ;;  %v788_v14 = vsel %vm566_vm8, %v786_v3, %v787_v5  ;;  %v790_v1 = vrot.slane %v753_v56, 2  ;;  %v841_v15 = vunpack.c.h.bf16 %v823_v58 }
  0x70   : > { %v842_v18 = vunpack.c.l.bf16 %v826_v6  ;;  %v856_v19 = vmul.f32 %v1403_v63, %v839_v10  ;;  %v810_v20 = vadd.f32 %v788_v14, %v733_v12  ;;  %v881_v21 = vmul.f32 %v1408_v4, %v839_v10 }
  0x71   : > { %v882_v22 = vmul.f32 %v1408_v4, %v840_v11  ;;  %v958_v23 = vmul.f32 %v1414_v9, %v839_v10  ;;  %v791_v24 = vsel %vm566_vm8, %v789_v51, %v790_v1  ;;  %v857_v25 = vmul.f32 %v1403_v63, %v841_v15 }
  0x72   : > { %v883_v26 = vmul.f32 %v1408_v4, %v841_v15  ;;  %v884_v27 = vmul.f32 %v1408_v4, %v842_v18  ;;  %v811_v28 = vadd.f32 %v791_v24, %v734_v13  ;;  %v864_v30 = vadd.f32 %v856_v19, %v810_v20 }
  0x73   : > { %v917_v32 = vrot.slane %v881_v21, 1  ;;  %v918_v33 = vrot.slane %v882_v22, 1  ;;  %v959_v36 = vmul.f32 %v1414_v9, %v840_v11  ;;  %v960_v37 = vmul.f32 %v1414_v9, %v841_v15 }
  0x74   : > { %v920_v34 = vrot.slane %v883_v26, 1  ;;  %v921_v35 = vrot.slane %v884_v27, 1  ;;  %v865_v42 = vadd.f32 %v857_v25, %v811_v28  ;;  %v961_v44 = vmul.f32 %v1414_v9, %v842_v18  ;;  %v620_v25 = vld [vmem:[#allocation2 + $0x3c] sm:$0x1]  ;;  %v622_v26 = vld [vmem:[#allocation2 + $0x44] sm:$0x1] }
  0x75   : > { %v919_v43 = vsel %vm488_vm7, %v917_v32, %v918_v33  ;;  %v994_v46 = vrot.slane %v958_v23, 2  ;;  %v995_v52 = vrot.slane %v959_v36, 2  ;;  %v997_v53 = vrot.slane %v960_v37, 2 }
  0x76   : > { %v922_v49 = vsel %vm488_vm7, %v920_v34, %v921_v35  ;;  %v941_v50 = vadd.f32 %v919_v43, %v864_v30  ;;  %v998_v57 = vrot.slane %v961_v44, 2  ;;  %v426_v58 = vunpack.c.l.bf16 %v410_v38 }
  0x77   : > { %v942_v54 = vadd.f32 %v922_v49, %v865_v42  ;;  %v427_v59 = vunpack.c.l.bf16 %v411_v40  ;;  %v996_v60 = vsel %vm566_vm8, %v994_v46, %v995_v52  ;;  %v428_v61 = vunpack.c.h.bf16 %v410_v38 }
  0x78   : > { %v429_v62 = vunpack.c.l.bf16 %v413_v47  ;;  %v635_v2 = vunpack.c.l.bf16 %v619_v48  ;;  %v999_v41 = vsel %vm566_vm8, %v997_v53, %v998_v57  ;;  %v1018_v56 = vadd.f32 %v996_v60, %v941_v50 }
  0x79   : > { %v441_v3 = vmul.f32 %v1355_v0, %v426_v58  ;;  %v468_v5 = vmul.f32 %v1324_v29, %v426_v58  ;;  %v1019_v6 = vadd.f32 %v999_v41, %v942_v54  ;;  %v442_v7 = vmul.f32 %v1355_v0, %v428_v61 }
  0x7a   : > { %v469_v8 = vmul.f32 %v1324_v29, %v427_v59  ;;  %v470_v10 = vmul.f32 %v1324_v29, %v428_v61  ;;  %v1032_v11 = vmul.f32 %v1432_v45, %v1018_v56  ;;  %v471_v12 = vmul.f32 %v1324_v29, %v429_v62 }
  0x7b   : > { %v507_v13 = vrot.slane %v468_v5, 1  ;;  %v546_v14 = vmul.f32 %v1334_v39, %v426_v58  ;;  %v1033_v51 = vmul.f32 %v1432_v45, %v1019_v6  ;;  %v547_v18 = vmul.f32 %v1334_v39, %v427_v59  ;;  %v827_v58 = vld [vmem:[#allocation2 + $0x40] ss:$8 sps:$4 sm:$0xff]   ;;  %v828_v59 = vld [vmem:[#allocation2 + $0x44] sm:$0x1] }
  0x7c   : > { %v508_v1 = vrot.slane %v469_v8, 1  ;;  %v510_v15 = vrot.slane %v470_v10, 1  ;;  %v1046_v19 = vadd.f32 %v1440_v55, %v1032_v11  ;;  %v511_v0 = vrot.slane %v471_v12, 1  ;;  %v830_v6 = vld [vmem:[#allocation2 + $0x4c] sm:$0x1] }
  0x7d   : > { %v548_v20 = vmul.f32 %v1334_v39, %v428_v61  ;;  %v549_v21 = vmul.f32 %v1334_v39, %v429_v62  ;;  %v1047_v22 = vadd.f32 %v1440_v55, %v1033_v51  ;;  %v585_v23 = vrot.slane %v546_v14, 2 }
  0x7e   : > { %v509_v29 = vsel %vm488_vm7, %v507_v13, %v508_v1  ;;  %v586_v24 = vrot.slane %v547_v18, 2  ;;  %v1054_v27 = vmax.f32 %v1046_v19, 0.0  ;;  %v512_v28 = vsel %vm488_vm7, %v510_v15, %v511_v0 }
  0x7f   : > { %v527_v30 = vadd.f32 %v509_v29, %v441_v3  ;;  %v588_v32 = vrot.slane %v548_v20, 2  ;;  %v1055_v33 = vmax.f32 %v1047_v22, 0.0  ;;  %v528_v34 = vadd.f32 %v512_v28, %v442_v7 }
  0x80   : > { %v587_v35 = vsel %vm566_vm8, %v585_v23, %v586_v24  ;;  %v589_v36 = vrot.slane %v549_v21, 2  ;;  %v636_v37 = vunpack.c.l.bf16 %v620_v25  ;;  %v637_v38 = vunpack.c.h.bf16 %v619_v48 }
  0x81   : > { %v605_v39 = vadd.f32 %v587_v35, %v527_v30  ;;  %v638_v40 = vunpack.c.l.bf16 %v622_v26  ;;  %v1166_v42 = vpack.c.bf16 %v1055_v33, %v1054_v27  ;;  %v650_v44 = vmul.f32 %v1372_v16, %v635_v2 }
  0x82   : > { %v590_v43 = vsel %vm566_vm8, %v588_v32, %v589_v36  ;;  %v677_v46 = vmul.f32 %v1377_v17, %v635_v2  ;;  %v651_v49 = vmul.f32 %v1372_v16, %v637_v38  ;;  %v678_v50 = vmul.f32 %v1377_v17, %v636_v37 }
  0x83   : > { %v606_v47 = vadd.f32 %v590_v43, %v528_v34  ;;  %v679_v52 = vmul.f32 %v1377_v17, %v637_v38  ;;  %1174 = vst [vmem:[%s1462_s23 + $0x10] sm:$0xff] %v1166_v42   ;;  %v658_v53 = vadd.f32 %v650_v44, %v605_v39  ;;  %v680_v54 = vmul.f32 %v1377_v17, %v638_v40 }
  0x84   : > { %v715_v48 = vrot.slane %v677_v46, 1  ;;  %v754_v57 = vmul.f32 %v1386_v31, %v635_v2  ;;  %v716_v61 = vrot.slane %v678_v50, 1  ;;  %v755_v41 = vmul.f32 %v1386_v31, %v636_v37 }
  0x85   : > { %v659_v60 = vadd.f32 %v651_v49, %v606_v47  ;;  %v718_v62 = vrot.slane %v679_v52, 1  ;;  %v719_v56 = vrot.slane %v680_v54, 1  ;;  %v756_v16 = vmul.f32 %v1386_v31, %v637_v38 }
  0x86   : > { %v757_v3 = vmul.f32 %v1386_v31, %v638_v40  ;;  %v792_v5 = vrot.slane %v754_v57, 2  ;;  %v717_v7 = vsel %vm488_vm7, %v715_v48, %v716_v61  ;;  %v793_v17 = vrot.slane %v755_v41, 2 }
  0x87   : > { %v843_v8 = vunpack.c.l.bf16 %v827_v58  ;;  %v844_v10 = vunpack.c.l.bf16 %v828_v59  ;;  %v720_v2 = vsel %vm488_vm7, %v718_v62, %v719_v56  ;;  %v735_v11 = vadd.f32 %v717_v7, %v658_v53 }
  0x88   : > { %v795_v12 = vrot.slane %v756_v16, 2  ;;  %v796_v13 = vrot.slane %v757_v3, 2  ;;  %v736_v14 = vadd.f32 %v720_v2, %v659_v60  ;;  %v794_v51 = vsel %vm566_vm8, %v792_v5, %v793_v17 }
  0x89   : > { %v845_v1 = vunpack.c.h.bf16 %v827_v58  ;;  %v846_v15 = vunpack.c.l.bf16 %v830_v6  ;;  %v812_v31 = vadd.f32 %v794_v51, %v735_v11  ;;  %v858_v19 = vmul.f32 %v1403_v63, %v843_v8 }
  0x8a   : > { %v797_v18 = vsel %vm566_vm8, %v795_v12, %v796_v13  ;;  %v885_v0 = vmul.f32 %v1408_v4, %v843_v8  ;;  %v886_v22 = vmul.f32 %v1408_v4, %v844_v10  ;;  %v962_v26 = vmul.f32 %v1414_v9, %v843_v8 }
  0x8b   : > { %v813_v20 = vadd.f32 %v797_v18, %v736_v14  ;;  %v859_v21 = vmul.f32 %v1403_v63, %v845_v1  ;;  %v887_v29 = vmul.f32 %v1408_v4, %v845_v1  ;;  %v866_v23 = vadd.f32 %v858_v19, %v812_v31 }
  0x8c   : > { %v888_v24 = vmul.f32 %v1408_v4, %v846_v15  ;;  %v923_v25 = vrot.slane %v885_v0, 1  ;;  %v924_v28 = vrot.slane %v886_v22, 1  ;;  %v963_v32 = vmul.f32 %v1414_v9, %v844_v10 }
  0x8d   : > { %v867_v27 = vadd.f32 %v859_v21, %v813_v20  ;;  %v926_v30 = vrot.slane %v887_v29, 1  ;;  %v964_v34 = vmul.f32 %v1414_v9, %v845_v1  ;;  %v965_v63 = vmul.f32 %v1414_v9, %v846_v15 }
  0x8e   : > { %v927_v33 = vrot.slane %v888_v24, 1  ;;  %v1000_v35 = vrot.slane %v962_v26, 2  ;;  %v925_v36 = vsel %vm488_vm7, %v923_v25, %v924_v28  ;;  %v1001_v39 = vrot.slane %v963_v32, 2 }
  0x8f   : > { %v943_v4 = vadd.f32 %v925_v36, %v866_v23  ;;  %v1003_v38 = vrot.slane %v964_v34, 2  ;;  %v1004_v40 = vrot.slane %v965_v63, 2 }
  0x90   : > { %v928_v37 = vsel %vm488_vm7, %v926_v30, %v927_v33  ;;  %v1002_v43 = vsel %vm566_vm8, %v1000_v35, %v1001_v39 }
  0x91   : > { %v944_v42 = vadd.f32 %v928_v37, %v867_v27  ;;  %v1005_v44 = vsel %vm566_vm8, %v1003_v38, %v1004_v40  ;;  %v1020_v46 = vadd.f32 %v1002_v43, %v943_v4 }
  0x93   : > { %v1021_v47 = vadd.f32 %v1005_v44, %v944_v42  ;;  %v1034_v49 = vmul.f32 %v1432_v45, %v1020_v46 }
  0x95   : > { %v1035_v9 = vmul.f32 %v1432_v45, %v1021_v47  ;;  %v1048_v50 = vadd.f32 %v1440_v55, %v1034_v49 }
  0x97   : > { %v1049_v52 = vadd.f32 %v1440_v55, %v1035_v9  ;;  %v1056_v53 = vmax.f32 %v1048_v50, 0.0 }
  0x99   : > { %v1057_v54 = vmax.f32 %v1049_v52, 0.0 }
  0x9b   : > { %v1171_v48 = vpack.c.bf16 %v1057_v54, %v1056_v53 }
  0x9d   : > { %1175 = vst [vmem:[%s1462_s23 + $0x18] sm:$0xff] %v1171_v48  }
  0x9e PF: > { %s14_s15 = sadd.s32 1, %s1191_s15  }
  0x9f   : > { %p11_p4 = scmp.ge.s32.totalorder %s14_s15, 4  }
  0xa1   :  { %13 = sbr.rel (!%p11_p4) target bundleno = 1 (0x1), region = 69 }

// kernel: _lambda_.17
= control target key start
LH: loop header
LB: loop body
LE: loop exit
PB: predicated region body
PF: predicated region fallthrough
CT: control target
= control target key end

     0   :  { %s698_s18 = smov 0   ;;  %s772_s0 = inlined_call_operand.vmem [shape: bf16[128,128], index: 0, kind: input, shape index: {}]   ;;  %s773_s1 = inlined_call_operand.vmem [shape: bf16[128,128], index: 1, kind: input, shape index: {}]   ;;  %s774_s2 = inlined_call_operand.vmem [shape: f32[1,128], index: 2, kind: input, shape index: {}]   ;;  %s775_s3 = inlined_call_operand.vmem [shape: f32[1,128], index: 3, kind: input, shape index: {}]   ;;  %s776_s4 = inlined_call_operand.vmem [shape: bf16[128,128], index: 4, kind: input, shape index: {}]   ;;  %s777_s5 = inlined_call_operand.vmem [shape: f32[128,128], index: 5, kind: output, shape index: {}]  }
   0x1 LB: > { %s542_s19 = sadd.s32 4294967295, %s666_s18   ;;  %p546_p0 = scmp.ge.s32.totalorder %s666_s18, 1  ;;  %s666_s18 = sphi %s698_s18, %s15_s18  }
   0x2   : > { %p199_p1 = scmp.lt.s32.totalorder %s666_s18, 3 }
   0x4   : > { %p200_p2 = pnand %p546_p0, %p199_p1 }
   0x5   : > { %s547_s22 = sshll.u32 (!%p200_p2), %s542_s19, 3 }
   0x6   : > { %203 = sbr.rel (%p200_p2) target bundleno = 251 (0xfb), region = 40  ;;  %p233_p3 = scmp.lt.s32.totalorder (!%p200_p2), %s547_s22, 15 }
   0xb   : > { %v648_v0 = vld [vmem:[%s773_s1 + $0x38] sm:$0xff]   ;;  %v649_v1 = vld [vmem:[%s773_s1 + $0x30] sm:$0xff]   ;;  %s779_s22 = smov (!%p233_p3, %s547_s22), 15  ;;  %v650_v2 = vld [vmem:[%s773_s1 + $0x28] sm:$0xff]  }
   0xc   : > { %600 = vmatprep.subr.bf16.mxu0 %v648_v0  ;;  %624 = vmatprep.subr.bf16.mxu1 %v648_v0  ;;  %s548_s27 = sshll.u32 %s779_s22, 2  ;;  %v651_v3 = vld [vmem:[%s773_s1 + $0x20] sm:$0xff]   ;;  %v652_v6 = vld [vmem:[%s773_s1 + $0x18] sm:$0xff]   ;;  %v653_v7 = vld [vmem:[%s773_s1 + $0x10] sm:$0xff]   ;;  %s552_s25 = sshll.u32 %s779_s22, 3 }
   0xd   : > { %601 = vmatpush3.bf16.msra.mxu0 %v648_v0  ;;  %632 = vmatpush3.bf16.msra.mxu1 %v648_v0  ;;  %s723_s30 = scalar_lea.vmem %s772_s0, %s548_s27  ;;  %v654_v8 = vld [vmem:[%s773_s1 + $0x8] sm:$0xff]   ;;  %v655_v9 = vld [vmem:[%s773_s1] sm:$0xff]   ;;  %s242_s19 = scalar_lea.vmem %s776_s4, %s548_s27 }
   0xe   : > { %602 = vmatprep.subr.bf16.mxu0 %v649_v1  ;;  %625 = vmatprep.subr.bf16.mxu1 %v649_v1  ;;  %v656_v4 = vld [vmem:[%s723_s30] sm:$0xff]   ;;  %v657_v5 = vld [vmem:[%s723_s30 + $0x10] sm:$0xff]   ;;  %v658_v10 = vld [vmem:[%s723_s30 + $0x8] sm:$0xff]   ;;  %s759_s28 = scalar_lea.vmem %s777_s5, %s552_s25 }
   0xf   : > { %616 = vmatprep.mubr.bf16.mxu0 %v656_v4  ;;  %620 = vmatprep.mubr.bf16.mxu1 %v657_v5  ;;  %v659_v11 = vld [vmem:[%s723_s30 + $0x18] sm:$0xff]   ;;  %v565_v12 = vld [vmem:[%s774_s2] ss:$0 sm:$0xff]  ;;  %v585_v13 = vld [vmem:[%s242_s19 + $0x8] sm:$0xff]  }
  0x10   : > { %v587_v14 = vld [vmem:[%s242_s19 + $0x18] sm:$0xff]   ;;  %v570_v15 = vld [vmem:[%s242_s19] sm:$0xff]   ;;  %v586_v16 = vld [vmem:[%s242_s19 + $0x10] sm:$0xff]   ;;  %v575_v21 = vunpack.c.l.bf16 %v585_v13  ;;  %v576_v33 = vunpack.c.h.bf16 %v585_v13 }
  0x11   : > { %603 = vmatpush3.bf16.msra.mxu0 %v649_v1  ;;  %633 = vmatpush3.bf16.msra.mxu1 %v649_v1  ;;  %v566_v18 = vld [vmem:[%s775_s3] ss:$0 sm:$0xff]  ;;  %v583_v23 = vunpack.c.l.bf16 %v587_v14  ;;  %v571_v25 = vunpack.c.l.bf16 %v570_v15  ;;  %v579_v27 = vunpack.c.l.bf16 %v586_v16  ;;  %v584_v35 = vunpack.c.h.bf16 %v587_v14 }
  0x12   : > { %604 = vmatprep.subr.bf16.mxu0 %v650_v2  ;;  %626 = vmatprep.subr.bf16.mxu1 %v650_v2  ;;  %v572_v43 = vunpack.c.h.bf16 %v570_v15  ;;  %v580_v45 = vunpack.c.h.bf16 %v586_v16 }
  0x15   : > { %605 = vmatpush3.bf16.msra.mxu0 %v650_v2  ;;  %634 = vmatpush3.bf16.msra.mxu1 %v650_v2 }
  0x16   : > { %606 = vmatprep.subr.bf16.mxu0 %v651_v3  ;;  %627 = vmatprep.subr.bf16.mxu1 %v651_v3 }
  0x19   : > { %607 = vmatpush3.bf16.msra.mxu0 %v651_v3  ;;  %635 = vmatpush3.bf16.msra.mxu1 %v651_v3 }
  0x1a   : > { %608 = vmatprep.subr.bf16.mxu0 %v652_v6  ;;  %628 = vmatprep.subr.bf16.mxu1 %v652_v6 }
  0x1d   : > { %609 = vmatpush3.bf16.msra.mxu0 %v652_v6  ;;  %636 = vmatpush3.bf16.msra.mxu1 %v652_v6 }
  0x1e   : > { %610 = vmatprep.subr.bf16.mxu0 %v653_v7  ;;  %629 = vmatprep.subr.bf16.mxu1 %v653_v7 }
  0x21   : > { %611 = vmatpush3.bf16.msra.mxu0 %v653_v7  ;;  %637 = vmatpush3.bf16.msra.mxu1 %v653_v7 }
  0x22   : > { %612 = vmatprep.subr.bf16.mxu0 %v654_v8  ;;  %630 = vmatprep.subr.bf16.mxu1 %v654_v8 }
  0x25   : > { %613 = vmatpush3.bf16.msra.mxu0 %v654_v8  ;;  %638 = vmatpush3.bf16.msra.mxu1 %v654_v8 }
  0x26   : > { %614 = vmatprep.subr.bf16.mxu0 %v655_v9  ;;  %631 = vmatprep.subr.bf16.mxu1 %v655_v9 }
  0x29   : > { %615 = vmatpush3.bf16.msra.mxu0 %v655_v9  ;;  %639 = vmatpush3.bf16.msra.mxu1 %v655_v9 }
  0x2c   : > { %617 = vmatmul.mubr.bf16.vlgmr.msra.gmra.mxu0 %v658_v10  ;;  %621 = vmatmul.mubr.bf16.vlgmr.msra.gmra.mxu1 %v659_v11 }
  0xec   : > { %v618_v17 = vpop.f32.mrf.mxu0  ;;  %v622_v19 = vpop.f32.mrf.mxu1 }
  0xed   : > { %v421_v20 = vmul.f32 %v618_v17, %v565_v12  ;;  %v425_v22 = vmul.f32 %v622_v19, %v565_v12 }
  0xee   : > { %v381_v24 = vpop.f32.mrf.mxu0  ;;  %v397_v26 = vpop.f32.mrf.mxu1 }
  0xef   : > { %v436_v28 = vadd.f32 %v566_v18, %v421_v20  ;;  %v440_v29 = vadd.f32 %v566_v18, %v425_v22  ;;  %v419_v30 = vmul.f32 %v565_v12, %v381_v24  ;;  %v423_v31 = vmul.f32 %v565_v12, %v397_v26 }
  0xf0   : > { %v619_v32 = vpop.f32.mrf.mxu0  ;;  %v623_v34 = vpop.f32.mrf.mxu1 }
  0xf1   : > { %v460_v36 = vadd.f32 %v575_v21, %v436_v28  ;;  %v464_v37 = vadd.f32 %v583_v23, %v440_v29  ;;  %v434_v38 = vadd.f32 %v566_v18, %v419_v30  ;;  %v438_v39 = vadd.f32 %v566_v18, %v423_v31 }
  0xf2   : > { %v422_v40 = vmul.f32 %v619_v32, %v565_v12  ;;  %v426_v41 = vmul.f32 %v623_v34, %v565_v12  ;;  %v384_v42 = vpop.f32.mrf.mxu0  ;;  %v400_v44 = vpop.f32.mrf.mxu1 }
  0xf3   : > { %468 = vst [vmem:[%s759_s28 + $0x10] sm:$0xff] %v460_v36  ;;  %472 = vst [vmem:[%s759_s28 + $0x30] sm:$0xff] %v464_v37  ;;  %v458_v46 = vadd.f32 %v571_v25, %v434_v38  ;;  %v462_v47 = vadd.f32 %v579_v27, %v438_v39  ;;  %v420_v48 = vmul.f32 %v565_v12, %v384_v42 }
  0xf4   : > { %v424_v49 = vmul.f32 %v565_v12, %v400_v44  ;;  %v437_v50 = vadd.f32 %v566_v18, %v422_v40  ;;  %v441_v51 = vadd.f32 %v566_v18, %v426_v41 }
  0xf5   : > { %466 = vst [vmem:[%s759_s28] sm:$0xff] %v458_v46  ;;  %470 = vst [vmem:[%s759_s28 + $0x20] sm:$0xff] %v462_v47  ;;  %v435_v52 = vadd.f32 %v566_v18, %v420_v48 }
  0xf6   : > { %v439_v53 = vadd.f32 %v566_v18, %v424_v49  ;;  %v461_v54 = vadd.f32 %v576_v33, %v437_v50  ;;  %v465_v55 = vadd.f32 %v584_v35, %v441_v51 }
  0xf7   : > { %v459_v56 = vadd.f32 %v572_v43, %v435_v52 }
  0xf8   : > { %v463_v57 = vadd.f32 %v580_v45, %v439_v53  ;;  %469 = vst [vmem:[%s759_s28 + $0x18] sm:$0xff] %v461_v54  ;;  %473 = vst [vmem:[%s759_s28 + $0x38] sm:$0xff] %v465_v55 }
  0xf9   : > { %467 = vst [vmem:[%s759_s28 + $0x8] sm:$0xff] %v459_v56 }
  0xfa   : > { %471 = vst [vmem:[%s759_s28 + $0x28] sm:$0xff] %v463_v57 }
  0xfb PF: > { %s15_s18 = sadd.s32 1, %s666_s18  }
  0xfc   : > { %p12_p4 = scmp.ge.s32.totalorder %s15_s18, 4  }
  0xfe   :  { %14 = sbr.rel (!%p12_p4) target bundleno = 1 (0x1), region = 73 }

</bundles_post_ra>
